<compile_context>
chip_gen: v7x
topology: tpu7x:2x2x1
jax: 0.10.0
libtpu: 0.0.40
codegen_flags: <defaults>
</compile_context>

<pallas_src>
import functools
import math

import numpy as np

import jax
import jax.numpy as jnp
from jax import lax
from jax.experimental import pallas as pl
from jax.experimental.pallas import tpu as pltpu

# ----- hyper-parameters implied by the module's __init__ (kept small) -----
EMBEDDING_SIZE = 32
HEADS = 4
HEAD_DIM = EMBEDDING_SIZE // HEADS
ENCODER_LAYERS = 2
DECODER_LAYERS = 2
FEEDFORWARD_SIZE = 64
LN_EPS = 1e-5  # nn.LayerNorm default


# ============================ host-side parameter packing ============================

class _Packer:
    """Packs 2-D parameter blocks into a single (rows, 128) slab.

    Every block starts at a row offset aligned to `row_align` (16 for bf16 so
    packed-sublane pairs never straddle a block boundary) and uses the first
    `cols` lanes.  Offsets are static Python ints consumed by the kernel.
    """

    def __init__(self, dtype, row_align):
        self.dtype = dtype
        self.row_align = row_align
        self.entries = []       # (row_offset, f32 ndarray)
        self.offsets = {}       # name -> (row_offset, rows, cols)
        self.rows = 0

    def add(self, name, arr):
        arr = np.asarray(arr, np.float32)
        r, c = arr.shape
        assert c <= 128, f"{name}: {c} lanes > 128"
        self.offsets[name] = (self.rows, r, c)
        self.entries.append((self.rows, arr))
        self.rows += -(-r // self.row_align) * self.row_align

    def finalize(self):
        total = -(-self.rows // 16) * 16
        slab = np.zeros((total, 128), np.float32)
        for off, arr in self.entries:
            r, c = arr.shape
            slab[off:off + r, :c] = arr
        return jnp.asarray(slab).astype(self.dtype), dict(self.offsets)


def init_params(key):
    """Deterministic init; weights stored pre-transposed as (K, N), per-head."""
    E, FF, H, dh = EMBEDDING_SIZE, FEEDFORWARD_SIZE, HEADS, HEAD_DIM
    scale = 1.0 / math.sqrt(dh)

    wp = _Packer(jnp.bfloat16, 16)   # matmul weights (MXU operands)
    vp = _Packer(jnp.float32, 1)     # biases + LayerNorm params (VPU operands)

    keys = iter(jax.random.split(key, 64))

    def rnd(shape):
        return np.asarray(jax.random.normal(next(keys), shape, jnp.float32)) * 0.02

    def add_attention(prefix):
        wq, wk, wv, wo = rnd((E, E)), rnd((E, E)), rnd((E, E)), rnd((E, E))
        for h in range(H):
            sl = slice(h * dh, (h + 1) * dh)
            # 1/sqrt(dh) folded into the Q projection (weights and bias).
            wp.add(f"{prefix}_wq{h}", wq[:, sl] * scale)
            wp.add(f"{prefix}_wk{h}", wk[:, sl])
            wp.add(f"{prefix}_wv{h}", wv[:, sl])
            wp.add(f"{prefix}_wo{h}", wo[sl, :])
            vp.add(f"{prefix}_bq{h}", np.zeros((1, dh), np.float32))
            vp.add(f"{prefix}_bk{h}", np.zeros((1, dh), np.float32))
            vp.add(f"{prefix}_bv{h}", np.zeros((1, dh), np.float32))
        vp.add(f"{prefix}_bo", np.zeros((1, E), np.float32))

    def add_ln(prefix):
        vp.add(prefix + "_g", np.ones((1, E), np.float32))
        vp.add(prefix + "_b", np.zeros((1, E), np.float32))

    def add_ffn(prefix):
        wp.add(prefix + "_w1", rnd((E, FF)))
        vp.add(prefix + "_b1", np.zeros((1, FF), np.float32))
        wp.add(prefix + "_w2", rnd((FF, E)))
        vp.add(prefix + "_b2", np.zeros((1, E), np.float32))

    for i in range(ENCODER_LAYERS):
        p = f"enc{i}"
        add_attention(p + "_sa")
        add_ln(p + "_ln1")
        add_ffn(p)
        add_ln(p + "_ln2")
    add_ln("enc_norm")

    for i in range(DECODER_LAYERS):
        p = f"dec{i}"
        add_attention(p + "_sa")
        add_ln(p + "_ln1")
        add_attention(p + "_ca")
        add_ln(p + "_ln2")
        add_ffn(p)
        add_ln(p + "_ln3")
    add_ln("dec_norm")

    wp.add("out_w", rnd((E, E)))
    vp.add("out_b", np.zeros((1, E), np.float32))

    wslab, woff = wp.finalize()
    vslab, voff = vp.finalize()
    return wslab, vslab, woff, voff


def positional_encoding(seq_len, d_model):
    pos = jnp.arange(seq_len, dtype=jnp.float32)[:, None]
    div = jnp.exp(jnp.arange(0, d_model, 2, dtype=jnp.float32)
                  * (-math.log(10000.0) / d_model))
    pe = jnp.zeros((seq_len, d_model), jnp.float32)
    pe = pe.at[:, 0::2].set(jnp.sin(pos * div))
    pe = pe.at[:, 1::2].set(jnp.cos(pos * div))
    return pe


# ============================ the single fused kernel ============================
# Runs once per batch element (grid=(B,), "parallel").  All refs are VMEM-resident.

def _fused_transformer_kernel(woff, voff, src_ref, tgt_ref, pe_ref,
                              w_ref, v_ref, out_ref):
    H, dh = HEADS, HEAD_DIM

    # ---- lazy, point-of-use parameter access (static offsets -> free views) ----
    def wget(name):
        o, r, c = woff[name]
        return w_ref[o:o + r, 0:c]          # bf16 (r, c)

    def vget(name):
        o, r, c = voff[name]
        return v_ref[o:o + r, 0:c]          # f32 (r, c)

    def layer_norm(x, name):
        mean = jnp.mean(x, axis=-1, keepdims=True)
        cen = x - mean
        var = jnp.mean(cen * cen, axis=-1, keepdims=True)
        return cen * lax.rsqrt(var + LN_EPS) * vget(name + "_g") + vget(name + "_b")

    def attention(xq, xkv, name):
        """Multi-head attention for one batch element.
        xq: (Sq, E) f32 query source, xkv: (Skv, E) f32 key/value source."""
        xq_b = xq.astype(jnp.bfloat16)
        xkv_b = xkv.astype(jnp.bfloat16)
        out = vget(name + "_bo")                               # (1, E) broadcasts
        for h in range(H):                                     # 4 heads, unrolled
            q = jnp.dot(xq_b, wget(f"{name}_wq{h}"),           # scale pre-folded
                        preferred_element_type=jnp.float32) + vget(f"{name}_bq{h}")
            k = jnp.dot(xkv_b, wget(f"{name}_wk{h}"),
                        preferred_element_type=jnp.float32) + vget(f"{name}_bk{h}")
            v = jnp.dot(xkv_b, wget(f"{name}_wv{h}"),
                        preferred_element_type=jnp.float32) + vget(f"{name}_bv{h}")
            # scores contract on the head dim directly (no materialized k.T)
            s = lax.dot_general(q, k, (((1,), (1,)), ((), ())),
                                preferred_element_type=jnp.float32)
            s = s - jnp.max(s, axis=-1, keepdims=True)
            p = jnp.exp(s)
            p = p * pl.reciprocal(jnp.sum(p, axis=-1, keepdims=True), approx=True)
            o_h = jnp.dot(p, v, preferred_element_type=jnp.float32)   # (Sq, dh)
            # Accumulate through the per-head rows of the output projection:
            # equivalent to concat(heads) @ W_o, with no lane-axis concat.
            out = out + jnp.dot(o_h.astype(jnp.bfloat16), wget(f"{name}_wo{h}"),
                                preferred_element_type=jnp.float32)
        return out

    def ffn(x, name):
        h1 = jnp.dot(x.astype(jnp.bfloat16), wget(name + "_w1"),
                     preferred_element_type=jnp.float32) + vget(name + "_b1")
        h1 = jnp.maximum(h1, 0.0)                  # ReLU, nn.Transformer default
        return jnp.dot(h1.astype(jnp.bfloat16), wget(name + "_w2"),
                       preferred_element_type=jnp.float32) + vget(name + "_b2")

    # ---- encoder (post-norm); PE added to src only, as in the reference forward ----
    x = src_ref[...] + pe_ref[...]
    for i in range(ENCODER_LAYERS):
        pfx = f"enc{i}"
        x = layer_norm(x + attention(x, x, pfx + "_sa"), pfx + "_ln1")
        x = layer_norm(x + ffn(x, pfx), pfx + "_ln2")
    memory = layer_norm(x, "enc_norm")

    # ---- decoder: raw tgt, no masks (matches the reference forward()) ----
    y = tgt_ref[...]
    for i in range(DECODER_LAYERS):
        pfx = f"dec{i}"
        y = layer_norm(y + attention(y, y, pfx + "_sa"), pfx + "_ln1")
        y = layer_norm(y + attention(y, memory, pfx + "_ca"), pfx + "_ln2")
        y = layer_norm(y + ffn(y, pfx), pfx + "_ln3")
    y = layer_norm(y, "dec_norm")

    # ---- output linear ----
    out = jnp.dot(y.astype(jnp.bfloat16), wget("out_w"),
                  preferred_element_type=jnp.float32) + vget("out_b")
    out_ref[...] = out.astype(out_ref.dtype)


# ============================ host-side glue ============================

def build_forward(woff, voff):
    kernel = functools.partial(_fused_transformer_kernel, woff, voff)

    @jax.jit
    def forward(src, tgt, pe, wslab, vslab):
        B, S_src, E = src.shape
        S_tgt = tgt.shape[1]
        return pl.pallas_call(
            kernel,
            out_shape=jax.ShapeDtypeStruct((B, S_tgt, E), src.dtype),
            grid=(B,),
            in_specs=[
                pl.BlockSpec((None, S_src, E), lambda b: (b, 0, 0)),   # src (per batch)
                pl.BlockSpec((None, S_tgt, E), lambda b: (b, 0, 0)),   # tgt (per batch)
                pl.BlockSpec((S_src, E), lambda b: (0, 0)),            # pos. encoding
                pl.BlockSpec(wslab.shape, lambda b: (0, 0)),           # bf16 weight slab
                pl.BlockSpec(vslab.shape, lambda b: (0, 0)),           # f32 bias/LN slab
            ],
            out_specs=pl.BlockSpec((None, S_tgt, E), lambda b: (b, 0, 0)),
            compiler_params=pltpu.CompilerParams(
                # batch axis is fully independent -> megacore-shardable on v7x;
                # a cheap sequential loop on single-TC v5e/v6e.
                dimension_semantics=("parallel",),
            ),
        )(src, tgt, pe, wslab, vslab)

    return forward


# ============================ main ============================

if __name__ == "__main__":
    key = jax.random.PRNGKey(0)
    k_src, k_tgt, k_par = jax.random.split(key, 3)

    B, S_SRC, S_TGT = 2, 8, 8
    src = jax.random.normal(k_src, (B, S_SRC, EMBEDDING_SIZE), jnp.float32)
    tgt = jax.random.normal(k_tgt, (B, S_TGT, EMBEDDING_SIZE), jnp.float32)

    wslab, vslab, woff, voff = init_params(k_par)
    pe = positional_encoding(S_SRC, EMBEDDING_SIZE)

    forward = build_forward(woff, voff)
    out = jax.block_until_ready(forward(src, tgt, pe, wslab, vslab))

    assert out.shape == (B, S_TGT, EMBEDDING_SIZE)
    assert bool(jnp.all(jnp.isfinite(out)))
    print("KERNEL_OK")
</pallas_src>

<mosaic_0001>
module attributes {stable_mosaic.version = 11 : i64} {
  func.func @_fused_transformer_kernel(%arg0: i32, %arg1: memref<1x8x32xf32, #tpu.memory_space<vmem>>, %arg2: memref<1x8x32xf32, #tpu.memory_space<vmem>>, %arg3: memref<8x32xf32, #tpu.memory_space<vmem>>, %arg4: memref<3104x128xbf16, #tpu.memory_space<vmem>>, %arg5: memref<112x128xf32, #tpu.memory_space<vmem>>, %arg6: memref<1x8x32xf32, #tpu.memory_space<vmem>>) attributes {dimension_semantics = [#tpu.dimension_semantics<parallel>], iteration_bounds = array<i64: 2>, scalar_prefetch = 0 : i64, scratch_operands = 0 : i64, tpu.core_type = #tpu.core_type<tc>, window_params = [{transform_indices = @transform_0, window_bounds = array<i64: 1, 8, 32>}, {transform_indices = @transform_1, window_bounds = array<i64: 1, 8, 32>}, {pipeline_mode = #tpu.pipeline_mode<synchronous>, transform_indices = @transform_2, window_bounds = array<i64: 8, 32>}, {pipeline_mode = #tpu.pipeline_mode<synchronous>, transform_indices = @transform_3, window_bounds = array<i64: 3104, 128>}, {pipeline_mode = #tpu.pipeline_mode<synchronous>, transform_indices = @transform_4, window_bounds = array<i64: 112, 128>}, {transform_indices = @transform_5, window_bounds = array<i64: 1, 8, 32>}]} {
    %c0 = arith.constant 0 : index
    %c0_0 = arith.constant 0 : index
    %c0_1 = arith.constant 0 : index
    %0 = vector.load %arg1[%c0, %c0_0, %c0_1] : memref<1x8x32xf32, #tpu.memory_space<vmem>>, vector<1x8x32xf32>
    %1 = vector.shape_cast %0 : vector<1x8x32xf32> to vector<8x32xf32>
    %c0_2 = arith.constant 0 : index
    %c0_3 = arith.constant 0 : index
    %2 = vector.load %arg3[%c0_2, %c0_3] : memref<8x32xf32, #tpu.memory_space<vmem>>, vector<8x32xf32>
    %3 = arith.addf %1, %2 : vector<8x32xf32>
    %4 = arith.truncf %3 : vector<8x32xf32> to vector<8x32xbf16>
    %5 = arith.truncf %3 : vector<8x32xf32> to vector<8x32xbf16>
    %c12 = arith.constant 12 : index
    %c0_4 = arith.constant 0 : index
    %6 = vector.load %arg5[%c12, %c0_4] : memref<112x128xf32, #tpu.memory_space<vmem>>, vector<1x32xf32>
    %c0_5 = arith.constant 0 : index
    %c0_6 = arith.constant 0 : index
    %7 = vector.load %arg4[%c0_5, %c0_6] : memref<3104x128xbf16, #tpu.memory_space<vmem>>, vector<32x8xbf16>
    %cst = arith.constant dense<0.000000e+00> : vector<8x8xf32>
    %8 = tpu.matmul %4, %7, %cst {dimension_numbers = #tpu.dot_dimension_numbers<[1], [0], [0], [1], [0, 0, 1, 1], [], []>} : vector<8x32xbf16>, vector<32x8xbf16>, vector<8x8xf32> -> vector<8x8xf32>
    %c0_7 = arith.constant 0 : index
    %c0_8 = arith.constant 0 : index
    %9 = vector.load %arg5[%c0_7, %c0_8] : memref<112x128xf32, #tpu.memory_space<vmem>>, vector<1x8xf32>
    %10 = vector.broadcast %9 : vector<1x8xf32> to vector<8x8xf32>
    %11 = arith.addf %8, %10 : vector<8x8xf32>
    %c32 = arith.constant 32 : index
    %c0_9 = arith.constant 0 : index
    %12 = vector.load %arg4[%c32, %c0_9] : memref<3104x128xbf16, #tpu.memory_space<vmem>>, vector<32x8xbf16>
    %cst_10 = arith.constant dense<0.000000e+00> : vector<8x8xf32>
    %13 = tpu.matmul %5, %12, %cst_10 {dimension_numbers = #tpu.dot_dimension_numbers<[1], [0], [0], [1], [0, 0, 1, 1], [], []>} : vector<8x32xbf16>, vector<32x8xbf16>, vector<8x8xf32> -> vector<8x8xf32>
    %c1 = arith.constant 1 : index
    %c0_11 = arith.constant 0 : index
    %14 = vector.load %arg5[%c1, %c0_11] : memref<112x128xf32, #tpu.memory_space<vmem>>, vector<1x8xf32>
    %15 = vector.broadcast %14 : vector<1x8xf32> to vector<8x8xf32>
    %16 = arith.addf %13, %15 : vector<8x8xf32>
    %c64 = arith.constant 64 : index
    %c0_12 = arith.constant 0 : index
    %17 = vector.load %arg4[%c64, %c0_12] : memref<3104x128xbf16, #tpu.memory_space<vmem>>, vector<32x8xbf16>
    %cst_13 = arith.constant dense<0.000000e+00> : vector<8x8xf32>
    %18 = tpu.matmul %5, %17, %cst_13 {dimension_numbers = #tpu.dot_dimension_numbers<[1], [0], [0], [1], [0, 0, 1, 1], [], []>} : vector<8x32xbf16>, vector<32x8xbf16>, vector<8x8xf32> -> vector<8x8xf32>
    %c2 = arith.constant 2 : index
    %c0_14 = arith.constant 0 : index
    %19 = vector.load %arg5[%c2, %c0_14] : memref<112x128xf32, #tpu.memory_space<vmem>>, vector<1x8xf32>
    %20 = vector.broadcast %19 : vector<1x8xf32> to vector<8x8xf32>
    %21 = arith.addf %18, %20 : vector<8x8xf32>
    %cst_15 = arith.constant dense<0.000000e+00> : vector<8x8xf32>
    %22 = tpu.matmul %11, %16, %cst_15 {dimension_numbers = #tpu.dot_dimension_numbers<[1], [1], [0], [0], [0, 0, 1, 0], [], []>} : vector<8x8xf32>, vector<8x8xf32>, vector<8x8xf32> -> vector<8x8xf32>
    %cst_16 = arith.constant dense<0xFF800000> : vector<8xf32>
    %23 = vector.multi_reduction <maximumf>, %22, %cst_16 [1] : vector<8x8xf32> to vector<8xf32>
    %24 = vector.shape_cast %23 : vector<8xf32> to vector<8x1xf32>
    %25 = vector.broadcast %24 : vector<8x1xf32> to vector<8x8xf32>
    %26 = arith.subf %22, %25 : vector<8x8xf32>
    %27 = math.exp %26 : vector<8x8xf32>
    %cst_17 = arith.constant dense<0.000000e+00> : vector<8xf32>
    %28 = vector.multi_reduction <add>, %27, %cst_17 [1] : vector<8x8xf32> to vector<8xf32>
    %29 = vector.shape_cast %28 : vector<8xf32> to vector<8x1xf32>
    %30 = tpu.reciprocal %29 {approx = true} : vector<8x1xf32> -> vector<8x1xf32>
    %31 = vector.broadcast %30 : vector<8x1xf32> to vector<8x8xf32>
    %32 = arith.mulf %27, %31 : vector<8x8xf32>
    %cst_18 = arith.constant dense<0.000000e+00> : vector<8x8xf32>
    %33 = tpu.matmul %32, %21, %cst_18 {dimension_numbers = #tpu.dot_dimension_numbers<[1], [0], [0], [1], [0, 0, 1, 1], [], []>} : vector<8x8xf32>, vector<8x8xf32>, vector<8x8xf32> -> vector<8x8xf32>
    %34 = arith.truncf %33 : vector<8x8xf32> to vector<8x8xbf16>
    %c96 = arith.constant 96 : index
    %c0_19 = arith.constant 0 : index
    %35 = vector.load %arg4[%c96, %c0_19] : memref<3104x128xbf16, #tpu.memory_space<vmem>>, vector<8x32xbf16>
    %cst_20 = arith.constant dense<0.000000e+00> : vector<8x32xf32>
    %36 = tpu.matmul %34, %35, %cst_20 {dimension_numbers = #tpu.dot_dimension_numbers<[1], [0], [0], [1], [0, 0, 1, 1], [], []>} : vector<8x8xbf16>, vector<8x32xbf16>, vector<8x32xf32> -> vector<8x32xf32>
    %37 = vector.broadcast %6 : vector<1x32xf32> to vector<8x32xf32>
    %38 = arith.addf %37, %36 : vector<8x32xf32>
    %c112 = arith.constant 112 : index
    %c0_21 = arith.constant 0 : index
    %39 = vector.load %arg4[%c112, %c0_21] : memref<3104x128xbf16, #tpu.memory_space<vmem>>, vector<32x8xbf16>
    %cst_22 = arith.constant dense<0.000000e+00> : vector<8x8xf32>
    %40 = tpu.matmul %4, %39, %cst_22 {dimension_numbers = #tpu.dot_dimension_numbers<[1], [0], [0], [1], [0, 0, 1, 1], [], []>} : vector<8x32xbf16>, vector<32x8xbf16>, vector<8x8xf32> -> vector<8x8xf32>
    %c3 = arith.constant 3 : index
    %c0_23 = arith.constant 0 : index
    %41 = vector.load %arg5[%c3, %c0_23] : memref<112x128xf32, #tpu.memory_space<vmem>>, vector<1x8xf32>
    %42 = vector.broadcast %41 : vector<1x8xf32> to vector<8x8xf32>
    %43 = arith.addf %40, %42 : vector<8x8xf32>
    %c144 = arith.constant 144 : index
    %c0_24 = arith.constant 0 : index
    %44 = vector.load %arg4[%c144, %c0_24] : memref<3104x128xbf16, #tpu.memory_space<vmem>>, vector<32x8xbf16>
    %cst_25 = arith.constant dense<0.000000e+00> : vector<8x8xf32>
    %45 = tpu.matmul %5, %44, %cst_25 {dimension_numbers = #tpu.dot_dimension_numbers<[1], [0], [0], [1], [0, 0, 1, 1], [], []>} : vector<8x32xbf16>, vector<32x8xbf16>, vector<8x8xf32> -> vector<8x8xf32>
    %c4 = arith.constant 4 : index
    %c0_26 = arith.constant 0 : index
    %46 = vector.load %arg5[%c4, %c0_26] : memref<112x128xf32, #tpu.memory_space<vmem>>, vector<1x8xf32>
    %47 = vector.broadcast %46 : vector<1x8xf32> to vector<8x8xf32>
    %48 = arith.addf %45, %47 : vector<8x8xf32>
    %c176 = arith.constant 176 : index
    %c0_27 = arith.constant 0 : index
    %49 = vector.load %arg4[%c176, %c0_27] : memref<3104x128xbf16, #tpu.memory_space<vmem>>, vector<32x8xbf16>
    %cst_28 = arith.constant dense<0.000000e+00> : vector<8x8xf32>
    %50 = tpu.matmul %5, %49, %cst_28 {dimension_numbers = #tpu.dot_dimension_numbers<[1], [0], [0], [1], [0, 0, 1, 1], [], []>} : vector<8x32xbf16>, vector<32x8xbf16>, vector<8x8xf32> -> vector<8x8xf32>
    %c5 = arith.constant 5 : index
    %c0_29 = arith.constant 0 : index
    %51 = vector.load %arg5[%c5, %c0_29] : memref<112x128xf32, #tpu.memory_space<vmem>>, vector<1x8xf32>
    %52 = vector.broadcast %51 : vector<1x8xf32> to vector<8x8xf32>
    %53 = arith.addf %50, %52 : vector<8x8xf32>
    %cst_30 = arith.constant dense<0.000000e+00> : vector<8x8xf32>
    %54 = tpu.matmul %43, %48, %cst_30 {dimension_numbers = #tpu.dot_dimension_numbers<[1], [1], [0], [0], [0, 0, 1, 0], [], []>} : vector<8x8xf32>, vector<8x8xf32>, vector<8x8xf32> -> vector<8x8xf32>
    %cst_31 = arith.constant dense<0xFF800000> : vector<8xf32>
    %55 = vector.multi_reduction <maximumf>, %54, %cst_31 [1] : vector<8x8xf32> to vector<8xf32>
    %56 = vector.shape_cast %55 : vector<8xf32> to vector<8x1xf32>
    %57 = vector.broadcast %56 : vector<8x1xf32> to vector<8x8xf32>
    %58 = arith.subf %54, %57 : vector<8x8xf32>
    %59 = math.exp %58 : vector<8x8xf32>
    %cst_32 = arith.constant dense<0.000000e+00> : vector<8xf32>
    %60 = vector.multi_reduction <add>, %59, %cst_32 [1] : vector<8x8xf32> to vector<8xf32>
    %61 = vector.shape_cast %60 : vector<8xf32> to vector<8x1xf32>
    %62 = tpu.reciprocal %61 {approx = true} : vector<8x1xf32> -> vector<8x1xf32>
    %63 = vector.broadcast %62 : vector<8x1xf32> to vector<8x8xf32>
    %64 = arith.mulf %59, %63 : vector<8x8xf32>
    %cst_33 = arith.constant dense<0.000000e+00> : vector<8x8xf32>
    %65 = tpu.matmul %64, %53, %cst_33 {dimension_numbers = #tpu.dot_dimension_numbers<[1], [0], [0], [1], [0, 0, 1, 1], [], []>} : vector<8x8xf32>, vector<8x8xf32>, vector<8x8xf32> -> vector<8x8xf32>
    %66 = arith.truncf %65 : vector<8x8xf32> to vector<8x8xbf16>
    %c208 = arith.constant 208 : index
    %c0_34 = arith.constant 0 : index
    %67 = vector.load %arg4[%c208, %c0_34] : memref<3104x128xbf16, #tpu.memory_space<vmem>>, vector<8x32xbf16>
    %cst_35 = arith.constant dense<0.000000e+00> : vector<8x32xf32>
    %68 = tpu.matmul %66, %67, %cst_35 {dimension_numbers = #tpu.dot_dimension_numbers<[1], [0], [0], [1], [0, 0, 1, 1], [], []>} : vector<8x8xbf16>, vector<8x32xbf16>, vector<8x32xf32> -> vector<8x32xf32>
    %69 = arith.addf %38, %68 : vector<8x32xf32>
    %c224 = arith.constant 224 : index
    %c0_36 = arith.constant 0 : index
    %70 = vector.load %arg4[%c224, %c0_36] : memref<3104x128xbf16, #tpu.memory_space<vmem>>, vector<32x8xbf16>
    %cst_37 = arith.constant dense<0.000000e+00> : vector<8x8xf32>
    %71 = tpu.matmul %4, %70, %cst_37 {dimension_numbers = #tpu.dot_dimension_numbers<[1], [0], [0], [1], [0, 0, 1, 1], [], []>} : vector<8x32xbf16>, vector<32x8xbf16>, vector<8x8xf32> -> vector<8x8xf32>
    %c6 = arith.constant 6 : index
    %c0_38 = arith.constant 0 : index
    %72 = vector.load %arg5[%c6, %c0_38] : memref<112x128xf32, #tpu.memory_space<vmem>>, vector<1x8xf32>
    %73 = vector.broadcast %72 : vector<1x8xf32> to vector<8x8xf32>
    %74 = arith.addf %71, %73 : vector<8x8xf32>
    %c256 = arith.constant 256 : index
    %c0_39 = arith.constant 0 : index
    %75 = vector.load %arg4[%c256, %c0_39] : memref<3104x128xbf16, #tpu.memory_space<vmem>>, vector<32x8xbf16>
    %cst_40 = arith.constant dense<0.000000e+00> : vector<8x8xf32>
    %76 = tpu.matmul %5, %75, %cst_40 {dimension_numbers = #tpu.dot_dimension_numbers<[1], [0], [0], [1], [0, 0, 1, 1], [], []>} : vector<8x32xbf16>, vector<32x8xbf16>, vector<8x8xf32> -> vector<8x8xf32>
    %c7 = arith.constant 7 : index
    %c0_41 = arith.constant 0 : index
    %77 = vector.load %arg5[%c7, %c0_41] : memref<112x128xf32, #tpu.memory_space<vmem>>, vector<1x8xf32>
    %78 = vector.broadcast %77 : vector<1x8xf32> to vector<8x8xf32>
    %79 = arith.addf %76, %78 : vector<8x8xf32>
    %c288 = arith.constant 288 : index
    %c0_42 = arith.constant 0 : index
    %80 = vector.load %arg4[%c288, %c0_42] : memref<3104x128xbf16, #tpu.memory_space<vmem>>, vector<32x8xbf16>
    %cst_43 = arith.constant dense<0.000000e+00> : vector<8x8xf32>
    %81 = tpu.matmul %5, %80, %cst_43 {dimension_numbers = #tpu.dot_dimension_numbers<[1], [0], [0], [1], [0, 0, 1, 1], [], []>} : vector<8x32xbf16>, vector<32x8xbf16>, vector<8x8xf32> -> vector<8x8xf32>
    %c8 = arith.constant 8 : index
    %c0_44 = arith.constant 0 : index
    %82 = vector.load %arg5[%c8, %c0_44] : memref<112x128xf32, #tpu.memory_space<vmem>>, vector<1x8xf32>
    %83 = vector.broadcast %82 : vector<1x8xf32> to vector<8x8xf32>
    %84 = arith.addf %81, %83 : vector<8x8xf32>
    %cst_45 = arith.constant dense<0.000000e+00> : vector<8x8xf32>
    %85 = tpu.matmul %74, %79, %cst_45 {dimension_numbers = #tpu.dot_dimension_numbers<[1], [1], [0], [0], [0, 0, 1, 0], [], []>} : vector<8x8xf32>, vector<8x8xf32>, vector<8x8xf32> -> vector<8x8xf32>
    %cst_46 = arith.constant dense<0xFF800000> : vector<8xf32>
    %86 = vector.multi_reduction <maximumf>, %85, %cst_46 [1] : vector<8x8xf32> to vector<8xf32>
    %87 = vector.shape_cast %86 : vector<8xf32> to vector<8x1xf32>
    %88 = vector.broadcast %87 : vector<8x1xf32> to vector<8x8xf32>
    %89 = arith.subf %85, %88 : vector<8x8xf32>
    %90 = math.exp %89 : vector<8x8xf32>
    %cst_47 = arith.constant dense<0.000000e+00> : vector<8xf32>
    %91 = vector.multi_reduction <add>, %90, %cst_47 [1] : vector<8x8xf32> to vector<8xf32>
    %92 = vector.shape_cast %91 : vector<8xf32> to vector<8x1xf32>
    %93 = tpu.reciprocal %92 {approx = true} : vector<8x1xf32> -> vector<8x1xf32>
    %94 = vector.broadcast %93 : vector<8x1xf32> to vector<8x8xf32>
    %95 = arith.mulf %90, %94 : vector<8x8xf32>
    %cst_48 = arith.constant dense<0.000000e+00> : vector<8x8xf32>
    %96 = tpu.matmul %95, %84, %cst_48 {dimension_numbers = #tpu.dot_dimension_numbers<[1], [0], [0], [1], [0, 0, 1, 1], [], []>} : vector<8x8xf32>, vector<8x8xf32>, vector<8x8xf32> -> vector<8x8xf32>
    %97 = arith.truncf %96 : vector<8x8xf32> to vector<8x8xbf16>
    %c320 = arith.constant 320 : index
    %c0_49 = arith.constant 0 : index
    %98 = vector.load %arg4[%c320, %c0_49] : memref<3104x128xbf16, #tpu.memory_space<vmem>>, vector<8x32xbf16>
    %cst_50 = arith.constant dense<0.000000e+00> : vector<8x32xf32>
    %99 = tpu.matmul %97, %98, %cst_50 {dimension_numbers = #tpu.dot_dimension_numbers<[1], [0], [0], [1], [0, 0, 1, 1], [], []>} : vector<8x8xbf16>, vector<8x32xbf16>, vector<8x32xf32> -> vector<8x32xf32>
    %100 = arith.addf %69, %99 : vector<8x32xf32>
    %c336 = arith.constant 336 : index
    %c0_51 = arith.constant 0 : index
    %101 = vector.load %arg4[%c336, %c0_51] : memref<3104x128xbf16, #tpu.memory_space<vmem>>, vector<32x8xbf16>
    %cst_52 = arith.constant dense<0.000000e+00> : vector<8x8xf32>
    %102 = tpu.matmul %4, %101, %cst_52 {dimension_numbers = #tpu.dot_dimension_numbers<[1], [0], [0], [1], [0, 0, 1, 1], [], []>} : vector<8x32xbf16>, vector<32x8xbf16>, vector<8x8xf32> -> vector<8x8xf32>
    %c9 = arith.constant 9 : index
    %c0_53 = arith.constant 0 : index
    %103 = vector.load %arg5[%c9, %c0_53] : memref<112x128xf32, #tpu.memory_space<vmem>>, vector<1x8xf32>
    %104 = vector.broadcast %103 : vector<1x8xf32> to vector<8x8xf32>
    %105 = arith.addf %102, %104 : vector<8x8xf32>
    %c368 = arith.constant 368 : index
    %c0_54 = arith.constant 0 : index
    %106 = vector.load %arg4[%c368, %c0_54] : memref<3104x128xbf16, #tpu.memory_space<vmem>>, vector<32x8xbf16>
    %cst_55 = arith.constant dense<0.000000e+00> : vector<8x8xf32>
    %107 = tpu.matmul %5, %106, %cst_55 {dimension_numbers = #tpu.dot_dimension_numbers<[1], [0], [0], [1], [0, 0, 1, 1], [], []>} : vector<8x32xbf16>, vector<32x8xbf16>, vector<8x8xf32> -> vector<8x8xf32>
    %c10 = arith.constant 10 : index
    %c0_56 = arith.constant 0 : index
    %108 = vector.load %arg5[%c10, %c0_56] : memref<112x128xf32, #tpu.memory_space<vmem>>, vector<1x8xf32>
    %109 = vector.broadcast %108 : vector<1x8xf32> to vector<8x8xf32>
    %110 = arith.addf %107, %109 : vector<8x8xf32>
    %c400 = arith.constant 400 : index
    %c0_57 = arith.constant 0 : index
    %111 = vector.load %arg4[%c400, %c0_57] : memref<3104x128xbf16, #tpu.memory_space<vmem>>, vector<32x8xbf16>
    %cst_58 = arith.constant dense<0.000000e+00> : vector<8x8xf32>
    %112 = tpu.matmul %5, %111, %cst_58 {dimension_numbers = #tpu.dot_dimension_numbers<[1], [0], [0], [1], [0, 0, 1, 1], [], []>} : vector<8x32xbf16>, vector<32x8xbf16>, vector<8x8xf32> -> vector<8x8xf32>
    %c11 = arith.constant 11 : index
    %c0_59 = arith.constant 0 : index
    %113 = vector.load %arg5[%c11, %c0_59] : memref<112x128xf32, #tpu.memory_space<vmem>>, vector<1x8xf32>
    %114 = vector.broadcast %113 : vector<1x8xf32> to vector<8x8xf32>
    %115 = arith.addf %112, %114 : vector<8x8xf32>
    %cst_60 = arith.constant dense<0.000000e+00> : vector<8x8xf32>
    %116 = tpu.matmul %105, %110, %cst_60 {dimension_numbers = #tpu.dot_dimension_numbers<[1], [1], [0], [0], [0, 0, 1, 0], [], []>} : vector<8x8xf32>, vector<8x8xf32>, vector<8x8xf32> -> vector<8x8xf32>
    %cst_61 = arith.constant dense<0xFF800000> : vector<8xf32>
    %117 = vector.multi_reduction <maximumf>, %116, %cst_61 [1] : vector<8x8xf32> to vector<8xf32>
    %118 = vector.shape_cast %117 : vector<8xf32> to vector<8x1xf32>
    %119 = vector.broadcast %118 : vector<8x1xf32> to vector<8x8xf32>
    %120 = arith.subf %116, %119 : vector<8x8xf32>
    %121 = math.exp %120 : vector<8x8xf32>
    %cst_62 = arith.constant dense<0.000000e+00> : vector<8xf32>
    %122 = vector.multi_reduction <add>, %121, %cst_62 [1] : vector<8x8xf32> to vector<8xf32>
    %123 = vector.shape_cast %122 : vector<8xf32> to vector<8x1xf32>
    %124 = tpu.reciprocal %123 {approx = true} : vector<8x1xf32> -> vector<8x1xf32>
    %125 = vector.broadcast %124 : vector<8x1xf32> to vector<8x8xf32>
    %126 = arith.mulf %121, %125 : vector<8x8xf32>
    %cst_63 = arith.constant dense<0.000000e+00> : vector<8x8xf32>
    %127 = tpu.matmul %126, %115, %cst_63 {dimension_numbers = #tpu.dot_dimension_numbers<[1], [0], [0], [1], [0, 0, 1, 1], [], []>} : vector<8x8xf32>, vector<8x8xf32>, vector<8x8xf32> -> vector<8x8xf32>
    %128 = arith.truncf %127 : vector<8x8xf32> to vector<8x8xbf16>
    %c432 = arith.constant 432 : index
    %c0_64 = arith.constant 0 : index
    %129 = vector.load %arg4[%c432, %c0_64] : memref<3104x128xbf16, #tpu.memory_space<vmem>>, vector<8x32xbf16>
    %cst_65 = arith.constant dense<0.000000e+00> : vector<8x32xf32>
    %130 = tpu.matmul %128, %129, %cst_65 {dimension_numbers = #tpu.dot_dimension_numbers<[1], [0], [0], [1], [0, 0, 1, 1], [], []>} : vector<8x8xbf16>, vector<8x32xbf16>, vector<8x32xf32> -> vector<8x32xf32>
    %131 = arith.addf %100, %130 : vector<8x32xf32>
    %132 = arith.addf %3, %131 : vector<8x32xf32>
    %cst_66 = arith.constant dense<0.000000e+00> : vector<8xf32>
    %133 = vector.multi_reduction <add>, %132, %cst_66 [1] : vector<8x32xf32> to vector<8xf32>
    %134 = vector.shape_cast %133 : vector<8xf32> to vector<8x1xf32>
    %cst_67 = arith.constant 3.200000e+01 : f32
    %135 = vector.broadcast %cst_67 : f32 to vector<8x1xf32>
    %136 = arith.divf %134, %135 : vector<8x1xf32>
    %137 = vector.broadcast %136 : vector<8x1xf32> to vector<8x32xf32>
    %138 = arith.subf %132, %137 : vector<8x32xf32>
    %139 = arith.mulf %138, %138 : vector<8x32xf32>
    %cst_68 = arith.constant dense<0.000000e+00> : vector<8xf32>
    %140 = vector.multi_reduction <add>, %139, %cst_68 [1] : vector<8x32xf32> to vector<8xf32>
    %141 = vector.shape_cast %140 : vector<8xf32> to vector<8x1xf32>
    %cst_69 = arith.constant 3.200000e+01 : f32
    %142 = vector.broadcast %cst_69 : f32 to vector<8x1xf32>
    %143 = arith.divf %141, %142 : vector<8x1xf32>
    %cst_70 = arith.constant 9.99999974E-6 : f32
    %144 = vector.broadcast %cst_70 : f32 to vector<8x1xf32>
    %145 = arith.addf %143, %144 : vector<8x1xf32>
    %146 = math.rsqrt %145 : vector<8x1xf32>
    %147 = vector.broadcast %146 : vector<8x1xf32> to vector<8x32xf32>
    %148 = arith.mulf %138, %147 : vector<8x32xf32>
    %c13 = arith.constant 13 : index
    %c0_71 = arith.constant 0 : index
    %149 = vector.load %arg5[%c13, %c0_71] : memref<112x128xf32, #tpu.memory_space<vmem>>, vector<1x32xf32>
    %150 = vector.broadcast %149 : vector<1x32xf32> to vector<8x32xf32>
    %151 = arith.mulf %148, %150 : vector<8x32xf32>
    %c14 = arith.constant 14 : index
    %c0_72 = arith.constant 0 : index
    %152 = vector.load %arg5[%c14, %c0_72] : memref<112x128xf32, #tpu.memory_space<vmem>>, vector<1x32xf32>
    %153 = vector.broadcast %152 : vector<1x32xf32> to vector<8x32xf32>
    %154 = arith.addf %151, %153 : vector<8x32xf32>
    %155 = arith.truncf %154 : vector<8x32xf32> to vector<8x32xbf16>
    %c448 = arith.constant 448 : index
    %c0_73 = arith.constant 0 : index
    %156 = vector.load %arg4[%c448, %c0_73] : memref<3104x128xbf16, #tpu.memory_space<vmem>>, vector<32x64xbf16>
    %cst_74 = arith.constant dense<0.000000e+00> : vector<8x64xf32>
    %157 = tpu.matmul %155, %156, %cst_74 {dimension_numbers = #tpu.dot_dimension_numbers<[1], [0], [0], [1], [0, 0, 1, 1], [], []>} : vector<8x32xbf16>, vector<32x64xbf16>, vector<8x64xf32> -> vector<8x64xf32>
    %c15 = arith.constant 15 : index
    %c0_75 = arith.constant 0 : index
    %158 = vector.load %arg5[%c15, %c0_75] : memref<112x128xf32, #tpu.memory_space<vmem>>, vector<1x64xf32>
    %159 = vector.broadcast %158 : vector<1x64xf32> to vector<8x64xf32>
    %160 = arith.addf %157, %159 : vector<8x64xf32>
    %cst_76 = arith.constant 0.000000e+00 : f32
    %161 = vector.broadcast %cst_76 : f32 to vector<8x64xf32>
    %162 = arith.maximumf %160, %161 : vector<8x64xf32>
    %163 = arith.truncf %162 : vector<8x64xf32> to vector<8x64xbf16>
    %c480 = arith.constant 480 : index
    %c0_77 = arith.constant 0 : index
    %164 = vector.load %arg4[%c480, %c0_77] : memref<3104x128xbf16, #tpu.memory_space<vmem>>, vector<64x32xbf16>
    %cst_78 = arith.constant dense<0.000000e+00> : vector<8x32xf32>
    %165 = tpu.matmul %163, %164, %cst_78 {dimension_numbers = #tpu.dot_dimension_numbers<[1], [0], [0], [1], [0, 0, 1, 1], [], []>} : vector<8x64xbf16>, vector<64x32xbf16>, vector<8x32xf32> -> vector<8x32xf32>
    %c16 = arith.constant 16 : index
    %c0_79 = arith.constant 0 : index
    %166 = vector.load %arg5[%c16, %c0_79] : memref<112x128xf32, #tpu.memory_space<vmem>>, vector<1x32xf32>
    %167 = vector.broadcast %166 : vector<1x32xf32> to vector<8x32xf32>
    %168 = arith.addf %165, %167 : vector<8x32xf32>
    %169 = arith.addf %154, %168 : vector<8x32xf32>
    %cst_80 = arith.constant dense<0.000000e+00> : vector<8xf32>
    %170 = vector.multi_reduction <add>, %169, %cst_80 [1] : vector<8x32xf32> to vector<8xf32>
    %171 = vector.shape_cast %170 : vector<8xf32> to vector<8x1xf32>
    %cst_81 = arith.constant 3.200000e+01 : f32
    %172 = vector.broadcast %cst_81 : f32 to vector<8x1xf32>
    %173 = arith.divf %171, %172 : vector<8x1xf32>
    %174 = vector.broadcast %173 : vector<8x1xf32> to vector<8x32xf32>
    %175 = arith.subf %169, %174 : vector<8x32xf32>
    %176 = arith.mulf %175, %175 : vector<8x32xf32>
    %cst_82 = arith.constant dense<0.000000e+00> : vector<8xf32>
    %177 = vector.multi_reduction <add>, %176, %cst_82 [1] : vector<8x32xf32> to vector<8xf32>
    %178 = vector.shape_cast %177 : vector<8xf32> to vector<8x1xf32>
    %cst_83 = arith.constant 3.200000e+01 : f32
    %179 = vector.broadcast %cst_83 : f32 to vector<8x1xf32>
    %180 = arith.divf %178, %179 : vector<8x1xf32>
    %cst_84 = arith.constant 9.99999974E-6 : f32
    %181 = vector.broadcast %cst_84 : f32 to vector<8x1xf32>
    %182 = arith.addf %180, %181 : vector<8x1xf32>
    %183 = math.rsqrt %182 : vector<8x1xf32>
    %184 = vector.broadcast %183 : vector<8x1xf32> to vector<8x32xf32>
    %185 = arith.mulf %175, %184 : vector<8x32xf32>
    %c17 = arith.constant 17 : index
    %c0_85 = arith.constant 0 : index
    %186 = vector.load %arg5[%c17, %c0_85] : memref<112x128xf32, #tpu.memory_space<vmem>>, vector<1x32xf32>
    %187 = vector.broadcast %186 : vector<1x32xf32> to vector<8x32xf32>
    %188 = arith.mulf %185, %187 : vector<8x32xf32>
    %c18 = arith.constant 18 : index
    %c0_86 = arith.constant 0 : index
    %189 = vector.load %arg5[%c18, %c0_86] : memref<112x128xf32, #tpu.memory_space<vmem>>, vector<1x32xf32>
    %190 = vector.broadcast %189 : vector<1x32xf32> to vector<8x32xf32>
    %191 = arith.addf %188, %190 : vector<8x32xf32>
    %192 = arith.truncf %191 : vector<8x32xf32> to vector<8x32xbf16>
    %193 = arith.truncf %191 : vector<8x32xf32> to vector<8x32xbf16>
    %c31 = arith.constant 31 : index
    %c0_87 = arith.constant 0 : index
    %194 = vector.load %arg5[%c31, %c0_87] : memref<112x128xf32, #tpu.memory_space<vmem>>, vector<1x32xf32>
    %c544 = arith.constant 544 : index
    %c0_88 = arith.constant 0 : index
    %195 = vector.load %arg4[%c544, %c0_88] : memref<3104x128xbf16, #tpu.memory_space<vmem>>, vector<32x8xbf16>
    %cst_89 = arith.constant dense<0.000000e+00> : vector<8x8xf32>
    %196 = tpu.matmul %192, %195, %cst_89 {dimension_numbers = #tpu.dot_dimension_numbers<[1], [0], [0], [1], [0, 0, 1, 1], [], []>} : vector<8x32xbf16>, vector<32x8xbf16>, vector<8x8xf32> -> vector<8x8xf32>
    %c19 = arith.constant 19 : index
    %c0_90 = arith.constant 0 : index
    %197 = vector.load %arg5[%c19, %c0_90] : memref<112x128xf32, #tpu.memory_space<vmem>>, vector<1x8xf32>
    %198 = vector.broadcast %197 : vector<1x8xf32> to vector<8x8xf32>
    %199 = arith.addf %196, %198 : vector<8x8xf32>
    %c576 = arith.constant 576 : index
    %c0_91 = arith.constant 0 : index
    %200 = vector.load %arg4[%c576, %c0_91] : memref<3104x128xbf16, #tpu.memory_space<vmem>>, vector<32x8xbf16>
    %cst_92 = arith.constant dense<0.000000e+00> : vector<8x8xf32>
    %201 = tpu.matmul %193, %200, %cst_92 {dimension_numbers = #tpu.dot_dimension_numbers<[1], [0], [0], [1], [0, 0, 1, 1], [], []>} : vector<8x32xbf16>, vector<32x8xbf16>, vector<8x8xf32> -> vector<8x8xf32>
    %c20 = arith.constant 20 : index
    %c0_93 = arith.constant 0 : index
    %202 = vector.load %arg5[%c20, %c0_93] : memref<112x128xf32, #tpu.memory_space<vmem>>, vector<1x8xf32>
    %203 = vector.broadcast %202 : vector<1x8xf32> to vector<8x8xf32>
    %204 = arith.addf %201, %203 : vector<8x8xf32>
    %c608 = arith.constant 608 : index
    %c0_94 = arith.constant 0 : index
    %205 = vector.load %arg4[%c608, %c0_94] : memref<3104x128xbf16, #tpu.memory_space<vmem>>, vector<32x8xbf16>
    %cst_95 = arith.constant dense<0.000000e+00> : vector<8x8xf32>
    %206 = tpu.matmul %193, %205, %cst_95 {dimension_numbers = #tpu.dot_dimension_numbers<[1], [0], [0], [1], [0, 0, 1, 1], [], []>} : vector<8x32xbf16>, vector<32x8xbf16>, vector<8x8xf32> -> vector<8x8xf32>
    %c21 = arith.constant 21 : index
    %c0_96 = arith.constant 0 : index
    %207 = vector.load %arg5[%c21, %c0_96] : memref<112x128xf32, #tpu.memory_space<vmem>>, vector<1x8xf32>
    %208 = vector.broadcast %207 : vector<1x8xf32> to vector<8x8xf32>
    %209 = arith.addf %206, %208 : vector<8x8xf32>
    %cst_97 = arith.constant dense<0.000000e+00> : vector<8x8xf32>
    %210 = tpu.matmul %199, %204, %cst_97 {dimension_numbers = #tpu.dot_dimension_numbers<[1], [1], [0], [0], [0, 0, 1, 0], [], []>} : vector<8x8xf32>, vector<8x8xf32>, vector<8x8xf32> -> vector<8x8xf32>
    %cst_98 = arith.constant dense<0xFF800000> : vector<8xf32>
    %211 = vector.multi_reduction <maximumf>, %210, %cst_98 [1] : vector<8x8xf32> to vector<8xf32>
    %212 = vector.shape_cast %211 : vector<8xf32> to vector<8x1xf32>
    %213 = vector.broadcast %212 : vector<8x1xf32> to vector<8x8xf32>
    %214 = arith.subf %210, %213 : vector<8x8xf32>
    %215 = math.exp %214 : vector<8x8xf32>
    %cst_99 = arith.constant dense<0.000000e+00> : vector<8xf32>
    %216 = vector.multi_reduction <add>, %215, %cst_99 [1] : vector<8x8xf32> to vector<8xf32>
    %217 = vector.shape_cast %216 : vector<8xf32> to vector<8x1xf32>
    %218 = tpu.reciprocal %217 {approx = true} : vector<8x1xf32> -> vector<8x1xf32>
    %219 = vector.broadcast %218 : vector<8x1xf32> to vector<8x8xf32>
    %220 = arith.mulf %215, %219 : vector<8x8xf32>
    %cst_100 = arith.constant dense<0.000000e+00> : vector<8x8xf32>
    %221 = tpu.matmul %220, %209, %cst_100 {dimension_numbers = #tpu.dot_dimension_numbers<[1], [0], [0], [1], [0, 0, 1, 1], [], []>} : vector<8x8xf32>, vector<8x8xf32>, vector<8x8xf32> -> vector<8x8xf32>
    %222 = arith.truncf %221 : vector<8x8xf32> to vector<8x8xbf16>
    %c640 = arith.constant 640 : index
    %c0_101 = arith.constant 0 : index
    %223 = vector.load %arg4[%c640, %c0_101] : memref<3104x128xbf16, #tpu.memory_space<vmem>>, vector<8x32xbf16>
    %cst_102 = arith.constant dense<0.000000e+00> : vector<8x32xf32>
    %224 = tpu.matmul %222, %223, %cst_102 {dimension_numbers = #tpu.dot_dimension_numbers<[1], [0], [0], [1], [0, 0, 1, 1], [], []>} : vector<8x8xbf16>, vector<8x32xbf16>, vector<8x32xf32> -> vector<8x32xf32>
    %225 = vector.broadcast %194 : vector<1x32xf32> to vector<8x32xf32>
    %226 = arith.addf %225, %224 : vector<8x32xf32>
    %c656 = arith.constant 656 : index
    %c0_103 = arith.constant 0 : index
    %227 = vector.load %arg4[%c656, %c0_103] : memref<3104x128xbf16, #tpu.memory_space<vmem>>, vector<32x8xbf16>
    %cst_104 = arith.constant dense<0.000000e+00> : vector<8x8xf32>
    %228 = tpu.matmul %192, %227, %cst_104 {dimension_numbers = #tpu.dot_dimension_numbers<[1], [0], [0], [1], [0, 0, 1, 1], [], []>} : vector<8x32xbf16>, vector<32x8xbf16>, vector<8x8xf32> -> vector<8x8xf32>
    %c22 = arith.constant 22 : index
    %c0_105 = arith.constant 0 : index
    %229 = vector.load %arg5[%c22, %c0_105] : memref<112x128xf32, #tpu.memory_space<vmem>>, vector<1x8xf32>
    %230 = vector.broadcast %229 : vector<1x8xf32> to vector<8x8xf32>
    %231 = arith.addf %228, %230 : vector<8x8xf32>
    %c688 = arith.constant 688 : index
    %c0_106 = arith.constant 0 : index
    %232 = vector.load %arg4[%c688, %c0_106] : memref<3104x128xbf16, #tpu.memory_space<vmem>>, vector<32x8xbf16>
    %cst_107 = arith.constant dense<0.000000e+00> : vector<8x8xf32>
    %233 = tpu.matmul %193, %232, %cst_107 {dimension_numbers = #tpu.dot_dimension_numbers<[1], [0], [0], [1], [0, 0, 1, 1], [], []>} : vector<8x32xbf16>, vector<32x8xbf16>, vector<8x8xf32> -> vector<8x8xf32>
    %c23 = arith.constant 23 : index
    %c0_108 = arith.constant 0 : index
    %234 = vector.load %arg5[%c23, %c0_108] : memref<112x128xf32, #tpu.memory_space<vmem>>, vector<1x8xf32>
    %235 = vector.broadcast %234 : vector<1x8xf32> to vector<8x8xf32>
    %236 = arith.addf %233, %235 : vector<8x8xf32>
    %c720 = arith.constant 720 : index
    %c0_109 = arith.constant 0 : index
    %237 = vector.load %arg4[%c720, %c0_109] : memref<3104x128xbf16, #tpu.memory_space<vmem>>, vector<32x8xbf16>
    %cst_110 = arith.constant dense<0.000000e+00> : vector<8x8xf32>
    %238 = tpu.matmul %193, %237, %cst_110 {dimension_numbers = #tpu.dot_dimension_numbers<[1], [0], [0], [1], [0, 0, 1, 1], [], []>} : vector<8x32xbf16>, vector<32x8xbf16>, vector<8x8xf32> -> vector<8x8xf32>
    %c24 = arith.constant 24 : index
    %c0_111 = arith.constant 0 : index
    %239 = vector.load %arg5[%c24, %c0_111] : memref<112x128xf32, #tpu.memory_space<vmem>>, vector<1x8xf32>
    %240 = vector.broadcast %239 : vector<1x8xf32> to vector<8x8xf32>
    %241 = arith.addf %238, %240 : vector<8x8xf32>
    %cst_112 = arith.constant dense<0.000000e+00> : vector<8x8xf32>
    %242 = tpu.matmul %231, %236, %cst_112 {dimension_numbers = #tpu.dot_dimension_numbers<[1], [1], [0], [0], [0, 0, 1, 0], [], []>} : vector<8x8xf32>, vector<8x8xf32>, vector<8x8xf32> -> vector<8x8xf32>
    %cst_113 = arith.constant dense<0xFF800000> : vector<8xf32>
    %243 = vector.multi_reduction <maximumf>, %242, %cst_113 [1] : vector<8x8xf32> to vector<8xf32>
    %244 = vector.shape_cast %243 : vector<8xf32> to vector<8x1xf32>
    %245 = vector.broadcast %244 : vector<8x1xf32> to vector<8x8xf32>
    %246 = arith.subf %242, %245 : vector<8x8xf32>
    %247 = math.exp %246 : vector<8x8xf32>
    %cst_114 = arith.constant dense<0.000000e+00> : vector<8xf32>
    %248 = vector.multi_reduction <add>, %247, %cst_114 [1] : vector<8x8xf32> to vector<8xf32>
    %249 = vector.shape_cast %248 : vector<8xf32> to vector<8x1xf32>
    %250 = tpu.reciprocal %249 {approx = true} : vector<8x1xf32> -> vector<8x1xf32>
    %251 = vector.broadcast %250 : vector<8x1xf32> to vector<8x8xf32>
    %252 = arith.mulf %247, %251 : vector<8x8xf32>
    %cst_115 = arith.constant dense<0.000000e+00> : vector<8x8xf32>
    %253 = tpu.matmul %252, %241, %cst_115 {dimension_numbers = #tpu.dot_dimension_numbers<[1], [0], [0], [1], [0, 0, 1, 1], [], []>} : vector<8x8xf32>, vector<8x8xf32>, vector<8x8xf32> -> vector<8x8xf32>
    %254 = arith.truncf %253 : vector<8x8xf32> to vector<8x8xbf16>
    %c752 = arith.constant 752 : index
    %c0_116 = arith.constant 0 : index
    %255 = vector.load %arg4[%c752, %c0_116] : memref<3104x128xbf16, #tpu.memory_space<vmem>>, vector<8x32xbf16>
    %cst_117 = arith.constant dense<0.000000e+00> : vector<8x32xf32>
    %256 = tpu.matmul %254, %255, %cst_117 {dimension_numbers = #tpu.dot_dimension_numbers<[1], [0], [0], [1], [0, 0, 1, 1], [], []>} : vector<8x8xbf16>, vector<8x32xbf16>, vector<8x32xf32> -> vector<8x32xf32>
    %257 = arith.addf %226, %256 : vector<8x32xf32>
    %c768 = arith.constant 768 : index
    %c0_118 = arith.constant 0 : index
    %258 = vector.load %arg4[%c768, %c0_118] : memref<3104x128xbf16, #tpu.memory_space<vmem>>, vector<32x8xbf16>
    %cst_119 = arith.constant dense<0.000000e+00> : vector<8x8xf32>
    %259 = tpu.matmul %192, %258, %cst_119 {dimension_numbers = #tpu.dot_dimension_numbers<[1], [0], [0], [1], [0, 0, 1, 1], [], []>} : vector<8x32xbf16>, vector<32x8xbf16>, vector<8x8xf32> -> vector<8x8xf32>
    %c25 = arith.constant 25 : index
    %c0_120 = arith.constant 0 : index
    %260 = vector.load %arg5[%c25, %c0_120] : memref<112x128xf32, #tpu.memory_space<vmem>>, vector<1x8xf32>
    %261 = vector.broadcast %260 : vector<1x8xf32> to vector<8x8xf32>
    %262 = arith.addf %259, %261 : vector<8x8xf32>
    %c800 = arith.constant 800 : index
    %c0_121 = arith.constant 0 : index
    %263 = vector.load %arg4[%c800, %c0_121] : memref<3104x128xbf16, #tpu.memory_space<vmem>>, vector<32x8xbf16>
    %cst_122 = arith.constant dense<0.000000e+00> : vector<8x8xf32>
    %264 = tpu.matmul %193, %263, %cst_122 {dimension_numbers = #tpu.dot_dimension_numbers<[1], [0], [0], [1], [0, 0, 1, 1], [], []>} : vector<8x32xbf16>, vector<32x8xbf16>, vector<8x8xf32> -> vector<8x8xf32>
    %c26 = arith.constant 26 : index
    %c0_123 = arith.constant 0 : index
    %265 = vector.load %arg5[%c26, %c0_123] : memref<112x128xf32, #tpu.memory_space<vmem>>, vector<1x8xf32>
    %266 = vector.broadcast %265 : vector<1x8xf32> to vector<8x8xf32>
    %267 = arith.addf %264, %266 : vector<8x8xf32>
    %c832 = arith.constant 832 : index
    %c0_124 = arith.constant 0 : index
    %268 = vector.load %arg4[%c832, %c0_124] : memref<3104x128xbf16, #tpu.memory_space<vmem>>, vector<32x8xbf16>
    %cst_125 = arith.constant dense<0.000000e+00> : vector<8x8xf32>
    %269 = tpu.matmul %193, %268, %cst_125 {dimension_numbers = #tpu.dot_dimension_numbers<[1], [0], [0], [1], [0, 0, 1, 1], [], []>} : vector<8x32xbf16>, vector<32x8xbf16>, vector<8x8xf32> -> vector<8x8xf32>
    %c27 = arith.constant 27 : index
    %c0_126 = arith.constant 0 : index
    %270 = vector.load %arg5[%c27, %c0_126] : memref<112x128xf32, #tpu.memory_space<vmem>>, vector<1x8xf32>
    %271 = vector.broadcast %270 : vector<1x8xf32> to vector<8x8xf32>
    %272 = arith.addf %269, %271 : vector<8x8xf32>
    %cst_127 = arith.constant dense<0.000000e+00> : vector<8x8xf32>
    %273 = tpu.matmul %262, %267, %cst_127 {dimension_numbers = #tpu.dot_dimension_numbers<[1], [1], [0], [0], [0, 0, 1, 0], [], []>} : vector<8x8xf32>, vector<8x8xf32>, vector<8x8xf32> -> vector<8x8xf32>
    %cst_128 = arith.constant dense<0xFF800000> : vector<8xf32>
    %274 = vector.multi_reduction <maximumf>, %273, %cst_128 [1] : vector<8x8xf32> to vector<8xf32>
    %275 = vector.shape_cast %274 : vector<8xf32> to vector<8x1xf32>
    %276 = vector.broadcast %275 : vector<8x1xf32> to vector<8x8xf32>
    %277 = arith.subf %273, %276 : vector<8x8xf32>
    %278 = math.exp %277 : vector<8x8xf32>
    %cst_129 = arith.constant dense<0.000000e+00> : vector<8xf32>
    %279 = vector.multi_reduction <add>, %278, %cst_129 [1] : vector<8x8xf32> to vector<8xf32>
    %280 = vector.shape_cast %279 : vector<8xf32> to vector<8x1xf32>
    %281 = tpu.reciprocal %280 {approx = true} : vector<8x1xf32> -> vector<8x1xf32>
    %282 = vector.broadcast %281 : vector<8x1xf32> to vector<8x8xf32>
    %283 = arith.mulf %278, %282 : vector<8x8xf32>
    %cst_130 = arith.constant dense<0.000000e+00> : vector<8x8xf32>
    %284 = tpu.matmul %283, %272, %cst_130 {dimension_numbers = #tpu.dot_dimension_numbers<[1], [0], [0], [1], [0, 0, 1, 1], [], []>} : vector<8x8xf32>, vector<8x8xf32>, vector<8x8xf32> -> vector<8x8xf32>
    %285 = arith.truncf %284 : vector<8x8xf32> to vector<8x8xbf16>
    %c864 = arith.constant 864 : index
    %c0_131 = arith.constant 0 : index
    %286 = vector.load %arg4[%c864, %c0_131] : memref<3104x128xbf16, #tpu.memory_space<vmem>>, vector<8x32xbf16>
    %cst_132 = arith.constant dense<0.000000e+00> : vector<8x32xf32>
    %287 = tpu.matmul %285, %286, %cst_132 {dimension_numbers = #tpu.dot_dimension_numbers<[1], [0], [0], [1], [0, 0, 1, 1], [], []>} : vector<8x8xbf16>, vector<8x32xbf16>, vector<8x32xf32> -> vector<8x32xf32>
    %288 = arith.addf %257, %287 : vector<8x32xf32>
    %c880 = arith.constant 880 : index
    %c0_133 = arith.constant 0 : index
    %289 = vector.load %arg4[%c880, %c0_133] : memref<3104x128xbf16, #tpu.memory_space<vmem>>, vector<32x8xbf16>
    %cst_134 = arith.constant dense<0.000000e+00> : vector<8x8xf32>
    %290 = tpu.matmul %192, %289, %cst_134 {dimension_numbers = #tpu.dot_dimension_numbers<[1], [0], [0], [1], [0, 0, 1, 1], [], []>} : vector<8x32xbf16>, vector<32x8xbf16>, vector<8x8xf32> -> vector<8x8xf32>
    %c28 = arith.constant 28 : index
    %c0_135 = arith.constant 0 : index
    %291 = vector.load %arg5[%c28, %c0_135] : memref<112x128xf32, #tpu.memory_space<vmem>>, vector<1x8xf32>
    %292 = vector.broadcast %291 : vector<1x8xf32> to vector<8x8xf32>
    %293 = arith.addf %290, %292 : vector<8x8xf32>
    %c912 = arith.constant 912 : index
    %c0_136 = arith.constant 0 : index
    %294 = vector.load %arg4[%c912, %c0_136] : memref<3104x128xbf16, #tpu.memory_space<vmem>>, vector<32x8xbf16>
    %cst_137 = arith.constant dense<0.000000e+00> : vector<8x8xf32>
    %295 = tpu.matmul %193, %294, %cst_137 {dimension_numbers = #tpu.dot_dimension_numbers<[1], [0], [0], [1], [0, 0, 1, 1], [], []>} : vector<8x32xbf16>, vector<32x8xbf16>, vector<8x8xf32> -> vector<8x8xf32>
    %c29 = arith.constant 29 : index
    %c0_138 = arith.constant 0 : index
    %296 = vector.load %arg5[%c29, %c0_138] : memref<112x128xf32, #tpu.memory_space<vmem>>, vector<1x8xf32>
    %297 = vector.broadcast %296 : vector<1x8xf32> to vector<8x8xf32>
    %298 = arith.addf %295, %297 : vector<8x8xf32>
    %c944 = arith.constant 944 : index
    %c0_139 = arith.constant 0 : index
    %299 = vector.load %arg4[%c944, %c0_139] : memref<3104x128xbf16, #tpu.memory_space<vmem>>, vector<32x8xbf16>
    %cst_140 = arith.constant dense<0.000000e+00> : vector<8x8xf32>
    %300 = tpu.matmul %193, %299, %cst_140 {dimension_numbers = #tpu.dot_dimension_numbers<[1], [0], [0], [1], [0, 0, 1, 1], [], []>} : vector<8x32xbf16>, vector<32x8xbf16>, vector<8x8xf32> -> vector<8x8xf32>
    %c30 = arith.constant 30 : index
    %c0_141 = arith.constant 0 : index
    %301 = vector.load %arg5[%c30, %c0_141] : memref<112x128xf32, #tpu.memory_space<vmem>>, vector<1x8xf32>
    %302 = vector.broadcast %301 : vector<1x8xf32> to vector<8x8xf32>
    %303 = arith.addf %300, %302 : vector<8x8xf32>
    %cst_142 = arith.constant dense<0.000000e+00> : vector<8x8xf32>
    %304 = tpu.matmul %293, %298, %cst_142 {dimension_numbers = #tpu.dot_dimension_numbers<[1], [1], [0], [0], [0, 0, 1, 0], [], []>} : vector<8x8xf32>, vector<8x8xf32>, vector<8x8xf32> -> vector<8x8xf32>
    %cst_143 = arith.constant dense<0xFF800000> : vector<8xf32>
    %305 = vector.multi_reduction <maximumf>, %304, %cst_143 [1] : vector<8x8xf32> to vector<8xf32>
    %306 = vector.shape_cast %305 : vector<8xf32> to vector<8x1xf32>
    %307 = vector.broadcast %306 : vector<8x1xf32> to vector<8x8xf32>
    %308 = arith.subf %304, %307 : vector<8x8xf32>
    %309 = math.exp %308 : vector<8x8xf32>
    %cst_144 = arith.constant dense<0.000000e+00> : vector<8xf32>
    %310 = vector.multi_reduction <add>, %309, %cst_144 [1] : vector<8x8xf32> to vector<8xf32>
    %311 = vector.shape_cast %310 : vector<8xf32> to vector<8x1xf32>
    %312 = tpu.reciprocal %311 {approx = true} : vector<8x1xf32> -> vector<8x1xf32>
    %313 = vector.broadcast %312 : vector<8x1xf32> to vector<8x8xf32>
    %314 = arith.mulf %309, %313 : vector<8x8xf32>
    %cst_145 = arith.constant dense<0.000000e+00> : vector<8x8xf32>
    %315 = tpu.matmul %314, %303, %cst_145 {dimension_numbers = #tpu.dot_dimension_numbers<[1], [0], [0], [1], [0, 0, 1, 1], [], []>} : vector<8x8xf32>, vector<8x8xf32>, vector<8x8xf32> -> vector<8x8xf32>
    %316 = arith.truncf %315 : vector<8x8xf32> to vector<8x8xbf16>
    %c976 = arith.constant 976 : index
    %c0_146 = arith.constant 0 : index
    %317 = vector.load %arg4[%c976, %c0_146] : memref<3104x128xbf16, #tpu.memory_space<vmem>>, vector<8x32xbf16>
    %cst_147 = arith.constant dense<0.000000e+00> : vector<8x32xf32>
    %318 = tpu.matmul %316, %317, %cst_147 {dimension_numbers = #tpu.dot_dimension_numbers<[1], [0], [0], [1], [0, 0, 1, 1], [], []>} : vector<8x8xbf16>, vector<8x32xbf16>, vector<8x32xf32> -> vector<8x32xf32>
    %319 = arith.addf %288, %318 : vector<8x32xf32>
    %320 = arith.addf %191, %319 : vector<8x32xf32>
    %cst_148 = arith.constant dense<0.000000e+00> : vector<8xf32>
    %321 = vector.multi_reduction <add>, %320, %cst_148 [1] : vector<8x32xf32> to vector<8xf32>
    %322 = vector.shape_cast %321 : vector<8xf32> to vector<8x1xf32>
    %cst_149 = arith.constant 3.200000e+01 : f32
    %323 = vector.broadcast %cst_149 : f32 to vector<8x1xf32>
    %324 = arith.divf %322, %323 : vector<8x1xf32>
    %325 = vector.broadcast %324 : vector<8x1xf32> to vector<8x32xf32>
    %326 = arith.subf %320, %325 : vector<8x32xf32>
    %327 = arith.mulf %326, %326 : vector<8x32xf32>
    %cst_150 = arith.constant dense<0.000000e+00> : vector<8xf32>
    %328 = vector.multi_reduction <add>, %327, %cst_150 [1] : vector<8x32xf32> to vector<8xf32>
    %329 = vector.shape_cast %328 : vector<8xf32> to vector<8x1xf32>
    %cst_151 = arith.constant 3.200000e+01 : f32
    %330 = vector.broadcast %cst_151 : f32 to vector<8x1xf32>
    %331 = arith.divf %329, %330 : vector<8x1xf32>
    %cst_152 = arith.constant 9.99999974E-6 : f32
    %332 = vector.broadcast %cst_152 : f32 to vector<8x1xf32>
    %333 = arith.addf %331, %332 : vector<8x1xf32>
    %334 = math.rsqrt %333 : vector<8x1xf32>
    %335 = vector.broadcast %334 : vector<8x1xf32> to vector<8x32xf32>
    %336 = arith.mulf %326, %335 : vector<8x32xf32>
    %c32_153 = arith.constant 32 : index
    %c0_154 = arith.constant 0 : index
    %337 = vector.load %arg5[%c32_153, %c0_154] : memref<112x128xf32, #tpu.memory_space<vmem>>, vector<1x32xf32>
    %338 = vector.broadcast %337 : vector<1x32xf32> to vector<8x32xf32>
    %339 = arith.mulf %336, %338 : vector<8x32xf32>
    %c33 = arith.constant 33 : index
    %c0_155 = arith.constant 0 : index
    %340 = vector.load %arg5[%c33, %c0_155] : memref<112x128xf32, #tpu.memory_space<vmem>>, vector<1x32xf32>
    %341 = vector.broadcast %340 : vector<1x32xf32> to vector<8x32xf32>
    %342 = arith.addf %339, %341 : vector<8x32xf32>
    %343 = arith.truncf %342 : vector<8x32xf32> to vector<8x32xbf16>
    %c992 = arith.constant 992 : index
    %c0_156 = arith.constant 0 : index
    %344 = vector.load %arg4[%c992, %c0_156] : memref<3104x128xbf16, #tpu.memory_space<vmem>>, vector<32x64xbf16>
    %cst_157 = arith.constant dense<0.000000e+00> : vector<8x64xf32>
    %345 = tpu.matmul %343, %344, %cst_157 {dimension_numbers = #tpu.dot_dimension_numbers<[1], [0], [0], [1], [0, 0, 1, 1], [], []>} : vector<8x32xbf16>, vector<32x64xbf16>, vector<8x64xf32> -> vector<8x64xf32>
    %c34 = arith.constant 34 : index
    %c0_158 = arith.constant 0 : index
    %346 = vector.load %arg5[%c34, %c0_158] : memref<112x128xf32, #tpu.memory_space<vmem>>, vector<1x64xf32>
    %347 = vector.broadcast %346 : vector<1x64xf32> to vector<8x64xf32>
    %348 = arith.addf %345, %347 : vector<8x64xf32>
    %cst_159 = arith.constant 0.000000e+00 : f32
    %349 = vector.broadcast %cst_159 : f32 to vector<8x64xf32>
    %350 = arith.maximumf %348, %349 : vector<8x64xf32>
    %351 = arith.truncf %350 : vector<8x64xf32> to vector<8x64xbf16>
    %c1024 = arith.constant 1024 : index
    %c0_160 = arith.constant 0 : index
    %352 = vector.load %arg4[%c1024, %c0_160] : memref<3104x128xbf16, #tpu.memory_space<vmem>>, vector<64x32xbf16>
    %cst_161 = arith.constant dense<0.000000e+00> : vector<8x32xf32>
    %353 = tpu.matmul %351, %352, %cst_161 {dimension_numbers = #tpu.dot_dimension_numbers<[1], [0], [0], [1], [0, 0, 1, 1], [], []>} : vector<8x64xbf16>, vector<64x32xbf16>, vector<8x32xf32> -> vector<8x32xf32>
    %c35 = arith.constant 35 : index
    %c0_162 = arith.constant 0 : index
    %354 = vector.load %arg5[%c35, %c0_162] : memref<112x128xf32, #tpu.memory_space<vmem>>, vector<1x32xf32>
    %355 = vector.broadcast %354 : vector<1x32xf32> to vector<8x32xf32>
    %356 = arith.addf %353, %355 : vector<8x32xf32>
    %357 = arith.addf %342, %356 : vector<8x32xf32>
    %cst_163 = arith.constant dense<0.000000e+00> : vector<8xf32>
    %358 = vector.multi_reduction <add>, %357, %cst_163 [1] : vector<8x32xf32> to vector<8xf32>
    %359 = vector.shape_cast %358 : vector<8xf32> to vector<8x1xf32>
    %cst_164 = arith.constant 3.200000e+01 : f32
    %360 = vector.broadcast %cst_164 : f32 to vector<8x1xf32>
    %361 = arith.divf %359, %360 : vector<8x1xf32>
    %362 = vector.broadcast %361 : vector<8x1xf32> to vector<8x32xf32>
    %363 = arith.subf %357, %362 : vector<8x32xf32>
    %364 = arith.mulf %363, %363 : vector<8x32xf32>
    %cst_165 = arith.constant dense<0.000000e+00> : vector<8xf32>
    %365 = vector.multi_reduction <add>, %364, %cst_165 [1] : vector<8x32xf32> to vector<8xf32>
    %366 = vector.shape_cast %365 : vector<8xf32> to vector<8x1xf32>
    %cst_166 = arith.constant 3.200000e+01 : f32
    %367 = vector.broadcast %cst_166 : f32 to vector<8x1xf32>
    %368 = arith.divf %366, %367 : vector<8x1xf32>
    %cst_167 = arith.constant 9.99999974E-6 : f32
    %369 = vector.broadcast %cst_167 : f32 to vector<8x1xf32>
    %370 = arith.addf %368, %369 : vector<8x1xf32>
    %371 = math.rsqrt %370 : vector<8x1xf32>
    %372 = vector.broadcast %371 : vector<8x1xf32> to vector<8x32xf32>
    %373 = arith.mulf %363, %372 : vector<8x32xf32>
    %c36 = arith.constant 36 : index
    %c0_168 = arith.constant 0 : index
    %374 = vector.load %arg5[%c36, %c0_168] : memref<112x128xf32, #tpu.memory_space<vmem>>, vector<1x32xf32>
    %375 = vector.broadcast %374 : vector<1x32xf32> to vector<8x32xf32>
    %376 = arith.mulf %373, %375 : vector<8x32xf32>
    %c37 = arith.constant 37 : index
    %c0_169 = arith.constant 0 : index
    %377 = vector.load %arg5[%c37, %c0_169] : memref<112x128xf32, #tpu.memory_space<vmem>>, vector<1x32xf32>
    %378 = vector.broadcast %377 : vector<1x32xf32> to vector<8x32xf32>
    %379 = arith.addf %376, %378 : vector<8x32xf32>
    %cst_170 = arith.constant dense<0.000000e+00> : vector<8xf32>
    %380 = vector.multi_reduction <add>, %379, %cst_170 [1] : vector<8x32xf32> to vector<8xf32>
    %381 = vector.shape_cast %380 : vector<8xf32> to vector<8x1xf32>
    %cst_171 = arith.constant 3.200000e+01 : f32
    %382 = vector.broadcast %cst_171 : f32 to vector<8x1xf32>
    %383 = arith.divf %381, %382 : vector<8x1xf32>
    %384 = vector.broadcast %383 : vector<8x1xf32> to vector<8x32xf32>
    %385 = arith.subf %379, %384 : vector<8x32xf32>
    %386 = arith.mulf %385, %385 : vector<8x32xf32>
    %cst_172 = arith.constant dense<0.000000e+00> : vector<8xf32>
    %387 = vector.multi_reduction <add>, %386, %cst_172 [1] : vector<8x32xf32> to vector<8xf32>
    %388 = vector.shape_cast %387 : vector<8xf32> to vector<8x1xf32>
    %cst_173 = arith.constant 3.200000e+01 : f32
    %389 = vector.broadcast %cst_173 : f32 to vector<8x1xf32>
    %390 = arith.divf %388, %389 : vector<8x1xf32>
    %cst_174 = arith.constant 9.99999974E-6 : f32
    %391 = vector.broadcast %cst_174 : f32 to vector<8x1xf32>
    %392 = arith.addf %390, %391 : vector<8x1xf32>
    %393 = math.rsqrt %392 : vector<8x1xf32>
    %394 = vector.broadcast %393 : vector<8x1xf32> to vector<8x32xf32>
    %395 = arith.mulf %385, %394 : vector<8x32xf32>
    %c38 = arith.constant 38 : index
    %c0_175 = arith.constant 0 : index
    %396 = vector.load %arg5[%c38, %c0_175] : memref<112x128xf32, #tpu.memory_space<vmem>>, vector<1x32xf32>
    %397 = vector.broadcast %396 : vector<1x32xf32> to vector<8x32xf32>
    %398 = arith.mulf %395, %397 : vector<8x32xf32>
    %c39 = arith.constant 39 : index
    %c0_176 = arith.constant 0 : index
    %399 = vector.load %arg5[%c39, %c0_176] : memref<112x128xf32, #tpu.memory_space<vmem>>, vector<1x32xf32>
    %400 = vector.broadcast %399 : vector<1x32xf32> to vector<8x32xf32>
    %401 = arith.addf %398, %400 : vector<8x32xf32>
    %c0_177 = arith.constant 0 : index
    %c0_178 = arith.constant 0 : index
    %c0_179 = arith.constant 0 : index
    %402 = vector.load %arg2[%c0_177, %c0_178, %c0_179] : memref<1x8x32xf32, #tpu.memory_space<vmem>>, vector<1x8x32xf32>
    %403 = vector.shape_cast %402 : vector<1x8x32xf32> to vector<8x32xf32>
    %404 = arith.truncf %403 : vector<8x32xf32> to vector<8x32xbf16>
    %405 = arith.truncf %403 : vector<8x32xf32> to vector<8x32xbf16>
    %c52 = arith.constant 52 : index
    %c0_180 = arith.constant 0 : index
    %406 = vector.load %arg5[%c52, %c0_180] : memref<112x128xf32, #tpu.memory_space<vmem>>, vector<1x32xf32>
    %c1088 = arith.constant 1088 : index
    %c0_181 = arith.constant 0 : index
    %407 = vector.load %arg4[%c1088, %c0_181] : memref<3104x128xbf16, #tpu.memory_space<vmem>>, vector<32x8xbf16>
    %cst_182 = arith.constant dense<0.000000e+00> : vector<8x8xf32>
    %408 = tpu.matmul %404, %407, %cst_182 {dimension_numbers = #tpu.dot_dimension_numbers<[1], [0], [0], [1], [0, 0, 1, 1], [], []>} : vector<8x32xbf16>, vector<32x8xbf16>, vector<8x8xf32> -> vector<8x8xf32>
    %c40 = arith.constant 40 : index
    %c0_183 = arith.constant 0 : index
    %409 = vector.load %arg5[%c40, %c0_183] : memref<112x128xf32, #tpu.memory_space<vmem>>, vector<1x8xf32>
    %410 = vector.broadcast %409 : vector<1x8xf32> to vector<8x8xf32>
    %411 = arith.addf %408, %410 : vector<8x8xf32>
    %c1120 = arith.constant 1120 : index
    %c0_184 = arith.constant 0 : index
    %412 = vector.load %arg4[%c1120, %c0_184] : memref<3104x128xbf16, #tpu.memory_space<vmem>>, vector<32x8xbf16>
    %cst_185 = arith.constant dense<0.000000e+00> : vector<8x8xf32>
    %413 = tpu.matmul %405, %412, %cst_185 {dimension_numbers = #tpu.dot_dimension_numbers<[1], [0], [0], [1], [0, 0, 1, 1], [], []>} : vector<8x32xbf16>, vector<32x8xbf16>, vector<8x8xf32> -> vector<8x8xf32>
    %c41 = arith.constant 41 : index
    %c0_186 = arith.constant 0 : index
    %414 = vector.load %arg5[%c41, %c0_186] : memref<112x128xf32, #tpu.memory_space<vmem>>, vector<1x8xf32>
    %415 = vector.broadcast %414 : vector<1x8xf32> to vector<8x8xf32>
    %416 = arith.addf %413, %415 : vector<8x8xf32>
    %c1152 = arith.constant 1152 : index
    %c0_187 = arith.constant 0 : index
    %417 = vector.load %arg4[%c1152, %c0_187] : memref<3104x128xbf16, #tpu.memory_space<vmem>>, vector<32x8xbf16>
    %cst_188 = arith.constant dense<0.000000e+00> : vector<8x8xf32>
    %418 = tpu.matmul %405, %417, %cst_188 {dimension_numbers = #tpu.dot_dimension_numbers<[1], [0], [0], [1], [0, 0, 1, 1], [], []>} : vector<8x32xbf16>, vector<32x8xbf16>, vector<8x8xf32> -> vector<8x8xf32>
    %c42 = arith.constant 42 : index
    %c0_189 = arith.constant 0 : index
    %419 = vector.load %arg5[%c42, %c0_189] : memref<112x128xf32, #tpu.memory_space<vmem>>, vector<1x8xf32>
    %420 = vector.broadcast %419 : vector<1x8xf32> to vector<8x8xf32>
    %421 = arith.addf %418, %420 : vector<8x8xf32>
    %cst_190 = arith.constant dense<0.000000e+00> : vector<8x8xf32>
    %422 = tpu.matmul %411, %416, %cst_190 {dimension_numbers = #tpu.dot_dimension_numbers<[1], [1], [0], [0], [0, 0, 1, 0], [], []>} : vector<8x8xf32>, vector<8x8xf32>, vector<8x8xf32> -> vector<8x8xf32>
    %cst_191 = arith.constant dense<0xFF800000> : vector<8xf32>
    %423 = vector.multi_reduction <maximumf>, %422, %cst_191 [1] : vector<8x8xf32> to vector<8xf32>
    %424 = vector.shape_cast %423 : vector<8xf32> to vector<8x1xf32>
    %425 = vector.broadcast %424 : vector<8x1xf32> to vector<8x8xf32>
    %426 = arith.subf %422, %425 : vector<8x8xf32>
    %427 = math.exp %426 : vector<8x8xf32>
    %cst_192 = arith.constant dense<0.000000e+00> : vector<8xf32>
    %428 = vector.multi_reduction <add>, %427, %cst_192 [1] : vector<8x8xf32> to vector<8xf32>
    %429 = vector.shape_cast %428 : vector<8xf32> to vector<8x1xf32>
    %430 = tpu.reciprocal %429 {approx = true} : vector<8x1xf32> -> vector<8x1xf32>
    %431 = vector.broadcast %430 : vector<8x1xf32> to vector<8x8xf32>
    %432 = arith.mulf %427, %431 : vector<8x8xf32>
    %cst_193 = arith.constant dense<0.000000e+00> : vector<8x8xf32>
    %433 = tpu.matmul %432, %421, %cst_193 {dimension_numbers = #tpu.dot_dimension_numbers<[1], [0], [0], [1], [0, 0, 1, 1], [], []>} : vector<8x8xf32>, vector<8x8xf32>, vector<8x8xf32> -> vector<8x8xf32>
    %434 = arith.truncf %433 : vector<8x8xf32> to vector<8x8xbf16>
    %c1184 = arith.constant 1184 : index
    %c0_194 = arith.constant 0 : index
    %435 = vector.load %arg4[%c1184, %c0_194] : memref<3104x128xbf16, #tpu.memory_space<vmem>>, vector<8x32xbf16>
    %cst_195 = arith.constant dense<0.000000e+00> : vector<8x32xf32>
    %436 = tpu.matmul %434, %435, %cst_195 {dimension_numbers = #tpu.dot_dimension_numbers<[1], [0], [0], [1], [0, 0, 1, 1], [], []>} : vector<8x8xbf16>, vector<8x32xbf16>, vector<8x32xf32> -> vector<8x32xf32>
    %437 = vector.broadcast %406 : vector<1x32xf32> to vector<8x32xf32>
    %438 = arith.addf %437, %436 : vector<8x32xf32>
    %c1200 = arith.constant 1200 : index
    %c0_196 = arith.constant 0 : index
    %439 = vector.load %arg4[%c1200, %c0_196] : memref<3104x128xbf16, #tpu.memory_space<vmem>>, vector<32x8xbf16>
    %cst_197 = arith.constant dense<0.000000e+00> : vector<8x8xf32>
    %440 = tpu.matmul %404, %439, %cst_197 {dimension_numbers = #tpu.dot_dimension_numbers<[1], [0], [0], [1], [0, 0, 1, 1], [], []>} : vector<8x32xbf16>, vector<32x8xbf16>, vector<8x8xf32> -> vector<8x8xf32>
    %c43 = arith.constant 43 : index
    %c0_198 = arith.constant 0 : index
    %441 = vector.load %arg5[%c43, %c0_198] : memref<112x128xf32, #tpu.memory_space<vmem>>, vector<1x8xf32>
    %442 = vector.broadcast %441 : vector<1x8xf32> to vector<8x8xf32>
    %443 = arith.addf %440, %442 : vector<8x8xf32>
    %c1232 = arith.constant 1232 : index
    %c0_199 = arith.constant 0 : index
    %444 = vector.load %arg4[%c1232, %c0_199] : memref<3104x128xbf16, #tpu.memory_space<vmem>>, vector<32x8xbf16>
    %cst_200 = arith.constant dense<0.000000e+00> : vector<8x8xf32>
    %445 = tpu.matmul %405, %444, %cst_200 {dimension_numbers = #tpu.dot_dimension_numbers<[1], [0], [0], [1], [0, 0, 1, 1], [], []>} : vector<8x32xbf16>, vector<32x8xbf16>, vector<8x8xf32> -> vector<8x8xf32>
    %c44 = arith.constant 44 : index
    %c0_201 = arith.constant 0 : index
    %446 = vector.load %arg5[%c44, %c0_201] : memref<112x128xf32, #tpu.memory_space<vmem>>, vector<1x8xf32>
    %447 = vector.broadcast %446 : vector<1x8xf32> to vector<8x8xf32>
    %448 = arith.addf %445, %447 : vector<8x8xf32>
    %c1264 = arith.constant 1264 : index
    %c0_202 = arith.constant 0 : index
    %449 = vector.load %arg4[%c1264, %c0_202] : memref<3104x128xbf16, #tpu.memory_space<vmem>>, vector<32x8xbf16>
    %cst_203 = arith.constant dense<0.000000e+00> : vector<8x8xf32>
    %450 = tpu.matmul %405, %449, %cst_203 {dimension_numbers = #tpu.dot_dimension_numbers<[1], [0], [0], [1], [0, 0, 1, 1], [], []>} : vector<8x32xbf16>, vector<32x8xbf16>, vector<8x8xf32> -> vector<8x8xf32>
    %c45 = arith.constant 45 : index
    %c0_204 = arith.constant 0 : index
    %451 = vector.load %arg5[%c45, %c0_204] : memref<112x128xf32, #tpu.memory_space<vmem>>, vector<1x8xf32>
    %452 = vector.broadcast %451 : vector<1x8xf32> to vector<8x8xf32>
    %453 = arith.addf %450, %452 : vector<8x8xf32>
    %cst_205 = arith.constant dense<0.000000e+00> : vector<8x8xf32>
    %454 = tpu.matmul %443, %448, %cst_205 {dimension_numbers = #tpu.dot_dimension_numbers<[1], [1], [0], [0], [0, 0, 1, 0], [], []>} : vector<8x8xf32>, vector<8x8xf32>, vector<8x8xf32> -> vector<8x8xf32>
    %cst_206 = arith.constant dense<0xFF800000> : vector<8xf32>
    %455 = vector.multi_reduction <maximumf>, %454, %cst_206 [1] : vector<8x8xf32> to vector<8xf32>
    %456 = vector.shape_cast %455 : vector<8xf32> to vector<8x1xf32>
    %457 = vector.broadcast %456 : vector<8x1xf32> to vector<8x8xf32>
    %458 = arith.subf %454, %457 : vector<8x8xf32>
    %459 = math.exp %458 : vector<8x8xf32>
    %cst_207 = arith.constant dense<0.000000e+00> : vector<8xf32>
    %460 = vector.multi_reduction <add>, %459, %cst_207 [1] : vector<8x8xf32> to vector<8xf32>
    %461 = vector.shape_cast %460 : vector<8xf32> to vector<8x1xf32>
    %462 = tpu.reciprocal %461 {approx = true} : vector<8x1xf32> -> vector<8x1xf32>
    %463 = vector.broadcast %462 : vector<8x1xf32> to vector<8x8xf32>
    %464 = arith.mulf %459, %463 : vector<8x8xf32>
    %cst_208 = arith.constant dense<0.000000e+00> : vector<8x8xf32>
    %465 = tpu.matmul %464, %453, %cst_208 {dimension_numbers = #tpu.dot_dimension_numbers<[1], [0], [0], [1], [0, 0, 1, 1], [], []>} : vector<8x8xf32>, vector<8x8xf32>, vector<8x8xf32> -> vector<8x8xf32>
    %466 = arith.truncf %465 : vector<8x8xf32> to vector<8x8xbf16>
    %c1296 = arith.constant 1296 : index
    %c0_209 = arith.constant 0 : index
    %467 = vector.load %arg4[%c1296, %c0_209] : memref<3104x128xbf16, #tpu.memory_space<vmem>>, vector<8x32xbf16>
    %cst_210 = arith.constant dense<0.000000e+00> : vector<8x32xf32>
    %468 = tpu.matmul %466, %467, %cst_210 {dimension_numbers = #tpu.dot_dimension_numbers<[1], [0], [0], [1], [0, 0, 1, 1], [], []>} : vector<8x8xbf16>, vector<8x32xbf16>, vector<8x32xf32> -> vector<8x32xf32>
    %469 = arith.addf %438, %468 : vector<8x32xf32>
    %c1312 = arith.constant 1312 : index
    %c0_211 = arith.constant 0 : index
    %470 = vector.load %arg4[%c1312, %c0_211] : memref<3104x128xbf16, #tpu.memory_space<vmem>>, vector<32x8xbf16>
    %cst_212 = arith.constant dense<0.000000e+00> : vector<8x8xf32>
    %471 = tpu.matmul %404, %470, %cst_212 {dimension_numbers = #tpu.dot_dimension_numbers<[1], [0], [0], [1], [0, 0, 1, 1], [], []>} : vector<8x32xbf16>, vector<32x8xbf16>, vector<8x8xf32> -> vector<8x8xf32>
    %c46 = arith.constant 46 : index
    %c0_213 = arith.constant 0 : index
    %472 = vector.load %arg5[%c46, %c0_213] : memref<112x128xf32, #tpu.memory_space<vmem>>, vector<1x8xf32>
    %473 = vector.broadcast %472 : vector<1x8xf32> to vector<8x8xf32>
    %474 = arith.addf %471, %473 : vector<8x8xf32>
    %c1344 = arith.constant 1344 : index
    %c0_214 = arith.constant 0 : index
    %475 = vector.load %arg4[%c1344, %c0_214] : memref<3104x128xbf16, #tpu.memory_space<vmem>>, vector<32x8xbf16>
    %cst_215 = arith.constant dense<0.000000e+00> : vector<8x8xf32>
    %476 = tpu.matmul %405, %475, %cst_215 {dimension_numbers = #tpu.dot_dimension_numbers<[1], [0], [0], [1], [0, 0, 1, 1], [], []>} : vector<8x32xbf16>, vector<32x8xbf16>, vector<8x8xf32> -> vector<8x8xf32>
    %c47 = arith.constant 47 : index
    %c0_216 = arith.constant 0 : index
    %477 = vector.load %arg5[%c47, %c0_216] : memref<112x128xf32, #tpu.memory_space<vmem>>, vector<1x8xf32>
    %478 = vector.broadcast %477 : vector<1x8xf32> to vector<8x8xf32>
    %479 = arith.addf %476, %478 : vector<8x8xf32>
    %c1376 = arith.constant 1376 : index
    %c0_217 = arith.constant 0 : index
    %480 = vector.load %arg4[%c1376, %c0_217] : memref<3104x128xbf16, #tpu.memory_space<vmem>>, vector<32x8xbf16>
    %cst_218 = arith.constant dense<0.000000e+00> : vector<8x8xf32>
    %481 = tpu.matmul %405, %480, %cst_218 {dimension_numbers = #tpu.dot_dimension_numbers<[1], [0], [0], [1], [0, 0, 1, 1], [], []>} : vector<8x32xbf16>, vector<32x8xbf16>, vector<8x8xf32> -> vector<8x8xf32>
    %c48 = arith.constant 48 : index
    %c0_219 = arith.constant 0 : index
    %482 = vector.load %arg5[%c48, %c0_219] : memref<112x128xf32, #tpu.memory_space<vmem>>, vector<1x8xf32>
    %483 = vector.broadcast %482 : vector<1x8xf32> to vector<8x8xf32>
    %484 = arith.addf %481, %483 : vector<8x8xf32>
    %cst_220 = arith.constant dense<0.000000e+00> : vector<8x8xf32>
    %485 = tpu.matmul %474, %479, %cst_220 {dimension_numbers = #tpu.dot_dimension_numbers<[1], [1], [0], [0], [0, 0, 1, 0], [], []>} : vector<8x8xf32>, vector<8x8xf32>, vector<8x8xf32> -> vector<8x8xf32>
    %cst_221 = arith.constant dense<0xFF800000> : vector<8xf32>
    %486 = vector.multi_reduction <maximumf>, %485, %cst_221 [1] : vector<8x8xf32> to vector<8xf32>
    %487 = vector.shape_cast %486 : vector<8xf32> to vector<8x1xf32>
    %488 = vector.broadcast %487 : vector<8x1xf32> to vector<8x8xf32>
    %489 = arith.subf %485, %488 : vector<8x8xf32>
    %490 = math.exp %489 : vector<8x8xf32>
    %cst_222 = arith.constant dense<0.000000e+00> : vector<8xf32>
    %491 = vector.multi_reduction <add>, %490, %cst_222 [1] : vector<8x8xf32> to vector<8xf32>
    %492 = vector.shape_cast %491 : vector<8xf32> to vector<8x1xf32>
    %493 = tpu.reciprocal %492 {approx = true} : vector<8x1xf32> -> vector<8x1xf32>
    %494 = vector.broadcast %493 : vector<8x1xf32> to vector<8x8xf32>
    %495 = arith.mulf %490, %494 : vector<8x8xf32>
    %cst_223 = arith.constant dense<0.000000e+00> : vector<8x8xf32>
    %496 = tpu.matmul %495, %484, %cst_223 {dimension_numbers = #tpu.dot_dimension_numbers<[1], [0], [0], [1], [0, 0, 1, 1], [], []>} : vector<8x8xf32>, vector<8x8xf32>, vector<8x8xf32> -> vector<8x8xf32>
    %497 = arith.truncf %496 : vector<8x8xf32> to vector<8x8xbf16>
    %c1408 = arith.constant 1408 : index
    %c0_224 = arith.constant 0 : index
    %498 = vector.load %arg4[%c1408, %c0_224] : memref<3104x128xbf16, #tpu.memory_space<vmem>>, vector<8x32xbf16>
    %cst_225 = arith.constant dense<0.000000e+00> : vector<8x32xf32>
    %499 = tpu.matmul %497, %498, %cst_225 {dimension_numbers = #tpu.dot_dimension_numbers<[1], [0], [0], [1], [0, 0, 1, 1], [], []>} : vector<8x8xbf16>, vector<8x32xbf16>, vector<8x32xf32> -> vector<8x32xf32>
    %500 = arith.addf %469, %499 : vector<8x32xf32>
    %c1424 = arith.constant 1424 : index
    %c0_226 = arith.constant 0 : index
    %501 = vector.load %arg4[%c1424, %c0_226] : memref<3104x128xbf16, #tpu.memory_space<vmem>>, vector<32x8xbf16>
    %cst_227 = arith.constant dense<0.000000e+00> : vector<8x8xf32>
    %502 = tpu.matmul %404, %501, %cst_227 {dimension_numbers = #tpu.dot_dimension_numbers<[1], [0], [0], [1], [0, 0, 1, 1], [], []>} : vector<8x32xbf16>, vector<32x8xbf16>, vector<8x8xf32> -> vector<8x8xf32>
    %c49 = arith.constant 49 : index
    %c0_228 = arith.constant 0 : index
    %503 = vector.load %arg5[%c49, %c0_228] : memref<112x128xf32, #tpu.memory_space<vmem>>, vector<1x8xf32>
    %504 = vector.broadcast %503 : vector<1x8xf32> to vector<8x8xf32>
    %505 = arith.addf %502, %504 : vector<8x8xf32>
    %c1456 = arith.constant 1456 : index
    %c0_229 = arith.constant 0 : index
    %506 = vector.load %arg4[%c1456, %c0_229] : memref<3104x128xbf16, #tpu.memory_space<vmem>>, vector<32x8xbf16>
    %cst_230 = arith.constant dense<0.000000e+00> : vector<8x8xf32>
    %507 = tpu.matmul %405, %506, %cst_230 {dimension_numbers = #tpu.dot_dimension_numbers<[1], [0], [0], [1], [0, 0, 1, 1], [], []>} : vector<8x32xbf16>, vector<32x8xbf16>, vector<8x8xf32> -> vector<8x8xf32>
    %c50 = arith.constant 50 : index
    %c0_231 = arith.constant 0 : index
    %508 = vector.load %arg5[%c50, %c0_231] : memref<112x128xf32, #tpu.memory_space<vmem>>, vector<1x8xf32>
    %509 = vector.broadcast %508 : vector<1x8xf32> to vector<8x8xf32>
    %510 = arith.addf %507, %509 : vector<8x8xf32>
    %c1488 = arith.constant 1488 : index
    %c0_232 = arith.constant 0 : index
    %511 = vector.load %arg4[%c1488, %c0_232] : memref<3104x128xbf16, #tpu.memory_space<vmem>>, vector<32x8xbf16>
    %cst_233 = arith.constant dense<0.000000e+00> : vector<8x8xf32>
    %512 = tpu.matmul %405, %511, %cst_233 {dimension_numbers = #tpu.dot_dimension_numbers<[1], [0], [0], [1], [0, 0, 1, 1], [], []>} : vector<8x32xbf16>, vector<32x8xbf16>, vector<8x8xf32> -> vector<8x8xf32>
    %c51 = arith.constant 51 : index
    %c0_234 = arith.constant 0 : index
    %513 = vector.load %arg5[%c51, %c0_234] : memref<112x128xf32, #tpu.memory_space<vmem>>, vector<1x8xf32>
    %514 = vector.broadcast %513 : vector<1x8xf32> to vector<8x8xf32>
    %515 = arith.addf %512, %514 : vector<8x8xf32>
    %cst_235 = arith.constant dense<0.000000e+00> : vector<8x8xf32>
    %516 = tpu.matmul %505, %510, %cst_235 {dimension_numbers = #tpu.dot_dimension_numbers<[1], [1], [0], [0], [0, 0, 1, 0], [], []>} : vector<8x8xf32>, vector<8x8xf32>, vector<8x8xf32> -> vector<8x8xf32>
    %cst_236 = arith.constant dense<0xFF800000> : vector<8xf32>
    %517 = vector.multi_reduction <maximumf>, %516, %cst_236 [1] : vector<8x8xf32> to vector<8xf32>
    %518 = vector.shape_cast %517 : vector<8xf32> to vector<8x1xf32>
    %519 = vector.broadcast %518 : vector<8x1xf32> to vector<8x8xf32>
    %520 = arith.subf %516, %519 : vector<8x8xf32>
    %521 = math.exp %520 : vector<8x8xf32>
    %cst_237 = arith.constant dense<0.000000e+00> : vector<8xf32>
    %522 = vector.multi_reduction <add>, %521, %cst_237 [1] : vector<8x8xf32> to vector<8xf32>
    %523 = vector.shape_cast %522 : vector<8xf32> to vector<8x1xf32>
    %524 = tpu.reciprocal %523 {approx = true} : vector<8x1xf32> -> vector<8x1xf32>
    %525 = vector.broadcast %524 : vector<8x1xf32> to vector<8x8xf32>
    %526 = arith.mulf %521, %525 : vector<8x8xf32>
    %cst_238 = arith.constant dense<0.000000e+00> : vector<8x8xf32>
    %527 = tpu.matmul %526, %515, %cst_238 {dimension_numbers = #tpu.dot_dimension_numbers<[1], [0], [0], [1], [0, 0, 1, 1], [], []>} : vector<8x8xf32>, vector<8x8xf32>, vector<8x8xf32> -> vector<8x8xf32>
    %528 = arith.truncf %527 : vector<8x8xf32> to vector<8x8xbf16>
    %c1520 = arith.constant 1520 : index
    %c0_239 = arith.constant 0 : index
    %529 = vector.load %arg4[%c1520, %c0_239] : memref<3104x128xbf16, #tpu.memory_space<vmem>>, vector<8x32xbf16>
    %cst_240 = arith.constant dense<0.000000e+00> : vector<8x32xf32>
    %530 = tpu.matmul %528, %529, %cst_240 {dimension_numbers = #tpu.dot_dimension_numbers<[1], [0], [0], [1], [0, 0, 1, 1], [], []>} : vector<8x8xbf16>, vector<8x32xbf16>, vector<8x32xf32> -> vector<8x32xf32>
    %531 = arith.addf %500, %530 : vector<8x32xf32>
    %532 = arith.addf %403, %531 : vector<8x32xf32>
    %cst_241 = arith.constant dense<0.000000e+00> : vector<8xf32>
    %533 = vector.multi_reduction <add>, %532, %cst_241 [1] : vector<8x32xf32> to vector<8xf32>
    %534 = vector.shape_cast %533 : vector<8xf32> to vector<8x1xf32>
    %cst_242 = arith.constant 3.200000e+01 : f32
    %535 = vector.broadcast %cst_242 : f32 to vector<8x1xf32>
    %536 = arith.divf %534, %535 : vector<8x1xf32>
    %537 = vector.broadcast %536 : vector<8x1xf32> to vector<8x32xf32>
    %538 = arith.subf %532, %537 : vector<8x32xf32>
    %539 = arith.mulf %538, %538 : vector<8x32xf32>
    %cst_243 = arith.constant dense<0.000000e+00> : vector<8xf32>
    %540 = vector.multi_reduction <add>, %539, %cst_243 [1] : vector<8x32xf32> to vector<8xf32>
    %541 = vector.shape_cast %540 : vector<8xf32> to vector<8x1xf32>
    %cst_244 = arith.constant 3.200000e+01 : f32
    %542 = vector.broadcast %cst_244 : f32 to vector<8x1xf32>
    %543 = arith.divf %541, %542 : vector<8x1xf32>
    %cst_245 = arith.constant 9.99999974E-6 : f32
    %544 = vector.broadcast %cst_245 : f32 to vector<8x1xf32>
    %545 = arith.addf %543, %544 : vector<8x1xf32>
    %546 = math.rsqrt %545 : vector<8x1xf32>
    %547 = vector.broadcast %546 : vector<8x1xf32> to vector<8x32xf32>
    %548 = arith.mulf %538, %547 : vector<8x32xf32>
    %c53 = arith.constant 53 : index
    %c0_246 = arith.constant 0 : index
    %549 = vector.load %arg5[%c53, %c0_246] : memref<112x128xf32, #tpu.memory_space<vmem>>, vector<1x32xf32>
    %550 = vector.broadcast %549 : vector<1x32xf32> to vector<8x32xf32>
    %551 = arith.mulf %548, %550 : vector<8x32xf32>
    %c54 = arith.constant 54 : index
    %c0_247 = arith.constant 0 : index
    %552 = vector.load %arg5[%c54, %c0_247] : memref<112x128xf32, #tpu.memory_space<vmem>>, vector<1x32xf32>
    %553 = vector.broadcast %552 : vector<1x32xf32> to vector<8x32xf32>
    %554 = arith.addf %551, %553 : vector<8x32xf32>
    %555 = arith.truncf %554 : vector<8x32xf32> to vector<8x32xbf16>
    %556 = arith.truncf %401 : vector<8x32xf32> to vector<8x32xbf16>
    %c67 = arith.constant 67 : index
    %c0_248 = arith.constant 0 : index
    %557 = vector.load %arg5[%c67, %c0_248] : memref<112x128xf32, #tpu.memory_space<vmem>>, vector<1x32xf32>
    %c1536 = arith.constant 1536 : index
    %c0_249 = arith.constant 0 : index
    %558 = vector.load %arg4[%c1536, %c0_249] : memref<3104x128xbf16, #tpu.memory_space<vmem>>, vector<32x8xbf16>
    %cst_250 = arith.constant dense<0.000000e+00> : vector<8x8xf32>
    %559 = tpu.matmul %555, %558, %cst_250 {dimension_numbers = #tpu.dot_dimension_numbers<[1], [0], [0], [1], [0, 0, 1, 1], [], []>} : vector<8x32xbf16>, vector<32x8xbf16>, vector<8x8xf32> -> vector<8x8xf32>
    %c55 = arith.constant 55 : index
    %c0_251 = arith.constant 0 : index
    %560 = vector.load %arg5[%c55, %c0_251] : memref<112x128xf32, #tpu.memory_space<vmem>>, vector<1x8xf32>
    %561 = vector.broadcast %560 : vector<1x8xf32> to vector<8x8xf32>
    %562 = arith.addf %559, %561 : vector<8x8xf32>
    %c1568 = arith.constant 1568 : index
    %c0_252 = arith.constant 0 : index
    %563 = vector.load %arg4[%c1568, %c0_252] : memref<3104x128xbf16, #tpu.memory_space<vmem>>, vector<32x8xbf16>
    %cst_253 = arith.constant dense<0.000000e+00> : vector<8x8xf32>
    %564 = tpu.matmul %556, %563, %cst_253 {dimension_numbers = #tpu.dot_dimension_numbers<[1], [0], [0], [1], [0, 0, 1, 1], [], []>} : vector<8x32xbf16>, vector<32x8xbf16>, vector<8x8xf32> -> vector<8x8xf32>
    %c56 = arith.constant 56 : index
    %c0_254 = arith.constant 0 : index
    %565 = vector.load %arg5[%c56, %c0_254] : memref<112x128xf32, #tpu.memory_space<vmem>>, vector<1x8xf32>
    %566 = vector.broadcast %565 : vector<1x8xf32> to vector<8x8xf32>
    %567 = arith.addf %564, %566 : vector<8x8xf32>
    %c1600 = arith.constant 1600 : index
    %c0_255 = arith.constant 0 : index
    %568 = vector.load %arg4[%c1600, %c0_255] : memref<3104x128xbf16, #tpu.memory_space<vmem>>, vector<32x8xbf16>
    %cst_256 = arith.constant dense<0.000000e+00> : vector<8x8xf32>
    %569 = tpu.matmul %556, %568, %cst_256 {dimension_numbers = #tpu.dot_dimension_numbers<[1], [0], [0], [1], [0, 0, 1, 1], [], []>} : vector<8x32xbf16>, vector<32x8xbf16>, vector<8x8xf32> -> vector<8x8xf32>
    %c57 = arith.constant 57 : index
    %c0_257 = arith.constant 0 : index
    %570 = vector.load %arg5[%c57, %c0_257] : memref<112x128xf32, #tpu.memory_space<vmem>>, vector<1x8xf32>
    %571 = vector.broadcast %570 : vector<1x8xf32> to vector<8x8xf32>
    %572 = arith.addf %569, %571 : vector<8x8xf32>
    %cst_258 = arith.constant dense<0.000000e+00> : vector<8x8xf32>
    %573 = tpu.matmul %562, %567, %cst_258 {dimension_numbers = #tpu.dot_dimension_numbers<[1], [1], [0], [0], [0, 0, 1, 0], [], []>} : vector<8x8xf32>, vector<8x8xf32>, vector<8x8xf32> -> vector<8x8xf32>
    %cst_259 = arith.constant dense<0xFF800000> : vector<8xf32>
    %574 = vector.multi_reduction <maximumf>, %573, %cst_259 [1] : vector<8x8xf32> to vector<8xf32>
    %575 = vector.shape_cast %574 : vector<8xf32> to vector<8x1xf32>
    %576 = vector.broadcast %575 : vector<8x1xf32> to vector<8x8xf32>
    %577 = arith.subf %573, %576 : vector<8x8xf32>
    %578 = math.exp %577 : vector<8x8xf32>
    %cst_260 = arith.constant dense<0.000000e+00> : vector<8xf32>
    %579 = vector.multi_reduction <add>, %578, %cst_260 [1] : vector<8x8xf32> to vector<8xf32>
    %580 = vector.shape_cast %579 : vector<8xf32> to vector<8x1xf32>
    %581 = tpu.reciprocal %580 {approx = true} : vector<8x1xf32> -> vector<8x1xf32>
    %582 = vector.broadcast %581 : vector<8x1xf32> to vector<8x8xf32>
    %583 = arith.mulf %578, %582 : vector<8x8xf32>
    %cst_261 = arith.constant dense<0.000000e+00> : vector<8x8xf32>
    %584 = tpu.matmul %583, %572, %cst_261 {dimension_numbers = #tpu.dot_dimension_numbers<[1], [0], [0], [1], [0, 0, 1, 1], [], []>} : vector<8x8xf32>, vector<8x8xf32>, vector<8x8xf32> -> vector<8x8xf32>
    %585 = arith.truncf %584 : vector<8x8xf32> to vector<8x8xbf16>
    %c1632 = arith.constant 1632 : index
    %c0_262 = arith.constant 0 : index
    %586 = vector.load %arg4[%c1632, %c0_262] : memref<3104x128xbf16, #tpu.memory_space<vmem>>, vector<8x32xbf16>
    %cst_263 = arith.constant dense<0.000000e+00> : vector<8x32xf32>
    %587 = tpu.matmul %585, %586, %cst_263 {dimension_numbers = #tpu.dot_dimension_numbers<[1], [0], [0], [1], [0, 0, 1, 1], [], []>} : vector<8x8xbf16>, vector<8x32xbf16>, vector<8x32xf32> -> vector<8x32xf32>
    %588 = vector.broadcast %557 : vector<1x32xf32> to vector<8x32xf32>
    %589 = arith.addf %588, %587 : vector<8x32xf32>
    %c1648 = arith.constant 1648 : index
    %c0_264 = arith.constant 0 : index
    %590 = vector.load %arg4[%c1648, %c0_264] : memref<3104x128xbf16, #tpu.memory_space<vmem>>, vector<32x8xbf16>
    %cst_265 = arith.constant dense<0.000000e+00> : vector<8x8xf32>
    %591 = tpu.matmul %555, %590, %cst_265 {dimension_numbers = #tpu.dot_dimension_numbers<[1], [0], [0], [1], [0, 0, 1, 1], [], []>} : vector<8x32xbf16>, vector<32x8xbf16>, vector<8x8xf32> -> vector<8x8xf32>
    %c58 = arith.constant 58 : index
    %c0_266 = arith.constant 0 : index
    %592 = vector.load %arg5[%c58, %c0_266] : memref<112x128xf32, #tpu.memory_space<vmem>>, vector<1x8xf32>
    %593 = vector.broadcast %592 : vector<1x8xf32> to vector<8x8xf32>
    %594 = arith.addf %591, %593 : vector<8x8xf32>
    %c1680 = arith.constant 1680 : index
    %c0_267 = arith.constant 0 : index
    %595 = vector.load %arg4[%c1680, %c0_267] : memref<3104x128xbf16, #tpu.memory_space<vmem>>, vector<32x8xbf16>
    %cst_268 = arith.constant dense<0.000000e+00> : vector<8x8xf32>
    %596 = tpu.matmul %556, %595, %cst_268 {dimension_numbers = #tpu.dot_dimension_numbers<[1], [0], [0], [1], [0, 0, 1, 1], [], []>} : vector<8x32xbf16>, vector<32x8xbf16>, vector<8x8xf32> -> vector<8x8xf32>
    %c59 = arith.constant 59 : index
    %c0_269 = arith.constant 0 : index
    %597 = vector.load %arg5[%c59, %c0_269] : memref<112x128xf32, #tpu.memory_space<vmem>>, vector<1x8xf32>
    %598 = vector.broadcast %597 : vector<1x8xf32> to vector<8x8xf32>
    %599 = arith.addf %596, %598 : vector<8x8xf32>
    %c1712 = arith.constant 1712 : index
    %c0_270 = arith.constant 0 : index
    %600 = vector.load %arg4[%c1712, %c0_270] : memref<3104x128xbf16, #tpu.memory_space<vmem>>, vector<32x8xbf16>
    %cst_271 = arith.constant dense<0.000000e+00> : vector<8x8xf32>
    %601 = tpu.matmul %556, %600, %cst_271 {dimension_numbers = #tpu.dot_dimension_numbers<[1], [0], [0], [1], [0, 0, 1, 1], [], []>} : vector<8x32xbf16>, vector<32x8xbf16>, vector<8x8xf32> -> vector<8x8xf32>
    %c60 = arith.constant 60 : index
    %c0_272 = arith.constant 0 : index
    %602 = vector.load %arg5[%c60, %c0_272] : memref<112x128xf32, #tpu.memory_space<vmem>>, vector<1x8xf32>
    %603 = vector.broadcast %602 : vector<1x8xf32> to vector<8x8xf32>
    %604 = arith.addf %601, %603 : vector<8x8xf32>
    %cst_273 = arith.constant dense<0.000000e+00> : vector<8x8xf32>
    %605 = tpu.matmul %594, %599, %cst_273 {dimension_numbers = #tpu.dot_dimension_numbers<[1], [1], [0], [0], [0, 0, 1, 0], [], []>} : vector<8x8xf32>, vector<8x8xf32>, vector<8x8xf32> -> vector<8x8xf32>
    %cst_274 = arith.constant dense<0xFF800000> : vector<8xf32>
    %606 = vector.multi_reduction <maximumf>, %605, %cst_274 [1] : vector<8x8xf32> to vector<8xf32>
    %607 = vector.shape_cast %606 : vector<8xf32> to vector<8x1xf32>
    %608 = vector.broadcast %607 : vector<8x1xf32> to vector<8x8xf32>
    %609 = arith.subf %605, %608 : vector<8x8xf32>
    %610 = math.exp %609 : vector<8x8xf32>
    %cst_275 = arith.constant dense<0.000000e+00> : vector<8xf32>
    %611 = vector.multi_reduction <add>, %610, %cst_275 [1] : vector<8x8xf32> to vector<8xf32>
    %612 = vector.shape_cast %611 : vector<8xf32> to vector<8x1xf32>
    %613 = tpu.reciprocal %612 {approx = true} : vector<8x1xf32> -> vector<8x1xf32>
    %614 = vector.broadcast %613 : vector<8x1xf32> to vector<8x8xf32>
    %615 = arith.mulf %610, %614 : vector<8x8xf32>
    %cst_276 = arith.constant dense<0.000000e+00> : vector<8x8xf32>
    %616 = tpu.matmul %615, %604, %cst_276 {dimension_numbers = #tpu.dot_dimension_numbers<[1], [0], [0], [1], [0, 0, 1, 1], [], []>} : vector<8x8xf32>, vector<8x8xf32>, vector<8x8xf32> -> vector<8x8xf32>
    %617 = arith.truncf %616 : vector<8x8xf32> to vector<8x8xbf16>
    %c1744 = arith.constant 1744 : index
    %c0_277 = arith.constant 0 : index
    %618 = vector.load %arg4[%c1744, %c0_277] : memref<3104x128xbf16, #tpu.memory_space<vmem>>, vector<8x32xbf16>
    %cst_278 = arith.constant dense<0.000000e+00> : vector<8x32xf32>
    %619 = tpu.matmul %617, %618, %cst_278 {dimension_numbers = #tpu.dot_dimension_numbers<[1], [0], [0], [1], [0, 0, 1, 1], [], []>} : vector<8x8xbf16>, vector<8x32xbf16>, vector<8x32xf32> -> vector<8x32xf32>
    %620 = arith.addf %589, %619 : vector<8x32xf32>
    %c1760 = arith.constant 1760 : index
    %c0_279 = arith.constant 0 : index
    %621 = vector.load %arg4[%c1760, %c0_279] : memref<3104x128xbf16, #tpu.memory_space<vmem>>, vector<32x8xbf16>
    %cst_280 = arith.constant dense<0.000000e+00> : vector<8x8xf32>
    %622 = tpu.matmul %555, %621, %cst_280 {dimension_numbers = #tpu.dot_dimension_numbers<[1], [0], [0], [1], [0, 0, 1, 1], [], []>} : vector<8x32xbf16>, vector<32x8xbf16>, vector<8x8xf32> -> vector<8x8xf32>
    %c61 = arith.constant 61 : index
    %c0_281 = arith.constant 0 : index
    %623 = vector.load %arg5[%c61, %c0_281] : memref<112x128xf32, #tpu.memory_space<vmem>>, vector<1x8xf32>
    %624 = vector.broadcast %623 : vector<1x8xf32> to vector<8x8xf32>
    %625 = arith.addf %622, %624 : vector<8x8xf32>
    %c1792 = arith.constant 1792 : index
    %c0_282 = arith.constant 0 : index
    %626 = vector.load %arg4[%c1792, %c0_282] : memref<3104x128xbf16, #tpu.memory_space<vmem>>, vector<32x8xbf16>
    %cst_283 = arith.constant dense<0.000000e+00> : vector<8x8xf32>
    %627 = tpu.matmul %556, %626, %cst_283 {dimension_numbers = #tpu.dot_dimension_numbers<[1], [0], [0], [1], [0, 0, 1, 1], [], []>} : vector<8x32xbf16>, vector<32x8xbf16>, vector<8x8xf32> -> vector<8x8xf32>
    %c62 = arith.constant 62 : index
    %c0_284 = arith.constant 0 : index
    %628 = vector.load %arg5[%c62, %c0_284] : memref<112x128xf32, #tpu.memory_space<vmem>>, vector<1x8xf32>
    %629 = vector.broadcast %628 : vector<1x8xf32> to vector<8x8xf32>
    %630 = arith.addf %627, %629 : vector<8x8xf32>
    %c1824 = arith.constant 1824 : index
    %c0_285 = arith.constant 0 : index
    %631 = vector.load %arg4[%c1824, %c0_285] : memref<3104x128xbf16, #tpu.memory_space<vmem>>, vector<32x8xbf16>
    %cst_286 = arith.constant dense<0.000000e+00> : vector<8x8xf32>
    %632 = tpu.matmul %556, %631, %cst_286 {dimension_numbers = #tpu.dot_dimension_numbers<[1], [0], [0], [1], [0, 0, 1, 1], [], []>} : vector<8x32xbf16>, vector<32x8xbf16>, vector<8x8xf32> -> vector<8x8xf32>
    %c63 = arith.constant 63 : index
    %c0_287 = arith.constant 0 : index
    %633 = vector.load %arg5[%c63, %c0_287] : memref<112x128xf32, #tpu.memory_space<vmem>>, vector<1x8xf32>
    %634 = vector.broadcast %633 : vector<1x8xf32> to vector<8x8xf32>
    %635 = arith.addf %632, %634 : vector<8x8xf32>
    %cst_288 = arith.constant dense<0.000000e+00> : vector<8x8xf32>
    %636 = tpu.matmul %625, %630, %cst_288 {dimension_numbers = #tpu.dot_dimension_numbers<[1], [1], [0], [0], [0, 0, 1, 0], [], []>} : vector<8x8xf32>, vector<8x8xf32>, vector<8x8xf32> -> vector<8x8xf32>
    %cst_289 = arith.constant dense<0xFF800000> : vector<8xf32>
    %637 = vector.multi_reduction <maximumf>, %636, %cst_289 [1] : vector<8x8xf32> to vector<8xf32>
    %638 = vector.shape_cast %637 : vector<8xf32> to vector<8x1xf32>
    %639 = vector.broadcast %638 : vector<8x1xf32> to vector<8x8xf32>
    %640 = arith.subf %636, %639 : vector<8x8xf32>
    %641 = math.exp %640 : vector<8x8xf32>
    %cst_290 = arith.constant dense<0.000000e+00> : vector<8xf32>
    %642 = vector.multi_reduction <add>, %641, %cst_290 [1] : vector<8x8xf32> to vector<8xf32>
    %643 = vector.shape_cast %642 : vector<8xf32> to vector<8x1xf32>
    %644 = tpu.reciprocal %643 {approx = true} : vector<8x1xf32> -> vector<8x1xf32>
    %645 = vector.broadcast %644 : vector<8x1xf32> to vector<8x8xf32>
    %646 = arith.mulf %641, %645 : vector<8x8xf32>
    %cst_291 = arith.constant dense<0.000000e+00> : vector<8x8xf32>
    %647 = tpu.matmul %646, %635, %cst_291 {dimension_numbers = #tpu.dot_dimension_numbers<[1], [0], [0], [1], [0, 0, 1, 1], [], []>} : vector<8x8xf32>, vector<8x8xf32>, vector<8x8xf32> -> vector<8x8xf32>
    %648 = arith.truncf %647 : vector<8x8xf32> to vector<8x8xbf16>
    %c1856 = arith.constant 1856 : index
    %c0_292 = arith.constant 0 : index
    %649 = vector.load %arg4[%c1856, %c0_292] : memref<3104x128xbf16, #tpu.memory_space<vmem>>, vector<8x32xbf16>
    %cst_293 = arith.constant dense<0.000000e+00> : vector<8x32xf32>
    %650 = tpu.matmul %648, %649, %cst_293 {dimension_numbers = #tpu.dot_dimension_numbers<[1], [0], [0], [1], [0, 0, 1, 1], [], []>} : vector<8x8xbf16>, vector<8x32xbf16>, vector<8x32xf32> -> vector<8x32xf32>
    %651 = arith.addf %620, %650 : vector<8x32xf32>
    %c1872 = arith.constant 1872 : index
    %c0_294 = arith.constant 0 : index
    %652 = vector.load %arg4[%c1872, %c0_294] : memref<3104x128xbf16, #tpu.memory_space<vmem>>, vector<32x8xbf16>
    %cst_295 = arith.constant dense<0.000000e+00> : vector<8x8xf32>
    %653 = tpu.matmul %555, %652, %cst_295 {dimension_numbers = #tpu.dot_dimension_numbers<[1], [0], [0], [1], [0, 0, 1, 1], [], []>} : vector<8x32xbf16>, vector<32x8xbf16>, vector<8x8xf32> -> vector<8x8xf32>
    %c64_296 = arith.constant 64 : index
    %c0_297 = arith.constant 0 : index
    %654 = vector.load %arg5[%c64_296, %c0_297] : memref<112x128xf32, #tpu.memory_space<vmem>>, vector<1x8xf32>
    %655 = vector.broadcast %654 : vector<1x8xf32> to vector<8x8xf32>
    %656 = arith.addf %653, %655 : vector<8x8xf32>
    %c1904 = arith.constant 1904 : index
    %c0_298 = arith.constant 0 : index
    %657 = vector.load %arg4[%c1904, %c0_298] : memref<3104x128xbf16, #tpu.memory_space<vmem>>, vector<32x8xbf16>
    %cst_299 = arith.constant dense<0.000000e+00> : vector<8x8xf32>
    %658 = tpu.matmul %556, %657, %cst_299 {dimension_numbers = #tpu.dot_dimension_numbers<[1], [0], [0], [1], [0, 0, 1, 1], [], []>} : vector<8x32xbf16>, vector<32x8xbf16>, vector<8x8xf32> -> vector<8x8xf32>
    %c65 = arith.constant 65 : index
    %c0_300 = arith.constant 0 : index
    %659 = vector.load %arg5[%c65, %c0_300] : memref<112x128xf32, #tpu.memory_space<vmem>>, vector<1x8xf32>
    %660 = vector.broadcast %659 : vector<1x8xf32> to vector<8x8xf32>
    %661 = arith.addf %658, %660 : vector<8x8xf32>
    %c1936 = arith.constant 1936 : index
    %c0_301 = arith.constant 0 : index
    %662 = vector.load %arg4[%c1936, %c0_301] : memref<3104x128xbf16, #tpu.memory_space<vmem>>, vector<32x8xbf16>
    %cst_302 = arith.constant dense<0.000000e+00> : vector<8x8xf32>
    %663 = tpu.matmul %556, %662, %cst_302 {dimension_numbers = #tpu.dot_dimension_numbers<[1], [0], [0], [1], [0, 0, 1, 1], [], []>} : vector<8x32xbf16>, vector<32x8xbf16>, vector<8x8xf32> -> vector<8x8xf32>
    %c66 = arith.constant 66 : index
    %c0_303 = arith.constant 0 : index
    %664 = vector.load %arg5[%c66, %c0_303] : memref<112x128xf32, #tpu.memory_space<vmem>>, vector<1x8xf32>
    %665 = vector.broadcast %664 : vector<1x8xf32> to vector<8x8xf32>
    %666 = arith.addf %663, %665 : vector<8x8xf32>
    %cst_304 = arith.constant dense<0.000000e+00> : vector<8x8xf32>
    %667 = tpu.matmul %656, %661, %cst_304 {dimension_numbers = #tpu.dot_dimension_numbers<[1], [1], [0], [0], [0, 0, 1, 0], [], []>} : vector<8x8xf32>, vector<8x8xf32>, vector<8x8xf32> -> vector<8x8xf32>
    %cst_305 = arith.constant dense<0xFF800000> : vector<8xf32>
    %668 = vector.multi_reduction <maximumf>, %667, %cst_305 [1] : vector<8x8xf32> to vector<8xf32>
    %669 = vector.shape_cast %668 : vector<8xf32> to vector<8x1xf32>
    %670 = vector.broadcast %669 : vector<8x1xf32> to vector<8x8xf32>
    %671 = arith.subf %667, %670 : vector<8x8xf32>
    %672 = math.exp %671 : vector<8x8xf32>
    %cst_306 = arith.constant dense<0.000000e+00> : vector<8xf32>
    %673 = vector.multi_reduction <add>, %672, %cst_306 [1] : vector<8x8xf32> to vector<8xf32>
    %674 = vector.shape_cast %673 : vector<8xf32> to vector<8x1xf32>
    %675 = tpu.reciprocal %674 {approx = true} : vector<8x1xf32> -> vector<8x1xf32>
    %676 = vector.broadcast %675 : vector<8x1xf32> to vector<8x8xf32>
    %677 = arith.mulf %672, %676 : vector<8x8xf32>
    %cst_307 = arith.constant dense<0.000000e+00> : vector<8x8xf32>
    %678 = tpu.matmul %677, %666, %cst_307 {dimension_numbers = #tpu.dot_dimension_numbers<[1], [0], [0], [1], [0, 0, 1, 1], [], []>} : vector<8x8xf32>, vector<8x8xf32>, vector<8x8xf32> -> vector<8x8xf32>
    %679 = arith.truncf %678 : vector<8x8xf32> to vector<8x8xbf16>
    %c1968 = arith.constant 1968 : index
    %c0_308 = arith.constant 0 : index
    %680 = vector.load %arg4[%c1968, %c0_308] : memref<3104x128xbf16, #tpu.memory_space<vmem>>, vector<8x32xbf16>
    %cst_309 = arith.constant dense<0.000000e+00> : vector<8x32xf32>
    %681 = tpu.matmul %679, %680, %cst_309 {dimension_numbers = #tpu.dot_dimension_numbers<[1], [0], [0], [1], [0, 0, 1, 1], [], []>} : vector<8x8xbf16>, vector<8x32xbf16>, vector<8x32xf32> -> vector<8x32xf32>
    %682 = arith.addf %651, %681 : vector<8x32xf32>
    %683 = arith.addf %554, %682 : vector<8x32xf32>
    %cst_310 = arith.constant dense<0.000000e+00> : vector<8xf32>
    %684 = vector.multi_reduction <add>, %683, %cst_310 [1] : vector<8x32xf32> to vector<8xf32>
    %685 = vector.shape_cast %684 : vector<8xf32> to vector<8x1xf32>
    %cst_311 = arith.constant 3.200000e+01 : f32
    %686 = vector.broadcast %cst_311 : f32 to vector<8x1xf32>
    %687 = arith.divf %685, %686 : vector<8x1xf32>
    %688 = vector.broadcast %687 : vector<8x1xf32> to vector<8x32xf32>
    %689 = arith.subf %683, %688 : vector<8x32xf32>
    %690 = arith.mulf %689, %689 : vector<8x32xf32>
    %cst_312 = arith.constant dense<0.000000e+00> : vector<8xf32>
    %691 = vector.multi_reduction <add>, %690, %cst_312 [1] : vector<8x32xf32> to vector<8xf32>
    %692 = vector.shape_cast %691 : vector<8xf32> to vector<8x1xf32>
    %cst_313 = arith.constant 3.200000e+01 : f32
    %693 = vector.broadcast %cst_313 : f32 to vector<8x1xf32>
    %694 = arith.divf %692, %693 : vector<8x1xf32>
    %cst_314 = arith.constant 9.99999974E-6 : f32
    %695 = vector.broadcast %cst_314 : f32 to vector<8x1xf32>
    %696 = arith.addf %694, %695 : vector<8x1xf32>
    %697 = math.rsqrt %696 : vector<8x1xf32>
    %698 = vector.broadcast %697 : vector<8x1xf32> to vector<8x32xf32>
    %699 = arith.mulf %689, %698 : vector<8x32xf32>
    %c68 = arith.constant 68 : index
    %c0_315 = arith.constant 0 : index
    %700 = vector.load %arg5[%c68, %c0_315] : memref<112x128xf32, #tpu.memory_space<vmem>>, vector<1x32xf32>
    %701 = vector.broadcast %700 : vector<1x32xf32> to vector<8x32xf32>
    %702 = arith.mulf %699, %701 : vector<8x32xf32>
    %c69 = arith.constant 69 : index
    %c0_316 = arith.constant 0 : index
    %703 = vector.load %arg5[%c69, %c0_316] : memref<112x128xf32, #tpu.memory_space<vmem>>, vector<1x32xf32>
    %704 = vector.broadcast %703 : vector<1x32xf32> to vector<8x32xf32>
    %705 = arith.addf %702, %704 : vector<8x32xf32>
    %706 = arith.truncf %705 : vector<8x32xf32> to vector<8x32xbf16>
    %c1984 = arith.constant 1984 : index
    %c0_317 = arith.constant 0 : index
    %707 = vector.load %arg4[%c1984, %c0_317] : memref<3104x128xbf16, #tpu.memory_space<vmem>>, vector<32x64xbf16>
    %cst_318 = arith.constant dense<0.000000e+00> : vector<8x64xf32>
    %708 = tpu.matmul %706, %707, %cst_318 {dimension_numbers = #tpu.dot_dimension_numbers<[1], [0], [0], [1], [0, 0, 1, 1], [], []>} : vector<8x32xbf16>, vector<32x64xbf16>, vector<8x64xf32> -> vector<8x64xf32>
    %c70 = arith.constant 70 : index
    %c0_319 = arith.constant 0 : index
    %709 = vector.load %arg5[%c70, %c0_319] : memref<112x128xf32, #tpu.memory_space<vmem>>, vector<1x64xf32>
    %710 = vector.broadcast %709 : vector<1x64xf32> to vector<8x64xf32>
    %711 = arith.addf %708, %710 : vector<8x64xf32>
    %cst_320 = arith.constant 0.000000e+00 : f32
    %712 = vector.broadcast %cst_320 : f32 to vector<8x64xf32>
    %713 = arith.maximumf %711, %712 : vector<8x64xf32>
    %714 = arith.truncf %713 : vector<8x64xf32> to vector<8x64xbf16>
    %c2016 = arith.constant 2016 : index
    %c0_321 = arith.constant 0 : index
    %715 = vector.load %arg4[%c2016, %c0_321] : memref<3104x128xbf16, #tpu.memory_space<vmem>>, vector<64x32xbf16>
    %cst_322 = arith.constant dense<0.000000e+00> : vector<8x32xf32>
    %716 = tpu.matmul %714, %715, %cst_322 {dimension_numbers = #tpu.dot_dimension_numbers<[1], [0], [0], [1], [0, 0, 1, 1], [], []>} : vector<8x64xbf16>, vector<64x32xbf16>, vector<8x32xf32> -> vector<8x32xf32>
    %c71 = arith.constant 71 : index
    %c0_323 = arith.constant 0 : index
    %717 = vector.load %arg5[%c71, %c0_323] : memref<112x128xf32, #tpu.memory_space<vmem>>, vector<1x32xf32>
    %718 = vector.broadcast %717 : vector<1x32xf32> to vector<8x32xf32>
    %719 = arith.addf %716, %718 : vector<8x32xf32>
    %720 = arith.addf %705, %719 : vector<8x32xf32>
    %cst_324 = arith.constant dense<0.000000e+00> : vector<8xf32>
    %721 = vector.multi_reduction <add>, %720, %cst_324 [1] : vector<8x32xf32> to vector<8xf32>
    %722 = vector.shape_cast %721 : vector<8xf32> to vector<8x1xf32>
    %cst_325 = arith.constant 3.200000e+01 : f32
    %723 = vector.broadcast %cst_325 : f32 to vector<8x1xf32>
    %724 = arith.divf %722, %723 : vector<8x1xf32>
    %725 = vector.broadcast %724 : vector<8x1xf32> to vector<8x32xf32>
    %726 = arith.subf %720, %725 : vector<8x32xf32>
    %727 = arith.mulf %726, %726 : vector<8x32xf32>
    %cst_326 = arith.constant dense<0.000000e+00> : vector<8xf32>
    %728 = vector.multi_reduction <add>, %727, %cst_326 [1] : vector<8x32xf32> to vector<8xf32>
    %729 = vector.shape_cast %728 : vector<8xf32> to vector<8x1xf32>
    %cst_327 = arith.constant 3.200000e+01 : f32
    %730 = vector.broadcast %cst_327 : f32 to vector<8x1xf32>
    %731 = arith.divf %729, %730 : vector<8x1xf32>
    %cst_328 = arith.constant 9.99999974E-6 : f32
    %732 = vector.broadcast %cst_328 : f32 to vector<8x1xf32>
    %733 = arith.addf %731, %732 : vector<8x1xf32>
    %734 = math.rsqrt %733 : vector<8x1xf32>
    %735 = vector.broadcast %734 : vector<8x1xf32> to vector<8x32xf32>
    %736 = arith.mulf %726, %735 : vector<8x32xf32>
    %c72 = arith.constant 72 : index
    %c0_329 = arith.constant 0 : index
    %737 = vector.load %arg5[%c72, %c0_329] : memref<112x128xf32, #tpu.memory_space<vmem>>, vector<1x32xf32>
    %738 = vector.broadcast %737 : vector<1x32xf32> to vector<8x32xf32>
    %739 = arith.mulf %736, %738 : vector<8x32xf32>
    %c73 = arith.constant 73 : index
    %c0_330 = arith.constant 0 : index
    %740 = vector.load %arg5[%c73, %c0_330] : memref<112x128xf32, #tpu.memory_space<vmem>>, vector<1x32xf32>
    %741 = vector.broadcast %740 : vector<1x32xf32> to vector<8x32xf32>
    %742 = arith.addf %739, %741 : vector<8x32xf32>
    %743 = arith.truncf %742 : vector<8x32xf32> to vector<8x32xbf16>
    %744 = arith.truncf %742 : vector<8x32xf32> to vector<8x32xbf16>
    %c86 = arith.constant 86 : index
    %c0_331 = arith.constant 0 : index
    %745 = vector.load %arg5[%c86, %c0_331] : memref<112x128xf32, #tpu.memory_space<vmem>>, vector<1x32xf32>
    %c2080 = arith.constant 2080 : index
    %c0_332 = arith.constant 0 : index
    %746 = vector.load %arg4[%c2080, %c0_332] : memref<3104x128xbf16, #tpu.memory_space<vmem>>, vector<32x8xbf16>
    %cst_333 = arith.constant dense<0.000000e+00> : vector<8x8xf32>
    %747 = tpu.matmul %743, %746, %cst_333 {dimension_numbers = #tpu.dot_dimension_numbers<[1], [0], [0], [1], [0, 0, 1, 1], [], []>} : vector<8x32xbf16>, vector<32x8xbf16>, vector<8x8xf32> -> vector<8x8xf32>
    %c74 = arith.constant 74 : index
    %c0_334 = arith.constant 0 : index
    %748 = vector.load %arg5[%c74, %c0_334] : memref<112x128xf32, #tpu.memory_space<vmem>>, vector<1x8xf32>
    %749 = vector.broadcast %748 : vector<1x8xf32> to vector<8x8xf32>
    %750 = arith.addf %747, %749 : vector<8x8xf32>
    %c2112 = arith.constant 2112 : index
    %c0_335 = arith.constant 0 : index
    %751 = vector.load %arg4[%c2112, %c0_335] : memref<3104x128xbf16, #tpu.memory_space<vmem>>, vector<32x8xbf16>
    %cst_336 = arith.constant dense<0.000000e+00> : vector<8x8xf32>
    %752 = tpu.matmul %744, %751, %cst_336 {dimension_numbers = #tpu.dot_dimension_numbers<[1], [0], [0], [1], [0, 0, 1, 1], [], []>} : vector<8x32xbf16>, vector<32x8xbf16>, vector<8x8xf32> -> vector<8x8xf32>
    %c75 = arith.constant 75 : index
    %c0_337 = arith.constant 0 : index
    %753 = vector.load %arg5[%c75, %c0_337] : memref<112x128xf32, #tpu.memory_space<vmem>>, vector<1x8xf32>
    %754 = vector.broadcast %753 : vector<1x8xf32> to vector<8x8xf32>
    %755 = arith.addf %752, %754 : vector<8x8xf32>
    %c2144 = arith.constant 2144 : index
    %c0_338 = arith.constant 0 : index
    %756 = vector.load %arg4[%c2144, %c0_338] : memref<3104x128xbf16, #tpu.memory_space<vmem>>, vector<32x8xbf16>
    %cst_339 = arith.constant dense<0.000000e+00> : vector<8x8xf32>
    %757 = tpu.matmul %744, %756, %cst_339 {dimension_numbers = #tpu.dot_dimension_numbers<[1], [0], [0], [1], [0, 0, 1, 1], [], []>} : vector<8x32xbf16>, vector<32x8xbf16>, vector<8x8xf32> -> vector<8x8xf32>
    %c76 = arith.constant 76 : index
    %c0_340 = arith.constant 0 : index
    %758 = vector.load %arg5[%c76, %c0_340] : memref<112x128xf32, #tpu.memory_space<vmem>>, vector<1x8xf32>
    %759 = vector.broadcast %758 : vector<1x8xf32> to vector<8x8xf32>
    %760 = arith.addf %757, %759 : vector<8x8xf32>
    %cst_341 = arith.constant dense<0.000000e+00> : vector<8x8xf32>
    %761 = tpu.matmul %750, %755, %cst_341 {dimension_numbers = #tpu.dot_dimension_numbers<[1], [1], [0], [0], [0, 0, 1, 0], [], []>} : vector<8x8xf32>, vector<8x8xf32>, vector<8x8xf32> -> vector<8x8xf32>
    %cst_342 = arith.constant dense<0xFF800000> : vector<8xf32>
    %762 = vector.multi_reduction <maximumf>, %761, %cst_342 [1] : vector<8x8xf32> to vector<8xf32>
    %763 = vector.shape_cast %762 : vector<8xf32> to vector<8x1xf32>
    %764 = vector.broadcast %763 : vector<8x1xf32> to vector<8x8xf32>
    %765 = arith.subf %761, %764 : vector<8x8xf32>
    %766 = math.exp %765 : vector<8x8xf32>
    %cst_343 = arith.constant dense<0.000000e+00> : vector<8xf32>
    %767 = vector.multi_reduction <add>, %766, %cst_343 [1] : vector<8x8xf32> to vector<8xf32>
    %768 = vector.shape_cast %767 : vector<8xf32> to vector<8x1xf32>
    %769 = tpu.reciprocal %768 {approx = true} : vector<8x1xf32> -> vector<8x1xf32>
    %770 = vector.broadcast %769 : vector<8x1xf32> to vector<8x8xf32>
    %771 = arith.mulf %766, %770 : vector<8x8xf32>
    %cst_344 = arith.constant dense<0.000000e+00> : vector<8x8xf32>
    %772 = tpu.matmul %771, %760, %cst_344 {dimension_numbers = #tpu.dot_dimension_numbers<[1], [0], [0], [1], [0, 0, 1, 1], [], []>} : vector<8x8xf32>, vector<8x8xf32>, vector<8x8xf32> -> vector<8x8xf32>
    %773 = arith.truncf %772 : vector<8x8xf32> to vector<8x8xbf16>
    %c2176 = arith.constant 2176 : index
    %c0_345 = arith.constant 0 : index
    %774 = vector.load %arg4[%c2176, %c0_345] : memref<3104x128xbf16, #tpu.memory_space<vmem>>, vector<8x32xbf16>
    %cst_346 = arith.constant dense<0.000000e+00> : vector<8x32xf32>
    %775 = tpu.matmul %773, %774, %cst_346 {dimension_numbers = #tpu.dot_dimension_numbers<[1], [0], [0], [1], [0, 0, 1, 1], [], []>} : vector<8x8xbf16>, vector<8x32xbf16>, vector<8x32xf32> -> vector<8x32xf32>
    %776 = vector.broadcast %745 : vector<1x32xf32> to vector<8x32xf32>
    %777 = arith.addf %776, %775 : vector<8x32xf32>
    %c2192 = arith.constant 2192 : index
    %c0_347 = arith.constant 0 : index
    %778 = vector.load %arg4[%c2192, %c0_347] : memref<3104x128xbf16, #tpu.memory_space<vmem>>, vector<32x8xbf16>
    %cst_348 = arith.constant dense<0.000000e+00> : vector<8x8xf32>
    %779 = tpu.matmul %743, %778, %cst_348 {dimension_numbers = #tpu.dot_dimension_numbers<[1], [0], [0], [1], [0, 0, 1, 1], [], []>} : vector<8x32xbf16>, vector<32x8xbf16>, vector<8x8xf32> -> vector<8x8xf32>
    %c77 = arith.constant 77 : index
    %c0_349 = arith.constant 0 : index
    %780 = vector.load %arg5[%c77, %c0_349] : memref<112x128xf32, #tpu.memory_space<vmem>>, vector<1x8xf32>
    %781 = vector.broadcast %780 : vector<1x8xf32> to vector<8x8xf32>
    %782 = arith.addf %779, %781 : vector<8x8xf32>
    %c2224 = arith.constant 2224 : index
    %c0_350 = arith.constant 0 : index
    %783 = vector.load %arg4[%c2224, %c0_350] : memref<3104x128xbf16, #tpu.memory_space<vmem>>, vector<32x8xbf16>
    %cst_351 = arith.constant dense<0.000000e+00> : vector<8x8xf32>
    %784 = tpu.matmul %744, %783, %cst_351 {dimension_numbers = #tpu.dot_dimension_numbers<[1], [0], [0], [1], [0, 0, 1, 1], [], []>} : vector<8x32xbf16>, vector<32x8xbf16>, vector<8x8xf32> -> vector<8x8xf32>
    %c78 = arith.constant 78 : index
    %c0_352 = arith.constant 0 : index
    %785 = vector.load %arg5[%c78, %c0_352] : memref<112x128xf32, #tpu.memory_space<vmem>>, vector<1x8xf32>
    %786 = vector.broadcast %785 : vector<1x8xf32> to vector<8x8xf32>
    %787 = arith.addf %784, %786 : vector<8x8xf32>
    %c2256 = arith.constant 2256 : index
    %c0_353 = arith.constant 0 : index
    %788 = vector.load %arg4[%c2256, %c0_353] : memref<3104x128xbf16, #tpu.memory_space<vmem>>, vector<32x8xbf16>
    %cst_354 = arith.constant dense<0.000000e+00> : vector<8x8xf32>
    %789 = tpu.matmul %744, %788, %cst_354 {dimension_numbers = #tpu.dot_dimension_numbers<[1], [0], [0], [1], [0, 0, 1, 1], [], []>} : vector<8x32xbf16>, vector<32x8xbf16>, vector<8x8xf32> -> vector<8x8xf32>
    %c79 = arith.constant 79 : index
    %c0_355 = arith.constant 0 : index
    %790 = vector.load %arg5[%c79, %c0_355] : memref<112x128xf32, #tpu.memory_space<vmem>>, vector<1x8xf32>
    %791 = vector.broadcast %790 : vector<1x8xf32> to vector<8x8xf32>
    %792 = arith.addf %789, %791 : vector<8x8xf32>
    %cst_356 = arith.constant dense<0.000000e+00> : vector<8x8xf32>
    %793 = tpu.matmul %782, %787, %cst_356 {dimension_numbers = #tpu.dot_dimension_numbers<[1], [1], [0], [0], [0, 0, 1, 0], [], []>} : vector<8x8xf32>, vector<8x8xf32>, vector<8x8xf32> -> vector<8x8xf32>
    %cst_357 = arith.constant dense<0xFF800000> : vector<8xf32>
    %794 = vector.multi_reduction <maximumf>, %793, %cst_357 [1] : vector<8x8xf32> to vector<8xf32>
    %795 = vector.shape_cast %794 : vector<8xf32> to vector<8x1xf32>
    %796 = vector.broadcast %795 : vector<8x1xf32> to vector<8x8xf32>
    %797 = arith.subf %793, %796 : vector<8x8xf32>
    %798 = math.exp %797 : vector<8x8xf32>
    %cst_358 = arith.constant dense<0.000000e+00> : vector<8xf32>
    %799 = vector.multi_reduction <add>, %798, %cst_358 [1] : vector<8x8xf32> to vector<8xf32>
    %800 = vector.shape_cast %799 : vector<8xf32> to vector<8x1xf32>
    %801 = tpu.reciprocal %800 {approx = true} : vector<8x1xf32> -> vector<8x1xf32>
    %802 = vector.broadcast %801 : vector<8x1xf32> to vector<8x8xf32>
    %803 = arith.mulf %798, %802 : vector<8x8xf32>
    %cst_359 = arith.constant dense<0.000000e+00> : vector<8x8xf32>
    %804 = tpu.matmul %803, %792, %cst_359 {dimension_numbers = #tpu.dot_dimension_numbers<[1], [0], [0], [1], [0, 0, 1, 1], [], []>} : vector<8x8xf32>, vector<8x8xf32>, vector<8x8xf32> -> vector<8x8xf32>
    %805 = arith.truncf %804 : vector<8x8xf32> to vector<8x8xbf16>
    %c2288 = arith.constant 2288 : index
    %c0_360 = arith.constant 0 : index
    %806 = vector.load %arg4[%c2288, %c0_360] : memref<3104x128xbf16, #tpu.memory_space<vmem>>, vector<8x32xbf16>
    %cst_361 = arith.constant dense<0.000000e+00> : vector<8x32xf32>
    %807 = tpu.matmul %805, %806, %cst_361 {dimension_numbers = #tpu.dot_dimension_numbers<[1], [0], [0], [1], [0, 0, 1, 1], [], []>} : vector<8x8xbf16>, vector<8x32xbf16>, vector<8x32xf32> -> vector<8x32xf32>
    %808 = arith.addf %777, %807 : vector<8x32xf32>
    %c2304 = arith.constant 2304 : index
    %c0_362 = arith.constant 0 : index
    %809 = vector.load %arg4[%c2304, %c0_362] : memref<3104x128xbf16, #tpu.memory_space<vmem>>, vector<32x8xbf16>
    %cst_363 = arith.constant dense<0.000000e+00> : vector<8x8xf32>
    %810 = tpu.matmul %743, %809, %cst_363 {dimension_numbers = #tpu.dot_dimension_numbers<[1], [0], [0], [1], [0, 0, 1, 1], [], []>} : vector<8x32xbf16>, vector<32x8xbf16>, vector<8x8xf32> -> vector<8x8xf32>
    %c80 = arith.constant 80 : index
    %c0_364 = arith.constant 0 : index
    %811 = vector.load %arg5[%c80, %c0_364] : memref<112x128xf32, #tpu.memory_space<vmem>>, vector<1x8xf32>
    %812 = vector.broadcast %811 : vector<1x8xf32> to vector<8x8xf32>
    %813 = arith.addf %810, %812 : vector<8x8xf32>
    %c2336 = arith.constant 2336 : index
    %c0_365 = arith.constant 0 : index
    %814 = vector.load %arg4[%c2336, %c0_365] : memref<3104x128xbf16, #tpu.memory_space<vmem>>, vector<32x8xbf16>
    %cst_366 = arith.constant dense<0.000000e+00> : vector<8x8xf32>
    %815 = tpu.matmul %744, %814, %cst_366 {dimension_numbers = #tpu.dot_dimension_numbers<[1], [0], [0], [1], [0, 0, 1, 1], [], []>} : vector<8x32xbf16>, vector<32x8xbf16>, vector<8x8xf32> -> vector<8x8xf32>
    %c81 = arith.constant 81 : index
    %c0_367 = arith.constant 0 : index
    %816 = vector.load %arg5[%c81, %c0_367] : memref<112x128xf32, #tpu.memory_space<vmem>>, vector<1x8xf32>
    %817 = vector.broadcast %816 : vector<1x8xf32> to vector<8x8xf32>
    %818 = arith.addf %815, %817 : vector<8x8xf32>
    %c2368 = arith.constant 2368 : index
    %c0_368 = arith.constant 0 : index
    %819 = vector.load %arg4[%c2368, %c0_368] : memref<3104x128xbf16, #tpu.memory_space<vmem>>, vector<32x8xbf16>
    %cst_369 = arith.constant dense<0.000000e+00> : vector<8x8xf32>
    %820 = tpu.matmul %744, %819, %cst_369 {dimension_numbers = #tpu.dot_dimension_numbers<[1], [0], [0], [1], [0, 0, 1, 1], [], []>} : vector<8x32xbf16>, vector<32x8xbf16>, vector<8x8xf32> -> vector<8x8xf32>
    %c82 = arith.constant 82 : index
    %c0_370 = arith.constant 0 : index
    %821 = vector.load %arg5[%c82, %c0_370] : memref<112x128xf32, #tpu.memory_space<vmem>>, vector<1x8xf32>
    %822 = vector.broadcast %821 : vector<1x8xf32> to vector<8x8xf32>
    %823 = arith.addf %820, %822 : vector<8x8xf32>
    %cst_371 = arith.constant dense<0.000000e+00> : vector<8x8xf32>
    %824 = tpu.matmul %813, %818, %cst_371 {dimension_numbers = #tpu.dot_dimension_numbers<[1], [1], [0], [0], [0, 0, 1, 0], [], []>} : vector<8x8xf32>, vector<8x8xf32>, vector<8x8xf32> -> vector<8x8xf32>
    %cst_372 = arith.constant dense<0xFF800000> : vector<8xf32>
    %825 = vector.multi_reduction <maximumf>, %824, %cst_372 [1] : vector<8x8xf32> to vector<8xf32>
    %826 = vector.shape_cast %825 : vector<8xf32> to vector<8x1xf32>
    %827 = vector.broadcast %826 : vector<8x1xf32> to vector<8x8xf32>
    %828 = arith.subf %824, %827 : vector<8x8xf32>
    %829 = math.exp %828 : vector<8x8xf32>
    %cst_373 = arith.constant dense<0.000000e+00> : vector<8xf32>
    %830 = vector.multi_reduction <add>, %829, %cst_373 [1] : vector<8x8xf32> to vector<8xf32>
    %831 = vector.shape_cast %830 : vector<8xf32> to vector<8x1xf32>
    %832 = tpu.reciprocal %831 {approx = true} : vector<8x1xf32> -> vector<8x1xf32>
    %833 = vector.broadcast %832 : vector<8x1xf32> to vector<8x8xf32>
    %834 = arith.mulf %829, %833 : vector<8x8xf32>
    %cst_374 = arith.constant dense<0.000000e+00> : vector<8x8xf32>
    %835 = tpu.matmul %834, %823, %cst_374 {dimension_numbers = #tpu.dot_dimension_numbers<[1], [0], [0], [1], [0, 0, 1, 1], [], []>} : vector<8x8xf32>, vector<8x8xf32>, vector<8x8xf32> -> vector<8x8xf32>
    %836 = arith.truncf %835 : vector<8x8xf32> to vector<8x8xbf16>
    %c2400 = arith.constant 2400 : index
    %c0_375 = arith.constant 0 : index
    %837 = vector.load %arg4[%c2400, %c0_375] : memref<3104x128xbf16, #tpu.memory_space<vmem>>, vector<8x32xbf16>
    %cst_376 = arith.constant dense<0.000000e+00> : vector<8x32xf32>
    %838 = tpu.matmul %836, %837, %cst_376 {dimension_numbers = #tpu.dot_dimension_numbers<[1], [0], [0], [1], [0, 0, 1, 1], [], []>} : vector<8x8xbf16>, vector<8x32xbf16>, vector<8x32xf32> -> vector<8x32xf32>
    %839 = arith.addf %808, %838 : vector<8x32xf32>
    %c2416 = arith.constant 2416 : index
    %c0_377 = arith.constant 0 : index
    %840 = vector.load %arg4[%c2416, %c0_377] : memref<3104x128xbf16, #tpu.memory_space<vmem>>, vector<32x8xbf16>
    %cst_378 = arith.constant dense<0.000000e+00> : vector<8x8xf32>
    %841 = tpu.matmul %743, %840, %cst_378 {dimension_numbers = #tpu.dot_dimension_numbers<[1], [0], [0], [1], [0, 0, 1, 1], [], []>} : vector<8x32xbf16>, vector<32x8xbf16>, vector<8x8xf32> -> vector<8x8xf32>
    %c83 = arith.constant 83 : index
    %c0_379 = arith.constant 0 : index
    %842 = vector.load %arg5[%c83, %c0_379] : memref<112x128xf32, #tpu.memory_space<vmem>>, vector<1x8xf32>
    %843 = vector.broadcast %842 : vector<1x8xf32> to vector<8x8xf32>
    %844 = arith.addf %841, %843 : vector<8x8xf32>
    %c2448 = arith.constant 2448 : index
    %c0_380 = arith.constant 0 : index
    %845 = vector.load %arg4[%c2448, %c0_380] : memref<3104x128xbf16, #tpu.memory_space<vmem>>, vector<32x8xbf16>
    %cst_381 = arith.constant dense<0.000000e+00> : vector<8x8xf32>
    %846 = tpu.matmul %744, %845, %cst_381 {dimension_numbers = #tpu.dot_dimension_numbers<[1], [0], [0], [1], [0, 0, 1, 1], [], []>} : vector<8x32xbf16>, vector<32x8xbf16>, vector<8x8xf32> -> vector<8x8xf32>
    %c84 = arith.constant 84 : index
    %c0_382 = arith.constant 0 : index
    %847 = vector.load %arg5[%c84, %c0_382] : memref<112x128xf32, #tpu.memory_space<vmem>>, vector<1x8xf32>
    %848 = vector.broadcast %847 : vector<1x8xf32> to vector<8x8xf32>
    %849 = arith.addf %846, %848 : vector<8x8xf32>
    %c2480 = arith.constant 2480 : index
    %c0_383 = arith.constant 0 : index
    %850 = vector.load %arg4[%c2480, %c0_383] : memref<3104x128xbf16, #tpu.memory_space<vmem>>, vector<32x8xbf16>
    %cst_384 = arith.constant dense<0.000000e+00> : vector<8x8xf32>
    %851 = tpu.matmul %744, %850, %cst_384 {dimension_numbers = #tpu.dot_dimension_numbers<[1], [0], [0], [1], [0, 0, 1, 1], [], []>} : vector<8x32xbf16>, vector<32x8xbf16>, vector<8x8xf32> -> vector<8x8xf32>
    %c85 = arith.constant 85 : index
    %c0_385 = arith.constant 0 : index
    %852 = vector.load %arg5[%c85, %c0_385] : memref<112x128xf32, #tpu.memory_space<vmem>>, vector<1x8xf32>
    %853 = vector.broadcast %852 : vector<1x8xf32> to vector<8x8xf32>
    %854 = arith.addf %851, %853 : vector<8x8xf32>
    %cst_386 = arith.constant dense<0.000000e+00> : vector<8x8xf32>
    %855 = tpu.matmul %844, %849, %cst_386 {dimension_numbers = #tpu.dot_dimension_numbers<[1], [1], [0], [0], [0, 0, 1, 0], [], []>} : vector<8x8xf32>, vector<8x8xf32>, vector<8x8xf32> -> vector<8x8xf32>
    %cst_387 = arith.constant dense<0xFF800000> : vector<8xf32>
    %856 = vector.multi_reduction <maximumf>, %855, %cst_387 [1] : vector<8x8xf32> to vector<8xf32>
    %857 = vector.shape_cast %856 : vector<8xf32> to vector<8x1xf32>
    %858 = vector.broadcast %857 : vector<8x1xf32> to vector<8x8xf32>
    %859 = arith.subf %855, %858 : vector<8x8xf32>
    %860 = math.exp %859 : vector<8x8xf32>
    %cst_388 = arith.constant dense<0.000000e+00> : vector<8xf32>
    %861 = vector.multi_reduction <add>, %860, %cst_388 [1] : vector<8x8xf32> to vector<8xf32>
    %862 = vector.shape_cast %861 : vector<8xf32> to vector<8x1xf32>
    %863 = tpu.reciprocal %862 {approx = true} : vector<8x1xf32> -> vector<8x1xf32>
    %864 = vector.broadcast %863 : vector<8x1xf32> to vector<8x8xf32>
    %865 = arith.mulf %860, %864 : vector<8x8xf32>
    %cst_389 = arith.constant dense<0.000000e+00> : vector<8x8xf32>
    %866 = tpu.matmul %865, %854, %cst_389 {dimension_numbers = #tpu.dot_dimension_numbers<[1], [0], [0], [1], [0, 0, 1, 1], [], []>} : vector<8x8xf32>, vector<8x8xf32>, vector<8x8xf32> -> vector<8x8xf32>
    %867 = arith.truncf %866 : vector<8x8xf32> to vector<8x8xbf16>
    %c2512 = arith.constant 2512 : index
    %c0_390 = arith.constant 0 : index
    %868 = vector.load %arg4[%c2512, %c0_390] : memref<3104x128xbf16, #tpu.memory_space<vmem>>, vector<8x32xbf16>
    %cst_391 = arith.constant dense<0.000000e+00> : vector<8x32xf32>
    %869 = tpu.matmul %867, %868, %cst_391 {dimension_numbers = #tpu.dot_dimension_numbers<[1], [0], [0], [1], [0, 0, 1, 1], [], []>} : vector<8x8xbf16>, vector<8x32xbf16>, vector<8x32xf32> -> vector<8x32xf32>
    %870 = arith.addf %839, %869 : vector<8x32xf32>
    %871 = arith.addf %742, %870 : vector<8x32xf32>
    %cst_392 = arith.constant dense<0.000000e+00> : vector<8xf32>
    %872 = vector.multi_reduction <add>, %871, %cst_392 [1] : vector<8x32xf32> to vector<8xf32>
    %873 = vector.shape_cast %872 : vector<8xf32> to vector<8x1xf32>
    %cst_393 = arith.constant 3.200000e+01 : f32
    %874 = vector.broadcast %cst_393 : f32 to vector<8x1xf32>
    %875 = arith.divf %873, %874 : vector<8x1xf32>
    %876 = vector.broadcast %875 : vector<8x1xf32> to vector<8x32xf32>
    %877 = arith.subf %871, %876 : vector<8x32xf32>
    %878 = arith.mulf %877, %877 : vector<8x32xf32>
    %cst_394 = arith.constant dense<0.000000e+00> : vector<8xf32>
    %879 = vector.multi_reduction <add>, %878, %cst_394 [1] : vector<8x32xf32> to vector<8xf32>
    %880 = vector.shape_cast %879 : vector<8xf32> to vector<8x1xf32>
    %cst_395 = arith.constant 3.200000e+01 : f32
    %881 = vector.broadcast %cst_395 : f32 to vector<8x1xf32>
    %882 = arith.divf %880, %881 : vector<8x1xf32>
    %cst_396 = arith.constant 9.99999974E-6 : f32
    %883 = vector.broadcast %cst_396 : f32 to vector<8x1xf32>
    %884 = arith.addf %882, %883 : vector<8x1xf32>
    %885 = math.rsqrt %884 : vector<8x1xf32>
    %886 = vector.broadcast %885 : vector<8x1xf32> to vector<8x32xf32>
    %887 = arith.mulf %877, %886 : vector<8x32xf32>
    %c87 = arith.constant 87 : index
    %c0_397 = arith.constant 0 : index
    %888 = vector.load %arg5[%c87, %c0_397] : memref<112x128xf32, #tpu.memory_space<vmem>>, vector<1x32xf32>
    %889 = vector.broadcast %888 : vector<1x32xf32> to vector<8x32xf32>
    %890 = arith.mulf %887, %889 : vector<8x32xf32>
    %c88 = arith.constant 88 : index
    %c0_398 = arith.constant 0 : index
    %891 = vector.load %arg5[%c88, %c0_398] : memref<112x128xf32, #tpu.memory_space<vmem>>, vector<1x32xf32>
    %892 = vector.broadcast %891 : vector<1x32xf32> to vector<8x32xf32>
    %893 = arith.addf %890, %892 : vector<8x32xf32>
    %894 = arith.truncf %893 : vector<8x32xf32> to vector<8x32xbf16>
    %895 = arith.truncf %401 : vector<8x32xf32> to vector<8x32xbf16>
    %c101 = arith.constant 101 : index
    %c0_399 = arith.constant 0 : index
    %896 = vector.load %arg5[%c101, %c0_399] : memref<112x128xf32, #tpu.memory_space<vmem>>, vector<1x32xf32>
    %c2528 = arith.constant 2528 : index
    %c0_400 = arith.constant 0 : index
    %897 = vector.load %arg4[%c2528, %c0_400] : memref<3104x128xbf16, #tpu.memory_space<vmem>>, vector<32x8xbf16>
    %cst_401 = arith.constant dense<0.000000e+00> : vector<8x8xf32>
    %898 = tpu.matmul %894, %897, %cst_401 {dimension_numbers = #tpu.dot_dimension_numbers<[1], [0], [0], [1], [0, 0, 1, 1], [], []>} : vector<8x32xbf16>, vector<32x8xbf16>, vector<8x8xf32> -> vector<8x8xf32>
    %c89 = arith.constant 89 : index
    %c0_402 = arith.constant 0 : index
    %899 = vector.load %arg5[%c89, %c0_402] : memref<112x128xf32, #tpu.memory_space<vmem>>, vector<1x8xf32>
    %900 = vector.broadcast %899 : vector<1x8xf32> to vector<8x8xf32>
    %901 = arith.addf %898, %900 : vector<8x8xf32>
    %c2560 = arith.constant 2560 : index
    %c0_403 = arith.constant 0 : index
    %902 = vector.load %arg4[%c2560, %c0_403] : memref<3104x128xbf16, #tpu.memory_space<vmem>>, vector<32x8xbf16>
    %cst_404 = arith.constant dense<0.000000e+00> : vector<8x8xf32>
    %903 = tpu.matmul %895, %902, %cst_404 {dimension_numbers = #tpu.dot_dimension_numbers<[1], [0], [0], [1], [0, 0, 1, 1], [], []>} : vector<8x32xbf16>, vector<32x8xbf16>, vector<8x8xf32> -> vector<8x8xf32>
    %c90 = arith.constant 90 : index
    %c0_405 = arith.constant 0 : index
    %904 = vector.load %arg5[%c90, %c0_405] : memref<112x128xf32, #tpu.memory_space<vmem>>, vector<1x8xf32>
    %905 = vector.broadcast %904 : vector<1x8xf32> to vector<8x8xf32>
    %906 = arith.addf %903, %905 : vector<8x8xf32>
    %c2592 = arith.constant 2592 : index
    %c0_406 = arith.constant 0 : index
    %907 = vector.load %arg4[%c2592, %c0_406] : memref<3104x128xbf16, #tpu.memory_space<vmem>>, vector<32x8xbf16>
    %cst_407 = arith.constant dense<0.000000e+00> : vector<8x8xf32>
    %908 = tpu.matmul %895, %907, %cst_407 {dimension_numbers = #tpu.dot_dimension_numbers<[1], [0], [0], [1], [0, 0, 1, 1], [], []>} : vector<8x32xbf16>, vector<32x8xbf16>, vector<8x8xf32> -> vector<8x8xf32>
    %c91 = arith.constant 91 : index
    %c0_408 = arith.constant 0 : index
    %909 = vector.load %arg5[%c91, %c0_408] : memref<112x128xf32, #tpu.memory_space<vmem>>, vector<1x8xf32>
    %910 = vector.broadcast %909 : vector<1x8xf32> to vector<8x8xf32>
    %911 = arith.addf %908, %910 : vector<8x8xf32>
    %cst_409 = arith.constant dense<0.000000e+00> : vector<8x8xf32>
    %912 = tpu.matmul %901, %906, %cst_409 {dimension_numbers = #tpu.dot_dimension_numbers<[1], [1], [0], [0], [0, 0, 1, 0], [], []>} : vector<8x8xf32>, vector<8x8xf32>, vector<8x8xf32> -> vector<8x8xf32>
    %cst_410 = arith.constant dense<0xFF800000> : vector<8xf32>
    %913 = vector.multi_reduction <maximumf>, %912, %cst_410 [1] : vector<8x8xf32> to vector<8xf32>
    %914 = vector.shape_cast %913 : vector<8xf32> to vector<8x1xf32>
    %915 = vector.broadcast %914 : vector<8x1xf32> to vector<8x8xf32>
    %916 = arith.subf %912, %915 : vector<8x8xf32>
    %917 = math.exp %916 : vector<8x8xf32>
    %cst_411 = arith.constant dense<0.000000e+00> : vector<8xf32>
    %918 = vector.multi_reduction <add>, %917, %cst_411 [1] : vector<8x8xf32> to vector<8xf32>
    %919 = vector.shape_cast %918 : vector<8xf32> to vector<8x1xf32>
    %920 = tpu.reciprocal %919 {approx = true} : vector<8x1xf32> -> vector<8x1xf32>
    %921 = vector.broadcast %920 : vector<8x1xf32> to vector<8x8xf32>
    %922 = arith.mulf %917, %921 : vector<8x8xf32>
    %cst_412 = arith.constant dense<0.000000e+00> : vector<8x8xf32>
    %923 = tpu.matmul %922, %911, %cst_412 {dimension_numbers = #tpu.dot_dimension_numbers<[1], [0], [0], [1], [0, 0, 1, 1], [], []>} : vector<8x8xf32>, vector<8x8xf32>, vector<8x8xf32> -> vector<8x8xf32>
    %924 = arith.truncf %923 : vector<8x8xf32> to vector<8x8xbf16>
    %c2624 = arith.constant 2624 : index
    %c0_413 = arith.constant 0 : index
    %925 = vector.load %arg4[%c2624, %c0_413] : memref<3104x128xbf16, #tpu.memory_space<vmem>>, vector<8x32xbf16>
    %cst_414 = arith.constant dense<0.000000e+00> : vector<8x32xf32>
    %926 = tpu.matmul %924, %925, %cst_414 {dimension_numbers = #tpu.dot_dimension_numbers<[1], [0], [0], [1], [0, 0, 1, 1], [], []>} : vector<8x8xbf16>, vector<8x32xbf16>, vector<8x32xf32> -> vector<8x32xf32>
    %927 = vector.broadcast %896 : vector<1x32xf32> to vector<8x32xf32>
    %928 = arith.addf %927, %926 : vector<8x32xf32>
    %c2640 = arith.constant 2640 : index
    %c0_415 = arith.constant 0 : index
    %929 = vector.load %arg4[%c2640, %c0_415] : memref<3104x128xbf16, #tpu.memory_space<vmem>>, vector<32x8xbf16>
    %cst_416 = arith.constant dense<0.000000e+00> : vector<8x8xf32>
    %930 = tpu.matmul %894, %929, %cst_416 {dimension_numbers = #tpu.dot_dimension_numbers<[1], [0], [0], [1], [0, 0, 1, 1], [], []>} : vector<8x32xbf16>, vector<32x8xbf16>, vector<8x8xf32> -> vector<8x8xf32>
    %c92 = arith.constant 92 : index
    %c0_417 = arith.constant 0 : index
    %931 = vector.load %arg5[%c92, %c0_417] : memref<112x128xf32, #tpu.memory_space<vmem>>, vector<1x8xf32>
    %932 = vector.broadcast %931 : vector<1x8xf32> to vector<8x8xf32>
    %933 = arith.addf %930, %932 : vector<8x8xf32>
    %c2672 = arith.constant 2672 : index
    %c0_418 = arith.constant 0 : index
    %934 = vector.load %arg4[%c2672, %c0_418] : memref<3104x128xbf16, #tpu.memory_space<vmem>>, vector<32x8xbf16>
    %cst_419 = arith.constant dense<0.000000e+00> : vector<8x8xf32>
    %935 = tpu.matmul %895, %934, %cst_419 {dimension_numbers = #tpu.dot_dimension_numbers<[1], [0], [0], [1], [0, 0, 1, 1], [], []>} : vector<8x32xbf16>, vector<32x8xbf16>, vector<8x8xf32> -> vector<8x8xf32>
    %c93 = arith.constant 93 : index
    %c0_420 = arith.constant 0 : index
    %936 = vector.load %arg5[%c93, %c0_420] : memref<112x128xf32, #tpu.memory_space<vmem>>, vector<1x8xf32>
    %937 = vector.broadcast %936 : vector<1x8xf32> to vector<8x8xf32>
    %938 = arith.addf %935, %937 : vector<8x8xf32>
    %c2704 = arith.constant 2704 : index
    %c0_421 = arith.constant 0 : index
    %939 = vector.load %arg4[%c2704, %c0_421] : memref<3104x128xbf16, #tpu.memory_space<vmem>>, vector<32x8xbf16>
    %cst_422 = arith.constant dense<0.000000e+00> : vector<8x8xf32>
    %940 = tpu.matmul %895, %939, %cst_422 {dimension_numbers = #tpu.dot_dimension_numbers<[1], [0], [0], [1], [0, 0, 1, 1], [], []>} : vector<8x32xbf16>, vector<32x8xbf16>, vector<8x8xf32> -> vector<8x8xf32>
    %c94 = arith.constant 94 : index
    %c0_423 = arith.constant 0 : index
    %941 = vector.load %arg5[%c94, %c0_423] : memref<112x128xf32, #tpu.memory_space<vmem>>, vector<1x8xf32>
    %942 = vector.broadcast %941 : vector<1x8xf32> to vector<8x8xf32>
    %943 = arith.addf %940, %942 : vector<8x8xf32>
    %cst_424 = arith.constant dense<0.000000e+00> : vector<8x8xf32>
    %944 = tpu.matmul %933, %938, %cst_424 {dimension_numbers = #tpu.dot_dimension_numbers<[1], [1], [0], [0], [0, 0, 1, 0], [], []>} : vector<8x8xf32>, vector<8x8xf32>, vector<8x8xf32> -> vector<8x8xf32>
    %cst_425 = arith.constant dense<0xFF800000> : vector<8xf32>
    %945 = vector.multi_reduction <maximumf>, %944, %cst_425 [1] : vector<8x8xf32> to vector<8xf32>
    %946 = vector.shape_cast %945 : vector<8xf32> to vector<8x1xf32>
    %947 = vector.broadcast %946 : vector<8x1xf32> to vector<8x8xf32>
    %948 = arith.subf %944, %947 : vector<8x8xf32>
    %949 = math.exp %948 : vector<8x8xf32>
    %cst_426 = arith.constant dense<0.000000e+00> : vector<8xf32>
    %950 = vector.multi_reduction <add>, %949, %cst_426 [1] : vector<8x8xf32> to vector<8xf32>
    %951 = vector.shape_cast %950 : vector<8xf32> to vector<8x1xf32>
    %952 = tpu.reciprocal %951 {approx = true} : vector<8x1xf32> -> vector<8x1xf32>
    %953 = vector.broadcast %952 : vector<8x1xf32> to vector<8x8xf32>
    %954 = arith.mulf %949, %953 : vector<8x8xf32>
    %cst_427 = arith.constant dense<0.000000e+00> : vector<8x8xf32>
    %955 = tpu.matmul %954, %943, %cst_427 {dimension_numbers = #tpu.dot_dimension_numbers<[1], [0], [0], [1], [0, 0, 1, 1], [], []>} : vector<8x8xf32>, vector<8x8xf32>, vector<8x8xf32> -> vector<8x8xf32>
    %956 = arith.truncf %955 : vector<8x8xf32> to vector<8x8xbf16>
    %c2736 = arith.constant 2736 : index
    %c0_428 = arith.constant 0 : index
    %957 = vector.load %arg4[%c2736, %c0_428] : memref<3104x128xbf16, #tpu.memory_space<vmem>>, vector<8x32xbf16>
    %cst_429 = arith.constant dense<0.000000e+00> : vector<8x32xf32>
    %958 = tpu.matmul %956, %957, %cst_429 {dimension_numbers = #tpu.dot_dimension_numbers<[1], [0], [0], [1], [0, 0, 1, 1], [], []>} : vector<8x8xbf16>, vector<8x32xbf16>, vector<8x32xf32> -> vector<8x32xf32>
    %959 = arith.addf %928, %958 : vector<8x32xf32>
    %c2752 = arith.constant 2752 : index
    %c0_430 = arith.constant 0 : index
    %960 = vector.load %arg4[%c2752, %c0_430] : memref<3104x128xbf16, #tpu.memory_space<vmem>>, vector<32x8xbf16>
    %cst_431 = arith.constant dense<0.000000e+00> : vector<8x8xf32>
    %961 = tpu.matmul %894, %960, %cst_431 {dimension_numbers = #tpu.dot_dimension_numbers<[1], [0], [0], [1], [0, 0, 1, 1], [], []>} : vector<8x32xbf16>, vector<32x8xbf16>, vector<8x8xf32> -> vector<8x8xf32>
    %c95 = arith.constant 95 : index
    %c0_432 = arith.constant 0 : index
    %962 = vector.load %arg5[%c95, %c0_432] : memref<112x128xf32, #tpu.memory_space<vmem>>, vector<1x8xf32>
    %963 = vector.broadcast %962 : vector<1x8xf32> to vector<8x8xf32>
    %964 = arith.addf %961, %963 : vector<8x8xf32>
    %c2784 = arith.constant 2784 : index
    %c0_433 = arith.constant 0 : index
    %965 = vector.load %arg4[%c2784, %c0_433] : memref<3104x128xbf16, #tpu.memory_space<vmem>>, vector<32x8xbf16>
    %cst_434 = arith.constant dense<0.000000e+00> : vector<8x8xf32>
    %966 = tpu.matmul %895, %965, %cst_434 {dimension_numbers = #tpu.dot_dimension_numbers<[1], [0], [0], [1], [0, 0, 1, 1], [], []>} : vector<8x32xbf16>, vector<32x8xbf16>, vector<8x8xf32> -> vector<8x8xf32>
    %c96_435 = arith.constant 96 : index
    %c0_436 = arith.constant 0 : index
    %967 = vector.load %arg5[%c96_435, %c0_436] : memref<112x128xf32, #tpu.memory_space<vmem>>, vector<1x8xf32>
    %968 = vector.broadcast %967 : vector<1x8xf32> to vector<8x8xf32>
    %969 = arith.addf %966, %968 : vector<8x8xf32>
    %c2816 = arith.constant 2816 : index
    %c0_437 = arith.constant 0 : index
    %970 = vector.load %arg4[%c2816, %c0_437] : memref<3104x128xbf16, #tpu.memory_space<vmem>>, vector<32x8xbf16>
    %cst_438 = arith.constant dense<0.000000e+00> : vector<8x8xf32>
    %971 = tpu.matmul %895, %970, %cst_438 {dimension_numbers = #tpu.dot_dimension_numbers<[1], [0], [0], [1], [0, 0, 1, 1], [], []>} : vector<8x32xbf16>, vector<32x8xbf16>, vector<8x8xf32> -> vector<8x8xf32>
    %c97 = arith.constant 97 : index
    %c0_439 = arith.constant 0 : index
    %972 = vector.load %arg5[%c97, %c0_439] : memref<112x128xf32, #tpu.memory_space<vmem>>, vector<1x8xf32>
    %973 = vector.broadcast %972 : vector<1x8xf32> to vector<8x8xf32>
    %974 = arith.addf %971, %973 : vector<8x8xf32>
    %cst_440 = arith.constant dense<0.000000e+00> : vector<8x8xf32>
    %975 = tpu.matmul %964, %969, %cst_440 {dimension_numbers = #tpu.dot_dimension_numbers<[1], [1], [0], [0], [0, 0, 1, 0], [], []>} : vector<8x8xf32>, vector<8x8xf32>, vector<8x8xf32> -> vector<8x8xf32>
    %cst_441 = arith.constant dense<0xFF800000> : vector<8xf32>
    %976 = vector.multi_reduction <maximumf>, %975, %cst_441 [1] : vector<8x8xf32> to vector<8xf32>
    %977 = vector.shape_cast %976 : vector<8xf32> to vector<8x1xf32>
    %978 = vector.broadcast %977 : vector<8x1xf32> to vector<8x8xf32>
    %979 = arith.subf %975, %978 : vector<8x8xf32>
    %980 = math.exp %979 : vector<8x8xf32>
    %cst_442 = arith.constant dense<0.000000e+00> : vector<8xf32>
    %981 = vector.multi_reduction <add>, %980, %cst_442 [1] : vector<8x8xf32> to vector<8xf32>
    %982 = vector.shape_cast %981 : vector<8xf32> to vector<8x1xf32>
    %983 = tpu.reciprocal %982 {approx = true} : vector<8x1xf32> -> vector<8x1xf32>
    %984 = vector.broadcast %983 : vector<8x1xf32> to vector<8x8xf32>
    %985 = arith.mulf %980, %984 : vector<8x8xf32>
    %cst_443 = arith.constant dense<0.000000e+00> : vector<8x8xf32>
    %986 = tpu.matmul %985, %974, %cst_443 {dimension_numbers = #tpu.dot_dimension_numbers<[1], [0], [0], [1], [0, 0, 1, 1], [], []>} : vector<8x8xf32>, vector<8x8xf32>, vector<8x8xf32> -> vector<8x8xf32>
    %987 = arith.truncf %986 : vector<8x8xf32> to vector<8x8xbf16>
    %c2848 = arith.constant 2848 : index
    %c0_444 = arith.constant 0 : index
    %988 = vector.load %arg4[%c2848, %c0_444] : memref<3104x128xbf16, #tpu.memory_space<vmem>>, vector<8x32xbf16>
    %cst_445 = arith.constant dense<0.000000e+00> : vector<8x32xf32>
    %989 = tpu.matmul %987, %988, %cst_445 {dimension_numbers = #tpu.dot_dimension_numbers<[1], [0], [0], [1], [0, 0, 1, 1], [], []>} : vector<8x8xbf16>, vector<8x32xbf16>, vector<8x32xf32> -> vector<8x32xf32>
    %990 = arith.addf %959, %989 : vector<8x32xf32>
    %c2864 = arith.constant 2864 : index
    %c0_446 = arith.constant 0 : index
    %991 = vector.load %arg4[%c2864, %c0_446] : memref<3104x128xbf16, #tpu.memory_space<vmem>>, vector<32x8xbf16>
    %cst_447 = arith.constant dense<0.000000e+00> : vector<8x8xf32>
    %992 = tpu.matmul %894, %991, %cst_447 {dimension_numbers = #tpu.dot_dimension_numbers<[1], [0], [0], [1], [0, 0, 1, 1], [], []>} : vector<8x32xbf16>, vector<32x8xbf16>, vector<8x8xf32> -> vector<8x8xf32>
    %c98 = arith.constant 98 : index
    %c0_448 = arith.constant 0 : index
    %993 = vector.load %arg5[%c98, %c0_448] : memref<112x128xf32, #tpu.memory_space<vmem>>, vector<1x8xf32>
    %994 = vector.broadcast %993 : vector<1x8xf32> to vector<8x8xf32>
    %995 = arith.addf %992, %994 : vector<8x8xf32>
    %c2896 = arith.constant 2896 : index
    %c0_449 = arith.constant 0 : index
    %996 = vector.load %arg4[%c2896, %c0_449] : memref<3104x128xbf16, #tpu.memory_space<vmem>>, vector<32x8xbf16>
    %cst_450 = arith.constant dense<0.000000e+00> : vector<8x8xf32>
    %997 = tpu.matmul %895, %996, %cst_450 {dimension_numbers = #tpu.dot_dimension_numbers<[1], [0], [0], [1], [0, 0, 1, 1], [], []>} : vector<8x32xbf16>, vector<32x8xbf16>, vector<8x8xf32> -> vector<8x8xf32>
    %c99 = arith.constant 99 : index
    %c0_451 = arith.constant 0 : index
    %998 = vector.load %arg5[%c99, %c0_451] : memref<112x128xf32, #tpu.memory_space<vmem>>, vector<1x8xf32>
    %999 = vector.broadcast %998 : vector<1x8xf32> to vector<8x8xf32>
    %1000 = arith.addf %997, %999 : vector<8x8xf32>
    %c2928 = arith.constant 2928 : index
    %c0_452 = arith.constant 0 : index
    %1001 = vector.load %arg4[%c2928, %c0_452] : memref<3104x128xbf16, #tpu.memory_space<vmem>>, vector<32x8xbf16>
    %cst_453 = arith.constant dense<0.000000e+00> : vector<8x8xf32>
    %1002 = tpu.matmul %895, %1001, %cst_453 {dimension_numbers = #tpu.dot_dimension_numbers<[1], [0], [0], [1], [0, 0, 1, 1], [], []>} : vector<8x32xbf16>, vector<32x8xbf16>, vector<8x8xf32> -> vector<8x8xf32>
    %c100 = arith.constant 100 : index
    %c0_454 = arith.constant 0 : index
    %1003 = vector.load %arg5[%c100, %c0_454] : memref<112x128xf32, #tpu.memory_space<vmem>>, vector<1x8xf32>
    %1004 = vector.broadcast %1003 : vector<1x8xf32> to vector<8x8xf32>
    %1005 = arith.addf %1002, %1004 : vector<8x8xf32>
    %cst_455 = arith.constant dense<0.000000e+00> : vector<8x8xf32>
    %1006 = tpu.matmul %995, %1000, %cst_455 {dimension_numbers = #tpu.dot_dimension_numbers<[1], [1], [0], [0], [0, 0, 1, 0], [], []>} : vector<8x8xf32>, vector<8x8xf32>, vector<8x8xf32> -> vector<8x8xf32>
    %cst_456 = arith.constant dense<0xFF800000> : vector<8xf32>
    %1007 = vector.multi_reduction <maximumf>, %1006, %cst_456 [1] : vector<8x8xf32> to vector<8xf32>
    %1008 = vector.shape_cast %1007 : vector<8xf32> to vector<8x1xf32>
    %1009 = vector.broadcast %1008 : vector<8x1xf32> to vector<8x8xf32>
    %1010 = arith.subf %1006, %1009 : vector<8x8xf32>
    %1011 = math.exp %1010 : vector<8x8xf32>
    %cst_457 = arith.constant dense<0.000000e+00> : vector<8xf32>
    %1012 = vector.multi_reduction <add>, %1011, %cst_457 [1] : vector<8x8xf32> to vector<8xf32>
    %1013 = vector.shape_cast %1012 : vector<8xf32> to vector<8x1xf32>
    %1014 = tpu.reciprocal %1013 {approx = true} : vector<8x1xf32> -> vector<8x1xf32>
    %1015 = vector.broadcast %1014 : vector<8x1xf32> to vector<8x8xf32>
    %1016 = arith.mulf %1011, %1015 : vector<8x8xf32>
    %cst_458 = arith.constant dense<0.000000e+00> : vector<8x8xf32>
    %1017 = tpu.matmul %1016, %1005, %cst_458 {dimension_numbers = #tpu.dot_dimension_numbers<[1], [0], [0], [1], [0, 0, 1, 1], [], []>} : vector<8x8xf32>, vector<8x8xf32>, vector<8x8xf32> -> vector<8x8xf32>
    %1018 = arith.truncf %1017 : vector<8x8xf32> to vector<8x8xbf16>
    %c2960 = arith.constant 2960 : index
    %c0_459 = arith.constant 0 : index
    %1019 = vector.load %arg4[%c2960, %c0_459] : memref<3104x128xbf16, #tpu.memory_space<vmem>>, vector<8x32xbf16>
    %cst_460 = arith.constant dense<0.000000e+00> : vector<8x32xf32>
    %1020 = tpu.matmul %1018, %1019, %cst_460 {dimension_numbers = #tpu.dot_dimension_numbers<[1], [0], [0], [1], [0, 0, 1, 1], [], []>} : vector<8x8xbf16>, vector<8x32xbf16>, vector<8x32xf32> -> vector<8x32xf32>
    %1021 = arith.addf %990, %1020 : vector<8x32xf32>
    %1022 = arith.addf %893, %1021 : vector<8x32xf32>
    %cst_461 = arith.constant dense<0.000000e+00> : vector<8xf32>
    %1023 = vector.multi_reduction <add>, %1022, %cst_461 [1] : vector<8x32xf32> to vector<8xf32>
    %1024 = vector.shape_cast %1023 : vector<8xf32> to vector<8x1xf32>
    %cst_462 = arith.constant 3.200000e+01 : f32
    %1025 = vector.broadcast %cst_462 : f32 to vector<8x1xf32>
    %1026 = arith.divf %1024, %1025 : vector<8x1xf32>
    %1027 = vector.broadcast %1026 : vector<8x1xf32> to vector<8x32xf32>
    %1028 = arith.subf %1022, %1027 : vector<8x32xf32>
    %1029 = arith.mulf %1028, %1028 : vector<8x32xf32>
    %cst_463 = arith.constant dense<0.000000e+00> : vector<8xf32>
    %1030 = vector.multi_reduction <add>, %1029, %cst_463 [1] : vector<8x32xf32> to vector<8xf32>
    %1031 = vector.shape_cast %1030 : vector<8xf32> to vector<8x1xf32>
    %cst_464 = arith.constant 3.200000e+01 : f32
    %1032 = vector.broadcast %cst_464 : f32 to vector<8x1xf32>
    %1033 = arith.divf %1031, %1032 : vector<8x1xf32>
    %cst_465 = arith.constant 9.99999974E-6 : f32
    %1034 = vector.broadcast %cst_465 : f32 to vector<8x1xf32>
    %1035 = arith.addf %1033, %1034 : vector<8x1xf32>
    %1036 = math.rsqrt %1035 : vector<8x1xf32>
    %1037 = vector.broadcast %1036 : vector<8x1xf32> to vector<8x32xf32>
    %1038 = arith.mulf %1028, %1037 : vector<8x32xf32>
    %c102 = arith.constant 102 : index
    %c0_466 = arith.constant 0 : index
    %1039 = vector.load %arg5[%c102, %c0_466] : memref<112x128xf32, #tpu.memory_space<vmem>>, vector<1x32xf32>
    %1040 = vector.broadcast %1039 : vector<1x32xf32> to vector<8x32xf32>
    %1041 = arith.mulf %1038, %1040 : vector<8x32xf32>
    %c103 = arith.constant 103 : index
    %c0_467 = arith.constant 0 : index
    %1042 = vector.load %arg5[%c103, %c0_467] : memref<112x128xf32, #tpu.memory_space<vmem>>, vector<1x32xf32>
    %1043 = vector.broadcast %1042 : vector<1x32xf32> to vector<8x32xf32>
    %1044 = arith.addf %1041, %1043 : vector<8x32xf32>
    %1045 = arith.truncf %1044 : vector<8x32xf32> to vector<8x32xbf16>
    %c2976 = arith.constant 2976 : index
    %c0_468 = arith.constant 0 : index
    %1046 = vector.load %arg4[%c2976, %c0_468] : memref<3104x128xbf16, #tpu.memory_space<vmem>>, vector<32x64xbf16>
    %cst_469 = arith.constant dense<0.000000e+00> : vector<8x64xf32>
    %1047 = tpu.matmul %1045, %1046, %cst_469 {dimension_numbers = #tpu.dot_dimension_numbers<[1], [0], [0], [1], [0, 0, 1, 1], [], []>} : vector<8x32xbf16>, vector<32x64xbf16>, vector<8x64xf32> -> vector<8x64xf32>
    %c104 = arith.constant 104 : index
    %c0_470 = arith.constant 0 : index
    %1048 = vector.load %arg5[%c104, %c0_470] : memref<112x128xf32, #tpu.memory_space<vmem>>, vector<1x64xf32>
    %1049 = vector.broadcast %1048 : vector<1x64xf32> to vector<8x64xf32>
    %1050 = arith.addf %1047, %1049 : vector<8x64xf32>
    %cst_471 = arith.constant 0.000000e+00 : f32
    %1051 = vector.broadcast %cst_471 : f32 to vector<8x64xf32>
    %1052 = arith.maximumf %1050, %1051 : vector<8x64xf32>
    %1053 = arith.truncf %1052 : vector<8x64xf32> to vector<8x64xbf16>
    %c3008 = arith.constant 3008 : index
    %c0_472 = arith.constant 0 : index
    %1054 = vector.load %arg4[%c3008, %c0_472] : memref<3104x128xbf16, #tpu.memory_space<vmem>>, vector<64x32xbf16>
    %cst_473 = arith.constant dense<0.000000e+00> : vector<8x32xf32>
    %1055 = tpu.matmul %1053, %1054, %cst_473 {dimension_numbers = #tpu.dot_dimension_numbers<[1], [0], [0], [1], [0, 0, 1, 1], [], []>} : vector<8x64xbf16>, vector<64x32xbf16>, vector<8x32xf32> -> vector<8x32xf32>
    %c105 = arith.constant 105 : index
    %c0_474 = arith.constant 0 : index
    %1056 = vector.load %arg5[%c105, %c0_474] : memref<112x128xf32, #tpu.memory_space<vmem>>, vector<1x32xf32>
    %1057 = vector.broadcast %1056 : vector<1x32xf32> to vector<8x32xf32>
    %1058 = arith.addf %1055, %1057 : vector<8x32xf32>
    %1059 = arith.addf %1044, %1058 : vector<8x32xf32>
    %cst_475 = arith.constant dense<0.000000e+00> : vector<8xf32>
    %1060 = vector.multi_reduction <add>, %1059, %cst_475 [1] : vector<8x32xf32> to vector<8xf32>
    %1061 = vector.shape_cast %1060 : vector<8xf32> to vector<8x1xf32>
    %cst_476 = arith.constant 3.200000e+01 : f32
    %1062 = vector.broadcast %cst_476 : f32 to vector<8x1xf32>
    %1063 = arith.divf %1061, %1062 : vector<8x1xf32>
    %1064 = vector.broadcast %1063 : vector<8x1xf32> to vector<8x32xf32>
    %1065 = arith.subf %1059, %1064 : vector<8x32xf32>
    %1066 = arith.mulf %1065, %1065 : vector<8x32xf32>
    %cst_477 = arith.constant dense<0.000000e+00> : vector<8xf32>
    %1067 = vector.multi_reduction <add>, %1066, %cst_477 [1] : vector<8x32xf32> to vector<8xf32>
    %1068 = vector.shape_cast %1067 : vector<8xf32> to vector<8x1xf32>
    %cst_478 = arith.constant 3.200000e+01 : f32
    %1069 = vector.broadcast %cst_478 : f32 to vector<8x1xf32>
    %1070 = arith.divf %1068, %1069 : vector<8x1xf32>
    %cst_479 = arith.constant 9.99999974E-6 : f32
    %1071 = vector.broadcast %cst_479 : f32 to vector<8x1xf32>
    %1072 = arith.addf %1070, %1071 : vector<8x1xf32>
    %1073 = math.rsqrt %1072 : vector<8x1xf32>
    %1074 = vector.broadcast %1073 : vector<8x1xf32> to vector<8x32xf32>
    %1075 = arith.mulf %1065, %1074 : vector<8x32xf32>
    %c106 = arith.constant 106 : index
    %c0_480 = arith.constant 0 : index
    %1076 = vector.load %arg5[%c106, %c0_480] : memref<112x128xf32, #tpu.memory_space<vmem>>, vector<1x32xf32>
    %1077 = vector.broadcast %1076 : vector<1x32xf32> to vector<8x32xf32>
    %1078 = arith.mulf %1075, %1077 : vector<8x32xf32>
    %c107 = arith.constant 107 : index
    %c0_481 = arith.constant 0 : index
    %1079 = vector.load %arg5[%c107, %c0_481] : memref<112x128xf32, #tpu.memory_space<vmem>>, vector<1x32xf32>
    %1080 = vector.broadcast %1079 : vector<1x32xf32> to vector<8x32xf32>
    %1081 = arith.addf %1078, %1080 : vector<8x32xf32>
    %cst_482 = arith.constant dense<0.000000e+00> : vector<8xf32>
    %1082 = vector.multi_reduction <add>, %1081, %cst_482 [1] : vector<8x32xf32> to vector<8xf32>
    %1083 = vector.shape_cast %1082 : vector<8xf32> to vector<8x1xf32>
    %cst_483 = arith.constant 3.200000e+01 : f32
    %1084 = vector.broadcast %cst_483 : f32 to vector<8x1xf32>
    %1085 = arith.divf %1083, %1084 : vector<8x1xf32>
    %1086 = vector.broadcast %1085 : vector<8x1xf32> to vector<8x32xf32>
    %1087 = arith.subf %1081, %1086 : vector<8x32xf32>
    %1088 = arith.mulf %1087, %1087 : vector<8x32xf32>
    %cst_484 = arith.constant dense<0.000000e+00> : vector<8xf32>
    %1089 = vector.multi_reduction <add>, %1088, %cst_484 [1] : vector<8x32xf32> to vector<8xf32>
    %1090 = vector.shape_cast %1089 : vector<8xf32> to vector<8x1xf32>
    %cst_485 = arith.constant 3.200000e+01 : f32
    %1091 = vector.broadcast %cst_485 : f32 to vector<8x1xf32>
    %1092 = arith.divf %1090, %1091 : vector<8x1xf32>
    %cst_486 = arith.constant 9.99999974E-6 : f32
    %1093 = vector.broadcast %cst_486 : f32 to vector<8x1xf32>
    %1094 = arith.addf %1092, %1093 : vector<8x1xf32>
    %1095 = math.rsqrt %1094 : vector<8x1xf32>
    %1096 = vector.broadcast %1095 : vector<8x1xf32> to vector<8x32xf32>
    %1097 = arith.mulf %1087, %1096 : vector<8x32xf32>
    %c108 = arith.constant 108 : index
    %c0_487 = arith.constant 0 : index
    %1098 = vector.load %arg5[%c108, %c0_487] : memref<112x128xf32, #tpu.memory_space<vmem>>, vector<1x32xf32>
    %1099 = vector.broadcast %1098 : vector<1x32xf32> to vector<8x32xf32>
    %1100 = arith.mulf %1097, %1099 : vector<8x32xf32>
    %c109 = arith.constant 109 : index
    %c0_488 = arith.constant 0 : index
    %1101 = vector.load %arg5[%c109, %c0_488] : memref<112x128xf32, #tpu.memory_space<vmem>>, vector<1x32xf32>
    %1102 = vector.broadcast %1101 : vector<1x32xf32> to vector<8x32xf32>
    %1103 = arith.addf %1100, %1102 : vector<8x32xf32>
    %1104 = arith.truncf %1103 : vector<8x32xf32> to vector<8x32xbf16>
    %c3072 = arith.constant 3072 : index
    %c0_489 = arith.constant 0 : index
    %1105 = vector.load %arg4[%c3072, %c0_489] : memref<3104x128xbf16, #tpu.memory_space<vmem>>, vector<32x32xbf16>
    %cst_490 = arith.constant dense<0.000000e+00> : vector<8x32xf32>
    %1106 = tpu.matmul %1104, %1105, %cst_490 {dimension_numbers = #tpu.dot_dimension_numbers<[1], [0], [0], [1], [0, 0, 1, 1], [], []>} : vector<8x32xbf16>, vector<32x32xbf16>, vector<8x32xf32> -> vector<8x32xf32>
    %c110 = arith.constant 110 : index
    %c0_491 = arith.constant 0 : index
    %1107 = vector.load %arg5[%c110, %c0_491] : memref<112x128xf32, #tpu.memory_space<vmem>>, vector<1x32xf32>
    %1108 = vector.broadcast %1107 : vector<1x32xf32> to vector<8x32xf32>
    %1109 = arith.addf %1106, %1108 : vector<8x32xf32>
    %c0_492 = arith.constant 0 : index
    %c0_493 = arith.constant 0 : index
    %c0_494 = arith.constant 0 : index
    %1110 = vector.load %arg6[%c0_492, %c0_493, %c0_494] : memref<1x8x32xf32, #tpu.memory_space<vmem>>, vector<1x8x32xf32>
    %1111 = vector.shape_cast %1110 : vector<1x8x32xf32> to vector<8x32xf32>
    %1112 = vector.shape_cast %1109 : vector<8x32xf32> to vector<1x8x32xf32>
    tpu.vector_store %arg6[%c0_492, %c0_493, %c0_494], %1112 {strides = array<i32>} : memref<1x8x32xf32, #tpu.memory_space<vmem>>, vector<1x8x32xf32>,
    return
  }
  func.func @transform_0(%arg0: i32) -> (i32, i32, i32) {
    %c0_i32 = arith.constant 0 : i32
    %c0_i32_0 = arith.constant 0 : i32
    %c0_i32_1 = arith.constant 0 : i32
    return %arg0, %c0_i32, %c0_i32_0 : i32, i32, i32
  }
  func.func @transform_1(%arg0: i32) -> (i32, i32, i32) {
    %c0_i32 = arith.constant 0 : i32
    %c0_i32_0 = arith.constant 0 : i32
    %c0_i32_1 = arith.constant 0 : i32
    return %arg0, %c0_i32, %c0_i32_0 : i32, i32, i32
  }
  func.func @transform_2(%arg0: i32) -> (i32, i32) {
    %c0_i32 = arith.constant 0 : i32
    %c0_i32_0 = arith.constant 0 : i32
    %c0_i32_1 = arith.constant 0 : i32
    return %c0_i32, %c0_i32_0 : i32, i32
  }
  func.func @transform_3(%arg0: i32) -> (i32, i32) {
    %c0_i32 = arith.constant 0 : i32
    %c0_i32_0 = arith.constant 0 : i32
    %c0_i32_1 = arith.constant 0 : i32
    return %c0_i32, %c0_i32_0 : i32, i32
  }
  func.func @transform_4(%arg0: i32) -> (i32, i32) {
    %c0_i32 = arith.constant 0 : i32
    %c0_i32_0 = arith.constant 0 : i32
    %c0_i32_1 = arith.constant 0 : i32
    return %c0_i32, %c0_i32_0 : i32, i32
  }
  func.func @transform_5(%arg0: i32) -> (i32, i32, i32) {
    %c0_i32 = arith.constant 0 : i32
    %c0_i32_0 = arith.constant 0 : i32
    %c0_i32_1 = arith.constant 0 : i32
    return %arg0, %c0_i32, %c0_i32_0 : i32, i32, i32
  }
}

</mosaic_0001>

<bundles_post_ra>
// kernel: forward.1
= control target key start
LH: loop header
LB: loop body
LE: loop exit
PB: predicated region body
PF: predicated region fallthrough
CT: control target
= control target key end

     0   :  { %s14732_s0 = inlined_call_operand.hbm [shape: f32[2,8,32], index: 0, kind: input, shape index: {}]   ;;  %s14733_s1 = inlined_call_operand.hbm [shape: f32[2,8,32], index: 1, kind: input, shape index: {}]   ;;  %s14734_s2 = inlined_call_operand.hbm [shape: f32[8,32], index: 2, kind: input, shape index: {}]   ;;  %s14735_s3 = inlined_call_operand.hbm [shape: bf16[3104,128], index: 3, kind: input, shape index: {}]   ;;  %s14736_s4 = inlined_call_operand.hbm [shape: f32[112,128], index: 4, kind: input, shape index: {}]   ;;  %s14737_s5 = inlined_call_operand.hbm [shape: f32[2,8,32], index: 5, kind: output, shape index: {}]  }
   0x1   :  { %14742 = sst [smem:[#allocation17_spill]] %s14734_s2 }
   0x2   :  { %14743 = sst [smem:[#allocation18_spill]] %s14735_s3 }
   0x3   :  { %10 = vsyncpa [#allocation3], 0 }
   0x4   :  { %12 = vsyncpa [#allocation3 + $0x1], 0 }
   0x5   :  { %13 = vsyncpa [#allocation6], 0 }
   0x6   :  { %15 = vsyncpa [#allocation6 + $0x1], 0 }
   0x7   :  { %16 = vsyncpa [#allocation9], 0 }
   0x8   :  { %17 = vsyncpa [#allocation4], 0 }
   0x9   :  { %19 = vsyncpa [#allocation4 + $0x1], 0  ;;  %s13459_s18 = smov 0   ;;  %s13461_s19 = smov 0  }
   0xa   :  { %s13463_s20 = smov 0   ;;  %s13465_s21 = smov 0  }
   0xb LB: > { %s13480_s22 = sadd.s32 4294967295, %s13415_s21   ;;  %s10893_s23 = sadd.s32 4294967294, %s13415_s21   ;;  %s13415_s21 = sphi %s13465_s21, %s14766_s21   ;;  %s13411_s20 = sphi %s13463_s20, %s14765_s20   ;;  %s13407_s19 = sphi %s13461_s19, %s14764_s19   ;;  %s13403_s18 = sphi %s13459_s18, %s14763_s18  }
   0xc   : > { %p45_p0 = scmp.ne.s32.totalorder %s13407_s19, %s13403_s18  ;;  %p14738_p1 = scmp.eq.s32.totalorder %s13480_s22, 0 }
   0xd   : > { %p164_p3 = scmp.eq.s32.totalorder %s10893_s23, 1  ;;  %p10894_p5 = scmp.ge.s32.totalorder %s13415_s21, 1 }
   0xe   : > { %p13489_p4 = por %p14738_p1, %p45_p0  ;;  %p171_p7 = scmp.lt.s32.totalorder %s13415_s21, 3 }
   0xf   : > { %p13494_p6 = por %p164_p3, %p45_p0  ;;  %s13417_s27 = smov [#allocation7]  }
  0x10   : > { %s14744_s24 = scalar_select %p13489_p4, 1, 0 }
  0x11   : > { %s14745_s25 = scalar_select %p13494_p6, 1, 0 }
  0x12   : > { %p13499_p8 = pnand %p10894_p5, %p171_p7  ;;  %s184_s28 = sshll.u32 %s13417_s27, 4  ;;  %s185_s28 = int_to_ptr.vmem [resolvable:$true] %s184_s28 }
  0x13   : > { %s13418_s29 = smov [#allocation8]   ;;  %s13419_s7 = smov [#allocation10]  }
  0x14   : > { %s14746_s26 = scalar_select %p13499_p8, 1, 0 }
  0x15   : > { %p12833_p10 = pneg %p13499_p8  ;;  %s194_s30 = sshll.u32 %s13418_s29, 4  ;;  %s13512_s30 = int_to_ptr.vmem [resolvable:$true] %s194_s30 }
  0x16   : > { %s13514_s8 = sshll.u32 %s13419_s7, 4  ;;  %s14748_s2 = sld [smem:[#allocation17_spill]]  ;;  %s208_s8 = int_to_ptr.vmem [resolvable:$true] %s13514_s8 }
  0x17   : > { %p13508_p11 = pnand %p12833_p10, %p14738_p1 }
  0x19   : > { %p13524_p13 = pneg %p13508_p11 }
  0x1c   : > { %s13193_s11 = scalar_lea.hbm %s14748_s2, 128 }
  0x1d   : > { %p13194_p12 = scmp.ne.s32.totalorder %s14748_s2, %s13193_s11  ;;  %p13200_p5 = scmp.lt.u32.totalorder %s13193_s11, %s14748_s2 }
  0x1f   : > { %p13196_p0 = pnand %p13524_p13, %p13194_p12 }
  0x21   : > { %p13197_p3 = pneg %p13196_p0 }
  0x23   : > { %p13202_p7 = pnand %p13200_p5, %p13197_p3 }
  0x25   : > { %13205 = shalt.err (!%p13202_p7)
}
  0x26   : > { %s13206_s17 = scalar_lea.vmem %s185_s28, 128  ;;  %p13214_p2 = scmp.lt.s32.totalorder %s185_s28, %s185_s28 }
  0x27   : > { %p13207_p10 = scmp.ne.s32.totalorder %s185_s28, %s13206_s17  ;;  %p13215_p6 = scmp.lt.s32.totalorder %s13206_s17, %s13206_s17 }
  0x29   : > { %p13209_p9 = pnand %p13207_p10, %p13524_p13  ;;  %p13216_p4 = por %p13215_p6, %p13214_p2 }
  0x2b   : > { %p13210_p1 = pneg %p13209_p9 }
  0x2d   : > { %p13217_p8 = pnand %p13216_p4, %p13210_p1 }
  0x2f   : > { %13220 = shalt.err (!%p13217_p8)
}
  0x30   : > { %12836 = dma.hbm_to_vmem [thread:$0]  (!%p13508_p11), %s14748_s2, 128, %s185_s28, [#allocation6]  }
  0x31   : > { %s14750_s3 = sld [smem:[#allocation18_spill]] }
  0x37   : > { %s13221_s9 = scalar_lea.hbm %s14750_s3, 24832 }
  0x38   : > { %p13222_p9 = scmp.ne.s32.totalorder %s14750_s3, %s13221_s9  ;;  %p13228_p1 = scmp.lt.u32.totalorder %s13221_s9, %s14750_s3 }
  0x3a   : > { %p13224_p12 = pnand %p13222_p9, %p13524_p13 }
  0x3c   : > { %p13225_p2 = pneg %p13224_p12 }
  0x3e   : > { %p13230_p4 = pnand %p13228_p1, %p13225_p2 }
  0x40   : > { %13233 = shalt.err (!%p13230_p4)
}
  0x41   : > { %s13234_s28 = scalar_lea.vmem %s13512_s30, 24832  ;;  %p13242_p3 = scmp.lt.s32.totalorder %s13512_s30, %s13512_s30 }
  0x42   : > { %p13235_p6 = scmp.ne.s32.totalorder %s13512_s30, %s13234_s28  ;;  %p13243_p5 = scmp.lt.s32.totalorder %s13234_s28, %s13234_s28 }
  0x44   : > { %p13237_p8 = pnand %p13235_p6, %p13524_p13  ;;  %p13244_p7 = por %p13243_p5, %p13242_p3 }
  0x46   : > { %p13238_p0 = pneg %p13237_p8 }
  0x48   : > { %p13245_p10 = pnand %p13244_p7, %p13238_p0 }
  0x4a   : > { %13248 = shalt.err (!%p13245_p10)
}
  0x4b   : > { %s13420_s15 = smov 64   ;;  %s13421_s16 = smov 4  }
  0x4c   : > { %12839 = dma.hbm_to_vmem [thread:$0]  (!%p13508_p11), %s14750_s3, 24832, %s13512_s30, [#allocation9], %s13420_s15, %s13420_s15, %s13421_s16  }
  0x4d   : > { %s13249_s7 = scalar_lea.hbm %s14736_s4, 1792 }
  0x4e   : > { %p13250_p9 = scmp.ne.s32.totalorder %s14736_s4, %s13249_s7  ;;  %p13256_p1 = scmp.lt.u32.totalorder %s13249_s7, %s14736_s4 }
  0x50   : > { %p13252_p12 = pnand %p13250_p9, %p13524_p13 }
  0x52   : > { %p13253_p2 = pneg %p13252_p12 }
  0x54   : > { %p13258_p4 = pnand %p13256_p1, %p13253_p2 }
  0x56   : > { %13261 = shalt.err (!%p13258_p4)
}
  0x57   : > { %s13262_s13 = scalar_lea.vmem %s208_s8, 1792  ;;  %p13270_p3 = scmp.lt.s32.totalorder %s208_s8, %s208_s8 }
  0x58   : > { %p13263_p6 = scmp.ne.s32.totalorder %s208_s8, %s13262_s13  ;;  %p13271_p5 = scmp.lt.s32.totalorder %s13262_s13, %s13262_s13 }
  0x5a   : > { %p13265_p8 = pnand %p13263_p6, %p13524_p13  ;;  %p13272_p7 = por %p13271_p5, %p13270_p3 }
  0x5c   : > { %p13266_p0 = pneg %p13265_p8 }
  0x5e   : > { %p13273_p10 = pnand %p13272_p7, %p13266_p0 }
  0x60   : > { %13276 = shalt.err (!%p13273_p10)
}
  0x61   : > { %s13422_s30 = smov 128   ;;  %s13423_s14 = smov 8  }
  0x62   : > { %12842 = dma.hbm_to_vmem [thread:$0]  (!%p13508_p11), %s14736_s4, 1792, %s208_s8, [#allocation9], %s13422_s30, %s13422_s30, %s13423_s14  }
  0x63   : > { %s13583_s16 = sadd.s32 1, %s13415_s21   ;;  %s32_s23 = sadd.s32 1, %s13411_s20 }
  0x64   : > { %s29_s17 = ssub.s32 %s13415_s21, %s13583_s16  ;;  %p39_p9 = scmp.ne.s32.totalorder %s13411_s20, %s13407_s19 }
  0x65   : > { %p30_p13 = scmp.eq.s32.totalorder %s29_s17, 0  ;;  %p40_p12 = scmp.eq.s32.totalorder %s13415_s21, 0 }
  0x66   : > { %p12857_p2 = scmp.lt.s32.totalorder %s13415_s21, 2  ;;  %p14751_p4 = scmp.eq.s32.totalorder %s13480_s22, 1 }
  0x67   : > { %s13593_s27 = scalar_select %p30_p13, %s13411_s20, %s32_s23  }
  0x68   : > { %p41_p1 = por %p40_p12, %p39_p9  ;;  %p13597_p6 = por %p14751_p4, %p39_p9 }
  0x69   : > { %s221_s6 = sand.u32 1, %s13411_s20   ;;  %s10900_s7 = sshll.u32 %s13415_s21, 7 }
  0x6a   : > { %s14752_s29 = scalar_select %p13597_p6, 1, 0 }
  0x6b   : > { %s13603_s8 = sshll.u32 %s221_s6, 3  ;;  %s13608_s11 = scalar_lea.hbm %s14732_s0, %s10900_s7 }
  0x6c   : > { %s225_s12 = scalar_lea.vmem [#allocation2], %s13603_s8  ;;  %p13611_p11 = pnand %p12857_p2, %p41_p1 }
  0x6d   : > { %s232_s13 = sshll.u32 %s225_s12, 4  ;;  %s13620_s15 = scalar_lea.hbm %s14733_s1, %s10900_s7  ;;  %s13615_s13 = int_to_ptr.vmem [resolvable:$true] %s232_s13 }
  0x6e   : > { %s222_s17 = scalar_lea.sflag [#allocation3], %s221_s6  ;;  %s13277_s23 = scalar_lea.hbm %s13608_s11, 128 }
  0x6f   : > { %p13278_p8 = scmp.ne.s32.totalorder %s13608_s11, %s13277_s23  ;;  %p13279_p0 = pneg %p13611_p11 }
  0x70   : > { %s13282_s12 = scalar_lea.hbm %s14732_s0, 256  ;;  %p13283_p7 = scmp.lt.u32.totalorder %s13608_s11, %s14732_s0 }
  0x71   : > { %p13280_p3 = pnand %p13279_p0, %p13278_p8  ;;  %p13284_p10 = scmp.lt.u32.totalorder %s13282_s12, %s13277_s23 }
  0x72   : > { %p13286_p9 = scmp.lt.u32.totalorder %s13277_s23, %s13608_s11 }
  0x73   : > { %p13281_p5 = pneg %p13280_p3  ;;  %p13285_p13 = por %p13284_p10, %p13283_p7 }
  0x75   : > { %p13287_p12 = por %p13286_p9, %p13285_p13 }
  0x77   : > { %p13288_p2 = pnand %p13287_p12, %p13281_p5 }
  0x79   : > { %13291 = shalt.err (!%p13288_p2)
}
  0x7a   : > { %s13292_s6 = scalar_lea.vmem %s13615_s13, 128  ;;  %s13424_s7 = smov [#allocation2]  }
  0x7b   : > { %p13293_p1 = scmp.ne.s32.totalorder %s13615_s13, %s13292_s6  ;;  %s13297_s14 = sshll.u32 %s13424_s7, 4  ;;  %s13298_s14 = int_to_ptr.vmem [resolvable:$false] %s13297_s14 }
  0x7c   : > { %s13299_s2 = scalar_lea.vmem %s13298_s14, 256  ;;  %p13300_p3 = scmp.lt.s32.totalorder %s13615_s13, %s13298_s14 }
  0x7d   : > { %p13295_p4 = pnand %p13293_p1, %p13279_p0  ;;  %p13301_p7 = scmp.lt.s32.totalorder %s13299_s2, %s13292_s6 }
  0x7f   : > { %p13296_p8 = pneg %p13295_p4  ;;  %p13302_p10 = por %p13301_p7, %p13300_p3 }
  0x81   : > { %p13303_p13 = pnand %p13302_p10, %p13296_p8 }
  0x83   : > { %13306 = shalt.err (!%p13303_p13)
}
  0x84   : > { %12846 = dma.hbm_to_vmem [thread:$0]  (!%p13611_p11), %s13608_s11, 128, %s13615_s13, %s222_s17  }
  0x85   : > { %s239_s3 = sand.u32 1, %s13415_s21   ;;  %s243_s28 = scalar_lea.vmem [#allocation5], %s13603_s8 }
  0x86   : > { %s250_s23 = sshll.u32 %s243_s28, 4  ;;  %s240_s9 = scalar_lea.sflag [#allocation6], %s239_s3  ;;  %s251_s23 = int_to_ptr.vmem [resolvable:$true] %s250_s23 }
  0x87   : > { %s13307_s10 = scalar_lea.hbm %s13620_s15, 128  ;;  %s13312_s7 = scalar_lea.hbm %s14733_s1, 256 }
  0x88   : > { %p13308_p5 = scmp.ne.s32.totalorder %s13620_s15, %s13307_s10  ;;  %p13313_p2 = scmp.lt.u32.totalorder %s13620_s15, %s14733_s1 }
  0x89   : > { %p13314_p1 = scmp.lt.u32.totalorder %s13312_s7, %s13307_s10  ;;  %p13316_p8 = scmp.lt.u32.totalorder %s13307_s10, %s13620_s15 }
  0x8a   : > { %p13310_p9 = pnand %p13308_p5, %p13279_p0 }
  0x8b   : > { %p13315_p4 = por %p13314_p1, %p13313_p2 }
  0x8c   : > { %p13311_p12 = pneg %p13310_p9 }
  0x8d   : > { %p13317_p3 = por %p13316_p8, %p13315_p4 }
  0x8f   : > { %p13318_p7 = pnand %p13317_p3, %p13311_p12 }
  0x91   : > { %13321 = shalt.err (!%p13318_p7)
}
  0x92   : > { %s13322_s8 = scalar_lea.vmem %s251_s23, 128  ;;  %s13425_s11 = smov [#allocation5]  }
  0x93   : > { %p13323_p10 = scmp.ne.s32.totalorder %s251_s23, %s13322_s8  ;;  %s13327_s13 = sshll.u32 %s13425_s11, 4  ;;  %s13328_s13 = int_to_ptr.vmem [resolvable:$false] %s13327_s13 }
  0x94   : > { %s13329_s17 = scalar_lea.vmem %s13328_s13, 256  ;;  %p13330_p9 = scmp.lt.s32.totalorder %s251_s23, %s13328_s13 }
  0x95   : > { %p13325_p13 = pnand %p13323_p10, %p13279_p0  ;;  %p13331_p6 = scmp.lt.s32.totalorder %s13329_s17, %s13322_s8 }
  0x97   : > { %p13326_p5 = pneg %p13325_p13  ;;  %p13332_p1 = por %p13331_p6, %p13330_p9 }
  0x99   : > { %p13333_p2 = pnand %p13332_p1, %p13326_p5 }
  0x9b   : > { %13336 = shalt.err (!%p13333_p2)
}
  0x9c   : > { %12849 = dma.hbm_to_vmem [thread:$0]  (!%p13611_p11), %s13620_s15, 128, %s251_s23, %s240_s9  }
  0x9d   : > { %p14754_p12 = scmp.ne.s32.totalorder %s14746_s26, 0 }
  0x9e   : > { %s13671_s3 = sand.u32 (!%p14754_p12), 1, %s13407_s19   ;;  %p14755_p6 = scmp.ne.s32.totalorder (!%p14754_p12), %s14744_s24, 0 }
  0x9f   : > { %259 = sbr.rel (%p14754_p12) target bundleno = 29299 (0x7273), region = 40  ;;  %s13674_s28 = sshll.u32 (!%p14754_p12), %s13671_s3, 3 }
  0xa0   : > { %s262_s10 = scalar_lea.sflag (!%p14754_p12), [#allocation3], %s13671_s3  ;;  %s265_s12 = scalar_lea.vmem (!%p14754_p12), [#allocation2], %s13674_s28 }
  0xa6   : > { %13382 = dma.done.wait (%p14755_p6), %s262_s10, 128  }
  0xa7   : > { %13384 = vsyncadd (%p14755_p6), %s262_s10, 4294967168  ;;  %s270_s26 = sand.u32 1, %s13480_s22   ;;  %s274_s15 = scalar_lea.vmem [#allocation5], %s13674_s28 }
  0xa8   : > { %s271_s30 = scalar_lea.sflag [#allocation6], %s270_s26 }
  0xa9   : > { %13386 = dma.done.wait (%p14755_p6), %s271_s30, 128  }
  0xaa   : > { %13388 = vsyncadd (%p14755_p6), %s271_s30, 4294967168  ;;  %p14756_p11 = scmp.eq.s32.totalorder %s13480_s22, 0 }
  0xac   : > { %13390 = dma.done.wait (%p14756_p11), [#allocation6], 128   ;;  %p14757_p0 = pmov %p14756_p11 }
  0xae   : > { %13392 = vsyncadd (%p14757_p0), [#allocation6], 4294967168  ;;  %p14758_p4 = pmov %p14757_p0 }
  0xaf   : > { %p14759_p8 = pmov %p14757_p0 }
  0xb0   : > { %13394 = dma.done.wait (%p14758_p4), [#allocation9], 26624  }
  0xb1   : > { %13396 = vsyncadd (%p14759_p8), [#allocation9], 4294940672  ;;  %v13426_v0 = vmov 0.0   ;;  %vm13427_vm0 = vmmov 0   ;;  %v12903_v1 = vld [vmem:[#allocation8] sm:$0xff]   ;;  %v12904_v2 = vld [vmem:[#allocation8 + $0x10] sm:$0xff]  }
  0xb2   : > { %11767 = vmatprep.subr.bf16.mxu0 %v13426_v0  ;;  %11775 = vmatprep.subr.bf16.mxu1 %v13426_v0  ;;  %v12905_v3 = vld [vmem:[#allocation8 + $0x8] sm:$0xff]   ;;  %v12906_v4 = vld [vmem:[#allocation8 + $0x18] sm:$0xff]   ;;  %vm345_vm1 = vcmask 261120   ;;  %v10914_v9 = vld [vmem:[#allocation10 + $0x1] ss:$0 sm:$0xff]  ;;  %vm511_vm2 = vcmask 64512  }
  0xb3   : > { %11771 = vmatprep.mubr.msk.bf16.mxu0 %vm13427_vm0, %v13426_v0  ;;  %11779 = vmatprep.mubr.msk.bf16.mxu1 %vm13427_vm0, %v13426_v0  ;;  %v319_v5 = vld [vmem:[%s265_s12] sm:$0xff]  ;;  %v10910_v10 = vld [vmem:[#allocation10] ss:$0 sm:$0xff]  ;;  %v12908_v22 = vld [vmem:[#allocation8 + $0x28] sm:$0xff]   ;;  %vm677_vm3 = vcmask 1043456   ;;  %vm2033_vm4 = vcmask 523264  }
  0xb4   : > { %11768 = vmatpush3.bf16.msra.mxu0 %v12903_v1  ;;  %11776 = vmatpush3.bf16.msra.mxu1 %v12904_v2  ;;  %v320_v6 = vld [vmem:[#allocation7] sm:$0xff]  ;;  %v12907_v21 = vld [vmem:[#allocation8 + $0x20] sm:$0xff]   ;;  %v10918_v34 = vld [vmem:[#allocation10 + $0x2] ss:$0 sm:$0xff]  ;;  %s11369_s24 = sshll.u32 %s13480_s22, 7  ;;  %s317_s23 = scalar_lea.vmem [#allocation11], %s13674_s28 }
  0xb5   : > { %11769 = vmatprep.subr.bf16.mxu0 %v13426_v0  ;;  %11777 = vmatprep.subr.bf16.mxu1 %v13426_v0  ;;  %v13704_v7 = vadd.f32 %v320_v6, %v319_v5  ;;  %v673_v40 = vld [vmem:[#allocation8 + $0x30] sm:$0xf]  ;;  %v12909_v42 = vld [vmem:[#allocation8 + $0x38] sm:$0xff]   ;;  %v12911_v43 = vld [vmem:[#allocation8 + $0x40] sm:$0xff]   ;;  %s10772_s9 = sshll.u32 %s317_s23, 4  ;;  %s14687_s14 = scalar_lea.hbm %s14737_s5, %s11369_s24  ;;  %s14689_s9 = int_to_ptr.vmem [resolvable:$true] %s10772_s9 }
  0xb6   : > { %v679_v41 = vsel %vm677_vm3, %v673_v40, 0  ;;  %v12910_v45 = vld [vmem:[#allocation8 + $0x48] sm:$0xff]   ;;  %v12912_v48 = vld [vmem:[#allocation8 + $0x50] sm:$0xff]   ;;  %v12913_v2 = vld [vmem:[#allocation8 + $0x58] sm:$0xff]   ;;  %s10759_s22 = scalar_lea.sflag [#allocation4], %s13671_s3  ;;  %s13337_s2 = scalar_lea.vmem %s14689_s9, 128 }
  0xb7   : > { %v13708_v8 = vpack.c.bf16 %v13704_v7, %v13704_v7  ;;  %v10931_v57 = vld [vmem:[#allocation10 + $0x4] ss:$0 sm:$0xff]  ;;  %v10927_v58 = vld [vmem:[#allocation10 + $0x3] ss:$0 sm:$0xff]  ;;  %p13338_p3 = scmp.ne.s32.totalorder %s14689_s9, %s13337_s2  ;;  %p14760_p7 = scmp.ne.s32.totalorder %s14752_s29, 0 }
  0xb8   : > { %11770 = vmatpush3.bf16.msra.mxu0 %v12905_v3  ;;  %11778 = vmatpush3.bf16.msra.mxu1 %v12906_v4  ;;  %v12914_v3 = vld [vmem:[#allocation8 + $0x60] sm:$0xff]   ;;  %s13428_s8 = smov [#allocation11]  }
  0xb9   : > { %11783 = vmatprep.subr.bf16.mxu0 %v13426_v0  ;;  %11791 = vmatprep.subr.mxu1 %v13426_v0  ;;  %p13339_p10 = pnand %p13338_p3, %p14760_p7  ;;  %s13341_s11 = sshll.u32 %s13428_s8, 4  ;;  %s13342_s11 = int_to_ptr.vmem [resolvable:$false] %s13341_s11 }
  0xba   : > { %s13343_s13 = scalar_lea.vmem %s13342_s11, 256  ;;  %p13344_p5 = scmp.lt.s32.totalorder %s14689_s9, %s13342_s11 }
  0xbb   : > { %11772 = vmatmul.mubr.msk.bf16.vlgmr.msra.gmra.mrb[0].mxu0 %vm345_vm1, %v13708_v8  ;;  %11780 = vmatmul.mubr.msk.bf16.vlgmr.msra.gmra.mrb[0].mxu1 %vm345_vm1, %v13708_v8  ;;  %p13340_p13 = pneg %p13339_p10  ;;  %p13345_p9 = scmp.lt.s32.totalorder %s13343_s13, %s13337_s2 }
  0xbc   : > { %11787 = vmatprep.mubr.msk.bf16.mxu0 %vm13427_vm0, %v13426_v0  ;;  %11793 = vmatprep.mubr.msk.f32.mxu1 %vm13427_vm0, %v13426_v0 }
  0xbd   : > { %11784 = vmatpush3.bf16.msra.mxu0 %v12907_v21  ;;  %p13346_p1 = por %p13345_p9, %p13344_p5 }
  0xbe   : > { %11785 = vmatprep.subr.bf16.mxu0 %v13426_v0 }
  0xbf   : > { %p13347_p2 = pnand %p13346_p1, %p13340_p13 }
  0xc1   : > { %11786 = vmatpush3.bf16.msra.mxu0 %v12908_v22 }
  0xc2   : > { %11801 = vmatprep.subr.bf16.mxu0 %v13426_v0 }
  0xc4   : > { %11788 = vmatmul.mubr.msk.bf16.vlgmr.msra.gmra.mrb[4].mxu0 %vm345_vm1, %v13708_v8 }
  0xc5   : > { %11803 = vmatprep.mubr.msk.bf16.mxu0 %vm13427_vm0, %v13426_v0  ;;  %11802 = vmatpush3.bf16.msra.mxu0 %v679_v41 }
  0xc6   : > { %11815 = vmatprep.subr.bf16.mxu0 %v13426_v0 }
 0x18e   : > { %v383_v11 = vpop.f32.mrb[0].mxu0  ;;  %v444_v12 = vpop.f32.mrb[0].mxu1 }
 0x18f   : > { %v11773_v13 = vpop.f32.mrb[1].mxu0  ;;  %v445_v14 = vadd.f32 %v10914_v9, %v444_v12  ;;  %v11781_v15 = vpop.f32.mrb[1].mxu1  ;;  %v384_v17 = vadd.f32 %v10910_v10, %v383_v11 }
 0x190   : > { %v386_v16 = vpop.f32.mrb[2].mxu0  ;;  %v447_v18 = vpop.f32.mrb[2].mxu1 }
 0x191   : > { %v11774_v19 = vpop.f32.mrb[3].mxu0  ;;  %v11782_v20 = vpop.f32.mrb[3].mxu1  ;;  %11792 = vmatpush3.xpose.msk.msra.mxu1 %vm511_vm2, %v445_v14 }
 0x192   : > { %11796 = vmatprep.subr.mxu1 %v13426_v0 }
 0x194   : > { %11794 = vmatmul.mubr.msk.f32.vlgmr.msra.gmra.mrb[4].mxu1 %vm511_vm2, %v384_v17  ;;  %v10935_v17 = vld [vmem:[#allocation10 + $0x5] ss:$0 sm:$0xff] }
 0x195   : > { %11798 = vmatprep.mubr.msk.f32.mxu1 %vm13427_vm0, %v13426_v0 }
 0x197   : > { %v505_v31 = vpop.f32.mrb[4].mxu0 }
 0x198   : > { %v11789_v32 = vpop.f32.mrb[5].mxu0  ;;  %v506_v36 = vadd.f32 %v10918_v34, %v505_v31  ;;  %v12918_v31 = vld [vmem:[#allocation8 + $0x88] sm:$0xff]  }
 0x199   : > { %v508_v33 = vpop.f32.mrb[6].mxu0 }
 0x19a   : > { %v11790_v35 = vpop.f32.mrb[7].mxu0  ;;  %11797 = vmatpush3.msra.mxu1 %v506_v36  ;;  %v10926_v36 = vld [vmem:[#allocation10 + $0xc] ss:$0 sm:$0xff] }
 0x19b   : > { %11807 = vmatprep.subr.bf16.mxu1 %v13426_v0 }
 0x267   : > { %v584_v23 = vpop.f32.mrb[4].mxu1 }
 0x268   : > { %v11795_v24 = vpop.f32.mrb[5].mxu1  ;;  %v588_v25 = vsel %vm511_vm2, %v584_v23, -inf }
 0x269   : > { %589 = vmax.xlane.f32.xlu0 %v588_v25  ;;  %v12915_v25 = vld [vmem:[#allocation8 + $0x70] sm:$0xff]  }
 0x2f6   : > { %v590_v26 = vpop.xlane.xlu0 %589 }
 0x2f7   : > { %v591_v27 = vsub.f32 %v584_v23, %v590_v26  ;;  %v1070_v23 = vld [vmem:[#allocation8 + $0x68] sm:$0xf]  ;;  %v12917_v26 = vld [vmem:[#allocation8 + $0x78] sm:$0xff]  }
 0x2f8   : > { %v1075_v24 = vsel %vm677_vm3, %v1070_v23, 0 }
 0x2f9   : > { %v592_v28 = vmul.f32 1.442695, %v591_v27 }
 0x2fb   : > { %13073 = vpow2.f32 %v592_v28  ;;  %v12916_v28 = vld [vmem:[#allocation8 + $0x80] sm:$0xff]  }
 0x305   : > { %v13074_v29 = vpop.eup %13073 }
 0x306   : > { %v594_v30 = vsel %vm511_vm2, %v13074_v29, 0.0 }
 0x307   : > { %595 = vadd.xlane.f32.xlu0 %v594_v30 }
 0x394   : > { %v596_v37 = vpop.xlane.xlu0 %595 }
 0x395   : > { %13075 = vrcp.f32 %v596_v37 }
 0x39f   : > { %v13076_v38 = vpop.eup %13075 }
 0x3a0   : > { %v598_v39 = vmul.f32 %v13076_v38, %v13074_v29 }
 0x3a2   : > { %11799 = vmatmul.mubr.msk.f32.vlgmr.msra.gmra.mrb[6].mxu1 %vm511_vm2, %v598_v39 }
 0x3a3   : > { %11811 = vmatprep.mubr.msk.bf16.mxu1 %vm13427_vm0, %v13426_v0  ;;  %11808 = vmatpush3.bf16.msra.mxu1 %v12909_v42 }
 0x3a4   : > { %11809 = vmatprep.subr.bf16.mxu1 %v13426_v0 }
 0x3a7   : > { %11810 = vmatpush3.bf16.msra.mxu1 %v12911_v43  ;;  %v10947_v43 = vld [vmem:[#allocation10 + $0x7] ss:$0 sm:$0xff] }
 0x3a8   : > { %11823 = vmatprep.subr.bf16.mxu1 %v13426_v0 }
 0x3aa   : > { %11812 = vmatmul.mubr.msk.bf16.vlgmr.msra.gmra.mrb[8].mxu1 %vm345_vm1, %v13708_v8 }
 0x3ab   : > { %11827 = vmatprep.mubr.msk.bf16.mxu1 %vm13427_vm0, %v13426_v0  ;;  %11824 = vmatpush3.bf16.msra.mxu1 %v12913_v2 }
 0x3ac   : > { %11825 = vmatprep.subr.bf16.mxu1 %v13426_v0 }
 0x3af   : > { %11826 = vmatpush3.bf16.msra.mxu1 %v12914_v3 }
 0x3b0   : > { %11841 = vmatprep.subr.bf16.mxu1 %v13426_v0 }
 0x3b2   : > { %11828 = vmatmul.mubr.msk.bf16.vlgmr.msra.gmra.mrb[12].mxu1 %vm345_vm1, %v13708_v8 }
 0x3b3   : > { %11843 = vmatprep.mubr.msk.bf16.mxu1 %vm13427_vm0, %v13426_v0  ;;  %11842 = vmatpush3.bf16.msra.mxu1 %v1075_v24 }
 0x3b4   : > { %11855 = vmatprep.subr.bf16.mxu1 %v13426_v0 }
 0x475   : > { %v668_v44 = vpop.f32.mrb[6].mxu1 }
 0x476   : > { %v672_v46 = vpack.c.bf16 %v668_v44, %v668_v44  ;;  %v11800_v47 = vpop.f32.mrb[7].mxu1  ;;  %v10943_v44 = vld [vmem:[#allocation10 + $0x6] ss:$0 sm:$0xff] }
 0x478   : > { %11804 = vmatmul.mubr.msk.bf16.vlgmr.msra.gmra.mrb[8].mxu0 %vm511_vm2, %v672_v46 }
 0x479   : > { %11816 = vmatpush3.bf16.msra.mxu0 %v12910_v45  ;;  %11819 = vmatprep.mubr.msk.bf16.mxu0 %vm13427_vm0, %v13426_v0 }
 0x47a   : > { %11817 = vmatprep.subr.bf16.mxu0 %v13426_v0 }
 0x47d   : > { %11818 = vmatpush3.bf16.msra.mxu0 %v12912_v48  ;;  %v781_v49 = vpop.f32.mrb[8].mxu1 }
 0x47e   : > { %11831 = vmatprep.subr.mxu0 %v13426_v0  ;;  %v11813_v50 = vpop.f32.mrb[9].mxu1  ;;  %v782_v62 = vadd.f32 %v10927_v58, %v781_v49 }
 0x47f   : > { %v784_v51 = vpop.f32.mrb[10].mxu1 }
 0x480   : > { %11820 = vmatmul.mubr.msk.bf16.vlgmr.msra.gmra.mrb[12].mxu0 %vm345_vm1, %v13708_v8  ;;  %v11814_v52 = vpop.f32.mrb[11].mxu1  ;;  %v12919_v51 = vld [vmem:[#allocation8 + $0x90] sm:$0xff]  }
 0x481   : > { %11833 = vmatprep.mubr.msk.f32.mxu0 %vm13427_vm0, %v13426_v0  ;;  %v12920_v52 = vld [vmem:[#allocation8 + $0x98] sm:$0xff]  }
 0x485   : > { %v903_v14 = vpop.f32.mrb[12].mxu1 }
 0x486   : > { %v11829_v15 = vpop.f32.mrb[13].mxu1  ;;  %v904_v19 = vadd.f32 %v10935_v17, %v903_v14  ;;  %v12922_v14 = vld [vmem:[#allocation8 + $0xb8] sm:$0xff]   ;;  %v12924_v17 = vld [vmem:[#allocation8 + $0xc0] sm:$0xff]  }
 0x487   : > { %v906_v16 = vpop.f32.mrb[14].mxu1 }
 0x488   : > { %v11830_v18 = vpop.f32.mrb[15].mxu1 }
 0x54b   : > { %v13754_v53 = vpop.f32.mrb[8].mxu0 }
 0x54c   : > { %v11805_v54 = vpop.f32.mrb[9].mxu0  ;;  %v725_v37 = vadd.f32 %v10926_v36, %v13754_v53  ;;  %v12926_v36 = vld [vmem:[#allocation8 + $0xd0] sm:$0xff]  }
 0x54d   : > { %v718_v55 = vpop.f32.mrb[10].mxu0 }
 0x54e   : > { %v11806_v56 = vpop.f32.mrb[11].mxu0 }
 0x553   : > { %v842_v59 = vpop.f32.mrb[12].mxu0 }
 0x554   : > { %v843_v60 = vadd.f32 %v10931_v57, %v842_v59  ;;  %v11821_v61 = vpop.f32.mrb[13].mxu0 }
 0x555   : > { %v845_v63 = vpop.f32.mrb[14].mxu0 }
 0x556   : > { %v11822_v1 = vpop.f32.mrb[15].mxu0  ;;  %11832 = vmatpush3.xpose.msk.msra.mxu0 %vm511_vm2, %v843_v60 }
 0x557   : > { %11836 = vmatprep.subr.mxu0 %v13426_v0  ;;  %v10951_v1 = vld [vmem:[#allocation10 + $0x8] ss:$0 sm:$0xff] }
 0x559   : > { %11834 = vmatmul.mubr.msk.f32.vlgmr.msra.gmra.mrb[16].mxu0 %vm511_vm2, %v782_v62 }
 0x55a   : > { %11838 = vmatprep.mubr.msk.f32.mxu0 %vm13427_vm0, %v13426_v0  ;;  %11837 = vmatpush3.msra.mxu0 %v904_v19 }
 0x55b   : > { %11847 = vmatprep.subr.bf16.mxu0 %v13426_v0 }
 0x62c   : > { %v981_v4 = vpop.f32.mrb[16].mxu0 }
 0x62d   : > { %v11835_v5 = vpop.f32.mrb[17].mxu0  ;;  %v985_v6 = vsel %vm511_vm2, %v981_v4, -inf }
 0x62e   : > { %986 = vmax.xlane.f32.xlu1 %v985_v6 }
 0x6bb   : > { %v987_v9 = vpop.xlane.xlu1 %986 }
 0x6bc   : > { %v988_v10 = vsub.f32 %v981_v4, %v987_v9  ;;  %v1462_v9 = vld [vmem:[#allocation8 + $0xa0] sm:$0xf] }
 0x6be   : > { %v989_v11 = vmul.f32 1.442695, %v988_v10  ;;  %v1467_v10 = vsel %vm677_vm3, %v1462_v9, 0  ;;  %v12927_v9 = vld [vmem:[#allocation8 + $0xe0] sm:$0xff]  }
 0x6c0   : > { %13077 = vpow2.f32 %v989_v11  ;;  %v12921_v11 = vld [vmem:[#allocation8 + $0xa8] sm:$0xff]  }
 0x6ca   : > { %v13078_v12 = vpop.eup %13077 }
 0x6cb   : > { %v991_v13 = vsel %vm511_vm2, %v13078_v12, 0.0 }
 0x6cc   : > { %992 = vadd.xlane.f32.xlu1 %v991_v13 }
 0x759   : > { %v993_v20 = vpop.xlane.xlu1 %992 }
 0x75a   : > { %13079 = vrcp.f32 %v993_v20 }
 0x764   : > { %v13080_v21 = vpop.eup %13079 }
 0x765   : > { %v995_v22 = vmul.f32 %v13080_v21, %v13078_v12  ;;  %v12923_v12 = vld [vmem:[#allocation8 + $0xb0] sm:$0xff]  }
 0x767   : > { %11839 = vmatmul.mubr.msk.f32.vlgmr.msra.gmra.mrb[18].mxu0 %vm511_vm2, %v995_v22 }
 0x768   : > { %11851 = vmatprep.mubr.msk.bf16.mxu0 %vm13427_vm0, %v13426_v0  ;;  %11848 = vmatpush3.bf16.msra.mxu0 %v12915_v25 }
 0x769   : > { %11849 = vmatprep.subr.bf16.mxu0 %v13426_v0 }
 0x76c   : > { %11850 = vmatpush3.bf16.msra.mxu0 %v12917_v26 }
 0x76d   : > { %11863 = vmatprep.subr.bf16.mxu0 %v13426_v0 }
 0x76f   : > { %11852 = vmatmul.mubr.msk.bf16.vlgmr.msra.gmra.mrb[20].mxu0 %vm345_vm1, %v13708_v8 }
 0x770   : > { %11867 = vmatprep.mubr.msk.bf16.mxu0 %vm13427_vm0, %v13426_v0  ;;  %11864 = vmatpush3.bf16.msra.mxu0 %v12919_v51 }
 0x771   : > { %11865 = vmatprep.subr.bf16.mxu0 %v13426_v0 }
 0x774   : > { %11866 = vmatpush3.bf16.msra.mxu0 %v12920_v52 }
 0x775   : > { %11881 = vmatprep.subr.bf16.mxu0 %v13426_v0 }
 0x777   : > { %11868 = vmatmul.mubr.msk.bf16.vlgmr.msra.gmra.mrb[24].mxu0 %vm345_vm1, %v13708_v8 }
 0x778   : > { %11883 = vmatprep.mubr.msk.bf16.mxu0 %vm13427_vm0, %v13426_v0  ;;  %11882 = vmatpush3.bf16.msra.mxu0 %v1467_v10  ;;  %v12928_v10 = vld [vmem:[#allocation8 + $0xe8] sm:$0xff]  }
 0x779   : > { %11895 = vmatprep.subr.bf16.mxu0 %v13426_v0 }
 0x83a   : > { %v1065_v27 = vpop.f32.mrb[18].mxu0 }
 0x83b   : > { %v1069_v29 = vpack.c.bf16 %v1065_v27, %v1065_v27  ;;  %v11840_v30 = vpop.f32.mrb[19].mxu0  ;;  %v10963_v27 = vld [vmem:[#allocation10 + $0xa] ss:$0 sm:$0xff] }
 0x83d   : > { %11844 = vmatmul.mubr.msk.bf16.vlgmr.msra.gmra.mrb[16].mxu1 %vm511_vm2, %v1069_v29 }
 0x83e   : > { %11856 = vmatpush3.bf16.msra.mxu1 %v12916_v28  ;;  %11859 = vmatprep.mubr.msk.bf16.mxu1 %vm13427_vm0, %v13426_v0  ;;  %v10959_v28 = vld [vmem:[#allocation10 + $0x9] ss:$0 sm:$0xff] }
 0x83f   : > { %11857 = vmatprep.subr.bf16.mxu1 %v13426_v0 }
 0x842   : > { %11858 = vmatpush3.bf16.msra.mxu1 %v12918_v31  ;;  %v1173_v32 = vpop.f32.mrb[20].mxu0 }
 0x843   : > { %11871 = vmatprep.subr.mxu1 %v13426_v0  ;;  %v11853_v33 = vpop.f32.mrb[21].mxu0  ;;  %v1174_v48 = vadd.f32 %v10943_v44, %v1173_v32 }
 0x844   : > { %v1176_v34 = vpop.f32.mrb[22].mxu0 }
 0x845   : > { %11860 = vmatmul.mubr.msk.bf16.vlgmr.msra.gmra.mrb[20].mxu1 %vm345_vm1, %v13708_v8  ;;  %v11854_v35 = vpop.f32.mrb[23].mxu0 }
 0x846   : > { %11873 = vmatprep.mubr.msk.f32.mxu1 %vm13427_vm0, %v13426_v0  ;;  %v12925_v35 = vld [vmem:[#allocation8 + $0xc8] sm:$0xff]  }
 0x84a   : > { %v1295_v61 = vpop.f32.mrb[24].mxu0 }
 0x84b   : > { %v11869_v62 = vpop.f32.mrb[25].mxu0  ;;  %v1296_v3 = vadd.f32 %v10951_v1, %v1295_v61 }
 0x84c   : > { %v1298_v63 = vpop.f32.mrb[26].mxu0 }
 0x84d   : > { %v11870_v2 = vpop.f32.mrb[27].mxu0 }
 0x910   : > { %v1111_v38 = vpop.f32.mrb[16].mxu1 }
 0x911   : > { %v13791_v39 = vadd.f32 %v1111_v38, %v725_v37  ;;  %v11845_v40 = vpop.f32.mrb[17].mxu1 }
 0x912   : > { %v1114_v41 = vpop.f32.mrb[18].mxu1 }
 0x913   : > { %v11846_v42 = vpop.f32.mrb[19].mxu1 }
 0x918   : > { %v1234_v45 = vpop.f32.mrb[20].mxu1 }
 0x919   : > { %v1235_v46 = vadd.f32 %v10947_v43, %v1234_v45  ;;  %v11861_v47 = vpop.f32.mrb[21].mxu1 }
 0x91a   : > { %v1237_v49 = vpop.f32.mrb[22].mxu1 }
 0x91b   : > { %v11862_v50 = vpop.f32.mrb[23].mxu1  ;;  %11872 = vmatpush3.xpose.msk.msra.mxu1 %vm511_vm2, %v1235_v46 }
 0x91c   : > { %11876 = vmatprep.subr.mxu1 %v13426_v0 }
 0x91e   : > { %11874 = vmatmul.mubr.msk.f32.vlgmr.msra.gmra.mrb[24].mxu1 %vm511_vm2, %v1174_v48 }
 0x91f   : > { %11878 = vmatprep.mubr.msk.f32.mxu1 %vm13427_vm0, %v13426_v0  ;;  %11877 = vmatpush3.msra.mxu1 %v1296_v3 }
 0x920   : > { %11887 = vmatprep.subr.bf16.mxu1 %v13426_v0 }
 0x9f1   : > { %v1373_v53 = vpop.f32.mrb[24].mxu1 }
 0x9f2   : > { %v11875_v54 = vpop.f32.mrb[25].mxu1  ;;  %v1377_v55 = vsel %vm511_vm2, %v1373_v53, -inf }
 0x9f3   : > { %1378 = vmax.xlane.f32.xlu0 %v1377_v55 }
 0xa80   : > { %v1379_v56 = vpop.xlane.xlu0 %1378 }
 0xa81   : > { %v1380_v57 = vsub.f32 %v1373_v53, %v1379_v56  ;;  %v1854_v53 = vld [vmem:[#allocation8 + $0xd8] sm:$0xf] }
 0xa82   : > { %v1859_v54 = vsel %vm677_vm3, %v1854_v53, 0 }
 0xa83   : > { %v1381_v58 = vmul.f32 1.442695, %v1380_v57 }
 0xa85   : > { %13081 = vpow2.f32 %v1381_v58 }
 0xa8f   : > { %v13082_v59 = vpop.eup %13081 }
 0xa90   : > { %v1383_v60 = vsel %vm511_vm2, %v13082_v59, 0.0 }
 0xa91   : > { %1384 = vadd.xlane.f32.xlu1 %v1383_v60 }
 0xb1e   : > { %v1385_v4 = vpop.xlane.xlu1 %1384 }
 0xb1f   : > { %13083 = vrcp.f32 %v1385_v4 }
 0xb29   : > { %v13084_v5 = vpop.eup %13083 }
 0xb2a   : > { %v1387_v6 = vmul.f32 %v13084_v5, %v13082_v59 }
 0xb2c   : > { %11879 = vmatmul.mubr.msk.f32.vlgmr.msra.gmra.mrb[26].mxu1 %vm511_vm2, %v1387_v6 }
 0xb2d   : > { %11891 = vmatprep.mubr.msk.bf16.mxu1 %vm13427_vm0, %v13426_v0  ;;  %11888 = vmatpush3.bf16.msra.mxu1 %v12921_v11  ;;  %v12929_v11 = vld [vmem:[#allocation8 + $0xf0] sm:$0xff]  }
 0xb2e   : > { %11889 = vmatprep.subr.bf16.mxu1 %v13426_v0 }
 0xb31   : > { %11890 = vmatpush3.bf16.msra.mxu1 %v12923_v12 }
 0xb32   : > { %11903 = vmatprep.subr.bf16.mxu1 %v13426_v0 }
 0xb34   : > { %11892 = vmatmul.mubr.msk.bf16.vlgmr.msra.gmra.mrb[28].mxu1 %vm345_vm1, %v13708_v8 }
 0xb35   : > { %11907 = vmatprep.mubr.msk.bf16.mxu1 %vm13427_vm0, %v13426_v0  ;;  %11904 = vmatpush3.bf16.msra.mxu1 %v12925_v35 }
 0xb36   : > { %11905 = vmatprep.subr.bf16.mxu1 %v13426_v0 }
 0xb39   : > { %11906 = vmatpush3.bf16.msra.mxu1 %v12926_v36 }
 0xb3a   : > { %11921 = vmatprep.subr.bf16.mxu1 %v13426_v0 }
 0xb3c   : > { %11908 = vmatmul.mubr.msk.bf16.vlgmr.msra.gmra.mrb[32].mxu1 %vm345_vm1, %v13708_v8 }
 0xb3d   : > { %11923 = vmatprep.mubr.msk.bf16.mxu1 %vm13427_vm0, %v13426_v0  ;;  %11922 = vmatpush3.bf16.msra.mxu1 %v1859_v54  ;;  %v10988_v54 = vld [vmem:[#allocation10 + $0x12] ss:$0 sm:$0xff] }
 0xb3e   : > { %11935 = vmatprep.subr.bf16.mxu1 %v13426_v0 }
 0xbff   : > { %v1457_v13 = vpop.f32.mrb[26].mxu1 }
 0xc00   : > { %v1461_v15 = vpack.c.bf16 %v1457_v13, %v1457_v13  ;;  %v11880_v16 = vpop.f32.mrb[27].mxu1 }
 0xc01   : > { %v10975_v16 = vld [vmem:[#allocation10 + $0xd] ss:$0 sm:$0xff] }
 0xc02   : > { %11884 = vmatmul.mubr.msk.bf16.vlgmr.msra.gmra.mrb[28].mxu0 %vm511_vm2, %v1461_v15 }
 0xc03   : > { %11896 = vmatpush3.bf16.msra.mxu0 %v12922_v14  ;;  %11899 = vmatprep.mubr.msk.bf16.mxu0 %vm13427_vm0, %v13426_v0 }
 0xc04   : > { %11897 = vmatprep.subr.bf16.mxu0 %v13426_v0 }
 0xc07   : > { %11898 = vmatpush3.bf16.msra.mxu0 %v12924_v17  ;;  %v1565_v18 = vpop.f32.mrb[28].mxu1 }
 0xc08   : > { %11911 = vmatprep.subr.mxu0 %v13426_v0  ;;  %v11893_v19 = vpop.f32.mrb[29].mxu1  ;;  %v1566_v32 = vadd.f32 %v10959_v28, %v1565_v18  ;;  %v10976_v18 = vld [vmem:[#allocation10 + $0xe] ss:$0 sm:$0xff] }
 0xc09   : > { %v1568_v20 = vpop.f32.mrb[30].mxu1 }
 0xc0a   : > { %11900 = vmatmul.mubr.msk.bf16.vlgmr.msra.gmra.mrb[32].mxu0 %vm345_vm1, %v13708_v8  ;;  %v11894_v21 = vpop.f32.mrb[31].mxu1  ;;  %v10967_v8 = vld [vmem:[#allocation10 + $0xb] ss:$0 sm:$0xff] }
 0xc0b   : > { %11913 = vmatprep.mubr.msk.f32.mxu0 %vm13427_vm0, %v13426_v0 }
 0xc0f   : > { %v1687_v45 = vpop.f32.mrb[32].mxu1 }
 0xc10   : > { %v11909_v46 = vpop.f32.mrb[33].mxu1  ;;  %v1688_v49 = vadd.f32 %v10967_v8, %v1687_v45  ;;  %v12933_v45 = vld [vmem:[#allocation8 + $0x110] sm:$0xff]   ;;  %v12936_v8 = vld [vmem:[#allocation8 + $0x138] sm:$0xff]  }
 0xc11   : > { %v1690_v47 = vpop.f32.mrb[34].mxu1  ;;  %v12934_v46 = vld [vmem:[#allocation8 + $0x130] sm:$0xff]  }
 0xc12   : > { %v11910_v48 = vpop.f32.mrb[35].mxu1  ;;  %v12935_v47 = vld [vmem:[#allocation8 + $0x118] sm:$0xff]  }
 0xcd5   : > { %v1503_v22 = vpop.f32.mrb[28].mxu0 }
 0xcd6   : > { %v1509_v23 = vadd.f32 %v1503_v22, %v13791_v39  ;;  %v11885_v24 = vpop.f32.mrb[29].mxu0  ;;  %v12931_v22 = vld [vmem:[#allocation8 + $0x100] sm:$0xff]  }
 0xcd7   : > { %v1506_v25 = vpop.f32.mrb[30].mxu0  ;;  %v10977_v24 = vld [vmem:[#allocation10 + $0xf] ss:$0 sm:$0xff] }
 0xcd8   : > { %v11886_v26 = vpop.f32.mrb[31].mxu0 }
 0xcdd   : > { %v1626_v29 = vpop.f32.mrb[32].mxu0 }
 0xcde   : > { %v1627_v30 = vadd.f32 %v10963_v27, %v1626_v29  ;;  %v11901_v31 = vpop.f32.mrb[33].mxu0 }
 0xcdf   : > { %v1629_v33 = vpop.f32.mrb[34].mxu0 }
 0xce0   : > { %v11902_v34 = vpop.f32.mrb[35].mxu0  ;;  %11912 = vmatpush3.xpose.msk.msra.mxu0 %vm511_vm2, %v1627_v30 }
 0xce1   : > { %11916 = vmatprep.subr.mxu0 %v13426_v0 }
 0xce3   : > { %11914 = vmatmul.mubr.msk.f32.vlgmr.msra.gmra.mrb[36].mxu0 %vm511_vm2, %v1566_v32  ;;  %v10981_v32 = vld [vmem:[#allocation10 + $0x10] ss:$0 sm:$0xff] }
 0xce4   : > { %11918 = vmatprep.mubr.msk.f32.mxu0 %vm13427_vm0, %v13426_v0  ;;  %11917 = vmatpush3.msra.mxu0 %v1688_v49 }
 0xce5   : > { %11927 = vmatprep.subr.bf16.mxu0 %v13426_v0 }
 0xdb6   : > { %v1765_v37 = vpop.f32.mrb[36].mxu0 }
 0xdb7   : > { %v11915_v38 = vpop.f32.mrb[37].mxu0  ;;  %v1769_v39 = vsel %vm511_vm2, %v1765_v37, -inf }
 0xdb8   : > { %1770 = vmax.xlane.f32.xlu0 %v1769_v39 }
 0xe45   : > { %v1771_v40 = vpop.xlane.xlu0 %1770 }
 0xe46   : > { %v1772_v41 = vsub.f32 %v1765_v37, %v1771_v40 }
 0xe48   : > { %v1773_v42 = vmul.f32 1.442695, %v1772_v41 }
 0xe4a   : > { %13085 = vpow2.f32 %v1773_v42 }
 0xe54   : > { %v13086_v43 = vpop.eup %13085 }
 0xe55   : > { %v1775_v44 = vsel %vm511_vm2, %v13086_v43, 0.0 }
 0xe56   : > { %1776 = vadd.xlane.f32.xlu1 %v1775_v44 }
 0xee3   : > { %v1777_v50 = vpop.xlane.xlu1 %1776 }
 0xee4   : > { %13087 = vrcp.f32 %v1777_v50 }
 0xeee   : > { %v13088_v51 = vpop.eup %13087 }
 0xeef   : > { %v1779_v52 = vmul.f32 %v13088_v51, %v13086_v43 }
 0xef1   : > { %11919 = vmatmul.mubr.msk.f32.vlgmr.msra.gmra.mrb[38].mxu0 %vm511_vm2, %v1779_v52  ;;  %v10987_v52 = vld [vmem:[#allocation10 + $0x11] ss:$0 sm:$0xff] }
 0xef2   : > { %11931 = vmatprep.mubr.msk.bf16.mxu0 %vm13427_vm0, %v13426_v0  ;;  %11928 = vmatpush3.bf16.msra.mxu0 %v12927_v9  ;;  %v10993_v9 = vld [vmem:[#allocation10 + $0x14] ss:$0 sm:$0xff] }
 0xef3   : > { %11929 = vmatprep.subr.bf16.mxu0 %v13426_v0 }
 0xef6   : > { %11930 = vmatpush3.bf16.msra.mxu0 %v12928_v10 }
 0xef7   : > { %11947 = vmatprep.subr.bf16.mxu0 %v13426_v0 }
 0xfc4   : > { %v1849_v55 = vpop.f32.mrb[38].mxu0 }
 0xfc5   : > { %v1853_v56 = vpack.c.bf16 %v1849_v55, %v1849_v55  ;;  %v11920_v57 = vpop.f32.mrb[39].mxu0 }
 0xfc6   : > { %v12937_v57 = vld [vmem:[#allocation8 + $0x120] sm:$0xff]  }
 0xfc7   : > { %11924 = vmatmul.mubr.msk.bf16.vlgmr.msra.gmra.mrb[36].mxu1 %vm511_vm2, %v1853_v56 }
 0xfc8   : > { %11943 = vmatprep.mubr.msk.bf16.mxu1 %vm13427_vm0, %v13426_v0  ;;  %11936 = vmatpush3.bf16.msra.mxu1 %v12929_v11  ;;  %v10989_v11 = vld [vmem:[#allocation10 + $0x13] ss:$0 sm:$0xff] }
 0xfc9   : > { %11937 = vmatprep.subr.bf16.mxu1 %v13426_v0 }
0x109a   : > { %v1895_v58 = vpop.f32.mrb[36].mxu1 }
0x109b   : > { %v1901_v59 = vadd.f32 %v1895_v58, %v1509_v23  ;;  %v11925_v60 = vpop.f32.mrb[37].mxu1  ;;  %v12932_v23 = vld [vmem:[#allocation8 + $0x108] sm:$0xff]  }
0x109c   : > { %v1898_v61 = vpop.f32.mrb[38].mxu1  ;;  %v10997_v60 = vld [vmem:[#allocation10 + $0x15] ss:$0 sm:$0xff] }
0x109d   : > { %v11926_v62 = vpop.f32.mrb[39].mxu1  ;;  %v1902_v63 = vadd.f32 %v1901_v59, %v13704_v7  ;;  %v12930_v7 = vld [vmem:[#allocation8 + $0xf8] sm:$0xff]   ;;  %v12938_v59 = vld [vmem:[#allocation8 + $0x128] sm:$0xff]  }
0x109e   : > { %11938 = vmatpush3.bf16.msra.mxu1 %v12930_v7 }
0x109f   : > { %v1903_v1 = vsel %vm345_vm1, %v1902_v63, 0.0  ;;  %11939 = vmatprep.subr.bf16.mxu1 %v13426_v0 }
0x10a0   : > { %1904 = vadd.xlane.f32.xlu0 %v1903_v1 }
0x10a2   : > { %11940 = vmatpush3.bf16.msra.mxu1 %v12931_v22 }
0x10a3   : > { %11941 = vmatprep.subr.bf16.mxu1 %v13426_v0 }
0x10a6   : > { %11942 = vmatpush3.bf16.msra.mxu1 %v12932_v23 }
0x10a7   : > { %11963 = vmatprep.subr.bf16.mxu1 %v13426_v0 }
0x112d   : > { %v1905_v2 = vpop.xlane.xlu0 %1904 }
0x112e   : > { %v1907_v3 = vmul.f32 0.03125, %v1905_v2 }
0x1130   : > { %v1908_v4 = vsub.f32 %v1902_v63, %v1907_v3 }
0x1132   : > { %v1909_v5 = vmul.f32 %v1908_v4, %v1908_v4 }
0x1134   : > { %v1910_v6 = vsel %vm345_vm1, %v1909_v5, 0.0 }
0x1135   : > { %1911 = vadd.xlane.f32.xlu1 %v1910_v6 }
0x11c2   : > { %v1912_v12 = vpop.xlane.xlu1 %1911 }
0x11c3   : > { %v1913_v13 = vmul.f32 0.03125, %v1912_v12 }
0x11c5   : > { %v1914_v14 = vadd.f32 1e-05, %v1913_v13 }
0x11c7   : > { %13089 = vrsqrt.f32 %v1914_v14 }
0x11d1   : > { %v13090_v15 = vpop.eup %13089 }
0x11d2   : > { %v1916_v17 = vmul.f32 %v13090_v15, %v1908_v4 }
0x11d4   : > { %v1922_v19 = vmul.f32 %v10975_v16, %v1916_v17 }
0x11d6   : > { %v1928_v20 = vadd.f32 %v10976_v18, %v1922_v19 }
0x11d8   : > { %v1929_v21 = vpack.c.bf16 %v1928_v20, %v1928_v20 }
0x11da   : > { %11932 = vmatmul.mubr.msk.bf16.vlgmr.msra.gmra.mrb[40].mxu0 %vm345_vm1, %v1929_v21 }
0x11db   : > { %11951 = vmatprep.mubr.msk.bf16.mxu0 %vm13427_vm0, %v13426_v0  ;;  %11948 = vmatpush3.bf16.msra.mxu0 %v12933_v45 }
0x11dc   : > { %11949 = vmatprep.subr.bf16.mxu0 %v13426_v0 }
0x11df   : > { %11950 = vmatpush3.bf16.msra.mxu0 %v12935_v47 }
0x11e0   : > { %11955 = vmatprep.subr.bf16.mxu0 %v13426_v0 }
0x12ad   : > { %v1988_v25 = vpop.f32.mrb[40].mxu0 }
0x12ae   : > { %v1989_v26 = vadd.f32 %v10977_v24, %v1988_v25  ;;  %v11933_v27 = vpop.f32.mrb[41].mxu0 }
0x12af   : > { %v1991_v28 = vpop.f32.mrb[42].mxu0 }
0x12b0   : > { %v1994_v29 = vmax.f32 %v1989_v26, 0.0  ;;  %v11934_v30 = vpop.f32.mrb[43].mxu0  ;;  %v12939_v26 = vld [vmem:[#allocation8 + $0x148] sm:$0xff]   ;;  %v12940_v28 = vld [vmem:[#allocation8 + $0x150] sm:$0xff]  }
0x12b1   : > { %v12942_v30 = vld [vmem:[#allocation8 + $0x170] sm:$0xff]  }
0x12b2   : > { %v1995_v31 = vpack.c.bf16 %v1994_v29, %v1994_v29  ;;  %v12941_v29 = vld [vmem:[#allocation8 + $0x168] sm:$0xff]  }
0x12b4   : > { %11944 = vmatmul.mubr.msk.bf16.vlgmr.msra.gmra.mrb[40].mxu1 %vm2033_vm4, %v1995_v31  ;;  %v2452_v31 = vld [vmem:[#allocation8 + $0x140] sm:$0xf] }
0x12b5   : > { %11967 = vmatprep.mubr.msk.bf16.mxu1 %vm13427_vm0, %v13426_v0  ;;  %11964 = vmatpush3.bf16.msra.mxu1 %v12934_v46 }
0x12b6   : > { %11965 = vmatprep.subr.bf16.mxu1 %v13426_v0 }
0x12b9   : > { %11966 = vmatpush3.bf16.msra.mxu1 %v12936_v8 }
0x12ba   : > { %11976 = vmatprep.subr.mxu1 %v13426_v0 }
0x1387   : > { %v2071_v33 = vpop.f32.mrb[40].mxu1 }
0x1388   : > { %v2072_v34 = vadd.f32 %v10981_v32, %v2071_v33  ;;  %v11945_v35 = vpop.f32.mrb[41].mxu1  ;;  %v2457_v32 = vsel %vm677_vm3, %v2452_v31, 0 }
0x1389   : > { %v2074_v36 = vpop.f32.mrb[42].mxu1 }
0x138a   : > { %v11946_v37 = vpop.f32.mrb[43].mxu1  ;;  %v2077_v38 = vadd.f32 %v2072_v34, %v1928_v20  ;;  %v12943_v34 = vld [vmem:[#allocation8 + $0x158] sm:$0xff]  }
0x138b   : > { %v12944_v37 = vld [vmem:[#allocation8 + $0x160] sm:$0xff]  }
0x138c   : > { %v2078_v39 = vsel %vm345_vm1, %v2077_v38, 0.0 }
0x138d   : > { %2079 = vadd.xlane.f32.xlu0 %v2078_v39 }
0x141a   : > { %v2080_v40 = vpop.xlane.xlu0 %2079 }
0x141b   : > { %v2081_v41 = vmul.f32 0.03125, %v2080_v40 }
0x141d   : > { %v2082_v42 = vsub.f32 %v2077_v38, %v2081_v41 }
0x141f   : > { %v2083_v43 = vmul.f32 %v2082_v42, %v2082_v42 }
0x1421   : > { %v2084_v44 = vsel %vm345_vm1, %v2083_v43, 0.0 }
0x1422   : > { %2085 = vadd.xlane.f32.xlu1 %v2084_v44 }
0x14af   : > { %v2086_v48 = vpop.xlane.xlu1 %2085 }
0x14b0   : > { %v2087_v49 = vmul.f32 0.03125, %v2086_v48 }
0x14b2   : > { %v2088_v50 = vadd.f32 1e-05, %v2087_v49  ;;  %v11010_v49 = vld [vmem:[#allocation10 + $0x17] ss:$0 sm:$0xff] }
0x14b4   : > { %13091 = vrsqrt.f32 %v2088_v50 }
0x14be   : > { %v13092_v51 = vpop.eup %13091 }
0x14bf   : > { %v2090_v53 = vmul.f32 %v13092_v51, %v2082_v42  ;;  %v11006_v51 = vld [vmem:[#allocation10 + $0x16] ss:$0 sm:$0xff] }
0x14c1   : > { %v2096_v55 = vmul.f32 %v10987_v52, %v2090_v53 }
0x14c3   : > { %v13871_v56 = vadd.f32 %v10988_v54, %v2096_v55  ;;  %v11014_v54 = vld [vmem:[#allocation10 + $0x18] ss:$0 sm:$0xff] }
0x14c5   : > { %v13875_v58 = vpack.c.bf16 %v13871_v56, %v13871_v56 }
0x14c7   : > { %11952 = vmatmul.mubr.msk.bf16.vlgmr.msra.gmra.mrb[44].mxu0 %vm345_vm1, %v13875_v58  ;;  %11968 = vmatmul.mubr.msk.bf16.vlgmr.msra.gmra.mrb[44].mxu1 %vm345_vm1, %v13875_v58 }
0x14c8   : > { %11956 = vmatpush3.bf16.msra.mxu0 %v12937_v57  ;;  %11959 = vmatprep.mubr.msk.bf16.mxu0 %vm13427_vm0, %v13426_v0 }
0x14c9   : > { %11957 = vmatprep.subr.bf16.mxu0 %v13426_v0  ;;  %11978 = vmatprep.mubr.msk.f32.mxu1 %vm13427_vm0, %v13426_v0 }
0x14cc   : > { %11958 = vmatpush3.bf16.msra.mxu0 %v12938_v59 }
0x14cd   : > { %11971 = vmatprep.subr.mxu0 %v13426_v0 }
0x14cf   : > { %11960 = vmatmul.mubr.msk.bf16.vlgmr.msra.gmra.mrb[48].mxu0 %vm345_vm1, %v13875_v58 }
0x14d0   : > { %11973 = vmatprep.mubr.msk.f32.mxu0 %vm13427_vm0, %v13426_v0 }
0x159a   : > { %v2163_v61 = vpop.f32.mrb[44].mxu0  ;;  %v2285_v62 = vpop.f32.mrb[44].mxu1 }
0x159b   : > { %v2286_v63 = vadd.f32 %v10997_v60, %v2285_v62  ;;  %v11953_v1 = vpop.f32.mrb[45].mxu0  ;;  %v11969_v2 = vpop.f32.mrb[45].mxu1  ;;  %v2164_v15 = vadd.f32 %v10989_v11, %v2163_v61 }
0x159c   : > { %v2166_v3 = vpop.f32.mrb[46].mxu0  ;;  %v2288_v4 = vpop.f32.mrb[46].mxu1 }
0x159d   : > { %v11954_v5 = vpop.f32.mrb[47].mxu0  ;;  %v11970_v6 = vpop.f32.mrb[47].mxu1  ;;  %11977 = vmatpush3.msra.mxu1 %v2286_v63 }
0x159e   : > { %11987 = vmatprep.subr.bf16.mxu1 %v13426_v0 }
0x15a2   : > { %v2224_v10 = vpop.f32.mrb[48].mxu0 }
0x15a3   : > { %v2225_v7 = vadd.f32 %v10993_v9, %v2224_v10  ;;  %v11961_v12 = vpop.f32.mrb[49].mxu0  ;;  %v12945_v10 = vld [vmem:[#allocation8 + $0x180] sm:$0xff]  }
0x15a4   : > { %v2227_v13 = vpop.f32.mrb[50].mxu0  ;;  %v12947_v12 = vld [vmem:[#allocation8 + $0x1a0] sm:$0xff]  }
0x15a5   : > { %v11962_v14 = vpop.f32.mrb[51].mxu0  ;;  %11972 = vmatpush3.xpose.msk.msra.mxu0 %vm511_vm2, %v2225_v7  ;;  %v12946_v7 = vld [vmem:[#allocation8 + $0x188] sm:$0xff]  }
0x15a6   : > { %11981 = vmatprep.subr.bf16.mxu0 %v13426_v0  ;;  %v12948_v13 = vld [vmem:[#allocation8 + $0x1a8] sm:$0xff]   ;;  %v2848_v14 = vld [vmem:[#allocation8 + $0x178] sm:$0xf] }
0x15a8   : > { %11974 = vmatmul.mubr.msk.f32.vlgmr.msra.gmra.mrb[52].mxu0 %vm511_vm2, %v2164_v15  ;;  %v2853_v15 = vsel %vm677_vm3, %v2848_v14, 0 }
0x15a9   : > { %11983 = vmatprep.mubr.msk.bf16.mxu0 %vm13427_vm0, %v13426_v0  ;;  %11982 = vmatpush3.bf16.msra.mxu0 %v2457_v32 }
0x15aa   : > { %11995 = vmatprep.subr.bf16.mxu0 %v13426_v0 }
0x167b   : > { %v2363_v16 = vpop.f32.mrb[52].mxu0 }
0x167c   : > { %v11975_v17 = vpop.f32.mrb[53].mxu0  ;;  %v2367_v18 = vsel %vm511_vm2, %v2363_v16, -inf }
0x167d   : > { %2368 = vmax.xlane.f32.xlu0 %v2367_v18  ;;  %v12949_v17 = vld [vmem:[#allocation8 + $0x190] sm:$0xff]  }
0x170a   : > { %v2369_v19 = vpop.xlane.xlu0 %2368 }
0x170b   : > { %v2370_v20 = vsub.f32 %v2363_v16, %v2369_v19 }
0x170d   : > { %v2371_v21 = vmul.f32 1.442695, %v2370_v20  ;;  %v12950_v20 = vld [vmem:[#allocation8 + $0x198] sm:$0xff]  }
0x170f   : > { %13093 = vpow2.f32 %v2371_v21 }
0x1719   : > { %v13094_v22 = vpop.eup %13093 }
0x171a   : > { %v2373_v23 = vsel %vm511_vm2, %v13094_v22, 0.0 }
0x171b   : > { %2374 = vadd.xlane.f32.xlu1 %v2373_v23 }
0x17a8   : > { %v2375_v24 = vpop.xlane.xlu1 %2374 }
0x17a9   : > { %13095 = vrcp.f32 %v2375_v24 }
0x17b3   : > { %v13096_v25 = vpop.eup %13095 }
0x17b4   : > { %v2377_v27 = vmul.f32 %v13096_v25, %v13094_v22 }
0x17b6   : > { %11979 = vmatmul.mubr.msk.f32.vlgmr.msra.gmra.mrb[48].mxu1 %vm511_vm2, %v2377_v27 }
0x17b7   : > { %11988 = vmatpush3.bf16.msra.mxu1 %v12939_v26  ;;  %11991 = vmatprep.mubr.msk.bf16.mxu1 %vm13427_vm0, %v13426_v0 }
0x17b8   : > { %11989 = vmatprep.subr.bf16.mxu1 %v13426_v0 }
0x17bb   : > { %11990 = vmatpush3.bf16.msra.mxu1 %v12940_v28 }
0x17bc   : > { %12003 = vmatprep.subr.bf16.mxu1 %v13426_v0 }
0x17be   : > { %11992 = vmatmul.mubr.msk.bf16.vlgmr.msra.gmra.mrb[52].mxu1 %vm345_vm1, %v13875_v58 }
0x17bf   : > { %12004 = vmatpush3.bf16.msra.mxu1 %v12941_v29  ;;  %12007 = vmatprep.mubr.msk.bf16.mxu1 %vm13427_vm0, %v13426_v0  ;;  %v11005_v29 = vld [vmem:[#allocation10 + $0x1f] ss:$0 sm:$0xff] }
0x17c0   : > { %12005 = vmatprep.subr.bf16.mxu1 %v13426_v0 }
0x17c3   : > { %12006 = vmatpush3.bf16.msra.mxu1 %v12942_v30 }
0x17c4   : > { %12021 = vmatprep.subr.bf16.mxu1 %v13426_v0 }
0x17c6   : > { %12008 = vmatmul.mubr.msk.bf16.vlgmr.msra.gmra.mrb[56].mxu1 %vm345_vm1, %v13875_v58 }
0x17c7   : > { %12023 = vmatprep.mubr.msk.bf16.mxu1 %vm13427_vm0, %v13426_v0  ;;  %12022 = vmatpush3.bf16.msra.mxu1 %v2853_v15 }
0x17c8   : > { %12035 = vmatprep.subr.bf16.mxu1 %v13426_v0 }
0x1889   : > { %v2447_v33 = vpop.f32.mrb[48].mxu1 }
0x188a   : > { %v2451_v35 = vpack.c.bf16 %v2447_v33, %v2447_v33  ;;  %v11980_v36 = vpop.f32.mrb[49].mxu1 }
0x188b   : > { %v11026_v36 = vld [vmem:[#allocation10 + $0x1a] ss:$0 sm:$0xff] }
0x188c   : > { %11984 = vmatmul.mubr.msk.bf16.vlgmr.msra.gmra.mrb[56].mxu0 %vm511_vm2, %v2451_v35 }
0x188d   : > { %11996 = vmatpush3.bf16.msra.mxu0 %v12943_v34  ;;  %11999 = vmatprep.mubr.msk.bf16.mxu0 %vm13427_vm0, %v13426_v0 }
0x188e   : > { %11997 = vmatprep.subr.bf16.mxu0 %v13426_v0 }
0x1891   : > { %v2559_v38 = vpop.f32.mrb[52].mxu1  ;;  %11998 = vmatpush3.bf16.msra.mxu0 %v12944_v37 }
0x1892   : > { %v11993_v39 = vpop.f32.mrb[53].mxu1  ;;  %12011 = vmatprep.subr.mxu0 %v13426_v0  ;;  %v2560_v59 = vadd.f32 %v11006_v51, %v2559_v38  ;;  %v11022_v38 = vld [vmem:[#allocation10 + $0x19] ss:$0 sm:$0xff] }
0x1893   : > { %v2562_v40 = vpop.f32.mrb[54].mxu1 }
0x1894   : > { %v11994_v41 = vpop.f32.mrb[55].mxu1  ;;  %12000 = vmatmul.mubr.msk.bf16.vlgmr.msra.gmra.mrb[60].mxu0 %vm345_vm1, %v13875_v58 }
0x1895   : > { %12013 = vmatprep.mubr.msk.f32.mxu0 %vm13427_vm0, %v13426_v0  ;;  %v11030_v41 = vld [vmem:[#allocation10 + $0x1b] ss:$0 sm:$0xff] }
0x1899   : > { %v2681_v42 = vpop.f32.mrb[56].mxu1 }
0x189a   : > { %v12009_v43 = vpop.f32.mrb[57].mxu1  ;;  %v2682_v60 = vadd.f32 %v11014_v54, %v2681_v42 }
0x189b   : > { %v2684_v44 = vpop.f32.mrb[58].mxu1 }
0x189c   : > { %v12010_v45 = vpop.f32.mrb[59].mxu1 }
0x195f   : > { %v13925_v46 = vpop.f32.mrb[56].mxu0 }
0x1960   : > { %v11985_v47 = vpop.f32.mrb[57].mxu0  ;;  %v2503_v30 = vadd.f32 %v11005_v29, %v13925_v46 }
0x1961   : > { %v2496_v8 = vpop.f32.mrb[58].mxu0 }
0x1962   : > { %v11986_v48 = vpop.f32.mrb[59].mxu0 }
0x1967   : > { %v2620_v50 = vpop.f32.mrb[60].mxu0 }
0x1968   : > { %v2621_v52 = vadd.f32 %v11010_v49, %v2620_v50  ;;  %v12001_v53 = vpop.f32.mrb[61].mxu0 }
0x1969   : > { %v2623_v55 = vpop.f32.mrb[62].mxu0 }
0x196a   : > { %v12002_v57 = vpop.f32.mrb[63].mxu0  ;;  %12012 = vmatpush3.xpose.msk.msra.mxu0 %vm511_vm2, %v2621_v52  ;;  %v12951_v55 = vld [vmem:[#allocation8 + $0x1b8] sm:$0xff]  }
0x196b   : > { %12016 = vmatprep.subr.mxu0 %v13426_v0 }
0x196d   : > { %12014 = vmatmul.mubr.msk.f32.vlgmr.msra.gmra.mrb[54].mxu0 %vm511_vm2, %v2560_v59  ;;  %v12952_v59 = vld [vmem:[#allocation8 + $0x1c0] sm:$0xff]  }
0x196e   : > { %12017 = vmatpush3.msra.mxu0 %v2682_v60  ;;  %12018 = vmatprep.mubr.msk.f32.mxu0 %vm13427_vm0, %v13426_v0  ;;  %v12953_v60 = vld [vmem:[#allocation8 + $0x1d8] sm:$0xff]  }
0x196f   : > { %12027 = vmatprep.subr.bf16.mxu0 %v13426_v0 }
0x1a40   : > { %v2759_v61 = vpop.f32.mrb[54].mxu0 }
0x1a41   : > { %v12015_v62 = vpop.f32.mrb[55].mxu0  ;;  %v2763_v63 = vsel %vm511_vm2, %v2759_v61, -inf }
0x1a42   : > { %2764 = vmax.xlane.f32.xlu0 %v2763_v63  ;;  %v3240_v62 = vld [vmem:[#allocation8 + $0x1b0] sm:$0xf] }
0x1a43   : > { %v3245_v63 = vsel %vm677_vm3, %v3240_v62, 0 }
0x1acf   : > { %v2765_v1 = vpop.xlane.xlu0 %2764 }
0x1ad0   : > { %v2766_v2 = vsub.f32 %v2759_v61, %v2765_v1  ;;  %v12954_v61 = vld [vmem:[#allocation8 + $0x1e0] sm:$0xff]  }
0x1ad2   : > { %v2767_v3 = vmul.f32 1.442695, %v2766_v2  ;;  %v12955_v2 = vld [vmem:[#allocation8 + $0x1c8] sm:$0xff]  }
0x1ad4   : > { %13097 = vpow2.f32 %v2767_v3 }
0x1ade   : > { %v13098_v4 = vpop.eup %13097 }
0x1adf   : > { %v2769_v5 = vsel %vm511_vm2, %v13098_v4, 0.0 }
0x1ae0   : > { %2770 = vadd.xlane.f32.xlu1 %v2769_v5  ;;  %v12956_v5 = vld [vmem:[#allocation8 + $0x1d0] sm:$0xff]  }
0x1b6d   : > { %v2771_v6 = vpop.xlane.xlu1 %2770 }
0x1b6e   : > { %13099 = vrcp.f32 %v2771_v6 }
0x1b78   : > { %v13100_v9 = vpop.eup %13099 }
0x1b79   : > { %v2773_v11 = vmul.f32 %v13100_v9, %v13098_v4 }
0x1b7b   : > { %12019 = vmatmul.mubr.msk.f32.vlgmr.msra.gmra.mrb[64].mxu0 %vm511_vm2, %v2773_v11 }
0x1b7c   : > { %12028 = vmatpush3.bf16.msra.mxu0 %v12945_v10  ;;  %12031 = vmatprep.mubr.msk.bf16.mxu0 %vm13427_vm0, %v13426_v0 }
0x1b7d   : > { %12029 = vmatprep.subr.bf16.mxu0 %v13426_v0 }
0x1b80   : > { %12030 = vmatpush3.bf16.msra.mxu0 %v12946_v7 }
0x1b81   : > { %12043 = vmatprep.subr.bf16.mxu0 %v13426_v0 }
0x1b83   : > { %12032 = vmatmul.mubr.msk.bf16.vlgmr.msra.gmra.mrb[68].mxu0 %vm345_vm1, %v13875_v58 }
0x1b84   : > { %12044 = vmatpush3.bf16.msra.mxu0 %v12947_v12  ;;  %12047 = vmatprep.mubr.msk.bf16.mxu0 %vm13427_vm0, %v13426_v0 }
0x1b85   : > { %12045 = vmatprep.subr.bf16.mxu0 %v13426_v0 }
0x1b88   : > { %12046 = vmatpush3.bf16.msra.mxu0 %v12948_v13 }
0x1b89   : > { %12061 = vmatprep.subr.bf16.mxu0 %v13426_v0 }
0x1b8b   : > { %12048 = vmatmul.mubr.msk.bf16.vlgmr.msra.gmra.mrb[72].mxu0 %vm345_vm1, %v13875_v58 }
0x1b8c   : > { %12063 = vmatprep.mubr.msk.bf16.mxu0 %vm13427_vm0, %v13426_v0  ;;  %12062 = vmatpush3.bf16.msra.mxu0 %v3245_v63 }
0x1b8d   : > { %12075 = vmatprep.subr.bf16.mxu0 %v13426_v0 }
0x1c4e   : > { %v2843_v16 = vpop.f32.mrb[64].mxu0 }
0x1c4f   : > { %v2847_v18 = vpack.c.bf16 %v2843_v16, %v2843_v16  ;;  %v12020_v19 = vpop.f32.mrb[65].mxu0 }
0x1c51   : > { %12024 = vmatmul.mubr.msk.bf16.vlgmr.msra.gmra.mrb[60].mxu1 %vm511_vm2, %v2847_v18 }
0x1c52   : > { %12036 = vmatpush3.bf16.msra.mxu1 %v12949_v17  ;;  %12039 = vmatprep.mubr.msk.bf16.mxu1 %vm13427_vm0, %v13426_v0 }
0x1c53   : > { %12037 = vmatprep.subr.bf16.mxu1 %v13426_v0 }
0x1c56   : > { %v2951_v21 = vpop.f32.mrb[68].mxu0  ;;  %12038 = vmatpush3.bf16.msra.mxu1 %v12950_v20  ;;  %v11042_v20 = vld [vmem:[#allocation10 + $0x1d] ss:$0 sm:$0xff] }
0x1c57   : > { %v12033_v22 = vpop.f32.mrb[69].mxu0  ;;  %12051 = vmatprep.subr.mxu1 %v13426_v0  ;;  %v2952_v44 = vadd.f32 %v11022_v38, %v2951_v21 }
0x1c58   : > { %v2954_v23 = vpop.f32.mrb[70].mxu0  ;;  %v11038_v22 = vld [vmem:[#allocation10 + $0x1c] ss:$0 sm:$0xff] }
0x1c59   : > { %v12034_v24 = vpop.f32.mrb[71].mxu0  ;;  %12040 = vmatmul.mubr.msk.bf16.vlgmr.msra.gmra.mrb[64].mxu1 %vm345_vm1, %v13875_v58 }
0x1c5a   : > { %12053 = vmatprep.mubr.msk.f32.mxu1 %vm13427_vm0, %v13426_v0 }
0x1c5e   : > { %v3073_v25 = vpop.f32.mrb[72].mxu0 }
0x1c5f   : > { %v12049_v26 = vpop.f32.mrb[73].mxu0  ;;  %v3074_v45 = vadd.f32 %v11030_v41, %v3073_v25  ;;  %v11046_v25 = vld [vmem:[#allocation10 + $0x1e] ss:$0 sm:$0xff] }
0x1c60   : > { %v3076_v27 = vpop.f32.mrb[74].mxu0 }
0x1c61   : > { %v12050_v28 = vpop.f32.mrb[75].mxu0 }
0x1d24   : > { %v2889_v31 = vpop.f32.mrb[60].mxu1 }
0x1d25   : > { %v13962_v32 = vadd.f32 %v2889_v31, %v2503_v30  ;;  %v12025_v33 = vpop.f32.mrb[61].mxu1 }
0x1d26   : > { %v2892_v34 = vpop.f32.mrb[62].mxu1 }
0x1d27   : > { %v12026_v35 = vpop.f32.mrb[63].mxu1 }
0x1d2c   : > { %v3012_v37 = vpop.f32.mrb[64].mxu1 }
0x1d2d   : > { %v3013_v39 = vadd.f32 %v11026_v36, %v3012_v37  ;;  %v12041_v40 = vpop.f32.mrb[65].mxu1 }
0x1d2e   : > { %v3015_v42 = vpop.f32.mrb[66].mxu1  ;;  %v3632_v40 = vld [vmem:[#allocation8 + $0x1e8] sm:$0xf] }
0x1d2f   : > { %v12042_v43 = vpop.f32.mrb[67].mxu1  ;;  %12052 = vmatpush3.xpose.msk.msra.mxu1 %vm511_vm2, %v3013_v39  ;;  %v3637_v41 = vsel %vm677_vm3, %v3632_v40, 0 }
0x1d30   : > { %12056 = vmatprep.subr.mxu1 %v13426_v0 }
0x1d32   : > { %12054 = vmatmul.mubr.msk.f32.vlgmr.msra.gmra.mrb[50].mxu1 %vm511_vm2, %v2952_v44 }
0x1d33   : > { %12057 = vmatpush3.msra.mxu1 %v3074_v45  ;;  %12058 = vmatprep.mubr.msk.f32.mxu1 %vm13427_vm0, %v13426_v0 }
0x1d34   : > { %12067 = vmatprep.subr.bf16.mxu1 %v13426_v0 }
0x1e05   : > { %v3151_v46 = vpop.f32.mrb[50].mxu1 }
0x1e06   : > { %v12055_v47 = vpop.f32.mrb[51].mxu1  ;;  %v3155_v8 = vsel %vm511_vm2, %v3151_v46, -inf }
0x1e07   : > { %3156 = vmax.xlane.f32.xlu0 %v3155_v8 }
0x1e94   : > { %v3157_v48 = vpop.xlane.xlu0 %3156 }
0x1e95   : > { %v3158_v49 = vsub.f32 %v3151_v46, %v3157_v48 }
0x1e97   : > { %v3159_v50 = vmul.f32 1.442695, %v3158_v49 }
0x1e99   : > { %13101 = vpow2.f32 %v3159_v50 }
0x1ea3   : > { %v13102_v51 = vpop.eup %13101 }
0x1ea4   : > { %v3161_v52 = vsel %vm511_vm2, %v13102_v51, 0.0 }
0x1ea5   : > { %3162 = vadd.xlane.f32.xlu1 %v3161_v52 }
0x1f32   : > { %v3163_v53 = vpop.xlane.xlu1 %3162 }
0x1f33   : > { %13103 = vrcp.f32 %v3163_v53 }
0x1f3d   : > { %v13104_v54 = vpop.eup %13103 }
0x1f3e   : > { %v3165_v57 = vmul.f32 %v13104_v54, %v13102_v51 }
0x1f40   : > { %12059 = vmatmul.mubr.msk.f32.vlgmr.msra.gmra.mrb[68].mxu1 %vm511_vm2, %v3165_v57  ;;  %v12957_v57 = vld [vmem:[#allocation8 + $0x1f0] sm:$0xff]  }
0x1f41   : > { %12068 = vmatpush3.bf16.msra.mxu1 %v12951_v55  ;;  %12071 = vmatprep.mubr.msk.bf16.mxu1 %vm13427_vm0, %v13426_v0 }
0x1f42   : > { %12069 = vmatprep.subr.bf16.mxu1 %v13426_v0 }
0x1f45   : > { %12070 = vmatpush3.bf16.msra.mxu1 %v12952_v59  ;;  %v12958_v59 = vld [vmem:[#allocation8 + $0x1f8] sm:$0xff]  }
0x1f46   : > { %12083 = vmatprep.subr.bf16.mxu1 %v13426_v0 }
0x1f48   : > { %12072 = vmatmul.mubr.msk.bf16.vlgmr.msra.gmra.mrb[72].mxu1 %vm345_vm1, %v13875_v58 }
0x1f49   : > { %12084 = vmatpush3.bf16.msra.mxu1 %v12953_v60  ;;  %12087 = vmatprep.mubr.msk.bf16.mxu1 %vm13427_vm0, %v13426_v0  ;;  %v12963_v60 = vld [vmem:[#allocation8 + $0x200] sm:$0xff]  }
0x1f4a   : > { %12085 = vmatprep.subr.bf16.mxu1 %v13426_v0 }
0x1f4d   : > { %12086 = vmatpush3.bf16.msra.mxu1 %v12954_v61 }
0x1f4e   : > { %12101 = vmatprep.subr.bf16.mxu1 %v13426_v0 }
0x1f50   : > { %12088 = vmatmul.mubr.msk.bf16.vlgmr.msra.gmra.mrb[76].mxu1 %vm345_vm1, %v13875_v58 }
0x1f51   : > { %12103 = vmatprep.mubr.msk.bf16.mxu1 %vm13427_vm0, %v13426_v0  ;;  %12102 = vmatpush3.bf16.msra.mxu1 %v3637_v41 }
0x1f52   : > { %12115 = vmatprep.subr.bf16.mxu1 %v13426_v0 }
0x2013   : > { %v3235_v1 = vpop.f32.mrb[68].mxu1 }
0x2014   : > { %v3239_v3 = vpack.c.bf16 %v3235_v1, %v3235_v1  ;;  %v12060_v4 = vpop.f32.mrb[69].mxu1 }
0x2015   : > { %v11055_v4 = vld [vmem:[#allocation10 + $0x21] ss:$0 sm:$0xff] }
0x2016   : > { %12064 = vmatmul.mubr.msk.bf16.vlgmr.msra.gmra.mrb[76].mxu0 %vm511_vm2, %v3239_v3 }
0x2017   : > { %12076 = vmatpush3.bf16.msra.mxu0 %v12955_v2  ;;  %12079 = vmatprep.mubr.msk.bf16.mxu0 %vm13427_vm0, %v13426_v0  ;;  %v11054_v2 = vld [vmem:[#allocation10 + $0x20] ss:$0 sm:$0xff] }
0x2018   : > { %12077 = vmatprep.subr.bf16.mxu0 %v13426_v0 }
0x201b   : > { %v3343_v6 = vpop.f32.mrb[72].mxu1  ;;  %12078 = vmatpush3.bf16.msra.mxu0 %v12956_v5 }
0x201c   : > { %v12073_v9 = vpop.f32.mrb[73].mxu1  ;;  %12091 = vmatprep.subr.mxu0 %v13426_v0  ;;  %v3344_v27 = vadd.f32 %v11038_v22, %v3343_v6 }
0x201d   : > { %v3346_v10 = vpop.f32.mrb[74].mxu1  ;;  %v12959_v9 = vld [vmem:[#allocation8 + $0x220] sm:$0xff]  }
0x201e   : > { %v12074_v11 = vpop.f32.mrb[75].mxu1  ;;  %12080 = vmatmul.mubr.msk.bf16.vlgmr.msra.gmra.mrb[80].mxu0 %vm345_vm1, %v13875_v58 }
0x201f   : > { %12093 = vmatprep.mubr.msk.f32.mxu0 %vm13427_vm0, %v13426_v0  ;;  %v12960_v11 = vld [vmem:[#allocation8 + $0x228] sm:$0xff]  }
0x2023   : > { %v3465_v7 = vpop.f32.mrb[76].mxu1 }
0x2024   : > { %v12089_v12 = vpop.f32.mrb[77].mxu1  ;;  %v3466_v28 = vadd.f32 %v11046_v25, %v3465_v7  ;;  %v14031_v7 = vld [vmem:[%s274_s15] sm:$0xff] }
0x2025   : > { %v3468_v13 = vpop.f32.mrb[78].mxu1  ;;  %v14036_v12 = vpack.c.bf16 %v14031_v7, %v14031_v7 }
0x2026   : > { %v12090_v14 = vpop.f32.mrb[79].mxu1  ;;  %v12961_v13 = vld [vmem:[#allocation8 + $0x230] sm:$0xff]  }
0x2027   : > { %v12962_v14 = vld [vmem:[#allocation8 + $0x238] sm:$0xff]  }
0x20e9   : > { %v3281_v15 = vpop.f32.mrb[76].mxu0 }
0x20ea   : > { %v3287_v16 = vadd.f32 %v3281_v15, %v13962_v32  ;;  %v12065_v17 = vpop.f32.mrb[77].mxu0  ;;  %v12965_v15 = vld [vmem:[#allocation8 + $0x210] sm:$0xff]  }
0x20eb   : > { %v3284_v18 = vpop.f32.mrb[78].mxu0  ;;  %v11056_v17 = vld [vmem:[#allocation10 + $0x22] ss:$0 sm:$0xff] }
0x20ec   : > { %v12066_v19 = vpop.f32.mrb[79].mxu0 }
0x20f1   : > { %v3404_v21 = vpop.f32.mrb[80].mxu0 }
0x20f2   : > { %v3405_v23 = vadd.f32 %v11042_v20, %v3404_v21  ;;  %v12081_v24 = vpop.f32.mrb[81].mxu0 }
0x20f3   : > { %v3407_v58 = vpop.f32.mrb[82].mxu0 }
0x20f4   : > { %v12082_v26 = vpop.f32.mrb[83].mxu0  ;;  %12092 = vmatpush3.xpose.msk.msra.mxu0 %vm511_vm2, %v3405_v23 }
0x20f5   : > { %12096 = vmatprep.subr.mxu0 %v13426_v0 }
0x20f7   : > { %12094 = vmatmul.mubr.msk.f32.vlgmr.msra.gmra.mrb[66].mxu0 %vm511_vm2, %v3344_v27 }
0x20f8   : > { %12097 = vmatpush3.msra.mxu0 %v3466_v28  ;;  %12098 = vmatprep.mubr.msk.f32.mxu0 %vm13427_vm0, %v13426_v0  ;;  %v11074_v28 = vld [vmem:[#allocation10 + $0x29] ss:$0 sm:$0xff] }
0x20f9   : > { %12107 = vmatprep.subr.bf16.mxu0 %v13426_v0 }
0x21ca   : > { %v3543_v29 = vpop.f32.mrb[66].mxu0 }
0x21cb   : > { %v12095_v30 = vpop.f32.mrb[67].mxu0  ;;  %v3547_v31 = vsel %vm511_vm2, %v3543_v29, -inf }
0x21cc   : > { %3548 = vmax.xlane.f32.xlu0 %v3547_v31  ;;  %v11070_v30 = vld [vmem:[#allocation10 + $0x28] ss:$0 sm:$0xff] }
0x2259   : > { %v3549_v32 = vpop.xlane.xlu0 %3548 }
0x225a   : > { %v3550_v33 = vsub.f32 %v3543_v29, %v3549_v32 }
0x225c   : > { %v3551_v34 = vmul.f32 1.442695, %v3550_v33 }
0x225e   : > { %13105 = vpow2.f32 %v3551_v34 }
0x2268   : > { %v13106_v35 = vpop.eup %13105 }
0x2269   : > { %v3553_v36 = vsel %vm511_vm2, %v13106_v35, 0.0 }
0x226a   : > { %3554 = vadd.xlane.f32.xlu1 %v3553_v36  ;;  %v12967_v36 = vld [vmem:[#allocation8 + $0x240] sm:$0xff]  }
0x22f7   : > { %v3555_v37 = vpop.xlane.xlu1 %3554 }
0x22f8   : > { %13107 = vrcp.f32 %v3555_v37  ;;  %v12968_v37 = vld [vmem:[#allocation8 + $0x248] sm:$0xff]  }
0x2302   : > { %v13108_v38 = vpop.eup %13107 }
0x2303   : > { %v3557_v39 = vmul.f32 %v13108_v38, %v13106_v35 }
0x2305   : > { %12099 = vmatmul.mubr.msk.f32.vlgmr.msra.gmra.mrb[84].mxu0 %vm511_vm2, %v3557_v39 }
0x2306   : > { %12111 = vmatprep.mubr.msk.bf16.mxu0 %vm13427_vm0, %v13426_v0  ;;  %12108 = vmatpush3.bf16.msra.mxu0 %v12957_v57 }
0x2307   : > { %12109 = vmatprep.subr.bf16.mxu0 %v13426_v0 }
0x230a   : > { %12110 = vmatpush3.bf16.msra.mxu0 %v12958_v59 }
0x230b   : > { %12127 = vmatprep.subr.bf16.mxu0 %v13426_v0 }
0x23d8   : > { %v3627_v42 = vpop.f32.mrb[84].mxu0 }
0x23d9   : > { %v3631_v43 = vpack.c.bf16 %v3627_v42, %v3627_v42  ;;  %v12100_v44 = vpop.f32.mrb[85].mxu0 }
0x23db   : > { %12104 = vmatmul.mubr.msk.bf16.vlgmr.msra.gmra.mrb[80].mxu1 %vm511_vm2, %v3631_v43 }
0x23dc   : > { %12123 = vmatprep.mubr.msk.bf16.mxu1 %vm13427_vm0, %v13426_v0  ;;  %12116 = vmatpush3.bf16.msra.mxu1 %v12963_v60  ;;  %v4254_v60 = vld [vmem:[#allocation8 + $0x250] sm:$0xf] }
0x23dd   : > { %12117 = vmatprep.subr.bf16.mxu1 %v13426_v0 }
0x24ae   : > { %v3673_v45 = vpop.f32.mrb[80].mxu1 }
0x24af   : > { %v3679_v46 = vadd.f32 %v3673_v45, %v3287_v16  ;;  %v12105_v47 = vpop.f32.mrb[81].mxu1  ;;  %v12966_v16 = vld [vmem:[#allocation8 + $0x218] sm:$0xff]  }
0x24b0   : > { %v3676_v8 = vpop.f32.mrb[82].mxu1 }
0x24b1   : > { %v12106_v48 = vpop.f32.mrb[83].mxu1  ;;  %v3680_v49 = vadd.f32 %v3679_v46, %v13871_v56  ;;  %v12964_v56 = vld [vmem:[#allocation8 + $0x208] sm:$0xff]  }
0x24b2   : > { %12118 = vmatpush3.bf16.msra.mxu1 %v12964_v56  ;;  %v4259_v56 = vsel %vm677_vm3, %v4254_v60, 0 }
0x24b3   : > { %v3681_v50 = vsel %vm345_vm1, %v3680_v49, 0.0  ;;  %12119 = vmatprep.subr.bf16.mxu1 %v13426_v0 }
0x24b4   : > { %3682 = vadd.xlane.f32.xlu0 %v3681_v50 }
0x24b6   : > { %12120 = vmatpush3.bf16.msra.mxu1 %v12965_v15 }
0x24b7   : > { %12121 = vmatprep.subr.bf16.mxu1 %v13426_v0 }
0x24ba   : > { %12122 = vmatpush3.bf16.msra.mxu1 %v12966_v16 }
0x24bb   : > { %12143 = vmatprep.subr.bf16.mxu1 %v13426_v0 }
0x2541   : > { %v3683_v51 = vpop.xlane.xlu0 %3682 }
0x2542   : > { %v3684_v52 = vmul.f32 0.03125, %v3683_v51 }
0x2544   : > { %v3685_v53 = vsub.f32 %v3680_v49, %v3684_v52  ;;  %v11078_v52 = vld [vmem:[#allocation10 + $0x2a] ss:$0 sm:$0xff] }
0x2546   : > { %v3686_v54 = vmul.f32 %v3685_v53, %v3685_v53 }
0x2548   : > { %v3687_v55 = vsel %vm345_vm1, %v3686_v54, 0.0 }
0x2549   : > { %3688 = vadd.xlane.f32.xlu1 %v3687_v55 }
0x25d6   : > { %v3689_v61 = vpop.xlane.xlu1 %3688 }
0x25d7   : > { %v3690_v62 = vmul.f32 0.03125, %v3689_v61  ;;  %v12969_v61 = vld [vmem:[#allocation8 + $0x258] sm:$0xff]  }
0x25d9   : > { %v3691_v63 = vadd.f32 1e-05, %v3690_v62  ;;  %v12971_v62 = vld [vmem:[#allocation8 + $0x260] sm:$0xff]  }
0x25db   : > { %13109 = vrsqrt.f32 %v3691_v63 }
0x25e5   : > { %v13110_v1 = vpop.eup %13109 }
0x25e6   : > { %v3693_v3 = vmul.f32 %v13110_v1, %v3685_v53  ;;  %v12970_v1 = vld [vmem:[#allocation8 + $0x268] sm:$0xff]  }
0x25e8   : > { %v3699_v5 = vmul.f32 %v11054_v2, %v3693_v3 }
0x25ea   : > { %v14022_v6 = vadd.f32 %v11055_v4, %v3699_v5  ;;  %v12972_v4 = vld [vmem:[#allocation8 + $0x270] sm:$0xff]  }
0x25ec   : > { %v3706_v10 = vpack.c.bf16 %v14022_v6, %v14022_v6 }
0x25ee   : > { %12112 = vmatmul.mubr.msk.bf16.vlgmr.msra.gmra.mrb[88].mxu0 %vm345_vm1, %v3706_v10 }
0x25ef   : > { %12128 = vmatpush3.bf16.msra.mxu0 %v12959_v9  ;;  %12131 = vmatprep.mubr.msk.bf16.mxu0 %vm13427_vm0, %v13426_v0 }
0x25f0   : > { %12129 = vmatprep.subr.bf16.mxu0 %v13426_v0 }
0x25f3   : > { %12130 = vmatpush3.bf16.msra.mxu0 %v12960_v11 }
0x25f4   : > { %12135 = vmatprep.subr.bf16.mxu0 %v13426_v0 }
0x25f6   : > { %12132 = vmatmul.mubr.msk.bf16.vlgmr.msra.gmra.mrb[92].mxu0 %vm345_vm1, %v14036_v12 }
0x25f7   : > { %12136 = vmatpush3.bf16.msra.mxu0 %v12961_v13  ;;  %12139 = vmatprep.mubr.msk.bf16.mxu0 %vm13427_vm0, %v13426_v0 }
0x25f8   : > { %12137 = vmatprep.subr.bf16.mxu0 %v13426_v0 }
0x25fb   : > { %12138 = vmatpush3.bf16.msra.mxu0 %v12962_v14 }
0x25fc   : > { %12151 = vmatprep.subr.mxu0 %v13426_v0 }
0x25fe   : > { %12140 = vmatmul.mubr.msk.bf16.vlgmr.msra.gmra.mrb[96].mxu0 %vm345_vm1, %v14036_v12 }
0x25ff   : > { %12153 = vmatprep.mubr.msk.f32.mxu0 %vm13427_vm0, %v13426_v0 }
0x26c1   : > { %v3765_v18 = vpop.f32.mrb[88].mxu0 }
0x26c2   : > { %v3766_v19 = vadd.f32 %v11056_v17, %v3765_v18  ;;  %v12113_v20 = vpop.f32.mrb[89].mxu0  ;;  %v11091_v17 = vld [vmem:[#allocation10 + $0x2c] ss:$0 sm:$0xff]  ;;  %v11087_v18 = vld [vmem:[#allocation10 + $0x2b] ss:$0 sm:$0xff] }
0x26c3   : > { %v3768_v21 = vpop.f32.mrb[90].mxu0 }
0x26c4   : > { %v3771_v22 = vmax.f32 %v3766_v19, 0.0  ;;  %v12114_v23 = vpop.f32.mrb[91].mxu0 }
0x26c6   : > { %v3772_v24 = vpack.c.bf16 %v3771_v22, %v3771_v22 }
0x26c8   : > { %12124 = vmatmul.mubr.msk.bf16.vlgmr.msra.gmra.mrb[84].mxu1 %vm2033_vm4, %v3772_v24 }
0x26c9   : > { %v3965_v25 = vpop.f32.mrb[92].mxu0  ;;  %12147 = vmatprep.mubr.msk.bf16.mxu1 %vm13427_vm0, %v13426_v0  ;;  %12144 = vmatpush3.bf16.msra.mxu1 %v12967_v36 }
0x26ca   : > { %v12133_v58 = vpop.f32.mrb[93].mxu0  ;;  %v3966_v35 = vadd.f32 %v11070_v30, %v3965_v25  ;;  %12145 = vmatprep.subr.bf16.mxu1 %v13426_v0  ;;  %v12973_v25 = vld [vmem:[#allocation8 + $0x278] sm:$0xff]  }
0x26cb   : > { %v3968_v26 = vpop.f32.mrb[94].mxu0  ;;  %v12974_v58 = vld [vmem:[#allocation8 + $0x280] sm:$0xff]  }
0x26cc   : > { %v12134_v27 = vpop.f32.mrb[95].mxu0 }
0x26cd   : > { %12146 = vmatpush3.bf16.msra.mxu1 %v12968_v37  ;;  %v11095_v37 = vld [vmem:[#allocation10 + $0x2d] ss:$0 sm:$0xff] }
0x26ce   : > { %12156 = vmatprep.subr.mxu1 %v13426_v0 }
0x26d0   : > { %12148 = vmatmul.mubr.msk.bf16.vlgmr.msra.gmra.mrb[88].mxu1 %vm345_vm1, %v14036_v12 }
0x26d1   : > { %v4026_v29 = vpop.f32.mrb[96].mxu0  ;;  %12158 = vmatprep.mubr.msk.f32.mxu1 %vm13427_vm0, %v13426_v0 }
0x26d2   : > { %v4027_v31 = vadd.f32 %v11074_v28, %v4026_v29  ;;  %v12141_v32 = vpop.f32.mrb[97].mxu0 }
0x26d3   : > { %v4029_v33 = vpop.f32.mrb[98].mxu0 }
0x26d4   : > { %v12142_v34 = vpop.f32.mrb[99].mxu0  ;;  %12152 = vmatpush3.xpose.msk.msra.mxu0 %vm511_vm2, %v4027_v31 }
0x26d5   : > { %12161 = vmatprep.subr.bf16.mxu0 %v13426_v0 }
0x26d7   : > { %12154 = vmatmul.mubr.msk.f32.vlgmr.msra.gmra.mrb[86].mxu0 %vm511_vm2, %v3966_v35 }
0x26d8   : > { %12163 = vmatprep.mubr.msk.bf16.mxu0 %vm13427_vm0, %v13426_v0  ;;  %12162 = vmatpush3.bf16.msra.mxu0 %v4259_v56 }
0x26d9   : > { %12175 = vmatprep.subr.bf16.mxu0 %v13426_v0 }
0x279b   : > { %v14065_v38 = vpop.f32.mrb[84].mxu1 }
0x279c   : > { %v12125_v39 = vpop.f32.mrb[85].mxu1 }
0x279d   : > { %v3850_v40 = vpop.f32.mrb[86].mxu1 }
0x279e   : > { %v12126_v41 = vpop.f32.mrb[87].mxu1 }
0x27a3   : > { %v4087_v49 = vpop.f32.mrb[88].mxu1 }
0x27a4   : > { %v12149_v50 = vpop.f32.mrb[89].mxu1  ;;  %v4088_v54 = vadd.f32 %v11078_v52, %v4087_v49 }
0x27a5   : > { %v4090_v51 = vpop.f32.mrb[90].mxu1 }
0x27a6   : > { %v12150_v53 = vpop.f32.mrb[91].mxu1  ;;  %12157 = vmatpush3.msra.mxu1 %v4088_v54  ;;  %v12978_v51 = vld [vmem:[#allocation8 + $0x2a8] sm:$0xff]  }
0x27a7   : > { %12167 = vmatprep.subr.bf16.mxu1 %v13426_v0 }
0x27aa   : > { %v4165_v42 = vpop.f32.mrb[86].mxu0 }
0x27ab   : > { %v12155_v43 = vpop.f32.mrb[87].mxu0  ;;  %v4169_v44 = vsel %vm511_vm2, %v4165_v42, -inf }
0x27ac   : > { %4170 = vmax.xlane.f32.xlu0 %v4169_v44  ;;  %v4650_v44 = vld [vmem:[#allocation8 + $0x288] sm:$0xf] }
0x2839   : > { %v4171_v45 = vpop.xlane.xlu0 %4170 }
0x283a   : > { %v4172_v46 = vsub.f32 %v4165_v42, %v4171_v45  ;;  %v4655_v45 = vsel %vm677_vm3, %v4650_v44, 0 }
0x283c   : > { %v4173_v47 = vmul.f32 1.442695, %v4172_v46  ;;  %v12975_v46 = vld [vmem:[#allocation8 + $0x290] sm:$0xff]  }
0x283e   : > { %13111 = vpow2.f32 %v4173_v47  ;;  %v12977_v47 = vld [vmem:[#allocation8 + $0x298] sm:$0xff]  }
0x2848   : > { %v13112_v8 = vpop.eup %13111 }
0x2849   : > { %v4175_v48 = vsel %vm511_vm2, %v13112_v8, 0.0 }
0x284a   : > { %4176 = vadd.xlane.f32.xlu1 %v4175_v48  ;;  %v12976_v48 = vld [vmem:[#allocation8 + $0x2a0] sm:$0xff]  }
0x28d7   : > { %v4177_v55 = vpop.xlane.xlu1 %4176 }
0x28d8   : > { %13113 = vrcp.f32 %v4177_v55 }
0x28e2   : > { %v13114_v57 = vpop.eup %13113 }
0x28e3   : > { %v4179_v59 = vmul.f32 %v13114_v57, %v13112_v8  ;;  %v11086_v57 = vld [vmem:[#allocation10 + $0x34] ss:$0 sm:$0xff] }
0x28e5   : > { %12159 = vmatmul.mubr.msk.f32.vlgmr.msra.gmra.mrb[70].mxu1 %vm511_vm2, %v4179_v59 }
0x28e6   : > { %12171 = vmatprep.mubr.msk.bf16.mxu1 %vm13427_vm0, %v13426_v0  ;;  %12168 = vmatpush3.bf16.msra.mxu1 %v12969_v61 }
0x28e7   : > { %12169 = vmatprep.subr.bf16.mxu1 %v13426_v0 }
0x28ea   : > { %12170 = vmatpush3.bf16.msra.mxu1 %v12971_v62 }
0x28eb   : > { %12183 = vmatprep.subr.bf16.mxu1 %v13426_v0 }
0x28ed   : > { %12172 = vmatmul.mubr.msk.bf16.vlgmr.msra.gmra.mrb[92].mxu1 %vm345_vm1, %v14036_v12 }
0x28ee   : > { %12187 = vmatprep.mubr.msk.bf16.mxu1 %vm13427_vm0, %v13426_v0  ;;  %12184 = vmatpush3.bf16.msra.mxu1 %v12973_v25 }
0x28ef   : > { %12185 = vmatprep.subr.bf16.mxu1 %v13426_v0 }
0x28f2   : > { %12186 = vmatpush3.bf16.msra.mxu1 %v12974_v58  ;;  %v11111_v58 = vld [vmem:[#allocation10 + $0x30] ss:$0 sm:$0xff] }
0x28f3   : > { %12201 = vmatprep.subr.bf16.mxu1 %v13426_v0 }
0x28f5   : > { %12188 = vmatmul.mubr.msk.bf16.vlgmr.msra.gmra.mrb[96].mxu1 %vm345_vm1, %v14036_v12 }
0x28f6   : > { %12203 = vmatprep.mubr.msk.bf16.mxu1 %vm13427_vm0, %v13426_v0  ;;  %12202 = vmatpush3.bf16.msra.mxu1 %v4655_v45 }
0x28f7   : > { %12215 = vmatprep.subr.bf16.mxu1 %v13426_v0 }
0x29b8   : > { %v4249_v63 = vpop.f32.mrb[70].mxu1 }
0x29b9   : > { %v4253_v2 = vpack.c.bf16 %v4249_v63, %v4249_v63  ;;  %v12160_v3 = vpop.f32.mrb[71].mxu1 }
0x29bb   : > { %12164 = vmatmul.mubr.msk.bf16.vlgmr.msra.gmra.mrb[100].mxu0 %vm511_vm2, %v4253_v2  ;;  %v11103_v2 = vld [vmem:[#allocation10 + $0x2e] ss:$0 sm:$0xff] }
0x29bc   : > { %12176 = vmatpush3.bf16.msra.mxu0 %v12970_v1  ;;  %12179 = vmatprep.mubr.msk.bf16.mxu0 %vm13427_vm0, %v13426_v0  ;;  %v11107_v1 = vld [vmem:[#allocation10 + $0x2f] ss:$0 sm:$0xff] }
0x29bd   : > { %12177 = vmatprep.subr.bf16.mxu0 %v13426_v0 }
0x29c0   : > { %12178 = vmatpush3.bf16.msra.mxu0 %v12972_v4  ;;  %v4361_v5 = vpop.f32.mrb[92].mxu1 }
0x29c1   : > { %12191 = vmatprep.subr.mxu0 %v13426_v0  ;;  %v12173_v9 = vpop.f32.mrb[93].mxu1  ;;  %v4362_v22 = vadd.f32 %v11087_v18, %v4361_v5 }
0x29c2   : > { %v4364_v10 = vpop.f32.mrb[94].mxu1 }
0x29c3   : > { %12180 = vmatmul.mubr.msk.bf16.vlgmr.msra.gmra.mrb[104].mxu0 %vm345_vm1, %v14036_v12  ;;  %v12174_v11 = vpop.f32.mrb[95].mxu1 }
0x29c4   : > { %12193 = vmatprep.mubr.msk.f32.mxu0 %vm13427_vm0, %v13426_v0 }
0x29c8   : > { %v4483_v34 = vpop.f32.mrb[96].mxu1 }
0x29c9   : > { %v12189_v35 = vpop.f32.mrb[97].mxu1  ;;  %v4484_v40 = vadd.f32 %v11095_v37, %v4483_v34  ;;  %v12983_v34 = vld [vmem:[#allocation8 + $0x2d0] sm:$0xff]  }
0x29ca   : > { %v4486_v36 = vpop.f32.mrb[98].mxu1 }
0x29cb   : > { %v12190_v39 = vpop.f32.mrb[99].mxu1  ;;  %v12982_v36 = vld [vmem:[#allocation8 + $0x2d8] sm:$0xff]  }
0x2a8e   : > { %v14090_v13 = vpop.f32.mrb[100].mxu0 }
0x2a8f   : > { %v12165_v14 = vpop.f32.mrb[101].mxu0  ;;  %v4305_v59 = vadd.f32 %v11086_v57, %v14090_v13  ;;  %v12979_v13 = vld [vmem:[#allocation8 + $0x2b0] sm:$0xff]  }
0x2a90   : > { %v4298_v15 = vpop.f32.mrb[102].mxu0  ;;  %v12980_v14 = vld [vmem:[#allocation8 + $0x2b8] sm:$0xff]  }
0x2a91   : > { %v12166_v16 = vpop.f32.mrb[103].mxu0 }
0x2a96   : > { %v4422_v19 = vpop.f32.mrb[104].mxu0 }
0x2a97   : > { %v4423_v20 = vadd.f32 %v11091_v17, %v4422_v19  ;;  %v12181_v21 = vpop.f32.mrb[105].mxu0 }
0x2a98   : > { %v4425_v23 = vpop.f32.mrb[106].mxu0 }
0x2a99   : > { %v12182_v24 = vpop.f32.mrb[107].mxu0  ;;  %12192 = vmatpush3.xpose.msk.msra.mxu0 %vm511_vm2, %v4423_v20 }
0x2a9a   : > { %12196 = vmatprep.subr.mxu0 %v13426_v0 }
0x2a9c   : > { %12194 = vmatmul.mubr.msk.f32.vlgmr.msra.gmra.mrb[108].mxu0 %vm511_vm2, %v4362_v22 }
0x2a9d   : > { %12198 = vmatprep.mubr.msk.f32.mxu0 %vm13427_vm0, %v13426_v0  ;;  %12197 = vmatpush3.msra.mxu0 %v4484_v40  ;;  %v12984_v40 = vld [vmem:[#allocation8 + $0x2e0] sm:$0xff]  }
0x2a9e   : > { %12207 = vmatprep.subr.bf16.mxu0 %v13426_v0 }
0x2b6f   : > { %v4561_v26 = vpop.f32.mrb[108].mxu0 }
0x2b70   : > { %v12195_v27 = vpop.f32.mrb[109].mxu0  ;;  %v4565_v28 = vsel %vm511_vm2, %v4561_v26, -inf }
0x2b71   : > { %4566 = vmax.xlane.f32.xlu0 %v4565_v28 }
0x2bfe   : > { %v4567_v29 = vpop.xlane.xlu0 %4566 }
0x2bff   : > { %v4568_v30 = vsub.f32 %v4561_v26, %v4567_v29 }
0x2c01   : > { %v4569_v31 = vmul.f32 1.442695, %v4568_v30 }
0x2c03   : > { %13115 = vpow2.f32 %v4569_v31  ;;  %v5042_v31 = vld [vmem:[#allocation8 + $0x2c0] sm:$0xf] }
0x2c0d   : > { %v13116_v32 = vpop.eup %13115 }
0x2c0e   : > { %v4571_v33 = vsel %vm511_vm2, %v13116_v32, 0.0 }
0x2c0f   : > { %4572 = vadd.xlane.f32.xlu1 %v4571_v33  ;;  %v12981_v33 = vld [vmem:[#allocation8 + $0x2c8] sm:$0xff]  }
0x2c9c   : > { %v4573_v41 = vpop.xlane.xlu1 %4572 }
0x2c9d   : > { %13117 = vrcp.f32 %v4573_v41 }
0x2ca7   : > { %v13118_v42 = vpop.eup %13117 }
0x2ca8   : > { %v4575_v43 = vmul.f32 %v13118_v42, %v13116_v32  ;;  %v5047_v32 = vsel %vm677_vm3, %v5042_v31, 0 }
0x2caa   : > { %12199 = vmatmul.mubr.msk.f32.vlgmr.msra.gmra.mrb[110].mxu0 %vm511_vm2, %v4575_v43 }
0x2cab   : > { %12211 = vmatprep.mubr.msk.bf16.mxu0 %vm13427_vm0, %v13426_v0  ;;  %12208 = vmatpush3.bf16.msra.mxu0 %v12975_v46 }
0x2cac   : > { %12209 = vmatprep.subr.bf16.mxu0 %v13426_v0 }
0x2caf   : > { %12210 = vmatpush3.bf16.msra.mxu0 %v12977_v47 }
0x2cb0   : > { %12223 = vmatprep.subr.bf16.mxu0 %v13426_v0 }
0x2cb2   : > { %12212 = vmatmul.mubr.msk.bf16.vlgmr.msra.gmra.mrb[112].mxu0 %vm345_vm1, %v14036_v12 }
0x2cb3   : > { %12227 = vmatprep.mubr.msk.bf16.mxu0 %vm13427_vm0, %v13426_v0  ;;  %12224 = vmatpush3.bf16.msra.mxu0 %v12979_v13 }
0x2cb4   : > { %12225 = vmatprep.subr.bf16.mxu0 %v13426_v0 }
0x2cb7   : > { %12226 = vmatpush3.bf16.msra.mxu0 %v12980_v14 }
0x2cb8   : > { %12241 = vmatprep.subr.bf16.mxu0 %v13426_v0 }
0x2cba   : > { %12228 = vmatmul.mubr.msk.bf16.vlgmr.msra.gmra.mrb[116].mxu0 %vm345_vm1, %v14036_v12 }
0x2cbb   : > { %12243 = vmatprep.mubr.msk.bf16.mxu0 %vm13427_vm0, %v13426_v0  ;;  %12242 = vmatpush3.bf16.msra.mxu0 %v5047_v32 }
0x2cbc   : > { %12255 = vmatprep.subr.bf16.mxu0 %v13426_v0 }
0x2d7d   : > { %v4645_v8 = vpop.f32.mrb[110].mxu0 }
0x2d7e   : > { %v4649_v49 = vpack.c.bf16 %v4645_v8, %v4645_v8  ;;  %v12200_v50 = vpop.f32.mrb[111].mxu0 }
0x2d7f   : > { %v11119_v50 = vld [vmem:[#allocation10 + $0x31] ss:$0 sm:$0xff] }
0x2d80   : > { %12204 = vmatmul.mubr.msk.bf16.vlgmr.msra.gmra.mrb[100].mxu1 %vm511_vm2, %v4649_v49  ;;  %v11123_v49 = vld [vmem:[#allocation10 + $0x32] ss:$0 sm:$0xff] }
0x2d81   : > { %12216 = vmatpush3.bf16.msra.mxu1 %v12976_v48  ;;  %12219 = vmatprep.mubr.msk.bf16.mxu1 %vm13427_vm0, %v13426_v0 }
0x2d82   : > { %12217 = vmatprep.subr.bf16.mxu1 %v13426_v0 }
0x2d85   : > { %12218 = vmatpush3.bf16.msra.mxu1 %v12978_v51  ;;  %v4753_v52 = vpop.f32.mrb[112].mxu0 }
0x2d86   : > { %12231 = vmatprep.subr.mxu1 %v13426_v0  ;;  %v12213_v53 = vpop.f32.mrb[113].mxu0  ;;  %v4754_v9 = vadd.f32 %v11103_v2, %v4753_v52 }
0x2d87   : > { %v4756_v54 = vpop.f32.mrb[114].mxu0 }
0x2d88   : > { %12220 = vmatmul.mubr.msk.bf16.vlgmr.msra.gmra.mrb[104].mxu1 %vm345_vm1, %v14036_v12  ;;  %v12214_v55 = vpop.f32.mrb[115].mxu0 }
0x2d89   : > { %12233 = vmatprep.mubr.msk.f32.mxu1 %vm13427_vm0, %v13426_v0 }
0x2d8d   : > { %v4875_v23 = vpop.f32.mrb[116].mxu0 }
0x2d8e   : > { %v12229_v24 = vpop.f32.mrb[117].mxu0  ;;  %v4876_v27 = vadd.f32 %v11111_v58, %v4875_v23 }
0x2d8f   : > { %v4878_v25 = vpop.f32.mrb[118].mxu0 }
0x2d90   : > { %v12230_v26 = vpop.f32.mrb[119].mxu0 }
0x2e53   : > { %v4691_v60 = vpop.f32.mrb[100].mxu1 }
0x2e54   : > { %v14127_v56 = vadd.f32 %v4691_v60, %v4305_v59  ;;  %v12205_v61 = vpop.f32.mrb[101].mxu1  ;;  %v12985_v59 = vld [vmem:[#allocation8 + $0x2e8] sm:$0xff]   ;;  %v12986_v60 = vld [vmem:[#allocation8 + $0x2f0] sm:$0xff]  }
0x2e55   : > { %v4694_v62 = vpop.f32.mrb[102].mxu1 }
0x2e56   : > { %v12206_v63 = vpop.f32.mrb[103].mxu1 }
0x2e5b   : > { %v4814_v3 = vpop.f32.mrb[104].mxu1 }
0x2e5c   : > { %v4815_v4 = vadd.f32 %v11107_v1, %v4814_v3  ;;  %v12221_v5 = vpop.f32.mrb[105].mxu1 }
0x2e5d   : > { %v4817_v10 = vpop.f32.mrb[106].mxu1 }
0x2e5e   : > { %v12222_v11 = vpop.f32.mrb[107].mxu1  ;;  %12232 = vmatpush3.xpose.msk.msra.mxu1 %vm511_vm2, %v4815_v4 }
0x2e5f   : > { %12236 = vmatprep.subr.mxu1 %v13426_v0 }
0x2e61   : > { %12234 = vmatmul.mubr.msk.f32.vlgmr.msra.gmra.mrb[108].mxu1 %vm511_vm2, %v4754_v9 }
0x2e62   : > { %12238 = vmatprep.mubr.msk.f32.mxu1 %vm13427_vm0, %v13426_v0  ;;  %12237 = vmatpush3.msra.mxu1 %v4876_v27  ;;  %v11066_v27 = vld [vmem:[#allocation10 + $0x24] ss:$0 sm:$0xff] }
0x2e63   : > { %12247 = vmatprep.subr.bf16.mxu1 %v13426_v0 }
0x2f34   : > { %v4953_v15 = vpop.f32.mrb[108].mxu1 }
0x2f35   : > { %v12235_v16 = vpop.f32.mrb[109].mxu1  ;;  %v4957_v17 = vsel %vm511_vm2, %v4953_v15, -inf }
0x2f36   : > { %4958 = vmax.xlane.f32.xlu0 %v4957_v17 }
0x2fc3   : > { %v4959_v18 = vpop.xlane.xlu0 %4958 }
0x2fc4   : > { %v4960_v19 = vsub.f32 %v4953_v15, %v4959_v18  ;;  %v11127_v18 = vld [vmem:[#allocation10 + $0x33] ss:$0 sm:$0xff] }
0x2fc6   : > { %v4961_v20 = vmul.f32 1.442695, %v4960_v19 }
0x2fc8   : > { %13119 = vpow2.f32 %v4961_v20 }
0x2fd2   : > { %v13120_v21 = vpop.eup %13119 }
0x2fd3   : > { %v4963_v22 = vsel %vm511_vm2, %v13120_v21, 0.0 }
0x2fd4   : > { %4964 = vadd.xlane.f32.xlu1 %v4963_v22 }
0x3061   : > { %v4965_v28 = vpop.xlane.xlu1 %4964 }
0x3062   : > { %13121 = vrcp.f32 %v4965_v28 }
0x306c   : > { %v13122_v29 = vpop.eup %13121 }
0x306d   : > { %v4967_v30 = vmul.f32 %v13122_v29, %v13120_v21  ;;  %v11067_v29 = vld [vmem:[#allocation10 + $0x25] ss:$0 sm:$0xff] }
0x306f   : > { %12239 = vmatmul.mubr.msk.f32.vlgmr.msra.gmra.mrb[110].mxu1 %vm511_vm2, %v4967_v30 }
0x3070   : > { %12251 = vmatprep.mubr.msk.bf16.mxu1 %vm13427_vm0, %v13426_v0  ;;  %12248 = vmatpush3.bf16.msra.mxu1 %v12981_v33  ;;  %v5434_v33 = vld [vmem:[#allocation8 + $0x2f8] sm:$0xf] }
0x3071   : > { %12249 = vmatprep.subr.bf16.mxu1 %v13426_v0 }
0x3074   : > { %12250 = vmatpush3.bf16.msra.mxu1 %v12983_v34  ;;  %v5439_v34 = vsel %vm677_vm3, %v5434_v33, 0 }
0x3075   : > { %12263 = vmatprep.subr.bf16.mxu1 %v13426_v0 }
0x3077   : > { %12252 = vmatmul.mubr.msk.bf16.vlgmr.msra.gmra.mrb[112].mxu1 %vm345_vm1, %v14036_v12 }
0x3078   : > { %12267 = vmatprep.mubr.msk.bf16.mxu1 %vm13427_vm0, %v13426_v0  ;;  %12264 = vmatpush3.bf16.msra.mxu1 %v12985_v59 }
0x3079   : > { %12265 = vmatprep.subr.bf16.mxu1 %v13426_v0 }
0x307c   : > { %12266 = vmatpush3.bf16.msra.mxu1 %v12986_v60 }
0x307d   : > { %12281 = vmatprep.subr.bf16.mxu1 %v13426_v0 }
0x307f   : > { %12268 = vmatmul.mubr.msk.bf16.vlgmr.msra.gmra.mrb[116].mxu1 %vm345_vm1, %v14036_v12 }
0x3080   : > { %12283 = vmatprep.mubr.msk.bf16.mxu1 %vm13427_vm0, %v13426_v0  ;;  %12282 = vmatpush3.bf16.msra.mxu1 %v5439_v34 }
0x3081   : > { %12295 = vmatprep.subr.bf16.mxu1 %v13426_v0 }
0x3142   : > { %v5037_v35 = vpop.f32.mrb[110].mxu1 }
0x3143   : > { %v5041_v37 = vpack.c.bf16 %v5037_v35, %v5037_v35  ;;  %v12240_v39 = vpop.f32.mrb[111].mxu1 }
0x3145   : > { %12244 = vmatmul.mubr.msk.bf16.vlgmr.msra.gmra.mrb[120].mxu0 %vm511_vm2, %v5041_v37 }
0x3146   : > { %12256 = vmatpush3.bf16.msra.mxu0 %v12982_v36  ;;  %12259 = vmatprep.mubr.msk.bf16.mxu0 %vm13427_vm0, %v13426_v0 }
0x3147   : > { %12257 = vmatprep.subr.bf16.mxu0 %v13426_v0 }
0x314a   : > { %12258 = vmatpush3.bf16.msra.mxu0 %v12984_v40  ;;  %v5145_v41 = vpop.f32.mrb[112].mxu1 }
0x314b   : > { %12271 = vmatprep.subr.mxu0 %v13426_v0  ;;  %v12253_v42 = vpop.f32.mrb[113].mxu1  ;;  %v5146_v54 = vadd.f32 %v11119_v50, %v5145_v41  ;;  %v11068_v50 = vld [vmem:[#allocation10 + $0x26] ss:$0 sm:$0xff] }
0x314c   : > { %v5148_v43 = vpop.f32.mrb[114].mxu1  ;;  %v12987_v42 = vld [vmem:[#allocation8 + $0x310] sm:$0xff]  }
0x314d   : > { %12260 = vmatmul.mubr.msk.bf16.vlgmr.msra.gmra.mrb[124].mxu0 %vm345_vm1, %v14036_v12  ;;  %v12254_v44 = vpop.f32.mrb[115].mxu1 }
0x314e   : > { %12273 = vmatprep.mubr.msk.f32.mxu0 %vm13427_vm0, %v13426_v0 }
0x3218   : > { %v5083_v45 = vpop.f32.mrb[120].mxu0 }
0x3219   : > { %v14164_v46 = vadd.f32 %v5083_v45, %v14127_v56  ;;  %v12245_v47 = vpop.f32.mrb[121].mxu0  ;;  %v11060_v56 = vld [vmem:[#allocation10 + $0x23] ss:$0 sm:$0xff]  ;;  %v12988_v45 = vld [vmem:[#allocation8 + $0x318] sm:$0xff]  }
0x321a   : > { %v5086_v8 = vpop.f32.mrb[122].mxu0  ;;  %v3848_v61 = vadd.f32 %v11060_v56, %v14065_v38 }
0x321b   : > { %v12246_v48 = vpop.f32.mrb[123].mxu0 }
0x321c   : > { %v3853_v2 = vadd.f32 %v3848_v61, %v14022_v6  ;;  %v5267_v6 = vpop.f32.mrb[116].mxu1 }
0x321d   : > { %v12269_v16 = vpop.f32.mrb[117].mxu1  ;;  %v5268_v20 = vadd.f32 %v11127_v18, %v5267_v6 }
0x321e   : > { %v3854_v3 = vsel %vm345_vm1, %v3853_v2, 0.0  ;;  %v5270_v17 = vpop.f32.mrb[118].mxu1 }
0x321f   : > { %v12270_v19 = vpop.f32.mrb[119].mxu1  ;;  %v11135_v17 = vld [vmem:[#allocation10 + $0x35] ss:$0 sm:$0xff] }
0x3220   : > { %v5206_v51 = vpop.f32.mrb[124].mxu0  ;;  %v11136_v19 = vld [vmem:[#allocation10 + $0x36] ss:$0 sm:$0xff] }
0x3221   : > { %v5207_v52 = vadd.f32 %v11123_v49, %v5206_v51  ;;  %v12261_v53 = vpop.f32.mrb[125].mxu0 }
0x3222   : > { %v5209_v55 = vpop.f32.mrb[126].mxu0 }
0x3223   : > { %v12262_v57 = vpop.f32.mrb[127].mxu0  ;;  %12272 = vmatpush3.xpose.msk.msra.mxu0 %vm511_vm2, %v5207_v52  ;;  %v11069_v52 = vld [vmem:[#allocation10 + $0x27] ss:$0 sm:$0xff] }
0x3224   : > { %12276 = vmatprep.subr.mxu0 %v13426_v0 }
0x3226   : > { %12274 = vmatmul.mubr.msk.f32.vlgmr.msra.gmra.mrb[128].mxu0 %vm511_vm2, %v5146_v54 }
0x3227   : > { %12278 = vmatprep.mubr.msk.f32.mxu0 %vm13427_vm0, %v13426_v0  ;;  %12277 = vmatpush3.msra.mxu0 %v5268_v20 }
0x3228   : > { %12287 = vmatprep.subr.bf16.mxu0 %v13426_v0 }
0x32f9   : > { %v5345_v62 = vpop.f32.mrb[128].mxu0 }
0x32fa   : > { %v12275_v63 = vpop.f32.mrb[129].mxu0  ;;  %v5349_v1 = vsel %vm511_vm2, %v5345_v62, -inf }
0x32fb   : > { %5350 = vmax.xlane.f32.xlu0 %v5349_v1  ;;  %v11141_v1 = vld [vmem:[#allocation10 + $0x38] ss:$0 sm:$0xff] }
0x32ff   : > { %3855 = vadd.xlane.f32.xlu0 %v3854_v3 }
0x3388   : > { %v5351_v4 = vpop.xlane.xlu0 %5350 }
0x3389   : > { %v5352_v5 = vsub.f32 %v5345_v62, %v5351_v4 }
0x338b   : > { %v5353_v9 = vmul.f32 1.442695, %v5352_v5 }
0x338c   : > { %v3856_v12 = vpop.xlane.xlu0 %3855 }
0x338d   : > { %13123 = vpow2.f32 %v5353_v9  ;;  %v3857_v10 = vmul.f32 0.03125, %v3856_v12 }
0x338f   : > { %v3858_v11 = vsub.f32 %v3853_v2, %v3857_v10 }
0x3391   : > { %v3859_v14 = vmul.f32 %v3858_v11, %v3858_v11 }
0x3393   : > { %v3860_v15 = vsel %vm345_vm1, %v3859_v14, 0.0 }
0x3397   : > { %v13124_v13 = vpop.eup %13123 }
0x3398   : > { %v5355_v38 = vsel %vm511_vm2, %v13124_v13, 0.0 }
0x3399   : > { %5356 = vadd.xlane.f32.xlu1 %v5355_v38  ;;  %v12990_v38 = vld [vmem:[#allocation8 + $0x308] sm:$0xff]  }
0x339d   : > { %3861 = vadd.xlane.f32.xlu1 %v3860_v15 }
0x3426   : > { %v5357_v21 = vpop.xlane.xlu1 %5356 }
0x3427   : > { %13125 = vrcp.f32 %v5357_v21 }
0x342a   : > { %v3862_v22 = vpop.xlane.xlu1 %3861 }
0x342b   : > { %v3863_v23 = vmul.f32 0.03125, %v3862_v22  ;;  %v12991_v22 = vld [vmem:[#allocation8 + $0x320] sm:$0xff]  }
0x342d   : > { %v3864_v24 = vadd.f32 1e-05, %v3863_v23 }
0x342f   : > { %13127 = vrsqrt.f32 %v3864_v24  ;;  %v12992_v24 = vld [vmem:[#allocation8 + $0x328] sm:$0xff]  }
0x3431   : > { %v13126_v25 = vpop.eup %13125 }
0x3432   : > { %v5359_v58 = vmul.f32 %v13126_v25, %v13124_v13  ;;  %v11137_v25 = vld [vmem:[#allocation10 + $0x37] ss:$0 sm:$0xff] }
0x3434   : > { %12279 = vmatmul.mubr.msk.f32.vlgmr.msra.gmra.mrb[130].mxu0 %vm511_vm2, %v5359_v58 }
0x3435   : > { %12291 = vmatprep.mubr.msk.bf16.mxu0 %vm13427_vm0, %v13426_v0 }
0x3439   : > { %v13128_v26 = vpop.eup %13127 }
0x343a   : > { %v3866_v28 = vmul.f32 %v13128_v26, %v3858_v11 }
0x343c   : > { %v3872_v30 = vmul.f32 %v11066_v27, %v3866_v28 }
0x343e   : > { %v3878_v31 = vadd.f32 %v11067_v29, %v3872_v30  ;;  %v11145_v30 = vld [vmem:[#allocation10 + $0x39] ss:$0 sm:$0xff] }
0x3440   : > { %v3879_v32 = vsel %vm345_vm1, %v3878_v31, 0.0 }
0x3441   : > { %3880 = vadd.xlane.f32.xlu0 %v3879_v32 }
0x34ce   : > { %v3881_v35 = vpop.xlane.xlu0 %3880 }
0x34cf   : > { %v3882_v36 = vmul.f32 0.03125, %v3881_v35 }
0x34d1   : > { %v3883_v37 = vsub.f32 %v3878_v31, %v3882_v36 }
0x34d3   : > { %v3884_v39 = vmul.f32 %v3883_v37, %v3883_v37 }
0x34d5   : > { %v3885_v40 = vsel %vm345_vm1, %v3884_v39, 0.0 }
0x34d6   : > { %3886 = vadd.xlane.f32.xlu0 %v3885_v40 }
0x3507   : > { %v5429_v41 = vpop.f32.mrb[130].mxu0 }
0x3508   : > { %v5433_v43 = vpack.c.bf16 %v5429_v41, %v5429_v41  ;;  %v12280_v44 = vpop.f32.mrb[131].mxu0 }
0x350a   : > { %12284 = vmatmul.mubr.msk.bf16.vlgmr.msra.gmra.mrb[120].mxu1 %vm511_vm2, %v5433_v43 }
0x350b   : > { %12296 = vmatpush3.bf16.msra.mxu1 %v12987_v42  ;;  %12299 = vmatprep.mubr.msk.bf16.mxu1 %vm13427_vm0, %v13426_v0 }
0x350c   : > { %12297 = vmatprep.subr.bf16.mxu1 %v13426_v0 }
0x350f   : > { %12298 = vmatpush3.bf16.msra.mxu1 %v12988_v45 }
0x3510   : > { %12311 = vmatprep.subr.mxu1 %v13426_v0 }
0x3563   : > { %v3887_v47 = vpop.xlane.xlu0 %3886 }
0x3564   : > { %v3888_v8 = vmul.f32 0.03125, %v3887_v47 }
0x3566   : > { %v3889_v48 = vadd.f32 1e-05, %v3888_v8  ;;  %v12993_v8 = vld [vmem:[#allocation8 + $0x338] sm:$0xff]  }
0x3568   : > { %13129 = vrsqrt.f32 %v3889_v48 }
0x3572   : > { %v13130_v49 = vpop.eup %13129 }
0x3573   : > { %v3891_v51 = vmul.f32 %v13130_v49, %v3883_v37  ;;  %v12994_v49 = vld [vmem:[#allocation8 + $0x340] sm:$0xff]  }
0x3575   : > { %v3897_v53 = vmul.f32 %v11068_v50, %v3891_v51  ;;  %v12995_v50 = vld [vmem:[#allocation8 + $0x358] sm:$0xff]   ;;  %v12996_v51 = vld [vmem:[#allocation8 + $0x360] sm:$0xff]  }
0x3577   : > { %v3903_v54 = vadd.f32 %v11069_v52, %v3897_v53  ;;  %v5861_v52 = vld [vmem:[#allocation8 + $0x330] sm:$0xf] }
0x3578   : > { %v5866_v53 = vsel %vm677_vm3, %v5861_v52, 0 }
0x3579   : > { %v14196_v55 = vpack.c.bf16 %v3903_v54, %v3903_v54 }
0x357b   : > { %12300 = vmatmul.mubr.msk.bf16.vlgmr.msra.gmra.mrb[124].mxu1 %vm345_vm1, %v14196_v55 }
0x357c   : > { %12313 = vmatprep.mubr.msk.f32.mxu1 %vm13427_vm0, %v13426_v0 }
0x35dd   : > { %v5475_v57 = vpop.f32.mrb[120].mxu1 }
0x35de   : > { %v5481_v59 = vadd.f32 %v5475_v57, %v14164_v46  ;;  %v12285_v60 = vpop.f32.mrb[121].mxu1  ;;  %v12997_v57 = vld [vmem:[#allocation8 + $0x348] sm:$0xff]  }
0x35df   : > { %v5478_v56 = vpop.f32.mrb[122].mxu1 }
0x35e0   : > { %v12286_v61 = vpop.f32.mrb[123].mxu1  ;;  %v5482_v62 = vadd.f32 %v5481_v59, %v14031_v7  ;;  %v12989_v7 = vld [vmem:[#allocation8 + $0x300] sm:$0xff]   ;;  %v12998_v56 = vld [vmem:[#allocation8 + $0x350] sm:$0xff]  }
0x35e1   : > { %12288 = vmatpush3.bf16.msra.mxu0 %v12989_v7  ;;  %v11154_v7 = vld [vmem:[#allocation10 + $0x3a] ss:$0 sm:$0xff] }
0x35e2   : > { %v5483_v63 = vsel %vm345_vm1, %v5482_v62, 0.0  ;;  %12289 = vmatprep.subr.bf16.mxu0 %v13426_v0 }
0x35e3   : > { %5484 = vadd.xlane.f32.xlu1 %v5483_v63 }
0x35e5   : > { %12290 = vmatpush3.bf16.msra.mxu0 %v12990_v38 }
0x35e6   : > { %12303 = vmatprep.subr.bf16.mxu0 %v13426_v0 }
0x364e   : > { %v5633_v2 = vpop.f32.mrb[124].mxu1 }
0x364f   : > { %v5634_v3 = vadd.f32 %v11141_v1, %v5633_v2  ;;  %v12301_v4 = vpop.f32.mrb[125].mxu1 }
0x3650   : > { %v5636_v5 = vpop.f32.mrb[126].mxu1 }
0x3651   : > { %v12302_v9 = vpop.f32.mrb[127].mxu1  ;;  %12312 = vmatpush3.xpose.msk.msra.mxu1 %vm511_vm2, %v5634_v3 }
0x3652   : > { %12316 = vmatprep.subr.mxu1 %v13426_v0 }
0x3670   : > { %v5485_v12 = vpop.xlane.xlu1 %5484 }
0x3671   : > { %v5486_v46 = vmul.f32 0.03125, %v5485_v12 }
0x3673   : > { %v5487_v10 = vsub.f32 %v5482_v62, %v5486_v46 }
0x3675   : > { %v5488_v11 = vmul.f32 %v5487_v10, %v5487_v10 }
0x3677   : > { %v5489_v13 = vsel %vm345_vm1, %v5488_v11, 0.0  ;;  %v11158_v11 = vld [vmem:[#allocation10 + $0x3b] ss:$0 sm:$0xff] }
0x3678   : > { %5490 = vadd.xlane.f32.xlu1 %v5489_v13 }
0x3705   : > { %v5491_v14 = vpop.xlane.xlu1 %5490 }
0x3706   : > { %v5492_v15 = vmul.f32 0.03125, %v5491_v14 }
0x3708   : > { %v5493_v6 = vadd.f32 1e-05, %v5492_v15  ;;  %v11162_v15 = vld [vmem:[#allocation10 + $0x3c] ss:$0 sm:$0xff] }
0x370a   : > { %13131 = vrsqrt.f32 %v5493_v6 }
0x3714   : > { %v13132_v16 = vpop.eup %13131 }
0x3715   : > { %v5495_v18 = vmul.f32 %v13132_v16, %v5487_v10 }
0x3717   : > { %v5501_v20 = vmul.f32 %v11135_v17, %v5495_v18 }
0x3719   : > { %v14210_v21 = vadd.f32 %v11136_v19, %v5501_v20 }
0x371b   : > { %v14214_v23 = vpack.c.bf16 %v14210_v21, %v14210_v21 }
0x371d   : > { %12292 = vmatmul.mubr.msk.bf16.vlgmr.msra.gmra.mrb[132].mxu0 %vm345_vm1, %v14214_v23 }
0x371e   : > { %12304 = vmatpush3.bf16.msra.mxu0 %v12991_v22  ;;  %12307 = vmatprep.mubr.msk.bf16.mxu0 %vm13427_vm0, %v13426_v0 }
0x371f   : > { %12305 = vmatprep.subr.bf16.mxu0 %v13426_v0 }
0x3722   : > { %12306 = vmatpush3.bf16.msra.mxu0 %v12992_v24 }
0x3723   : > { %12321 = vmatprep.subr.bf16.mxu0 %v13426_v0 }
0x3725   : > { %12308 = vmatmul.mubr.msk.bf16.vlgmr.msra.gmra.mrb[136].mxu0 %vm345_vm1, %v14196_v55 }
0x3726   : > { %12323 = vmatprep.mubr.msk.bf16.mxu0 %vm13427_vm0, %v13426_v0  ;;  %12322 = vmatpush3.bf16.msra.mxu0 %v5866_v53 }
0x3727   : > { %12335 = vmatprep.subr.bf16.mxu0 %v13426_v0 }
0x37f0   : > { %v5569_v58 = vpop.f32.mrb[132].mxu0 }
0x37f1   : > { %v5570_v26 = vadd.f32 %v11137_v25, %v5569_v58  ;;  %v12293_v27 = vpop.f32.mrb[133].mxu0 }
0x37f2   : > { %v5572_v28 = vpop.f32.mrb[134].mxu0 }
0x37f3   : > { %v12294_v29 = vpop.f32.mrb[135].mxu0  ;;  %12314 = vmatmul.mubr.msk.f32.vlgmr.msra.gmra.mrb[128].mxu1 %vm511_vm2, %v5570_v26 }
0x37f4   : > { %12318 = vmatprep.mubr.msk.f32.mxu1 %vm13427_vm0, %v13426_v0 }
0x37f8   : > { %v5694_v31 = vpop.f32.mrb[136].mxu0 }
0x37f9   : > { %v5695_v32 = vadd.f32 %v11145_v30, %v5694_v31  ;;  %v12309_v33 = vpop.f32.mrb[137].mxu0  ;;  %v12999_v30 = vld [vmem:[#allocation8 + $0x370] sm:$0xff]  }
0x37fa   : > { %v5697_v34 = vpop.f32.mrb[138].mxu0  ;;  %v13001_v33 = vld [vmem:[#allocation8 + $0x390] sm:$0xff]  }
0x37fb   : > { %v12310_v35 = vpop.f32.mrb[139].mxu0  ;;  %12317 = vmatpush3.msra.mxu1 %v5695_v32  ;;  %v13000_v32 = vld [vmem:[#allocation8 + $0x378] sm:$0xff]  }
0x37fc   : > { %12327 = vmatprep.subr.bf16.mxu1 %v13426_v0  ;;  %v13002_v34 = vld [vmem:[#allocation8 + $0x398] sm:$0xff]   ;;  %v6257_v35 = vld [vmem:[#allocation8 + $0x368] sm:$0xf] }
0x38c6   : > { %v5772_v36 = vpop.f32.mrb[128].mxu1 }
0x38c7   : > { %v12315_v37 = vpop.f32.mrb[129].mxu1  ;;  %v5776_v39 = vsel %vm511_vm2, %v5772_v36, -inf }
0x38c8   : > { %5777 = vmax.xlane.f32.xlu0 %v5776_v39  ;;  %v13003_v39 = vld [vmem:[#allocation8 + $0x380] sm:$0xff]  }
0x3955   : > { %v5778_v40 = vpop.xlane.xlu0 %5777 }
0x3956   : > { %v5779_v41 = vsub.f32 %v5772_v36, %v5778_v40  ;;  %v6262_v36 = vsel %vm677_vm3, %v6257_v35, 0 }
0x3958   : > { %v5780_v42 = vmul.f32 1.442695, %v5779_v41 }
0x395a   : > { %13133 = vpow2.f32 %v5780_v42  ;;  %v13004_v42 = vld [vmem:[#allocation8 + $0x388] sm:$0xff]  }
0x3964   : > { %v13134_v43 = vpop.eup %13133 }
0x3965   : > { %v5782_v44 = vsel %vm511_vm2, %v13134_v43, 0.0 }
0x3966   : > { %5783 = vadd.xlane.f32.xlu1 %v5782_v44 }
0x39f3   : > { %v5784_v45 = vpop.xlane.xlu1 %5783 }
0x39f4   : > { %13135 = vrcp.f32 %v5784_v45 }
0x39fe   : > { %v13136_v47 = vpop.eup %13135 }
0x39ff   : > { %v5786_v48 = vmul.f32 %v13136_v47, %v13134_v43 }
0x3a01   : > { %12319 = vmatmul.mubr.msk.f32.vlgmr.msra.gmra.mrb[130].mxu1 %vm511_vm2, %v5786_v48 }
0x3a02   : > { %12328 = vmatpush3.bf16.msra.mxu1 %v12993_v8  ;;  %12331 = vmatprep.mubr.msk.bf16.mxu1 %vm13427_vm0, %v13426_v0 }
0x3a03   : > { %12329 = vmatprep.subr.bf16.mxu1 %v13426_v0 }
0x3a06   : > { %12330 = vmatpush3.bf16.msra.mxu1 %v12994_v49 }
0x3a07   : > { %12343 = vmatprep.subr.bf16.mxu1 %v13426_v0 }
0x3a09   : > { %12332 = vmatmul.mubr.msk.bf16.vlgmr.msra.gmra.mrb[132].mxu1 %vm345_vm1, %v14214_v23 }
0x3a0a   : > { %12344 = vmatpush3.bf16.msra.mxu1 %v12995_v50  ;;  %12347 = vmatprep.mubr.msk.bf16.mxu1 %vm13427_vm0, %v13426_v0 }
0x3a0b   : > { %12345 = vmatprep.subr.bf16.mxu1 %v13426_v0 }
0x3a0e   : > { %12346 = vmatpush3.bf16.msra.mxu1 %v12996_v51  ;;  %v11153_v51 = vld [vmem:[#allocation10 + $0x43] ss:$0 sm:$0xff] }
0x3a0f   : > { %12361 = vmatprep.subr.bf16.mxu1 %v13426_v0 }
0x3a11   : > { %12348 = vmatmul.mubr.msk.bf16.vlgmr.msra.gmra.mrb[136].mxu1 %vm345_vm1, %v14196_v55 }
0x3a12   : > { %12363 = vmatprep.mubr.msk.bf16.mxu1 %vm13427_vm0, %v13426_v0  ;;  %12362 = vmatpush3.bf16.msra.mxu1 %v6262_v36 }
0x3a13   : > { %12375 = vmatprep.subr.bf16.mxu1 %v13426_v0 }
0x3ad4   : > { %v5856_v54 = vpop.f32.mrb[130].mxu1 }
0x3ad5   : > { %v5860_v59 = vpack.c.bf16 %v5856_v54, %v5856_v54  ;;  %v12320_v60 = vpop.f32.mrb[131].mxu1 }
0x3ad7   : > { %12324 = vmatmul.mubr.msk.bf16.vlgmr.msra.gmra.mrb[140].mxu0 %vm511_vm2, %v5860_v59 }
0x3ad8   : > { %12336 = vmatpush3.bf16.msra.mxu0 %v12997_v57  ;;  %12339 = vmatprep.mubr.msk.bf16.mxu0 %vm13427_vm0, %v13426_v0 }
0x3ad9   : > { %12337 = vmatprep.subr.bf16.mxu0 %v13426_v0 }
0x3adc   : > { %v5968_v61 = vpop.f32.mrb[132].mxu1  ;;  %12338 = vmatpush3.bf16.msra.mxu0 %v12998_v56  ;;  %v11174_v56 = vld [vmem:[#allocation10 + $0x3e] ss:$0 sm:$0xff] }
0x3add   : > { %v12333_v62 = vpop.f32.mrb[133].mxu1  ;;  %12351 = vmatprep.subr.mxu0 %v13426_v0  ;;  %v5969_v17 = vadd.f32 %v11154_v7, %v5968_v61 }
0x3ade   : > { %v5971_v63 = vpop.f32.mrb[134].mxu1  ;;  %v11170_v62 = vld [vmem:[#allocation10 + $0x3d] ss:$0 sm:$0xff] }
0x3adf   : > { %v12334_v1 = vpop.f32.mrb[135].mxu1  ;;  %12340 = vmatmul.mubr.msk.bf16.vlgmr.msra.gmra.mrb[144].mxu0 %vm345_vm1, %v14196_v55 }
0x3ae0   : > { %12353 = vmatprep.mubr.msk.f32.mxu0 %vm13427_vm0, %v13426_v0 }
0x3ae4   : > { %v6090_v2 = vpop.f32.mrb[136].mxu1 }
0x3ae5   : > { %v12349_v3 = vpop.f32.mrb[137].mxu1  ;;  %v6091_v18 = vadd.f32 %v11162_v15, %v6090_v2  ;;  %v11178_v2 = vld [vmem:[#allocation10 + $0x3f] ss:$0 sm:$0xff] }
0x3ae6   : > { %v6093_v4 = vpop.f32.mrb[138].mxu1 }
0x3ae7   : > { %v12350_v5 = vpop.f32.mrb[139].mxu1 }
0x3baa   : > { %v14258_v9 = vpop.f32.mrb[140].mxu0 }
0x3bab   : > { %v12325_v12 = vpop.f32.mrb[141].mxu0  ;;  %v5912_v52 = vadd.f32 %v11153_v51, %v14258_v9 }
0x3bac   : > { %v5905_v46 = vpop.f32.mrb[142].mxu0 }
0x3bad   : > { %v12326_v10 = vpop.f32.mrb[143].mxu0 }
0x3bb2   : > { %v6029_v13 = vpop.f32.mrb[144].mxu0 }
0x3bb3   : > { %v6030_v38 = vadd.f32 %v11158_v11, %v6029_v13  ;;  %v12341_v14 = vpop.f32.mrb[145].mxu0 }
0x3bb4   : > { %v6032_v6 = vpop.f32.mrb[146].mxu0 }
0x3bb5   : > { %v12342_v16 = vpop.f32.mrb[147].mxu0  ;;  %12352 = vmatpush3.xpose.msk.msra.mxu0 %vm511_vm2, %v6030_v38 }
0x3bb6   : > { %12356 = vmatprep.subr.mxu0 %v13426_v0  ;;  %v13005_v16 = vld [vmem:[#allocation8 + $0x3a8] sm:$0xff]  }
0x3bb8   : > { %12354 = vmatmul.mubr.msk.f32.vlgmr.msra.gmra.mrb[148].mxu0 %vm511_vm2, %v5969_v17 }
0x3bb9   : > { %12357 = vmatpush3.msra.mxu0 %v6091_v18  ;;  %12358 = vmatprep.mubr.msk.f32.mxu0 %vm13427_vm0, %v13426_v0  ;;  %v13006_v18 = vld [vmem:[#allocation8 + $0x3b0] sm:$0xff]  }
0x3bba   : > { %12367 = vmatprep.subr.bf16.mxu0 %v13426_v0 }
0x3c8b   : > { %v6168_v19 = vpop.f32.mrb[148].mxu0 }
0x3c8c   : > { %v12355_v20 = vpop.f32.mrb[149].mxu0  ;;  %v6172_v22 = vsel %vm511_vm2, %v6168_v19, -inf }
0x3c8d   : > { %6173 = vmax.xlane.f32.xlu0 %v6172_v22  ;;  %v13008_v20 = vld [vmem:[#allocation8 + $0x3d0] sm:$0xff]   ;;  %v6649_v22 = vld [vmem:[#allocation8 + $0x3a0] sm:$0xf] }
0x3d1a   : > { %v6174_v24 = vpop.xlane.xlu0 %6173 }
0x3d1b   : > { %v6175_v25 = vsub.f32 %v6168_v19, %v6174_v24  ;;  %v13007_v19 = vld [vmem:[#allocation8 + $0x3c8] sm:$0xff]   ;;  %v6654_v24 = vsel %vm677_vm3, %v6649_v22, 0 }
0x3d1d   : > { %v6176_v58 = vmul.f32 1.442695, %v6175_v25  ;;  %v13009_v25 = vld [vmem:[#allocation8 + $0x3b8] sm:$0xff]  }
0x3d1f   : > { %13137 = vpow2.f32 %v6176_v58 }
0x3d29   : > { %v13138_v26 = vpop.eup %13137 }
0x3d2a   : > { %v6178_v27 = vsel %vm511_vm2, %v13138_v26, 0.0 }
0x3d2b   : > { %6179 = vadd.xlane.f32.xlu1 %v6178_v27  ;;  %v13010_v27 = vld [vmem:[#allocation8 + $0x3c0] sm:$0xff]  }
0x3db8   : > { %v6180_v28 = vpop.xlane.xlu1 %6179 }
0x3db9   : > { %13139 = vrcp.f32 %v6180_v28 }
0x3dc3   : > { %v13140_v29 = vpop.eup %13139 }
0x3dc4   : > { %v6182_v31 = vmul.f32 %v13140_v29, %v13138_v26 }
0x3dc6   : > { %12359 = vmatmul.mubr.msk.f32.vlgmr.msra.gmra.mrb[150].mxu0 %vm511_vm2, %v6182_v31 }
0x3dc7   : > { %12368 = vmatpush3.bf16.msra.mxu0 %v12999_v30  ;;  %12371 = vmatprep.mubr.msk.bf16.mxu0 %vm13427_vm0, %v13426_v0 }
0x3dc8   : > { %12369 = vmatprep.subr.bf16.mxu0 %v13426_v0 }
0x3dcb   : > { %12370 = vmatpush3.bf16.msra.mxu0 %v13000_v32 }
0x3dcc   : > { %12383 = vmatprep.subr.bf16.mxu0 %v13426_v0 }
0x3dce   : > { %12372 = vmatmul.mubr.msk.bf16.vlgmr.msra.gmra.mrb[152].mxu0 %vm345_vm1, %v14214_v23 }
0x3dcf   : > { %12384 = vmatpush3.bf16.msra.mxu0 %v13001_v33  ;;  %12387 = vmatprep.mubr.msk.bf16.mxu0 %vm13427_vm0, %v13426_v0 }
0x3dd0   : > { %12385 = vmatprep.subr.bf16.mxu0 %v13426_v0 }
0x3dd3   : > { %12386 = vmatpush3.bf16.msra.mxu0 %v13002_v34 }
0x3dd4   : > { %12401 = vmatprep.subr.bf16.mxu0 %v13426_v0 }
0x3dd6   : > { %12388 = vmatmul.mubr.msk.bf16.vlgmr.msra.gmra.mrb[156].mxu0 %vm345_vm1, %v14196_v55 }
0x3dd7   : > { %12403 = vmatprep.mubr.msk.bf16.mxu0 %vm13427_vm0, %v13426_v0  ;;  %12402 = vmatpush3.bf16.msra.mxu0 %v6654_v24 }
0x3dd8   : > { %12415 = vmatprep.subr.bf16.mxu0 %v13426_v0 }
0x3e99   : > { %v6252_v37 = vpop.f32.mrb[150].mxu0 }
0x3e9a   : > { %v6256_v40 = vpack.c.bf16 %v6252_v37, %v6252_v37  ;;  %v12360_v41 = vpop.f32.mrb[151].mxu0 }
0x3e9c   : > { %12364 = vmatmul.mubr.msk.bf16.vlgmr.msra.gmra.mrb[140].mxu1 %vm511_vm2, %v6256_v40 }
0x3e9d   : > { %12376 = vmatpush3.bf16.msra.mxu1 %v13003_v39  ;;  %12379 = vmatprep.mubr.msk.bf16.mxu1 %vm13427_vm0, %v13426_v0 }
0x3e9e   : > { %12377 = vmatprep.subr.bf16.mxu1 %v13426_v0 }
0x3ea1   : > { %v6360_v43 = vpop.f32.mrb[152].mxu0  ;;  %12378 = vmatpush3.bf16.msra.mxu1 %v13004_v42  ;;  %v11190_v42 = vld [vmem:[#allocation10 + $0x41] ss:$0 sm:$0xff] }
0x3ea2   : > { %v12373_v44 = vpop.f32.mrb[153].mxu0  ;;  %12391 = vmatprep.subr.mxu1 %v13426_v0  ;;  %v6361_v5 = vadd.f32 %v11170_v62, %v6360_v43 }
0x3ea3   : > { %v6363_v45 = vpop.f32.mrb[154].mxu0  ;;  %v11186_v44 = vld [vmem:[#allocation10 + $0x40] ss:$0 sm:$0xff] }
0x3ea4   : > { %v12374_v47 = vpop.f32.mrb[155].mxu0  ;;  %12380 = vmatmul.mubr.msk.bf16.vlgmr.msra.gmra.mrb[144].mxu1 %vm345_vm1, %v14196_v55 }
0x3ea5   : > { %12393 = vmatprep.mubr.msk.f32.mxu1 %vm13427_vm0, %v13426_v0 }
0x3ea9   : > { %v6482_v8 = vpop.f32.mrb[156].mxu0 }
0x3eaa   : > { %v12389_v48 = vpop.f32.mrb[157].mxu0  ;;  %v6483_v9 = vadd.f32 %v11178_v2, %v6482_v8  ;;  %v11194_v8 = vld [vmem:[#allocation10 + $0x42] ss:$0 sm:$0xff]  ;;  %v7041_v2 = vld [vmem:[#allocation8 + $0x3d8] sm:$0xf] }
0x3eab   : > { %v6485_v49 = vpop.f32.mrb[158].mxu0 }
0x3eac   : > { %v12390_v50 = vpop.f32.mrb[159].mxu0 }
0x3f6f   : > { %v6298_v53 = vpop.f32.mrb[140].mxu1 }
0x3f70   : > { %v14295_v54 = vadd.f32 %v6298_v53, %v5912_v52  ;;  %v12365_v57 = vpop.f32.mrb[141].mxu1 }
0x3f71   : > { %v6301_v59 = vpop.f32.mrb[142].mxu1 }
0x3f72   : > { %v12366_v60 = vpop.f32.mrb[143].mxu1 }
0x3f77   : > { %v6421_v61 = vpop.f32.mrb[144].mxu1 }
0x3f78   : > { %v6422_v63 = vadd.f32 %v11174_v56, %v6421_v61  ;;  %v12381_v1 = vpop.f32.mrb[145].mxu1 }
0x3f79   : > { %v6424_v3 = vpop.f32.mrb[146].mxu1 }
0x3f7a   : > { %v12382_v4 = vpop.f32.mrb[147].mxu1  ;;  %12392 = vmatpush3.xpose.msk.msra.mxu1 %vm511_vm2, %v6422_v63  ;;  %v7046_v3 = vsel %vm677_vm3, %v7041_v2, 0  ;;  %v11214_v2 = vld [vmem:[#allocation10 + $0x48] ss:$0 sm:$0xff] }
0x3f7b   : > { %12396 = vmatprep.subr.mxu1 %v13426_v0 }
0x3f7d   : > { %12394 = vmatmul.mubr.msk.f32.vlgmr.msra.gmra.mrb[148].mxu1 %vm511_vm2, %v6361_v5 }
0x3f7e   : > { %12397 = vmatpush3.msra.mxu1 %v6483_v9  ;;  %12398 = vmatprep.mubr.msk.f32.mxu1 %vm13427_vm0, %v13426_v0 }
0x3f7f   : > { %12407 = vmatprep.subr.bf16.mxu1 %v13426_v0 }
0x4050   : > { %v6560_v12 = vpop.f32.mrb[148].mxu1 }
0x4051   : > { %v12395_v46 = vpop.f32.mrb[149].mxu1  ;;  %v6564_v10 = vsel %vm511_vm2, %v6560_v12, -inf }
0x4052   : > { %6565 = vmax.xlane.f32.xlu0 %v6564_v10 }
0x40df   : > { %v6566_v11 = vpop.xlane.xlu0 %6565 }
0x40e0   : > { %v6567_v13 = vsub.f32 %v6560_v12, %v6566_v11 }
0x40e2   : > { %v6568_v7 = vmul.f32 1.442695, %v6567_v13 }
0x40e4   : > { %13141 = vpow2.f32 %v6568_v7 }
0x40ee   : > { %v13142_v38 = vpop.eup %13141 }
0x40ef   : > { %v6570_v14 = vsel %vm511_vm2, %v13142_v38, 0.0 }
0x40f0   : > { %6571 = vadd.xlane.f32.xlu1 %v6570_v14 }
0x417d   : > { %v6572_v15 = vpop.xlane.xlu1 %6571 }
0x417e   : > { %13143 = vrcp.f32 %v6572_v15 }
0x4188   : > { %v13144_v6 = vpop.eup %13143 }
0x4189   : > { %v6574_v17 = vmul.f32 %v13144_v6, %v13142_v38 }
0x418b   : > { %12399 = vmatmul.mubr.msk.f32.vlgmr.msra.gmra.mrb[150].mxu1 %vm511_vm2, %v6574_v17 }
0x418c   : > { %12408 = vmatpush3.bf16.msra.mxu1 %v13005_v16  ;;  %12411 = vmatprep.mubr.msk.bf16.mxu1 %vm13427_vm0, %v13426_v0 }
0x418d   : > { %12409 = vmatprep.subr.bf16.mxu1 %v13426_v0 }
0x4190   : > { %12410 = vmatpush3.bf16.msra.mxu1 %v13006_v18  ;;  %v13011_v18 = vld [vmem:[#allocation8 + $0x3e0] sm:$0xff]  }
0x4191   : > { %12423 = vmatprep.subr.bf16.mxu1 %v13426_v0 }
0x4193   : > { %12412 = vmatmul.mubr.msk.bf16.vlgmr.msra.gmra.mrb[152].mxu1 %vm345_vm1, %v14214_v23 }
0x4194   : > { %12424 = vmatpush3.bf16.msra.mxu1 %v13007_v19  ;;  %12427 = vmatprep.mubr.msk.bf16.mxu1 %vm13427_vm0, %v13426_v0  ;;  %v13012_v19 = vld [vmem:[#allocation8 + $0x3e8] sm:$0xff]  }
0x4195   : > { %12425 = vmatprep.subr.bf16.mxu1 %v13426_v0 }
0x4198   : > { %12426 = vmatpush3.bf16.msra.mxu1 %v13008_v20  ;;  %v13013_v20 = vld [vmem:[#allocation8 + $0x3f0] sm:$0xff]  }
0x4199   : > { %12441 = vmatprep.subr.bf16.mxu1 %v13426_v0 }
0x419b   : > { %12428 = vmatmul.mubr.msk.bf16.vlgmr.msra.gmra.mrb[156].mxu1 %vm345_vm1, %v14196_v55 }
0x419c   : > { %12443 = vmatprep.mubr.msk.bf16.mxu1 %vm13427_vm0, %v13426_v0  ;;  %12442 = vmatpush3.bf16.msra.mxu1 %v7046_v3 }
0x419d   : > { %12455 = vmatprep.subr.bf16.mxu1 %v13426_v0 }
0x425e   : > { %v6644_v23 = vpop.f32.mrb[150].mxu1 }
0x425f   : > { %v6648_v58 = vpack.c.bf16 %v6644_v23, %v6644_v23  ;;  %v12400_v26 = vpop.f32.mrb[151].mxu1 }
0x4261   : > { %12404 = vmatmul.mubr.msk.bf16.vlgmr.msra.gmra.mrb[160].mxu0 %vm511_vm2, %v6648_v58  ;;  %v11202_v58 = vld [vmem:[#allocation10 + $0x44] ss:$0 sm:$0xff] }
0x4262   : > { %12416 = vmatpush3.bf16.msra.mxu0 %v13009_v25  ;;  %12419 = vmatprep.mubr.msk.bf16.mxu0 %vm13427_vm0, %v13426_v0 }
0x4263   : > { %12417 = vmatprep.subr.bf16.mxu0 %v13426_v0 }
0x4266   : > { %v6752_v28 = vpop.f32.mrb[152].mxu1  ;;  %12418 = vmatpush3.bf16.msra.mxu0 %v13010_v27  ;;  %v11203_v27 = vld [vmem:[#allocation10 + $0x45] ss:$0 sm:$0xff] }
0x4267   : > { %v12413_v29 = vpop.f32.mrb[153].mxu1  ;;  %12431 = vmatprep.subr.mxu0 %v13426_v0  ;;  %v6753_v50 = vadd.f32 %v11186_v44, %v6752_v28 }
0x4268   : > { %v6755_v30 = vpop.f32.mrb[154].mxu1 }
0x4269   : > { %v12414_v31 = vpop.f32.mrb[155].mxu1  ;;  %12420 = vmatmul.mubr.msk.bf16.vlgmr.msra.gmra.mrb[164].mxu0 %vm345_vm1, %v14196_v55 }
0x426a   : > { %12433 = vmatprep.mubr.msk.f32.mxu0 %vm13427_vm0, %v13426_v0  ;;  %v13015_v31 = vld [vmem:[#allocation8 + $0x400] sm:$0xff]  }
0x426e   : > { %v6874_v32 = vpop.f32.mrb[156].mxu1 }
0x426f   : > { %v12429_v33 = vpop.f32.mrb[157].mxu1  ;;  %v6875_v51 = vadd.f32 %v11194_v8, %v6874_v32  ;;  %v13016_v32 = vld [vmem:[#allocation8 + $0x408] sm:$0xff]  }
0x4270   : > { %v6877_v34 = vpop.f32.mrb[158].mxu1  ;;  %v11204_v33 = vld [vmem:[#allocation10 + $0x46] ss:$0 sm:$0xff] }
0x4271   : > { %v12430_v35 = vpop.f32.mrb[159].mxu1 }
0x4334   : > { %v6690_v36 = vpop.f32.mrb[160].mxu0 }
0x4335   : > { %v6696_v37 = vadd.f32 %v6690_v36, %v14295_v54  ;;  %v12405_v39 = vpop.f32.mrb[161].mxu0 }
0x4336   : > { %v6693_v40 = vpop.f32.mrb[162].mxu0 }
0x4337   : > { %v12406_v41 = vpop.f32.mrb[163].mxu0 }
0x433c   : > { %v6813_v43 = vpop.f32.mrb[164].mxu0 }
0x433d   : > { %v6814_v45 = vadd.f32 %v11190_v42, %v6813_v43  ;;  %v12421_v47 = vpop.f32.mrb[165].mxu0  ;;  %v11208_v42 = vld [vmem:[#allocation10 + $0x47] ss:$0 sm:$0xff] }
0x433e   : > { %v6816_v48 = vpop.f32.mrb[166].mxu0 }
0x433f   : > { %v12422_v49 = vpop.f32.mrb[167].mxu0  ;;  %12432 = vmatpush3.xpose.msk.msra.mxu0 %vm511_vm2, %v6814_v45 }
0x4340   : > { %12436 = vmatprep.subr.mxu0 %v13426_v0 }
0x4342   : > { %12434 = vmatmul.mubr.msk.f32.vlgmr.msra.gmra.mrb[168].mxu0 %vm511_vm2, %v6753_v50 }
0x4343   : > { %12437 = vmatpush3.msra.mxu0 %v6875_v51  ;;  %12438 = vmatprep.mubr.msk.f32.mxu0 %vm13427_vm0, %v13426_v0 }
0x4344   : > { %12447 = vmatprep.subr.bf16.mxu0 %v13426_v0 }
0x4415   : > { %v6952_v52 = vpop.f32.mrb[168].mxu0 }
0x4416   : > { %v12435_v53 = vpop.f32.mrb[169].mxu0  ;;  %v6956_v54 = vsel %vm511_vm2, %v6952_v52, -inf }
0x4417   : > { %6957 = vmax.xlane.f32.xlu0 %v6956_v54 }
0x44a4   : > { %v6958_v57 = vpop.xlane.xlu0 %6957 }
0x44a5   : > { %v6959_v59 = vsub.f32 %v6952_v52, %v6958_v57  ;;  %v13017_v57 = vld [vmem:[#allocation8 + $0x410] sm:$0xff]  }
0x44a7   : > { %v6960_v60 = vmul.f32 1.442695, %v6959_v59  ;;  %v13018_v59 = vld [vmem:[#allocation8 + $0x430] sm:$0xff]  }
0x44a9   : > { %13145 = vpow2.f32 %v6960_v60  ;;  %v13019_v60 = vld [vmem:[#allocation8 + $0x418] sm:$0xff]  }
0x44b3   : > { %v13146_v56 = vpop.eup %13145 }
0x44b4   : > { %v6962_v61 = vsel %vm511_vm2, %v13146_v56, 0.0 }
0x44b5   : > { %6963 = vadd.xlane.f32.xlu1 %v6962_v61 }
0x4542   : > { %v6964_v62 = vpop.xlane.xlu1 %6963 }
0x4543   : > { %13147 = vrcp.f32 %v6964_v62 }
0x454d   : > { %v13148_v63 = vpop.eup %13147 }
0x454e   : > { %v6966_v1 = vmul.f32 %v13148_v63, %v13146_v56  ;;  %v13020_v56 = vld [vmem:[#allocation8 + $0x438] sm:$0xff]  }
0x4550   : > { %12439 = vmatmul.mubr.msk.f32.vlgmr.msra.gmra.mrb[170].mxu0 %vm511_vm2, %v6966_v1 }
0x4551   : > { %12451 = vmatprep.mubr.msk.bf16.mxu0 %vm13427_vm0, %v13426_v0  ;;  %12448 = vmatpush3.bf16.msra.mxu0 %v13011_v18 }
0x4552   : > { %12449 = vmatprep.subr.bf16.mxu0 %v13426_v0 }
0x4555   : > { %12450 = vmatpush3.bf16.msra.mxu0 %v13012_v19  ;;  %v11220_v19 = vld [vmem:[#allocation10 + $0x4b] ss:$0 sm:$0xff] }
0x4556   : > { %12467 = vmatprep.subr.bf16.mxu0 %v13426_v0 }
0x4623   : > { %v7036_v4 = vpop.f32.mrb[170].mxu0 }
0x4624   : > { %v7040_v5 = vpack.c.bf16 %v7036_v4, %v7036_v4  ;;  %v12440_v9 = vpop.f32.mrb[171].mxu0  ;;  %v11215_v4 = vld [vmem:[#allocation10 + $0x49] ss:$0 sm:$0xff] }
0x4626   : > { %12444 = vmatmul.mubr.msk.bf16.vlgmr.msra.gmra.mrb[160].mxu1 %vm511_vm2, %v7040_v5 }
0x4627   : > { %12463 = vmatprep.mubr.msk.bf16.mxu1 %vm13427_vm0, %v13426_v0  ;;  %12456 = vmatpush3.bf16.msra.mxu1 %v13013_v20 }
0x4628   : > { %12457 = vmatprep.subr.bf16.mxu1 %v13426_v0 }
0x46f9   : > { %v7082_v12 = vpop.f32.mrb[160].mxu1 }
0x46fa   : > { %v7088_v46 = vadd.f32 %v7082_v12, %v6696_v37  ;;  %v12445_v10 = vpop.f32.mrb[161].mxu1  ;;  %v13021_v12 = vld [vmem:[#allocation8 + $0x420] sm:$0xff]  }
0x46fb   : > { %v7085_v11 = vpop.f32.mrb[162].mxu1  ;;  %v13022_v10 = vld [vmem:[#allocation8 + $0x428] sm:$0xff]  }
0x46fc   : > { %v12446_v13 = vpop.f32.mrb[163].mxu1  ;;  %v7089_v7 = vadd.f32 %v7088_v46, %v14210_v21  ;;  %v13014_v21 = vld [vmem:[#allocation8 + $0x3f8] sm:$0xff]  }
0x46fd   : > { %12458 = vmatpush3.bf16.msra.mxu1 %v13014_v21  ;;  %v11224_v11 = vld [vmem:[#allocation10 + $0x4c] ss:$0 sm:$0xff]  ;;  %v11216_v21 = vld [vmem:[#allocation10 + $0x4a] ss:$0 sm:$0xff] }
0x46fe   : > { %v7090_v38 = vsel %vm345_vm1, %v7089_v7, 0.0  ;;  %12459 = vmatprep.subr.bf16.mxu1 %v13426_v0 }
0x46ff   : > { %7091 = vadd.xlane.f32.xlu0 %v7090_v38 }
0x4701   : > { %12460 = vmatpush3.bf16.msra.mxu1 %v13015_v31 }
0x4702   : > { %12461 = vmatprep.subr.bf16.mxu1 %v13426_v0 }
0x4705   : > { %12462 = vmatpush3.bf16.msra.mxu1 %v13016_v32 }
0x4706   : > { %12483 = vmatprep.subr.bf16.mxu1 %v13426_v0 }
0x478c   : > { %v7092_v14 = vpop.xlane.xlu0 %7091 }
0x478d   : > { %v7093_v15 = vmul.f32 0.03125, %v7092_v14 }
0x478f   : > { %v7094_v6 = vsub.f32 %v7089_v7, %v7093_v15 }
0x4791   : > { %v7095_v16 = vmul.f32 %v7094_v6, %v7094_v6 }
0x4793   : > { %v7096_v17 = vsel %vm345_vm1, %v7095_v16, 0.0 }
0x4794   : > { %7097 = vadd.xlane.f32.xlu1 %v7096_v17 }
0x4821   : > { %v7098_v22 = vpop.xlane.xlu1 %7097 }
0x4822   : > { %v7099_v24 = vmul.f32 0.03125, %v7098_v22 }
0x4824   : > { %v7100_v23 = vadd.f32 1e-05, %v7099_v24 }
0x4826   : > { %13149 = vrsqrt.f32 %v7100_v23 }
0x4830   : > { %v13150_v25 = vpop.eup %13149 }
0x4831   : > { %v7102_v26 = vmul.f32 %v13150_v25, %v7094_v6 }
0x4833   : > { %v7108_v28 = vmul.f32 %v11202_v58, %v7102_v26 }
0x4835   : > { %v7114_v29 = vadd.f32 %v11203_v27, %v7108_v28 }
0x4837   : > { %v7115_v30 = vpack.c.bf16 %v7114_v29, %v7114_v29 }
0x4839   : > { %12452 = vmatmul.mubr.msk.bf16.vlgmr.msra.gmra.mrb[172].mxu0 %vm345_vm1, %v7115_v30 }
0x483a   : > { %12471 = vmatprep.mubr.msk.bf16.mxu0 %vm13427_vm0, %v13426_v0  ;;  %12468 = vmatpush3.bf16.msra.mxu0 %v13017_v57 }
0x483b   : > { %12469 = vmatprep.subr.bf16.mxu0 %v13426_v0 }
0x483e   : > { %12470 = vmatpush3.bf16.msra.mxu0 %v13019_v60 }
0x483f   : > { %12475 = vmatprep.subr.bf16.mxu0 %v13426_v0 }
0x490c   : > { %v7174_v34 = vpop.f32.mrb[172].mxu0 }
0x490d   : > { %v7175_v35 = vadd.f32 %v11204_v33, %v7174_v34  ;;  %v12453_v36 = vpop.f32.mrb[173].mxu0 }
0x490e   : > { %v7177_v37 = vpop.f32.mrb[174].mxu0  ;;  %v13023_v36 = vld [vmem:[#allocation8 + $0x448] sm:$0xff]  }
0x490f   : > { %v7180_v39 = vmax.f32 %v7175_v35, 0.0  ;;  %v12454_v40 = vpop.f32.mrb[175].mxu0 }
0x4910   : > { %v13025_v40 = vld [vmem:[#allocation8 + $0x468] sm:$0xff]  }
0x4911   : > { %v7181_v41 = vpack.c.bf16 %v7180_v39, %v7180_v39  ;;  %v13024_v39 = vld [vmem:[#allocation8 + $0x450] sm:$0xff]  }
0x4913   : > { %12464 = vmatmul.mubr.msk.bf16.vlgmr.msra.gmra.mrb[164].mxu1 %vm2033_vm4, %v7181_v41  ;;  %v13026_v41 = vld [vmem:[#allocation8 + $0x470] sm:$0xff]  }
0x4914   : > { %12487 = vmatprep.mubr.msk.bf16.mxu1 %vm13427_vm0, %v13426_v0  ;;  %12484 = vmatpush3.bf16.msra.mxu1 %v13018_v59 }
0x4915   : > { %12485 = vmatprep.subr.bf16.mxu1 %v13426_v0 }
0x4918   : > { %12486 = vmatpush3.bf16.msra.mxu1 %v13020_v56 }
0x4919   : > { %12496 = vmatprep.subr.mxu1 %v13426_v0 }
0x49e6   : > { %v7256_v43 = vpop.f32.mrb[164].mxu1 }
0x49e7   : > { %v7257_v44 = vadd.f32 %v11208_v42, %v7256_v43  ;;  %v12465_v45 = vpop.f32.mrb[165].mxu1  ;;  %v7637_v42 = vld [vmem:[#allocation8 + $0x440] sm:$0xf] }
0x49e8   : > { %v7259_v47 = vpop.f32.mrb[166].mxu1  ;;  %v7642_v43 = vsel %vm677_vm3, %v7637_v42, 0  ;;  %v13027_v45 = vld [vmem:[#allocation8 + $0x458] sm:$0xff]  }
0x49e9   : > { %v12466_v8 = vpop.f32.mrb[167].mxu1  ;;  %v7262_v48 = vadd.f32 %v7257_v44, %v7114_v29 }
0x49eb   : > { %v7263_v49 = vsel %vm345_vm1, %v7262_v48, 0.0 }
0x49ec   : > { %7264 = vadd.xlane.f32.xlu0 %v7263_v49 }
0x4a79   : > { %v7265_v50 = vpop.xlane.xlu0 %7264 }
0x4a7a   : > { %v7266_v51 = vmul.f32 0.03125, %v7265_v50 }
0x4a7c   : > { %v7267_v52 = vsub.f32 %v7262_v48, %v7266_v51  ;;  %v13028_v48 = vld [vmem:[#allocation8 + $0x460] sm:$0xff]  }
0x4a7e   : > { %v7268_v53 = vmul.f32 %v7267_v52, %v7267_v52 }
0x4a80   : > { %v7269_v54 = vsel %vm345_vm1, %v7268_v53, 0.0 }
0x4a81   : > { %7270 = vadd.xlane.f32.xlu1 %v7269_v54 }
0x4b0e   : > { %v7271_v61 = vpop.xlane.xlu1 %7270 }
0x4b0f   : > { %v7272_v62 = vmul.f32 0.03125, %v7271_v61 }
0x4b11   : > { %v7273_v63 = vadd.f32 1e-05, %v7272_v62 }
0x4b13   : > { %13151 = vrsqrt.f32 %v7273_v63  ;;  %v11237_v63 = vld [vmem:[#allocation10 + $0x4e] ss:$0 sm:$0xff] }
0x4b1d   : > { %v13152_v1 = vpop.eup %13151 }
0x4b1e   : > { %v7275_v3 = vmul.f32 %v13152_v1, %v7267_v52 }
0x4b20   : > { %v7281_v5 = vmul.f32 %v11214_v2, %v7275_v3  ;;  %v11233_v2 = vld [vmem:[#allocation10 + $0x4d] ss:$0 sm:$0xff] }
0x4b22   : > { %v14369_v9 = vadd.f32 %v11215_v4, %v7281_v5  ;;  %v11241_v5 = vld [vmem:[#allocation10 + $0x4f] ss:$0 sm:$0xff] }
0x4b24   : > { %v14373_v46 = vpack.c.bf16 %v14369_v9, %v14369_v9 }
0x4b26   : > { %12472 = vmatmul.mubr.msk.bf16.vlgmr.msra.gmra.mrb[176].mxu0 %vm345_vm1, %v14373_v46  ;;  %12488 = vmatmul.mubr.msk.bf16.vlgmr.msra.gmra.mrb[168].mxu1 %vm345_vm1, %v14373_v46 }
0x4b27   : > { %12476 = vmatpush3.bf16.msra.mxu0 %v13021_v12  ;;  %12479 = vmatprep.mubr.msk.bf16.mxu0 %vm13427_vm0, %v13426_v0 }
0x4b28   : > { %12477 = vmatprep.subr.bf16.mxu0 %v13426_v0  ;;  %12498 = vmatprep.mubr.msk.f32.mxu1 %vm13427_vm0, %v13426_v0 }
0x4b2b   : > { %12478 = vmatpush3.bf16.msra.mxu0 %v13022_v10 }
0x4b2c   : > { %12491 = vmatprep.subr.mxu0 %v13426_v0 }
0x4b2e   : > { %12480 = vmatmul.mubr.msk.bf16.vlgmr.msra.gmra.mrb[180].mxu0 %vm345_vm1, %v14373_v46 }
0x4b2f   : > { %12493 = vmatprep.mubr.msk.f32.mxu0 %vm13427_vm0, %v13426_v0 }
0x4bf9   : > { %v7348_v13 = vpop.f32.mrb[176].mxu0  ;;  %v7470_v7 = vpop.f32.mrb[168].mxu1 }
0x4bfa   : > { %v7471_v38 = vadd.f32 %v11224_v11, %v7470_v7  ;;  %v12473_v14 = vpop.f32.mrb[177].mxu0  ;;  %v12489_v15 = vpop.f32.mrb[169].mxu1  ;;  %v7349_v58 = vadd.f32 %v11216_v21, %v7348_v13  ;;  %v13029_v21 = vld [vmem:[#allocation8 + $0x480] sm:$0xff]  }
0x4bfb   : > { %v7351_v6 = vpop.f32.mrb[178].mxu0  ;;  %v7473_v16 = vpop.f32.mrb[170].mxu1 }
0x4bfc   : > { %v12474_v17 = vpop.f32.mrb[179].mxu0  ;;  %v12490_v18 = vpop.f32.mrb[171].mxu1  ;;  %12497 = vmatpush3.msra.mxu1 %v7471_v38 }
0x4bfd   : > { %12507 = vmatprep.subr.bf16.mxu1 %v13426_v0 }
0x4c01   : > { %v7409_v20 = vpop.f32.mrb[180].mxu0 }
0x4c02   : > { %v7410_v22 = vadd.f32 %v11220_v19, %v7409_v20  ;;  %v12481_v24 = vpop.f32.mrb[181].mxu0 }
0x4c03   : > { %v7412_v23 = vpop.f32.mrb[182].mxu0  ;;  %v13030_v24 = vld [vmem:[#allocation8 + $0x488] sm:$0xff]  }
0x4c04   : > { %v12482_v25 = vpop.f32.mrb[183].mxu0  ;;  %12492 = vmatpush3.xpose.msk.msra.mxu0 %vm511_vm2, %v7410_v22  ;;  %v13031_v23 = vld [vmem:[#allocation8 + $0x4a0] sm:$0xff]  }
0x4c05   : > { %12501 = vmatprep.subr.bf16.mxu0 %v13426_v0  ;;  %v13032_v25 = vld [vmem:[#allocation8 + $0x4a8] sm:$0xff]  }
0x4c07   : > { %12494 = vmatmul.mubr.msk.f32.vlgmr.msra.gmra.mrb[184].mxu0 %vm511_vm2, %v7349_v58  ;;  %v8033_v58 = vld [vmem:[#allocation8 + $0x478] sm:$0xf] }
0x4c08   : > { %12503 = vmatprep.mubr.msk.bf16.mxu0 %vm13427_vm0, %v13426_v0  ;;  %12502 = vmatpush3.bf16.msra.mxu0 %v7642_v43 }
0x4c09   : > { %12515 = vmatprep.subr.bf16.mxu0 %v13426_v0 }
0x4cda   : > { %v7548_v26 = vpop.f32.mrb[184].mxu0 }
0x4cdb   : > { %v12495_v27 = vpop.f32.mrb[185].mxu0  ;;  %v7552_v28 = vsel %vm511_vm2, %v7548_v26, -inf }
0x4cdc   : > { %7553 = vmax.xlane.f32.xlu0 %v7552_v28  ;;  %v13033_v28 = vld [vmem:[#allocation8 + $0x490] sm:$0xff]  }
0x4d69   : > { %v7554_v29 = vpop.xlane.xlu0 %7553 }
0x4d6a   : > { %v7555_v30 = vsub.f32 %v7548_v26, %v7554_v29  ;;  %v8038_v26 = vsel %vm677_vm3, %v8033_v58, 0 }
0x4d6c   : > { %v7556_v31 = vmul.f32 1.442695, %v7555_v30 }
0x4d6e   : > { %13153 = vpow2.f32 %v7556_v31  ;;  %v13034_v31 = vld [vmem:[#allocation8 + $0x498] sm:$0xff]  }
0x4d78   : > { %v13154_v32 = vpop.eup %13153 }
0x4d79   : > { %v7558_v33 = vsel %vm511_vm2, %v13154_v32, 0.0 }
0x4d7a   : > { %7559 = vadd.xlane.f32.xlu1 %v7558_v33 }
0x4e07   : > { %v7560_v34 = vpop.xlane.xlu1 %7559 }
0x4e08   : > { %13155 = vrcp.f32 %v7560_v34 }
0x4e12   : > { %v13156_v35 = vpop.eup %13155 }
0x4e13   : > { %v7562_v37 = vmul.f32 %v13156_v35, %v13154_v32 }
0x4e15   : > { %12499 = vmatmul.mubr.msk.f32.vlgmr.msra.gmra.mrb[172].mxu1 %vm511_vm2, %v7562_v37 }
0x4e16   : > { %12508 = vmatpush3.bf16.msra.mxu1 %v13023_v36  ;;  %12511 = vmatprep.mubr.msk.bf16.mxu1 %vm13427_vm0, %v13426_v0 }
0x4e17   : > { %12509 = vmatprep.subr.bf16.mxu1 %v13426_v0 }
0x4e1a   : > { %12510 = vmatpush3.bf16.msra.mxu1 %v13024_v39 }
0x4e1b   : > { %12523 = vmatprep.subr.bf16.mxu1 %v13426_v0 }
0x4e1d   : > { %12512 = vmatmul.mubr.msk.bf16.vlgmr.msra.gmra.mrb[176].mxu1 %vm345_vm1, %v14373_v46 }
0x4e1e   : > { %12524 = vmatpush3.bf16.msra.mxu1 %v13025_v40  ;;  %12527 = vmatprep.mubr.msk.bf16.mxu1 %vm13427_vm0, %v13426_v0 }
0x4e1f   : > { %12525 = vmatprep.subr.bf16.mxu1 %v13426_v0 }
0x4e22   : > { %12526 = vmatpush3.bf16.msra.mxu1 %v13026_v41  ;;  %v11232_v41 = vld [vmem:[#allocation10 + $0x56] ss:$0 sm:$0xff] }
0x4e23   : > { %12541 = vmatprep.subr.bf16.mxu1 %v13426_v0 }
0x4e25   : > { %12528 = vmatmul.mubr.msk.bf16.vlgmr.msra.gmra.mrb[180].mxu1 %vm345_vm1, %v14373_v46 }
0x4e26   : > { %12543 = vmatprep.mubr.msk.bf16.mxu1 %vm13427_vm0, %v13426_v0  ;;  %12542 = vmatpush3.bf16.msra.mxu1 %v8038_v26 }
0x4e27   : > { %12555 = vmatprep.subr.bf16.mxu1 %v13426_v0 }
0x4ee8   : > { %v7632_v44 = vpop.f32.mrb[172].mxu1 }
0x4ee9   : > { %v7636_v47 = vpack.c.bf16 %v7632_v44, %v7632_v44  ;;  %v12500_v8 = vpop.f32.mrb[173].mxu1 }
0x4eeb   : > { %12504 = vmatmul.mubr.msk.bf16.vlgmr.msra.gmra.mrb[188].mxu0 %vm511_vm2, %v7636_v47 }
0x4eec   : > { %12516 = vmatpush3.bf16.msra.mxu0 %v13027_v45  ;;  %12519 = vmatprep.mubr.msk.bf16.mxu0 %vm13427_vm0, %v13426_v0 }
0x4eed   : > { %12517 = vmatprep.subr.bf16.mxu0 %v13426_v0 }
0x4ef0   : > { %v7744_v49 = vpop.f32.mrb[176].mxu1  ;;  %12518 = vmatpush3.bf16.msra.mxu0 %v13028_v48  ;;  %v11253_v48 = vld [vmem:[#allocation10 + $0x51] ss:$0 sm:$0xff] }
0x4ef1   : > { %v12513_v50 = vpop.f32.mrb[177].mxu1  ;;  %12531 = vmatprep.subr.mxu0 %v13426_v0  ;;  %v7745_v11 = vadd.f32 %v11233_v2, %v7744_v49 }
0x4ef2   : > { %v7747_v51 = vpop.f32.mrb[178].mxu1  ;;  %v11249_v50 = vld [vmem:[#allocation10 + $0x50] ss:$0 sm:$0xff] }
0x4ef3   : > { %v12514_v52 = vpop.f32.mrb[179].mxu1  ;;  %12520 = vmatmul.mubr.msk.bf16.vlgmr.msra.gmra.mrb[192].mxu0 %vm345_vm1, %v14373_v46 }
0x4ef4   : > { %12533 = vmatprep.mubr.msk.f32.mxu0 %vm13427_vm0, %v13426_v0 }
0x4ef8   : > { %v7866_v53 = vpop.f32.mrb[180].mxu1 }
0x4ef9   : > { %v12529_v54 = vpop.f32.mrb[181].mxu1  ;;  %v7867_v13 = vadd.f32 %v11241_v5, %v7866_v53  ;;  %v11257_v53 = vld [vmem:[#allocation10 + $0x52] ss:$0 sm:$0xff] }
0x4efa   : > { %v7869_v57 = vpop.f32.mrb[182].mxu1 }
0x4efb   : > { %v12530_v59 = vpop.f32.mrb[183].mxu1 }
0x4fbe   : > { %v14423_v60 = vpop.f32.mrb[188].mxu0 }
0x4fbf   : > { %v12505_v56 = vpop.f32.mrb[189].mxu0  ;;  %v7688_v42 = vadd.f32 %v11232_v41, %v14423_v60 }
0x4fc0   : > { %v7681_v61 = vpop.f32.mrb[190].mxu0 }
0x4fc1   : > { %v12506_v62 = vpop.f32.mrb[191].mxu0 }
0x4fc6   : > { %v7805_v1 = vpop.f32.mrb[192].mxu0 }
0x4fc7   : > { %v7806_v3 = vadd.f32 %v11237_v63, %v7805_v1  ;;  %v12521_v4 = vpop.f32.mrb[193].mxu0 }
0x4fc8   : > { %v7808_v12 = vpop.f32.mrb[194].mxu0 }
0x4fc9   : > { %v12522_v10 = vpop.f32.mrb[195].mxu0  ;;  %12532 = vmatpush3.xpose.msk.msra.mxu0 %vm511_vm2, %v7806_v3 }
0x4fca   : > { %12536 = vmatprep.subr.mxu0 %v13426_v0  ;;  %v13035_v10 = vld [vmem:[#allocation8 + $0x4b8] sm:$0xff]  }
0x4fcc   : > { %12534 = vmatmul.mubr.msk.f32.vlgmr.msra.gmra.mrb[186].mxu0 %vm511_vm2, %v7745_v11 }
0x4fcd   : > { %12537 = vmatpush3.msra.mxu0 %v7867_v13  ;;  %12538 = vmatprep.mubr.msk.f32.mxu0 %vm13427_vm0, %v13426_v0  ;;  %v13036_v13 = vld [vmem:[#allocation8 + $0x4c0] sm:$0xff]  }
0x4fce   : > { %12547 = vmatprep.subr.bf16.mxu0 %v13426_v0 }
0x509f   : > { %v7944_v7 = vpop.f32.mrb[186].mxu0 }
0x50a0   : > { %v12535_v38 = vpop.f32.mrb[187].mxu0  ;;  %v7948_v14 = vsel %vm511_vm2, %v7944_v7, -inf }
0x50a1   : > { %7949 = vmax.xlane.f32.xlu0 %v7948_v14  ;;  %v13038_v38 = vld [vmem:[#allocation8 + $0x4e0] sm:$0xff]   ;;  %v8425_v14 = vld [vmem:[#allocation8 + $0x4b0] sm:$0xf] }
0x512e   : > { %v7950_v15 = vpop.xlane.xlu0 %7949 }
0x512f   : > { %v7951_v6 = vsub.f32 %v7944_v7, %v7950_v15  ;;  %v13037_v7 = vld [vmem:[#allocation8 + $0x4d8] sm:$0xff]   ;;  %v8430_v15 = vsel %vm677_vm3, %v8425_v14, 0 }
0x5131   : > { %v7952_v16 = vmul.f32 1.442695, %v7951_v6 }
0x5133   : > { %13157 = vpow2.f32 %v7952_v16  ;;  %v13039_v16 = vld [vmem:[#allocation8 + $0x4c8] sm:$0xff]  }
0x513d   : > { %v13158_v17 = vpop.eup %13157 }
0x513e   : > { %v7954_v18 = vsel %vm511_vm2, %v13158_v17, 0.0 }
0x513f   : > { %7955 = vadd.xlane.f32.xlu1 %v7954_v18 }
0x51cc   : > { %v7956_v19 = vpop.xlane.xlu1 %7955 }
0x51cd   : > { %13159 = vrcp.f32 %v7956_v19  ;;  %v13040_v19 = vld [vmem:[#allocation8 + $0x4d0] sm:$0xff]  }
0x51d7   : > { %v13160_v20 = vpop.eup %13159 }
0x51d8   : > { %v7958_v22 = vmul.f32 %v13160_v20, %v13158_v17 }
0x51da   : > { %12539 = vmatmul.mubr.msk.f32.vlgmr.msra.gmra.mrb[196].mxu0 %vm511_vm2, %v7958_v22 }
0x51db   : > { %12548 = vmatpush3.bf16.msra.mxu0 %v13029_v21  ;;  %12551 = vmatprep.mubr.msk.bf16.mxu0 %vm13427_vm0, %v13426_v0 }
0x51dc   : > { %12549 = vmatprep.subr.bf16.mxu0 %v13426_v0 }
0x51df   : > { %12550 = vmatpush3.bf16.msra.mxu0 %v13030_v24 }
0x51e0   : > { %12563 = vmatprep.subr.bf16.mxu0 %v13426_v0 }
0x51e2   : > { %12552 = vmatmul.mubr.msk.bf16.vlgmr.msra.gmra.mrb[200].mxu0 %vm345_vm1, %v14373_v46 }
0x51e3   : > { %12564 = vmatpush3.bf16.msra.mxu0 %v13031_v23  ;;  %12567 = vmatprep.mubr.msk.bf16.mxu0 %vm13427_vm0, %v13426_v0 }
0x51e4   : > { %12565 = vmatprep.subr.bf16.mxu0 %v13426_v0 }
0x51e7   : > { %12566 = vmatpush3.bf16.msra.mxu0 %v13032_v25 }
0x51e8   : > { %12581 = vmatprep.subr.bf16.mxu0 %v13426_v0 }
0x51ea   : > { %12568 = vmatmul.mubr.msk.bf16.vlgmr.msra.gmra.mrb[204].mxu0 %vm345_vm1, %v14373_v46 }
0x51eb   : > { %12583 = vmatprep.mubr.msk.bf16.mxu0 %vm13427_vm0, %v13426_v0  ;;  %12582 = vmatpush3.bf16.msra.mxu0 %v8430_v15 }
0x51ec   : > { %12595 = vmatprep.subr.bf16.mxu0 %v13426_v0 }
0x52ad   : > { %v8028_v27 = vpop.f32.mrb[196].mxu0 }
0x52ae   : > { %v8032_v29 = vpack.c.bf16 %v8028_v27, %v8028_v27  ;;  %v12540_v30 = vpop.f32.mrb[197].mxu0 }
0x52b0   : > { %12544 = vmatmul.mubr.msk.bf16.vlgmr.msra.gmra.mrb[184].mxu1 %vm511_vm2, %v8032_v29 }
0x52b1   : > { %12556 = vmatpush3.bf16.msra.mxu1 %v13033_v28  ;;  %12559 = vmatprep.mubr.msk.bf16.mxu1 %vm13427_vm0, %v13426_v0 }
0x52b2   : > { %12557 = vmatprep.subr.bf16.mxu1 %v13426_v0 }
0x52b5   : > { %v8136_v32 = vpop.f32.mrb[200].mxu0  ;;  %12558 = vmatpush3.bf16.msra.mxu1 %v13034_v31 }
0x52b6   : > { %v12553_v33 = vpop.f32.mrb[201].mxu0  ;;  %12571 = vmatprep.subr.mxu1 %v13426_v0  ;;  %v8137_v59 = vadd.f32 %v11249_v50, %v8136_v32  ;;  %v11269_v32 = vld [vmem:[#allocation10 + $0x54] ss:$0 sm:$0xff] }
0x52b7   : > { %v8139_v34 = vpop.f32.mrb[202].mxu0 }
0x52b8   : > { %v12554_v35 = vpop.f32.mrb[203].mxu0  ;;  %12560 = vmatmul.mubr.msk.bf16.vlgmr.msra.gmra.mrb[188].mxu1 %vm345_vm1, %v14373_v46  ;;  %v11265_v34 = vld [vmem:[#allocation10 + $0x53] ss:$0 sm:$0xff] }
0x52b9   : > { %12573 = vmatprep.mubr.msk.f32.mxu1 %vm13427_vm0, %v13426_v0 }
0x52bd   : > { %v8258_v36 = vpop.f32.mrb[204].mxu0 }
0x52be   : > { %v12569_v37 = vpop.f32.mrb[205].mxu0  ;;  %v8259_v60 = vadd.f32 %v11257_v53, %v8258_v36  ;;  %v8817_v53 = vld [vmem:[#allocation8 + $0x4e8] sm:$0xf] }
0x52bf   : > { %v8261_v39 = vpop.f32.mrb[206].mxu0  ;;  %v11273_v37 = vld [vmem:[#allocation10 + $0x55] ss:$0 sm:$0xff] }
0x52c0   : > { %v12570_v40 = vpop.f32.mrb[207].mxu0 }
0x5383   : > { %v8074_v43 = vpop.f32.mrb[184].mxu1 }
0x5384   : > { %v14460_v44 = vadd.f32 %v8074_v43, %v7688_v42  ;;  %v12545_v45 = vpop.f32.mrb[185].mxu1 }
0x5385   : > { %v8077_v47 = vpop.f32.mrb[186].mxu1 }
0x5386   : > { %v12546_v8 = vpop.f32.mrb[187].mxu1 }
0x538b   : > { %v8197_v49 = vpop.f32.mrb[188].mxu1 }
0x538c   : > { %v8198_v51 = vadd.f32 %v11253_v48, %v8197_v49  ;;  %v12561_v52 = vpop.f32.mrb[189].mxu1 }
0x538d   : > { %v8200_v54 = vpop.f32.mrb[190].mxu1 }
0x538e   : > { %v12562_v57 = vpop.f32.mrb[191].mxu1  ;;  %12572 = vmatpush3.xpose.msk.msra.mxu1 %vm511_vm2, %v8198_v51  ;;  %v8822_v54 = vsel %vm677_vm3, %v8817_v53, 0 }
0x538f   : > { %12576 = vmatprep.subr.mxu1 %v13426_v0 }
0x5391   : > { %12574 = vmatmul.mubr.msk.f32.vlgmr.msra.gmra.mrb[174].mxu1 %vm511_vm2, %v8137_v59  ;;  %v13041_v59 = vld [vmem:[#allocation8 + $0x500] sm:$0xff]  }
0x5392   : > { %12577 = vmatpush3.msra.mxu1 %v8259_v60  ;;  %12578 = vmatprep.mubr.msk.f32.mxu1 %vm13427_vm0, %v13426_v0 }
0x5393   : > { %12587 = vmatprep.subr.bf16.mxu1 %v13426_v0 }
0x5464   : > { %v8336_v56 = vpop.f32.mrb[174].mxu1 }
0x5465   : > { %v12575_v61 = vpop.f32.mrb[175].mxu1  ;;  %v8340_v62 = vsel %vm511_vm2, %v8336_v56, -inf }
0x5466   : > { %8341 = vmax.xlane.f32.xlu0 %v8340_v62  ;;  %v13042_v61 = vld [vmem:[#allocation8 + $0x508] sm:$0xff]  }
0x54f3   : > { %v8342_v63 = vpop.xlane.xlu0 %8341 }
0x54f4   : > { %v8343_v1 = vsub.f32 %v8336_v56, %v8342_v63 }
0x54f6   : > { %v8344_v2 = vmul.f32 1.442695, %v8343_v1 }
0x54f8   : > { %13161 = vpow2.f32 %v8344_v2 }
0x5502   : > { %v13162_v3 = vpop.eup %13161 }
0x5503   : > { %v8346_v4 = vsel %vm511_vm2, %v13162_v3, 0.0 }
0x5504   : > { %8347 = vadd.xlane.f32.xlu1 %v8346_v4 }
0x5591   : > { %v8348_v5 = vpop.xlane.xlu1 %8347 }
0x5592   : > { %13163 = vrcp.f32 %v8348_v5 }
0x559c   : > { %v13164_v12 = vpop.eup %13163 }
0x559d   : > { %v8350_v11 = vmul.f32 %v13164_v12, %v13162_v3  ;;  %v11287_v12 = vld [vmem:[#allocation10 + $0x5a] ss:$0 sm:$0xff] }
0x559f   : > { %12579 = vmatmul.mubr.msk.f32.vlgmr.msra.gmra.mrb[192].mxu1 %vm511_vm2, %v8350_v11 }
0x55a0   : > { %12588 = vmatpush3.bf16.msra.mxu1 %v13035_v10  ;;  %12591 = vmatprep.mubr.msk.bf16.mxu1 %vm13427_vm0, %v13426_v0 }
0x55a1   : > { %12589 = vmatprep.subr.bf16.mxu1 %v13426_v0 }
0x55a4   : > { %12590 = vmatpush3.bf16.msra.mxu1 %v13036_v13 }
0x55a5   : > { %12603 = vmatprep.subr.bf16.mxu1 %v13426_v0 }
0x55a7   : > { %12592 = vmatmul.mubr.msk.bf16.vlgmr.msra.gmra.mrb[196].mxu1 %vm345_vm1, %v14373_v46 }
0x55a8   : > { %12604 = vmatpush3.bf16.msra.mxu1 %v13037_v7  ;;  %12607 = vmatprep.mubr.msk.bf16.mxu1 %vm13427_vm0, %v13426_v0 }
0x55a9   : > { %12605 = vmatprep.subr.bf16.mxu1 %v13426_v0 }
0x55ac   : > { %12606 = vmatpush3.bf16.msra.mxu1 %v13038_v38 }
0x55ad   : > { %12621 = vmatprep.subr.bf16.mxu1 %v13426_v0 }
0x55af   : > { %12608 = vmatmul.mubr.msk.bf16.vlgmr.msra.gmra.mrb[200].mxu1 %vm345_vm1, %v14373_v46 }
0x55b0   : > { %12623 = vmatprep.mubr.msk.bf16.mxu1 %vm13427_vm0, %v13426_v0  ;;  %12622 = vmatpush3.bf16.msra.mxu1 %v8822_v54  ;;  %v13048_v54 = vld [vmem:[#allocation8 + $0x530] sm:$0xff]  }
0x55b1   : > { %12635 = vmatprep.subr.bf16.mxu1 %v13426_v0 }
0x5672   : > { %v8420_v6 = vpop.f32.mrb[192].mxu1 }
0x5673   : > { %v8424_v17 = vpack.c.bf16 %v8420_v6, %v8420_v6  ;;  %v12580_v18 = vpop.f32.mrb[193].mxu1 }
0x5674   : > { %v13044_v18 = vld [vmem:[#allocation8 + $0x4f8] sm:$0xff]  }
0x5675   : > { %12584 = vmatmul.mubr.msk.bf16.vlgmr.msra.gmra.mrb[208].mxu0 %vm511_vm2, %v8424_v17 }
0x5676   : > { %12596 = vmatpush3.bf16.msra.mxu0 %v13039_v16  ;;  %12599 = vmatprep.mubr.msk.bf16.mxu0 %vm13427_vm0, %v13426_v0 }
0x5677   : > { %12597 = vmatprep.subr.bf16.mxu0 %v13426_v0 }
0x567a   : > { %v8528_v20 = vpop.f32.mrb[196].mxu1  ;;  %12598 = vmatpush3.bf16.msra.mxu0 %v13040_v19 }
0x567b   : > { %v12593_v21 = vpop.f32.mrb[197].mxu1  ;;  %12611 = vmatprep.subr.mxu0 %v13426_v0  ;;  %v8529_v40 = vadd.f32 %v11265_v34, %v8528_v20 }
0x567c   : > { %v8531_v22 = vpop.f32.mrb[198].mxu1 }
0x567d   : > { %v12594_v24 = vpop.f32.mrb[199].mxu1  ;;  %12600 = vmatmul.mubr.msk.bf16.vlgmr.msra.gmra.mrb[212].mxu0 %vm345_vm1, %v14373_v46 }
0x567e   : > { %12613 = vmatprep.mubr.msk.f32.mxu0 %vm13427_vm0, %v13426_v0  ;;  %v11281_v24 = vld [vmem:[#allocation10 + $0x57] ss:$0 sm:$0xff] }
0x5682   : > { %v8650_v23 = vpop.f32.mrb[200].mxu1 }
0x5683   : > { %v12609_v25 = vpop.f32.mrb[201].mxu1  ;;  %v8651_v41 = vadd.f32 %v11273_v37, %v8650_v23 }
0x5684   : > { %v8653_v58 = vpop.f32.mrb[202].mxu1  ;;  %v11282_v25 = vld [vmem:[#allocation10 + $0x58] ss:$0 sm:$0xff] }
0x5685   : > { %v12610_v26 = vpop.f32.mrb[203].mxu1 }
0x5748   : > { %v8466_v27 = vpop.f32.mrb[208].mxu0 }
0x5749   : > { %v8472_v28 = vadd.f32 %v8466_v27, %v14460_v44  ;;  %v12585_v29 = vpop.f32.mrb[209].mxu0  ;;  %v13045_v27 = vld [vmem:[#allocation8 + $0x510] sm:$0xff]  }
0x574a   : > { %v8469_v30 = vpop.f32.mrb[210].mxu0  ;;  %v13046_v29 = vld [vmem:[#allocation8 + $0x518] sm:$0xff]  }
0x574b   : > { %v12586_v31 = vpop.f32.mrb[211].mxu0  ;;  %v11283_v30 = vld [vmem:[#allocation10 + $0x59] ss:$0 sm:$0xff] }
0x5750   : > { %v8589_v33 = vpop.f32.mrb[212].mxu0 }
0x5751   : > { %v8590_v35 = vadd.f32 %v11269_v32, %v8589_v33  ;;  %v12601_v36 = vpop.f32.mrb[213].mxu0 }
0x5752   : > { %v8592_v46 = vpop.f32.mrb[214].mxu0  ;;  %v11291_v36 = vld [vmem:[#allocation10 + $0x5b] ss:$0 sm:$0xff] }
0x5753   : > { %v12602_v39 = vpop.f32.mrb[215].mxu0  ;;  %12612 = vmatpush3.xpose.msk.msra.mxu0 %vm511_vm2, %v8590_v35 }
0x5754   : > { %12616 = vmatprep.subr.mxu0 %v13426_v0 }
0x5756   : > { %12614 = vmatmul.mubr.msk.f32.vlgmr.msra.gmra.mrb[198].mxu0 %vm511_vm2, %v8529_v40 }
0x5757   : > { %12617 = vmatpush3.msra.mxu0 %v8651_v41  ;;  %12618 = vmatprep.mubr.msk.f32.mxu0 %vm13427_vm0, %v13426_v0 }
0x5758   : > { %12627 = vmatprep.subr.bf16.mxu0 %v13426_v0 }
0x5829   : > { %v8728_v42 = vpop.f32.mrb[198].mxu0 }
0x582a   : > { %v12615_v43 = vpop.f32.mrb[199].mxu0  ;;  %v8732_v44 = vsel %vm511_vm2, %v8728_v42, -inf }
0x582b   : > { %8733 = vmax.xlane.f32.xlu0 %v8732_v44 }
0x58b8   : > { %v8734_v45 = vpop.xlane.xlu0 %8733 }
0x58b9   : > { %v8735_v47 = vsub.f32 %v8728_v42, %v8734_v45 }
0x58bb   : > { %v8736_v8 = vmul.f32 1.442695, %v8735_v47 }
0x58bd   : > { %13165 = vpow2.f32 %v8736_v8 }
0x58c7   : > { %v13166_v48 = vpop.eup %13165 }
0x58c8   : > { %v8738_v49 = vsel %vm511_vm2, %v13166_v48, 0.0 }
0x58c9   : > { %8739 = vadd.xlane.f32.xlu1 %v8738_v49 }
0x5956   : > { %v8740_v50 = vpop.xlane.xlu1 %8739 }
0x5957   : > { %13167 = vrcp.f32 %v8740_v50 }
0x5961   : > { %v13168_v51 = vpop.eup %13167 }
0x5962   : > { %v8742_v52 = vmul.f32 %v13168_v51, %v13166_v48 }
0x5964   : > { %12619 = vmatmul.mubr.msk.f32.vlgmr.msra.gmra.mrb[216].mxu0 %vm511_vm2, %v8742_v52  ;;  %v13047_v52 = vld [vmem:[#allocation8 + $0x528] sm:$0xff]  }
0x5965   : > { %12631 = vmatprep.mubr.msk.bf16.mxu0 %vm13427_vm0, %v13426_v0 }
0x5a37   : > { %v8812_v57 = vpop.f32.mrb[216].mxu0 }
0x5a38   : > { %v8816_v60 = vpack.c.bf16 %v8812_v57, %v8812_v57  ;;  %v12620_v56 = vpop.f32.mrb[217].mxu0  ;;  %v13049_v57 = vld [vmem:[#allocation8 + $0x548] sm:$0xff]  }
0x5a3a   : > { %12624 = vmatmul.mubr.msk.bf16.vlgmr.msra.gmra.mrb[204].mxu1 %vm511_vm2, %v8816_v60  ;;  %v9240_v60 = vld [vmem:[#allocation8 + $0x520] sm:$0xf] }
0x5a3b   : > { %12636 = vmatpush3.bf16.msra.mxu1 %v13041_v59  ;;  %12639 = vmatprep.mubr.msk.bf16.mxu1 %vm13427_vm0, %v13426_v0  ;;  %v13050_v59 = vld [vmem:[#allocation8 + $0x550] sm:$0xff]   ;;  %v9245_v56 = vsel %vm677_vm3, %v9240_v60, 0 }
0x5a3c   : > { %12637 = vmatprep.subr.bf16.mxu1 %v13426_v0 }
0x5a3f   : > { %12638 = vmatpush3.bf16.msra.mxu1 %v13042_v61 }
0x5a40   : > { %12651 = vmatprep.subr.mxu1 %v13426_v0 }
0x5a42   : > { %12640 = vmatmul.mubr.msk.bf16.vlgmr.msra.gmra.mrb[208].mxu1 %vm345_vm1, %v14196_v55 }
0x5a43   : > { %12653 = vmatprep.mubr.msk.f32.mxu1 %vm13427_vm0, %v13426_v0 }
0x5b0d   : > { %v8858_v62 = vpop.f32.mrb[204].mxu1 }
0x5b0e   : > { %v8864_v63 = vadd.f32 %v8858_v62, %v8472_v28  ;;  %v12625_v1 = vpop.f32.mrb[205].mxu1  ;;  %v13051_v62 = vld [vmem:[#allocation8 + $0x538] sm:$0xff]  }
0x5b0f   : > { %v8861_v2 = vpop.f32.mrb[206].mxu1 }
0x5b10   : > { %v12626_v3 = vpop.f32.mrb[207].mxu1  ;;  %v8865_v4 = vadd.f32 %v8864_v63, %v14369_v9  ;;  %v13043_v9 = vld [vmem:[#allocation8 + $0x4f0] sm:$0xff]   ;;  %v13052_v2 = vld [vmem:[#allocation8 + $0x540] sm:$0xff]  }
0x5b11   : > { %12628 = vmatpush3.bf16.msra.mxu0 %v13043_v9  ;;  %v11300_v9 = vld [vmem:[#allocation10 + $0x5c] ss:$0 sm:$0xff] }
0x5b12   : > { %v8866_v5 = vsel %vm345_vm1, %v8865_v4, 0.0  ;;  %12629 = vmatprep.subr.bf16.mxu0 %v13426_v0 }
0x5b13   : > { %8867 = vadd.xlane.f32.xlu0 %v8866_v5 }
0x5b15   : > { %v9012_v10 = vpop.f32.mrb[208].mxu1  ;;  %12630 = vmatpush3.bf16.msra.mxu0 %v13044_v18 }
0x5b16   : > { %v9013_v11 = vadd.f32 %v11287_v12, %v9012_v10  ;;  %v12641_v13 = vpop.f32.mrb[209].mxu1  ;;  %12643 = vmatprep.subr.bf16.mxu0 %v13426_v0 }
0x5b17   : > { %v9015_v7 = vpop.f32.mrb[210].mxu1 }
0x5b18   : > { %v12642_v38 = vpop.f32.mrb[211].mxu1  ;;  %12652 = vmatpush3.xpose.msk.msra.mxu1 %vm511_vm2, %v9013_v11 }
0x5b19   : > { %12656 = vmatprep.subr.mxu1 %v13426_v0 }
0x5ba0   : > { %v8868_v14 = vpop.xlane.xlu0 %8867 }
0x5ba1   : > { %v8869_v15 = vmul.f32 0.03125, %v8868_v14 }
0x5ba3   : > { %v8870_v6 = vsub.f32 %v8865_v4, %v8869_v15 }
0x5ba5   : > { %v8871_v16 = vmul.f32 %v8870_v6, %v8870_v6 }
0x5ba7   : > { %v8872_v17 = vsel %vm345_vm1, %v8871_v16, 0.0  ;;  %v11304_v16 = vld [vmem:[#allocation10 + $0x5d] ss:$0 sm:$0xff] }
0x5ba8   : > { %8873 = vadd.xlane.f32.xlu1 %v8872_v17 }
0x5c35   : > { %v8874_v19 = vpop.xlane.xlu1 %8873 }
0x5c36   : > { %v8875_v20 = vmul.f32 0.03125, %v8874_v19 }
0x5c38   : > { %v8876_v21 = vadd.f32 1e-05, %v8875_v20  ;;  %v11308_v20 = vld [vmem:[#allocation10 + $0x5e] ss:$0 sm:$0xff] }
0x5c3a   : > { %13169 = vrsqrt.f32 %v8876_v21 }
0x5c44   : > { %v13170_v22 = vpop.eup %13169 }
0x5c45   : > { %v8878_v23 = vmul.f32 %v13170_v22, %v8870_v6 }
0x5c47   : > { %v8884_v58 = vmul.f32 %v11281_v24, %v8878_v23 }
0x5c49   : > { %v14526_v26 = vadd.f32 %v11282_v25, %v8884_v58 }
0x5c4b   : > { %v14530_v28 = vpack.c.bf16 %v14526_v26, %v14526_v26 }
0x5c4d   : > { %12632 = vmatmul.mubr.msk.bf16.vlgmr.msra.gmra.mrb[220].mxu0 %vm345_vm1, %v14530_v28 }
0x5c4e   : > { %12644 = vmatpush3.bf16.msra.mxu0 %v13045_v27  ;;  %12647 = vmatprep.mubr.msk.bf16.mxu0 %vm13427_vm0, %v13426_v0 }
0x5c4f   : > { %12645 = vmatprep.subr.bf16.mxu0 %v13426_v0 }
0x5c52   : > { %12646 = vmatpush3.bf16.msra.mxu0 %v13046_v29 }
0x5c53   : > { %12661 = vmatprep.subr.bf16.mxu0 %v13426_v0 }
0x5c55   : > { %12648 = vmatmul.mubr.msk.bf16.vlgmr.msra.gmra.mrb[224].mxu0 %vm345_vm1, %v14196_v55 }
0x5c56   : > { %12663 = vmatprep.mubr.msk.bf16.mxu0 %vm13427_vm0, %v13426_v0  ;;  %12662 = vmatpush3.bf16.msra.mxu0 %v9245_v56 }
0x5c57   : > { %12675 = vmatprep.subr.bf16.mxu0 %v13426_v0 }
0x5d20   : > { %v8951_v31 = vpop.f32.mrb[220].mxu0 }
0x5d21   : > { %v8952_v32 = vadd.f32 %v11283_v30, %v8951_v31  ;;  %v12633_v33 = vpop.f32.mrb[221].mxu0 }
0x5d22   : > { %v8954_v34 = vpop.f32.mrb[222].mxu0 }
0x5d23   : > { %v12634_v35 = vpop.f32.mrb[223].mxu0  ;;  %12654 = vmatmul.mubr.msk.f32.vlgmr.msra.gmra.mrb[194].mxu1 %vm511_vm2, %v8952_v32 }
0x5d24   : > { %12658 = vmatprep.mubr.msk.f32.mxu1 %vm13427_vm0, %v13426_v0 }
0x5d28   : > { %v9073_v37 = vpop.f32.mrb[224].mxu0 }
0x5d29   : > { %v9074_v46 = vadd.f32 %v11291_v36, %v9073_v37  ;;  %v12649_v39 = vpop.f32.mrb[225].mxu0  ;;  %v13053_v36 = vld [vmem:[#allocation8 + $0x560] sm:$0xff]  }
0x5d2a   : > { %v9076_v40 = vpop.f32.mrb[226].mxu0  ;;  %v13055_v39 = vld [vmem:[#allocation8 + $0x580] sm:$0xff]  }
0x5d2b   : > { %v12650_v41 = vpop.f32.mrb[227].mxu0  ;;  %12657 = vmatpush3.msra.mxu1 %v9074_v46  ;;  %v13054_v46 = vld [vmem:[#allocation8 + $0x568] sm:$0xff]  }
0x5d2c   : > { %12667 = vmatprep.subr.bf16.mxu1 %v13426_v0  ;;  %v13056_v40 = vld [vmem:[#allocation8 + $0x588] sm:$0xff]   ;;  %v9636_v41 = vld [vmem:[#allocation8 + $0x558] sm:$0xf] }
0x5df6   : > { %v9151_v42 = vpop.f32.mrb[194].mxu1 }
0x5df7   : > { %v12655_v43 = vpop.f32.mrb[195].mxu1  ;;  %v9155_v44 = vsel %vm511_vm2, %v9151_v42, -inf }
0x5df8   : > { %9156 = vmax.xlane.f32.xlu0 %v9155_v44  ;;  %v13057_v44 = vld [vmem:[#allocation8 + $0x570] sm:$0xff]  }
0x5e85   : > { %v9157_v45 = vpop.xlane.xlu0 %9156 }
0x5e86   : > { %v9158_v47 = vsub.f32 %v9151_v42, %v9157_v45  ;;  %v9641_v42 = vsel %vm677_vm3, %v9636_v41, 0 }
0x5e88   : > { %v9159_v8 = vmul.f32 1.442695, %v9158_v47 }
0x5e8a   : > { %13171 = vpow2.f32 %v9159_v8  ;;  %v13058_v8 = vld [vmem:[#allocation8 + $0x578] sm:$0xff]  }
0x5e94   : > { %v13172_v48 = vpop.eup %13171 }
0x5e95   : > { %v9161_v49 = vsel %vm511_vm2, %v13172_v48, 0.0 }
0x5e96   : > { %9162 = vadd.xlane.f32.xlu1 %v9161_v49 }
0x5f23   : > { %v9163_v50 = vpop.xlane.xlu1 %9162 }
0x5f24   : > { %13173 = vrcp.f32 %v9163_v50 }
0x5f2e   : > { %v13174_v51 = vpop.eup %13173 }
0x5f2f   : > { %v9165_v53 = vmul.f32 %v13174_v51, %v13172_v48 }
0x5f31   : > { %12659 = vmatmul.mubr.msk.f32.vlgmr.msra.gmra.mrb[212].mxu1 %vm511_vm2, %v9165_v53 }
0x5f32   : > { %12668 = vmatpush3.bf16.msra.mxu1 %v13047_v52  ;;  %12671 = vmatprep.mubr.msk.bf16.mxu1 %vm13427_vm0, %v13426_v0 }
0x5f33   : > { %12669 = vmatprep.subr.bf16.mxu1 %v13426_v0 }
0x5f36   : > { %12670 = vmatpush3.bf16.msra.mxu1 %v13048_v54 }
0x5f37   : > { %12683 = vmatprep.subr.bf16.mxu1 %v13426_v0 }
0x5f39   : > { %12672 = vmatmul.mubr.msk.bf16.vlgmr.msra.gmra.mrb[216].mxu1 %vm345_vm1, %v14530_v28 }
0x5f3a   : > { %12684 = vmatpush3.bf16.msra.mxu1 %v13049_v57  ;;  %12687 = vmatprep.mubr.msk.bf16.mxu1 %vm13427_vm0, %v13426_v0 }
0x5f3b   : > { %12685 = vmatprep.subr.bf16.mxu1 %v13426_v0 }
0x5f3e   : > { %12686 = vmatpush3.bf16.msra.mxu1 %v13050_v59  ;;  %v11299_v59 = vld [vmem:[#allocation10 + $0x65] ss:$0 sm:$0xff] }
0x5f3f   : > { %12701 = vmatprep.subr.bf16.mxu1 %v13426_v0 }
0x5f41   : > { %12688 = vmatmul.mubr.msk.bf16.vlgmr.msra.gmra.mrb[220].mxu1 %vm345_vm1, %v14196_v55 }
0x5f42   : > { %12703 = vmatprep.mubr.msk.bf16.mxu1 %vm13427_vm0, %v13426_v0  ;;  %12702 = vmatpush3.bf16.msra.mxu1 %v9641_v42 }
0x5f43   : > { %12715 = vmatprep.subr.bf16.mxu1 %v13426_v0 }
0x6004   : > { %v9235_v61 = vpop.f32.mrb[212].mxu1 }
0x6005   : > { %v9239_v63 = vpack.c.bf16 %v9235_v61, %v9235_v61  ;;  %v12660_v1 = vpop.f32.mrb[213].mxu1 }
0x6007   : > { %12664 = vmatmul.mubr.msk.bf16.vlgmr.msra.gmra.mrb[228].mxu0 %vm511_vm2, %v9239_v63 }
0x6008   : > { %12676 = vmatpush3.bf16.msra.mxu0 %v13051_v62  ;;  %12679 = vmatprep.mubr.msk.bf16.mxu0 %vm13427_vm0, %v13426_v0 }
0x6009   : > { %12677 = vmatprep.subr.bf16.mxu0 %v13426_v0 }
0x600c   : > { %v9347_v3 = vpop.f32.mrb[216].mxu1  ;;  %12678 = vmatpush3.bf16.msra.mxu0 %v13052_v2  ;;  %v11320_v2 = vld [vmem:[#allocation10 + $0x60] ss:$0 sm:$0xff] }
0x600d   : > { %v12673_v4 = vpop.f32.mrb[217].mxu1  ;;  %12691 = vmatprep.subr.mxu0 %v13426_v0  ;;  %v9348_v24 = vadd.f32 %v11300_v9, %v9347_v3 }
0x600e   : > { %v9350_v5 = vpop.f32.mrb[218].mxu1  ;;  %v11316_v4 = vld [vmem:[#allocation10 + $0x5f] ss:$0 sm:$0xff] }
0x600f   : > { %v12674_v12 = vpop.f32.mrb[219].mxu1  ;;  %12680 = vmatmul.mubr.msk.bf16.vlgmr.msra.gmra.mrb[232].mxu0 %vm345_vm1, %v14196_v55 }
0x6010   : > { %12693 = vmatprep.mubr.msk.f32.mxu0 %vm13427_vm0, %v13426_v0 }
0x6014   : > { %v9469_v10 = vpop.f32.mrb[220].mxu1 }
0x6015   : > { %v12689_v11 = vpop.f32.mrb[221].mxu1  ;;  %v9470_v23 = vadd.f32 %v11308_v20, %v9469_v10  ;;  %v11324_v10 = vld [vmem:[#allocation10 + $0x61] ss:$0 sm:$0xff] }
0x6016   : > { %v9472_v13 = vpop.f32.mrb[222].mxu1 }
0x6017   : > { %v12690_v7 = vpop.f32.mrb[223].mxu1 }
0x60da   : > { %v14574_v38 = vpop.f32.mrb[228].mxu0 }
0x60db   : > { %v12665_v14 = vpop.f32.mrb[229].mxu0  ;;  %v9291_v60 = vadd.f32 %v11299_v59, %v14574_v38 }
0x60dc   : > { %v9284_v15 = vpop.f32.mrb[230].mxu0 }
0x60dd   : > { %v12666_v6 = vpop.f32.mrb[231].mxu0 }
0x60e2   : > { %v9408_v17 = vpop.f32.mrb[232].mxu0 }
0x60e3   : > { %v9409_v18 = vadd.f32 %v11304_v16, %v9408_v17  ;;  %v12681_v19 = vpop.f32.mrb[233].mxu0 }
0x60e4   : > { %v9411_v21 = vpop.f32.mrb[234].mxu0 }
0x60e5   : > { %v12682_v22 = vpop.f32.mrb[235].mxu0  ;;  %12692 = vmatpush3.xpose.msk.msra.mxu0 %vm511_vm2, %v9409_v18 }
0x60e6   : > { %12696 = vmatprep.subr.mxu0 %v13426_v0  ;;  %v13059_v22 = vld [vmem:[#allocation8 + $0x598] sm:$0xff]  }
0x60e8   : > { %12694 = vmatmul.mubr.msk.f32.vlgmr.msra.gmra.mrb[218].mxu0 %vm511_vm2, %v9348_v24 }
0x60e9   : > { %12697 = vmatpush3.msra.mxu0 %v9470_v23  ;;  %12698 = vmatprep.mubr.msk.f32.mxu0 %vm13427_vm0, %v13426_v0  ;;  %v13060_v23 = vld [vmem:[#allocation8 + $0x5a0] sm:$0xff]  }
0x60ea   : > { %12707 = vmatprep.subr.bf16.mxu0 %v13426_v0 }
0x61bb   : > { %v9547_v25 = vpop.f32.mrb[218].mxu0 }
0x61bc   : > { %v12695_v58 = vpop.f32.mrb[219].mxu0  ;;  %v9551_v27 = vsel %vm511_vm2, %v9547_v25, -inf }
0x61bd   : > { %9552 = vmax.xlane.f32.xlu0 %v9551_v27  ;;  %v13062_v58 = vld [vmem:[#allocation8 + $0x5c0] sm:$0xff]   ;;  %v10028_v27 = vld [vmem:[#allocation8 + $0x590] sm:$0xf] }
0x624a   : > { %v9553_v29 = vpop.xlane.xlu0 %9552 }
0x624b   : > { %v9554_v30 = vsub.f32 %v9547_v25, %v9553_v29  ;;  %v13061_v25 = vld [vmem:[#allocation8 + $0x5b8] sm:$0xff]   ;;  %v10033_v29 = vsel %vm677_vm3, %v10028_v27, 0 }
0x624d   : > { %v9555_v31 = vmul.f32 1.442695, %v9554_v30  ;;  %v13063_v30 = vld [vmem:[#allocation8 + $0x5a8] sm:$0xff]  }
0x624f   : > { %13175 = vpow2.f32 %v9555_v31 }
0x6259   : > { %v13176_v32 = vpop.eup %13175 }
0x625a   : > { %v9557_v33 = vsel %vm511_vm2, %v13176_v32, 0.0 }
0x625b   : > { %9558 = vadd.xlane.f32.xlu1 %v9557_v33  ;;  %v13064_v33 = vld [vmem:[#allocation8 + $0x5b0] sm:$0xff]  }
0x62e8   : > { %v9559_v34 = vpop.xlane.xlu1 %9558 }
0x62e9   : > { %13177 = vrcp.f32 %v9559_v34 }
0x62f3   : > { %v13178_v35 = vpop.eup %13177 }
0x62f4   : > { %v9561_v37 = vmul.f32 %v13178_v35, %v13176_v32 }
0x62f6   : > { %12699 = vmatmul.mubr.msk.f32.vlgmr.msra.gmra.mrb[236].mxu0 %vm511_vm2, %v9561_v37 }
0x62f7   : > { %12708 = vmatpush3.bf16.msra.mxu0 %v13053_v36  ;;  %12711 = vmatprep.mubr.msk.bf16.mxu0 %vm13427_vm0, %v13426_v0 }
0x62f8   : > { %12709 = vmatprep.subr.bf16.mxu0 %v13426_v0 }
0x62fb   : > { %12710 = vmatpush3.bf16.msra.mxu0 %v13054_v46 }
0x62fc   : > { %12723 = vmatprep.subr.bf16.mxu0 %v13426_v0 }
0x62fe   : > { %12712 = vmatmul.mubr.msk.bf16.vlgmr.msra.gmra.mrb[240].mxu0 %vm345_vm1, %v14530_v28 }
0x62ff   : > { %12724 = vmatpush3.bf16.msra.mxu0 %v13055_v39  ;;  %12727 = vmatprep.mubr.msk.bf16.mxu0 %vm13427_vm0, %v13426_v0 }
0x6300   : > { %12725 = vmatprep.subr.bf16.mxu0 %v13426_v0 }
0x6303   : > { %12726 = vmatpush3.bf16.msra.mxu0 %v13056_v40 }
0x6304   : > { %12741 = vmatprep.subr.bf16.mxu0 %v13426_v0 }
0x6306   : > { %12728 = vmatmul.mubr.msk.bf16.vlgmr.msra.gmra.mrb[244].mxu0 %vm345_vm1, %v14196_v55 }
0x6307   : > { %12743 = vmatprep.mubr.msk.bf16.mxu0 %vm13427_vm0, %v13426_v0  ;;  %12742 = vmatpush3.bf16.msra.mxu0 %v10033_v29 }
0x6308   : > { %12755 = vmatprep.subr.bf16.mxu0 %v13426_v0 }
0x63c9   : > { %v9631_v43 = vpop.f32.mrb[236].mxu0 }
0x63ca   : > { %v9635_v45 = vpack.c.bf16 %v9631_v43, %v9631_v43  ;;  %v12700_v47 = vpop.f32.mrb[237].mxu0 }
0x63cc   : > { %12704 = vmatmul.mubr.msk.bf16.vlgmr.msra.gmra.mrb[224].mxu1 %vm511_vm2, %v9635_v45 }
0x63cd   : > { %12716 = vmatpush3.bf16.msra.mxu1 %v13057_v44  ;;  %12719 = vmatprep.mubr.msk.bf16.mxu1 %vm13427_vm0, %v13426_v0 }
0x63ce   : > { %12717 = vmatprep.subr.bf16.mxu1 %v13426_v0 }
0x63d1   : > { %v9739_v48 = vpop.f32.mrb[240].mxu0  ;;  %12718 = vmatpush3.bf16.msra.mxu1 %v13058_v8  ;;  %v11336_v8 = vld [vmem:[#allocation10 + $0x63] ss:$0 sm:$0xff] }
0x63d2   : > { %v12713_v49 = vpop.f32.mrb[241].mxu0  ;;  %12731 = vmatprep.subr.mxu1 %v13426_v0  ;;  %v9740_v7 = vadd.f32 %v11316_v4, %v9739_v48 }
0x63d3   : > { %v9742_v50 = vpop.f32.mrb[242].mxu0  ;;  %v11332_v49 = vld [vmem:[#allocation10 + $0x62] ss:$0 sm:$0xff] }
0x63d4   : > { %v12714_v51 = vpop.f32.mrb[243].mxu0  ;;  %12720 = vmatmul.mubr.msk.bf16.vlgmr.msra.gmra.mrb[228].mxu1 %vm345_vm1, %v14196_v55 }
0x63d5   : > { %12733 = vmatprep.mubr.msk.f32.mxu1 %vm13427_vm0, %v13426_v0 }
0x63d9   : > { %v9861_v52 = vpop.f32.mrb[244].mxu0 }
0x63da   : > { %v12729_v53 = vpop.f32.mrb[245].mxu0  ;;  %v9862_v38 = vadd.f32 %v11324_v10, %v9861_v52  ;;  %v11340_v52 = vld [vmem:[#allocation10 + $0x64] ss:$0 sm:$0xff] }
0x63db   : > { %v9864_v54 = vpop.f32.mrb[246].mxu0 }
0x63dc   : > { %v12730_v57 = vpop.f32.mrb[247].mxu0 }
0x649f   : > { %v9677_v56 = vpop.f32.mrb[224].mxu1 }
0x64a0   : > { %v14611_v61 = vadd.f32 %v9677_v56, %v9291_v60  ;;  %v12705_v62 = vpop.f32.mrb[225].mxu1 }
0x64a1   : > { %v9680_v63 = vpop.f32.mrb[226].mxu1 }
0x64a2   : > { %v12706_v1 = vpop.f32.mrb[227].mxu1 }
0x64a7   : > { %v9800_v3 = vpop.f32.mrb[228].mxu1 }
0x64a8   : > { %v9801_v5 = vadd.f32 %v11320_v2, %v9800_v3  ;;  %v12721_v12 = vpop.f32.mrb[229].mxu1 }
0x64a9   : > { %v9803_v11 = vpop.f32.mrb[230].mxu1  ;;  %v10420_v12 = vld [vmem:[#allocation8 + $0x5c8] sm:$0xf] }
0x64aa   : > { %v12722_v13 = vpop.f32.mrb[231].mxu1  ;;  %12732 = vmatpush3.xpose.msk.msra.mxu1 %vm511_vm2, %v9801_v5  ;;  %v10425_v10 = vsel %vm677_vm3, %v10420_v12, 0 }
0x64ab   : > { %12736 = vmatprep.subr.mxu1 %v13426_v0 }
0x64ad   : > { %12734 = vmatmul.mubr.msk.f32.vlgmr.msra.gmra.mrb[214].mxu1 %vm511_vm2, %v9740_v7 }
0x64ae   : > { %12737 = vmatpush3.msra.mxu1 %v9862_v38  ;;  %12738 = vmatprep.mubr.msk.f32.mxu1 %vm13427_vm0, %v13426_v0 }
0x64af   : > { %12747 = vmatprep.subr.bf16.mxu1 %v13426_v0 }
0x6580   : > { %v9939_v14 = vpop.f32.mrb[214].mxu1 }
0x6581   : > { %v12735_v15 = vpop.f32.mrb[215].mxu1  ;;  %v9943_v6 = vsel %vm511_vm2, %v9939_v14, -inf }
0x6582   : > { %9944 = vmax.xlane.f32.xlu0 %v9943_v6 }
0x660f   : > { %v9945_v16 = vpop.xlane.xlu0 %9944 }
0x6610   : > { %v9946_v17 = vsub.f32 %v9939_v14, %v9945_v16 }
0x6612   : > { %v9947_v9 = vmul.f32 1.442695, %v9946_v17 }
0x6614   : > { %13179 = vpow2.f32 %v9947_v9 }
0x661e   : > { %v13180_v18 = vpop.eup %13179 }
0x661f   : > { %v9949_v19 = vsel %vm511_vm2, %v13180_v18, 0.0 }
0x6620   : > { %9950 = vadd.xlane.f32.xlu1 %v9949_v19 }
0x66ad   : > { %v9951_v20 = vpop.xlane.xlu1 %9950 }
0x66ae   : > { %13181 = vrcp.f32 %v9951_v20 }
0x66b8   : > { %v13182_v21 = vpop.eup %13181 }
0x66b9   : > { %v9953_v24 = vmul.f32 %v13182_v21, %v13180_v18 }
0x66bb   : > { %12739 = vmatmul.mubr.msk.f32.vlgmr.msra.gmra.mrb[232].mxu1 %vm511_vm2, %v9953_v24  ;;  %v13065_v24 = vld [vmem:[#allocation8 + $0x5d0] sm:$0xff]  }
0x66bc   : > { %12748 = vmatpush3.bf16.msra.mxu1 %v13059_v22  ;;  %12751 = vmatprep.mubr.msk.bf16.mxu1 %vm13427_vm0, %v13426_v0 }
0x66bd   : > { %12749 = vmatprep.subr.bf16.mxu1 %v13426_v0 }
0x66c0   : > { %12750 = vmatpush3.bf16.msra.mxu1 %v13060_v23  ;;  %v13066_v23 = vld [vmem:[#allocation8 + $0x5d8] sm:$0xff]  }
0x66c1   : > { %12763 = vmatprep.subr.bf16.mxu1 %v13426_v0 }
0x66c3   : > { %12752 = vmatmul.mubr.msk.bf16.vlgmr.msra.gmra.mrb[236].mxu1 %vm345_vm1, %v14530_v28 }
0x66c4   : > { %12764 = vmatpush3.bf16.msra.mxu1 %v13061_v25  ;;  %12767 = vmatprep.mubr.msk.bf16.mxu1 %vm13427_vm0, %v13426_v0  ;;  %v13067_v25 = vld [vmem:[#allocation8 + $0x5e0] sm:$0xff]  }
0x66c5   : > { %12765 = vmatprep.subr.bf16.mxu1 %v13426_v0 }
0x66c8   : > { %12766 = vmatpush3.bf16.msra.mxu1 %v13062_v58 }
0x66c9   : > { %12781 = vmatprep.subr.bf16.mxu1 %v13426_v0 }
0x66cb   : > { %12768 = vmatmul.mubr.msk.bf16.vlgmr.msra.gmra.mrb[240].mxu1 %vm345_vm1, %v14196_v55 }
0x66cc   : > { %12783 = vmatprep.mubr.msk.bf16.mxu1 %vm13427_vm0, %v13426_v0  ;;  %12782 = vmatpush3.bf16.msra.mxu1 %v10425_v10 }
0x66cd   : > { %12795 = vmatprep.subr.bf16.mxu1 %v13426_v0 }
0x678e   : > { %v10023_v28 = vpop.f32.mrb[232].mxu1 }
0x678f   : > { %v10027_v31 = vpack.c.bf16 %v10023_v28, %v10023_v28  ;;  %v12740_v32 = vpop.f32.mrb[233].mxu1 }
0x6790   : > { %v11349_v32 = vld [vmem:[#allocation10 + $0x67] ss:$0 sm:$0xff] }
0x6791   : > { %12744 = vmatmul.mubr.msk.bf16.vlgmr.msra.gmra.mrb[248].mxu0 %vm511_vm2, %v10027_v31 }
0x6792   : > { %12756 = vmatpush3.bf16.msra.mxu0 %v13063_v30  ;;  %12759 = vmatprep.mubr.msk.bf16.mxu0 %vm13427_vm0, %v13426_v0  ;;  %v11348_v30 = vld [vmem:[#allocation10 + $0x66] ss:$0 sm:$0xff] }
0x6793   : > { %12757 = vmatprep.subr.bf16.mxu0 %v13426_v0 }
0x6796   : > { %v10131_v34 = vpop.f32.mrb[236].mxu1  ;;  %12758 = vmatpush3.bf16.msra.mxu0 %v13064_v33 }
0x6797   : > { %v12753_v35 = vpop.f32.mrb[237].mxu1  ;;  %12771 = vmatprep.subr.mxu0 %v13426_v0  ;;  %v10132_v54 = vadd.f32 %v11332_v49, %v10131_v34 }
0x6798   : > { %v10134_v36 = vpop.f32.mrb[238].mxu1 }
0x6799   : > { %v12754_v37 = vpop.f32.mrb[239].mxu1  ;;  %12760 = vmatmul.mubr.msk.bf16.vlgmr.msra.gmra.mrb[252].mxu0 %vm345_vm1, %v14196_v55  ;;  %v13069_v36 = vld [vmem:[#allocation8 + $0x5f0] sm:$0xff]  }
0x679a   : > { %12773 = vmatprep.mubr.msk.f32.mxu0 %vm13427_vm0, %v13426_v0  ;;  %v13070_v37 = vld [vmem:[#allocation8 + $0x5f8] sm:$0xff]  }
0x679e   : > { %v10253_v46 = vpop.f32.mrb[240].mxu1 }
0x679f   : > { %v12769_v39 = vpop.f32.mrb[241].mxu1  ;;  %v10254_v57 = vadd.f32 %v11340_v52, %v10253_v46  ;;  %v11350_v46 = vld [vmem:[#allocation10 + $0x68] ss:$0 sm:$0xff] }
0x67a0   : > { %v10256_v40 = vpop.f32.mrb[242].mxu1 }
0x67a1   : > { %v12770_v41 = vpop.f32.mrb[243].mxu1 }
0x6864   : > { %v10069_v42 = vpop.f32.mrb[248].mxu0 }
0x6865   : > { %v10075_v43 = vadd.f32 %v10069_v42, %v14611_v61  ;;  %v12745_v44 = vpop.f32.mrb[249].mxu0 }
0x6866   : > { %v10072_v45 = vpop.f32.mrb[250].mxu0 }
0x6867   : > { %v12746_v47 = vpop.f32.mrb[251].mxu0 }
0x6868   : > { %v11354_v47 = vld [vmem:[#allocation10 + $0x69] ss:$0 sm:$0xff] }
0x686c   : > { %v10192_v48 = vpop.f32.mrb[252].mxu0 }
0x686d   : > { %v10193_v50 = vadd.f32 %v11336_v8, %v10192_v48  ;;  %v12761_v51 = vpop.f32.mrb[253].mxu0 }
0x686e   : > { %v10195_v55 = vpop.f32.mrb[254].mxu0 }
0x686f   : > { %v12762_v53 = vpop.f32.mrb[255].mxu0  ;;  %12772 = vmatpush3.xpose.msk.msra.mxu0 %vm511_vm2, %v10193_v50 }
0x6870   : > { %12776 = vmatprep.subr.mxu0 %v13426_v0 }
0x6872   : > { %12774 = vmatmul.mubr.msk.f32.vlgmr.msra.gmra.mrb[238].mxu0 %vm511_vm2, %v10132_v54 }
0x6873   : > { %12777 = vmatpush3.msra.mxu0 %v10254_v57  ;;  %12778 = vmatprep.mubr.msk.f32.mxu0 %vm13427_vm0, %v13426_v0 }
0x6874   : > { %12787 = vmatprep.subr.bf16.mxu0 %v13426_v0 }
0x6945   : > { %v10331_v59 = vpop.f32.mrb[238].mxu0 }
0x6946   : > { %v12775_v60 = vpop.f32.mrb[239].mxu0  ;;  %v10335_v56 = vsel %vm511_vm2, %v10331_v59, -inf }
0x6947   : > { %10336 = vmax.xlane.f32.xlu0 %v10335_v56 }
0x69d4   : > { %v10337_v61 = vpop.xlane.xlu0 %10336 }
0x69d5   : > { %v10338_v62 = vsub.f32 %v10331_v59, %v10337_v61 }
0x69d7   : > { %v10339_v63 = vmul.f32 1.442695, %v10338_v62 }
0x69d9   : > { %13183 = vpow2.f32 %v10339_v63 }
0x69e3   : > { %v13184_v1 = vpop.eup %13183 }
0x69e4   : > { %v10341_v2 = vsel %vm511_vm2, %v13184_v1, 0.0 }
0x69e5   : > { %10342 = vadd.xlane.f32.xlu1 %v10341_v2 }
0x6a72   : > { %v10343_v3 = vpop.xlane.xlu1 %10342 }
0x6a73   : > { %13185 = vrcp.f32 %v10343_v3  ;;  %v11361_v3 = vld [vmem:[#allocation10 + $0x6b] ss:$0 sm:$0xff] }
0x6a7d   : > { %v13186_v4 = vpop.eup %13185 }
0x6a7e   : > { %v10345_v5 = vmul.f32 %v13186_v4, %v13184_v1  ;;  %v11360_v1 = vld [vmem:[#allocation10 + $0x6a] ss:$0 sm:$0xff] }
0x6a80   : > { %12779 = vmatmul.mubr.msk.f32.vlgmr.msra.gmra.mrb[0].mxu0 %vm511_vm2, %v10345_v5 }
0x6a81   : > { %12791 = vmatprep.mubr.msk.bf16.mxu0 %vm13427_vm0, %v13426_v0  ;;  %12788 = vmatpush3.bf16.msra.mxu0 %v13065_v24 }
0x6a82   : > { %12789 = vmatprep.subr.bf16.mxu0 %v13426_v0 }
0x6a85   : > { %12790 = vmatpush3.bf16.msra.mxu0 %v13066_v23 }
0x6a86   : > { %12807 = vmatprep.subr.bf16.mxu0 %v13426_v0 }
0x6b53   : > { %v10415_v11 = vpop.f32.mrb[0].mxu0 }
0x6b54   : > { %v10419_v13 = vpack.c.bf16 %v10415_v11, %v10415_v11  ;;  %v12780_v7 = vpop.f32.mrb[1].mxu0 }
0x6b56   : > { %12784 = vmatmul.mubr.msk.bf16.vlgmr.msra.gmra.mrb[244].mxu1 %vm511_vm2, %v10419_v13 }
0x6b57   : > { %12803 = vmatprep.mubr.msk.bf16.mxu1 %vm13427_vm0, %v13426_v0  ;;  %12796 = vmatpush3.bf16.msra.mxu1 %v13067_v25 }
0x6b58   : > { %12797 = vmatprep.subr.bf16.mxu1 %v13426_v0 }
0x6c29   : > { %v10461_v38 = vpop.f32.mrb[244].mxu1 }
0x6c2a   : > { %v10467_v14 = vadd.f32 %v10461_v38, %v10075_v43  ;;  %v12785_v15 = vpop.f32.mrb[245].mxu1 }
0x6c2b   : > { %v10464_v6 = vpop.f32.mrb[246].mxu1  ;;  %v13072_v15 = vld [vmem:[#allocation8 + $0x608] sm:$0xff]  }
0x6c2c   : > { %v12786_v16 = vpop.f32.mrb[247].mxu1  ;;  %v10468_v17 = vadd.f32 %v10467_v14, %v14526_v26  ;;  %v13068_v26 = vld [vmem:[#allocation8 + $0x5e8] sm:$0xff]   ;;  %v13071_v14 = vld [vmem:[#allocation8 + $0x600] sm:$0xff]  }
0x6c2d   : > { %12798 = vmatpush3.bf16.msra.mxu1 %v13068_v26 }
0x6c2e   : > { %v10469_v9 = vsel %vm345_vm1, %v10468_v17, 0.0  ;;  %12799 = vmatprep.subr.bf16.mxu1 %v13426_v0 }
0x6c2f   : > { %10470 = vadd.xlane.f32.xlu0 %v10469_v9 }
0x6c31   : > { %12800 = vmatpush3.bf16.msra.mxu1 %v13069_v36 }
0x6c32   : > { %12801 = vmatprep.subr.bf16.mxu1 %v13426_v0 }
0x6c35   : > { %12802 = vmatpush3.bf16.msra.mxu1 %v13070_v37 }
0x6cbc   : > { %v10471_v18 = vpop.xlane.xlu0 %10470 }
0x6cbd   : > { %v10472_v19 = vmul.f32 0.03125, %v10471_v18  ;;  %v11362_v18 = vld [vmem:[#allocation10 + $0x6c] ss:$0 sm:$0xff] }
0x6cbf   : > { %v10473_v20 = vsub.f32 %v10468_v17, %v10472_v19 }
0x6cc1   : > { %v10474_v21 = vmul.f32 %v10473_v20, %v10473_v20 }
0x6cc3   : > { %v10475_v22 = vsel %vm345_vm1, %v10474_v21, 0.0 }
0x6cc4   : > { %10476 = vadd.xlane.f32.xlu1 %v10475_v22 }
0x6d51   : > { %v10477_v58 = vpop.xlane.xlu1 %10476 }
0x6d52   : > { %v10478_v27 = vmul.f32 0.03125, %v10477_v58 }
0x6d54   : > { %v10479_v29 = vadd.f32 1e-05, %v10478_v27 }
0x6d56   : > { %13187 = vrsqrt.f32 %v10479_v29 }
0x6d60   : > { %v13188_v28 = vpop.eup %13187 }
0x6d61   : > { %v10481_v31 = vmul.f32 %v13188_v28, %v10473_v20  ;;  %v11363_v20 = vld [vmem:[#allocation10 + $0x6d] ss:$0 sm:$0xff] }
0x6d63   : > { %v10487_v33 = vmul.f32 %v11348_v30, %v10481_v31 }
0x6d65   : > { %v10493_v34 = vadd.f32 %v11349_v32, %v10487_v33 }
0x6d67   : > { %v10494_v35 = vpack.c.bf16 %v10493_v34, %v10493_v34 }
0x6d69   : > { %12792 = vmatmul.mubr.msk.bf16.vlgmr.msra.gmra.mrb[4].mxu0 %vm345_vm1, %v10494_v35 }
0x6d6a   : > { %12811 = vmatprep.mubr.msk.bf16.mxu0 %vm13427_vm0, %v13426_v0  ;;  %12808 = vmatpush3.bf16.msra.mxu0 %v13071_v14 }
0x6d6b   : > { %12809 = vmatprep.subr.bf16.mxu0 %v13426_v0  ;;  %v11364_v0 = vld [vmem:[#allocation10 + $0x6e] ss:$0 sm:$0xff] }
0x6d6e   : > { %12810 = vmatpush3.bf16.msra.mxu0 %v13072_v15 }
0x6e3c   : > { %v10553_v39 = vpop.f32.mrb[4].mxu0 }
0x6e3d   : > { %v10554_v40 = vadd.f32 %v11350_v46, %v10553_v39  ;;  %v12793_v41 = vpop.f32.mrb[5].mxu0 }
0x6e3e   : > { %v10556_v42 = vpop.f32.mrb[6].mxu0 }
0x6e3f   : > { %v10559_v43 = vmax.f32 %v10554_v40, 0.0  ;;  %v12794_v44 = vpop.f32.mrb[7].mxu0 }
0x6e41   : > { %v10560_v45 = vpack.c.bf16 %v10559_v43, %v10559_v43 }
0x6e43   : > { %12804 = vmatmul.mubr.msk.bf16.vlgmr.msra.gmra.mrb[248].mxu1 %vm2033_vm4, %v10560_v45 }
0x6f16   : > { %v10635_v8 = vpop.f32.mrb[248].mxu1 }
0x6f17   : > { %v10636_v48 = vadd.f32 %v11354_v47, %v10635_v8  ;;  %v12805_v49 = vpop.f32.mrb[249].mxu1 }
0x6f18   : > { %v10638_v50 = vpop.f32.mrb[250].mxu1 }
0x6f19   : > { %v12806_v51 = vpop.f32.mrb[251].mxu1  ;;  %v10641_v52 = vadd.f32 %v10636_v48, %v10493_v34 }
0x6f1b   : > { %v10642_v55 = vsel %vm345_vm1, %v10641_v52, 0.0 }
0x6f1c   : > { %10643 = vadd.xlane.f32.xlu0 %v10642_v55 }
0x6fa9   : > { %v10644_v53 = vpop.xlane.xlu0 %10643 }
0x6faa   : > { %v10645_v54 = vmul.f32 0.03125, %v10644_v53 }
0x6fac   : > { %v10646_v57 = vsub.f32 %v10641_v52, %v10645_v54 }
0x6fae   : > { %v10647_v59 = vmul.f32 %v10646_v57, %v10646_v57 }
0x6fb0   : > { %v10648_v60 = vsel %vm345_vm1, %v10647_v59, 0.0 }
0x6fb1   : > { %10649 = vadd.xlane.f32.xlu1 %v10648_v60 }
0x703e   : > { %v10650_v56 = vpop.xlane.xlu1 %10649 }
0x703f   : > { %v10651_v61 = vmul.f32 0.03125, %v10650_v56 }
0x7041   : > { %v10652_v62 = vadd.f32 1e-05, %v10651_v61 }
0x7043   : > { %13189 = vrsqrt.f32 %v10652_v62 }
0x704d   : > { %v13190_v63 = vpop.eup %13189 }
0x704e   : > { %v10654_v2 = vmul.f32 %v13190_v63, %v10646_v57 }
0x7050   : > { %v10660_v4 = vmul.f32 %v11360_v1, %v10654_v2 }
0x7052   : > { %v10666_v5 = vadd.f32 %v11361_v3, %v10660_v4 }
0x7054   : > { %v10667_v12 = vsel %vm345_vm1, %v10666_v5, 0.0 }
0x7055   : > { %10668 = vadd.xlane.f32.xlu0 %v10667_v12 }
0x70e2   : > { %v10669_v10 = vpop.xlane.xlu0 %10668 }
0x70e3   : > { %v10670_v11 = vmul.f32 0.03125, %v10669_v10 }
0x70e5   : > { %v10671_v13 = vsub.f32 %v10666_v5, %v10670_v11 }
0x70e7   : > { %v10672_v7 = vmul.f32 %v10671_v13, %v10671_v13 }
0x70e9   : > { %v10673_v38 = vsel %vm345_vm1, %v10672_v7, 0.0 }
0x70ea   : > { %10674 = vadd.xlane.f32.xlu1 %v10673_v38 }
0x7177   : > { %v10675_v6 = vpop.xlane.xlu1 %10674 }
0x7178   : > { %v10676_v16 = vmul.f32 0.03125, %v10675_v6 }
0x717a   : > { %v10677_v17 = vadd.f32 1e-05, %v10676_v16 }
0x717c   : > { %13191 = vrsqrt.f32 %v10677_v17 }
0x7186   : > { %v13192_v9 = vpop.eup %13191 }
0x7187   : > { %v10679_v19 = vmul.f32 %v13192_v9, %v10671_v13 }
0x7189   : > { %v10685_v21 = vmul.f32 %v11362_v18, %v10679_v19 }
0x718b   : > { %v10691_v22 = vadd.f32 %v11363_v20, %v10685_v21 }
0x718d   : > { %v10692_v24 = vpack.c.bf16 %v10691_v22, %v10691_v22 }
0x718f   : > { %12812 = vmatmul.mubr.msk.bf16.vlgmr.msra.gmra.mrb[8].mxu0 %vm345_vm1, %v10692_v24 }
0x7262   : > { %v10751_v23 = vpop.f32.mrb[8].mxu0 }
0x7263   : > { %v10752_v25 = vadd.f32 %v11364_v0, %v10751_v23  ;;  %v12813_v26 = vpop.f32.mrb[9].mxu0 }
0x7264   : > { %v10754_v58 = vpop.f32.mrb[10].mxu0 }
0x7265   : > { %v12814_v27 = vpop.f32.mrb[11].mxu0  ;;  %10757 = vst.msk [vmem:[%s317_s23] sm:$0xff] %vm345_vm1, %v10752_v25 }
0x7266   : > { %13350 = shalt.err (!%p13347_p2)
}
0x7267   : > { %s13351_s17 = scalar_lea.hbm %s14687_s14, 128  ;;  %s13355_s10 = scalar_lea.hbm %s14737_s5, 256 }
0x7268   : > { %p13352_p12 = scmp.ne.s32.totalorder %s14687_s14, %s13351_s17  ;;  %p13356_p0 = scmp.lt.u32.totalorder %s14687_s14, %s14737_s5 }
0x7269   : > { %p13357_p4 = scmp.lt.u32.totalorder %s13355_s10, %s13351_s17  ;;  %p13359_p3 = scmp.lt.u32.totalorder %s13351_s17, %s14687_s14 }
0x726a   : > { %p13353_p6 = pnand %p13352_p12, %p14760_p7 }
0x726b   : > { %p13358_p8 = por %p13357_p4, %p13356_p0 }
0x726c   : > { %p13354_p11 = pneg %p13353_p6 }
0x726d   : > { %p13360_p10 = por %p13359_p3, %p13358_p8 }
0x726f   : > { %p13361_p13 = pnand %p13360_p10, %p13354_p11 }
0x7271   : > { %13364 = shalt.err (!%p13361_p13)
}
0x7272   : > { %12831 = dma.vmem_to_hbm [thread:$0]  (%p14760_p7), %s14689_s9, 128, %s14687_s14, %s10759_s22  }
0x7273 PF: > { %s10784_s30 = sand.u32 1, %s13403_s18   ;;  %p14761_p5 = scmp.ne.s32.totalorder %s14745_s25, 0 }
0x7274   : > { %p14762_p9 = scmp.ge.s32.totalorder %s13415_s21, 2  ;;  %s10785_s15 = scalar_lea.sflag [#allocation4], %s10784_s30 }
0x7276   : > { %p12851_p1 = pnand %p14762_p9, %p14761_p5 }
0x7278   : > { %13398 = dma.done.wait (!%p12851_p1), %s10785_s15, 128  }
0x7279   : > { %13400 = vsyncadd (!%p12851_p1), %s10785_s15, 4294967168  ;;  %p22_p2 = scmp.ge.s32.totalorder %s13583_s16, 4   ;;  %s14763_s18 = smov %s13407_s19 }
0x727a   : > { %s14764_s19 = smov %s13411_s20  ;;  %s14765_s20 = smov %s13593_s27 }
0x727b   : > { %s14766_s21 = smov %s13583_s16  ;;  %24 = sbr.rel (!%p22_p2) target bundleno = 11 (0xb), region = 110 }
0x7282   :  { %10790 = vsyncpa [#allocation3], 1 }
0x7283   :  { %10792 = vsyncpa [#allocation3 + $0x1], 1 }
0x7284   :  { %10793 = vsyncpa [#allocation6], 1 }
0x7285   :  { %10795 = vsyncpa [#allocation6 + $0x1], 1 }
0x7286   :  { %10796 = vsyncpa [#allocation9], 1 }
0x7287   :  { %10797 = vsyncpa [#allocation4], 1 }
0x7288   :  { %10799 = vsyncpa [#allocation4 + $0x1], 1 }

</bundles_post_ra>
